<compile_context>
chip_gen: v7x
topology: tpu7x:2x2x1
jax: 0.10.0
libtpu: 0.0.40
codegen_flags: <defaults>
</compile_context>

<pallas_src>
import functools

import jax
import jax.numpy as jnp
from jax.experimental import pallas as pl
from jax.experimental.pallas import tpu as pltpu

BN_EPS = 1e-5
K_FEAT = 197100                 # 54 * 50 * 73
K_PAD = 197120                  # next multiple of 128
TK = 19712                      # 154 * 128, K chunk for the linear layer
VMEM_LIMIT = 48 * 1024 * 1024


# ---------- fused Conv3x3 + bias (+ReLU) (+vertical 2-max) + BN stats --------
def _conv_kernel(x_ref, w_ref, b_ref, o_ref, sum_ref, sq_ref, *,
                 rows, pool, relu_out):
    # x_ref  : (1, Hin, Cin, Win)  bf16, whole image (resident across row blocks)
    # w_ref  : (Cout, 9*Cin)       bf16, taps packed [kh, kw, ci]
    # b_ref  : (Cout, 1)           f32
    # o_ref  : (1, rows, Cout, Wout) bf16 (conv rows, or max of row pairs)
    # sum_ref, sq_ref: (1, 1, Cout, 1) f32 per-(batch, row-block) partials
    j = pl.program_id(1)
    cout = o_ref.shape[2]
    wout = o_ref.shape[3]
    step = 2 if pool else 1
    h0 = j * rows * step
    bias = b_ref[...]                                        # (Cout, 1) f32
    w_bf = w_ref[...]                                        # (Cout, 9*Cin) bf16

    def conv_row(h):
        # load 3 input rows, build im2col in f32 (aligned concat), cast to bf16
        r0 = x_ref[0, h].astype(jnp.float32)
        r1 = x_ref[0, h + 1].astype(jnp.float32)
        r2 = x_ref[0, h + 2].astype(jnp.float32)             # (Cin, Win)
        pieces = [r[:, kw:kw + wout] for r in (r0, r1, r2) for kw in range(3)]
        xk = jnp.concatenate(pieces, axis=0).astype(jnp.bfloat16)  # (9Cin, Wout)
        acc = jnp.dot(w_bf, xk, preferred_element_type=jnp.float32)
        acc = acc + bias
        if relu_out:
            acc = jnp.maximum(acc, 0.0)
        return acc                                           # (Cout, Wout) f32

    def body(r, carry):
        s_acc, q_acc = carry
        h = h0 + r * step
        a0 = conv_row(h)
        s_acc = s_acc + jnp.sum(a0, axis=1, keepdims=True)
        q_acc = q_acc + jnp.sum(a0 * a0, axis=1, keepdims=True)
        if pool:
            a1 = conv_row(h + 1)
            s_acc = s_acc + jnp.sum(a1, axis=1, keepdims=True)
            q_acc = q_acc + jnp.sum(a1 * a1, axis=1, keepdims=True)
            out = jnp.maximum(a0, a1)                        # vertical 2x1 max
        else:
            out = a0
        o_ref[0, r] = out.astype(o_ref.dtype)
        return s_acc, q_acc

    init = (jnp.zeros((cout, 1), jnp.float32),
            jnp.zeros((cout, 1), jnp.float32))
    s_blk, q_blk = jax.lax.fori_loop(0, rows, body, init)
    sum_ref[0, 0] = s_blk
    sq_ref[0, 0] = q_blk


def conv_block(x, w_packed, b, *, rows, pool, relu_out):
    n, hin, cin, win = x.shape
    cout = w_packed.shape[0]
    assert w_packed.shape[1] == 9 * cin, (w_packed.shape, cin)
    hconv, wout = hin - 2, win - 2
    step = 2 if pool else 1
    assert hconv % step == 0
    hout = hconv // step
    assert hout % rows == 0, (hout, rows)
    nblk = hout // rows

    kernel = functools.partial(_conv_kernel, rows=rows, pool=pool,
                               relu_out=relu_out)
    return pl.pallas_call(
        kernel,
        out_shape=(jax.ShapeDtypeStruct((n, hout, cout, wout), jnp.bfloat16),
                   jax.ShapeDtypeStruct((n, nblk, cout, 1), jnp.float32),
                   jax.ShapeDtypeStruct((n, nblk, cout, 1), jnp.float32)),
        grid=(n, nblk),
        in_specs=[
            pl.BlockSpec((1, hin, cin, win), lambda i, j: (i, 0, 0, 0)),
            pl.BlockSpec((cout, 9 * cin), lambda i, j: (0, 0)),
            pl.BlockSpec((cout, 1), lambda i, j: (0, 0)),
        ],
        out_specs=(
            pl.BlockSpec((1, rows, cout, wout), lambda i, j: (i, j, 0, 0)),
            pl.BlockSpec((1, 1, cout, 1), lambda i, j: (i, j, 0, 0)),
            pl.BlockSpec((1, 1, cout, 1), lambda i, j: (i, j, 0, 0)),
        ),
        compiler_params=pltpu.CompilerParams(
            dimension_semantics=("parallel", "parallel"),
            vmem_limit_bytes=VMEM_LIMIT),
    )(x, w_packed, b)


# ----------------------------- BN / pool glue --------------------------------
def finish_stats(sums, sqs, count):
    s = jnp.sum(sums, axis=(0, 1))[:, 0]                     # (C,)
    q = jnp.sum(sqs, axis=(0, 1))[:, 0]
    mean = s / count
    var = jnp.maximum(q / count - mean * mean, 0.0)          # clamp cancellation
    return mean, var


def bn_scale_shift(mean, var, gamma, beta):
    scale = gamma * jax.lax.rsqrt(var + BN_EPS)
    shift = beta - mean * scale
    return scale, shift


def hpool_bn_relu(y_half, scale, shift):
    # y_half: (N, Hp, C, W) bf16 raw (already vertically pooled) conv output.
    # Horizontal pair-max, then BN affine + ReLU (exact: scale > 0).
    p = jnp.maximum(y_half[..., 0::2], y_half[..., 1::2]).astype(jnp.float32)
    a = p * scale.reshape(1, 1, -1, 1) + shift.reshape(1, 1, -1, 1)
    return jnp.maximum(a, 0.0).astype(jnp.bfloat16)


def _conv_count(y, pooled):
    n, h, _, w = y.shape
    return float(n * (2 * h if pooled else h) * w)


# --------------------------------- Linear -----------------------------------
def _linear_kernel(x_ref, w_ref, b_ref, o_ref):
    @pl.when(pl.program_id(0) == 0)
    def _():
        o_ref[...] = jnp.zeros_like(o_ref) + b_ref[...]

    # NT contraction: (N, tk) . (7, tk) -> (N, 7), bf16 operands, f32 acc.
    o_ref[...] += jax.lax.dot_general(
        x_ref[...], w_ref[...], (((1,), (1,)), ((), ())),
        preferred_element_type=jnp.float32)


def linear(x_pad, w_pad, b):
    n, kp = x_pad.shape
    nout = w_pad.shape[0]
    assert kp % TK == 0 and w_pad.shape[1] == kp
    return pl.pallas_call(
        _linear_kernel,
        out_shape=jax.ShapeDtypeStruct((n, nout), jnp.float32),
        grid=(kp // TK,),
        in_specs=[pl.BlockSpec((n, TK), lambda k: (0, k)),
                  pl.BlockSpec((nout, TK), lambda k: (0, k)),
                  pl.BlockSpec((1, nout), lambda k: (0, 0))],
        out_specs=pl.BlockSpec((n, nout), lambda k: (0, 0)),
        compiler_params=pltpu.CompilerParams(
            dimension_semantics=("arbitrary",),
            vmem_limit_bytes=VMEM_LIMIT),
    )(x_pad, w_pad, b)


# ---------------------------- parameters / model -----------------------------
def _conv_init(key, cin, cout, *, cin_pad=None, cout_pad=None):
    k1, k2 = jax.random.split(key)
    bound = 1.0 / (cin * 9) ** 0.5
    w = jax.random.uniform(k1, (cout, cin, 3, 3), jnp.float32, -bound, bound)
    b = jax.random.uniform(k2, (cout,), jnp.float32, -bound, bound)
    if cin_pad is not None and cin_pad > cin:
        w = jnp.pad(w, ((0, 0), (0, cin_pad - cin), (0, 0), (0, 0)))
        cin = cin_pad
    if cout_pad is not None and cout_pad > cout:
        w = jnp.pad(w, ((0, cout_pad - cout), (0, 0), (0, 0), (0, 0)))
        b = jnp.pad(b, (0, cout_pad - cout))
        cout = cout_pad
    # pack to (Cout, 9*Cin), ordered [kh, kw, ci]
    w_packed = jnp.transpose(w, (0, 2, 3, 1)).reshape(cout, 9 * cin)
    return w_packed, b.reshape(cout, 1)


def init_params(key):
    keys = jax.random.split(key, 6)
    p = {}
    # (cin, cout, cin_pad, cout_pad, bn_channels)
    specs = [(3, 8, 8, None, 8),
             (8, 32, None, None, 32),
             (32, 50, None, 56, 56),     # conv3 Cout padded 50->56 (zeros)
             (50, 50, 56, None, 50)]     # conv4 Cin padded 50->56 (zeros)
    for i, (cin, cout, cpi, cpo, bn_c) in enumerate(specs, 1):
        w, b = _conv_init(keys[i - 1], cin, cout, cin_pad=cpi, cout_pad=cpo)
        p[f"w{i}"], p[f"b{i}"] = w, b
        p[f"g{i}"] = jnp.ones((bn_c,), jnp.float32)      # BN gamma
        p[f"be{i}"] = jnp.zeros((bn_c,), jnp.float32)    # BN beta
    bound = 1.0 / (K_FEAT ** 0.5)
    wl = jax.random.uniform(keys[4], (7, K_FEAT), jnp.float32, -bound, bound)
    # Reorder columns from PyTorch's (c, h, w) flatten order to our (h, c, w)
    # activation layout, pad K to a multiple of 128, store bf16.
    wl = wl.reshape(7, 50, 54, 73).transpose(0, 2, 1, 3).reshape(7, K_FEAT)
    p["wl"] = jnp.pad(wl, ((0, 0), (0, K_PAD - K_FEAT))).astype(jnp.bfloat16)
    p["bl"] = jax.random.uniform(keys[5], (1, 7), jnp.float32, -bound, bound)
    return p


def forward(x_nchw, p):
    bf = jnp.bfloat16
    n = x_nchw.shape[0]
    x = jnp.transpose(x_nchw, (0, 2, 1, 3))                 # (N, H, C, W)
    x = jnp.pad(x, ((0, 0), (0, 0), (0, 8 - x.shape[2]), (0, 0)))  # C: 3 -> 8
    x = x.astype(bf)

    # ---- block 1: Conv -> ReLU (fused); BN(8) folded into conv2 below ----
    z1, s1, q1 = conv_block(x, p["w1"].astype(bf), p["b1"],
                            rows=223, pool=False, relu_out=True)
    m1, v1 = finish_stats(s1, q1, _conv_count(z1, pooled=False))
    sc1, sh1 = bn_scale_shift(m1, v1, p["g1"], p["be1"])    # (8,)
    # BN affine is per-channel linear and conv2 is VALID -> exact weight fold.
    w2 = (p["w2"] * jnp.tile(sc1, 9)[None, :]).astype(bf)
    b2 = p["b2"] + jnp.dot(p["w2"], jnp.tile(sh1, 9))[:, None]

    # ---- block 2: Conv -> BN -> ReLU -> MaxPool (vertical max fused) ----
    y2, s2, q2 = conv_block(z1, w2, b2, rows=37, pool=True, relu_out=False)
    m2, v2 = finish_stats(s2, q2, _conv_count(y2, pooled=True))
    sc2, sh2 = bn_scale_shift(m2, v2, p["g2"], p["be2"])
    a2 = hpool_bn_relu(y2, sc2, sh2)                        # (N, 222, 32, 298)

    # ---- block 3 (output channels padded 50 -> 56 with zeros) ----
    y3, s3, q3 = conv_block(a2, p["w3"].astype(bf), p["b3"],
                            rows=55, pool=True, relu_out=False)
    m3, v3 = finish_stats(s3, q3, _conv_count(y3, pooled=True))
    sc3, sh3 = bn_scale_shift(m3, v3, p["g3"], p["be3"])
    a3 = hpool_bn_relu(y3, sc3, sh3)                        # (N, 110, 56, 148)

    # ---- block 4 ----
    y4, s4, q4 = conv_block(a3, p["w4"].astype(bf), p["b4"],
                            rows=27, pool=True, relu_out=False)
    m4, v4 = finish_stats(s4, q4, _conv_count(y4, pooled=True))
    sc4, sh4 = bn_scale_shift(m4, v4, p["g4"], p["be4"])
    a4 = hpool_bn_relu(y4, sc4, sh4)                        # (N, 54, 50, 73)

    # ---- Flatten (weight was pre-permuted to (h,c,w) order) + Linear ----
    feat = a4.reshape(n, K_FEAT)
    feat = jnp.pad(feat, ((0, 0), (0, K_PAD - K_FEAT)))
    return linear(feat, p["wl"], p["bl"])


if __name__ == "__main__":
    key = jax.random.PRNGKey(0)
    k_x, k_p = jax.random.split(key)
    # batch 2; spatial (448, 600) is dictated by Linear(197100, 7).
    x = jax.random.normal(k_x, (2, 3, 448, 600), jnp.float32)
    params = init_params(k_p)

    fwd = jax.jit(forward)
    out = jax.block_until_ready(fwd(x, params))
    assert out.shape == (2, 7) and out.dtype == jnp.float32
    print("KERNEL_OK")
</pallas_src>

<mosaic_0001>
module attributes {stable_mosaic.version = 11 : i64} {
  func.func @_conv_kernel(%arg0: i32, %arg1: i32, %arg2: memref<1x448x8x600xbf16, #tpu.memory_space<vmem>>, %arg3: memref<8x72xbf16, #tpu.memory_space<vmem>>, %arg4: memref<8x1xf32, #tpu.memory_space<vmem>>, %arg5: memref<1x223x8x598xbf16, #tpu.memory_space<vmem>>, %arg6: memref<1x1x8x1xf32, #tpu.memory_space<vmem>>, %arg7: memref<1x1x8x1xf32, #tpu.memory_space<vmem>>) attributes {dimension_semantics = [#tpu.dimension_semantics<parallel>, #tpu.dimension_semantics<parallel>], iteration_bounds = array<i64: 2, 2>, scalar_prefetch = 0 : i64, scratch_operands = 0 : i64, tpu.core_type = #tpu.core_type<tc>, window_params = [{transform_indices = @transform_0, window_bounds = array<i64: 1, 448, 8, 600>}, {pipeline_mode = #tpu.pipeline_mode<synchronous>, transform_indices = @transform_1, window_bounds = array<i64: 8, 72>}, {pipeline_mode = #tpu.pipeline_mode<synchronous>, transform_indices = @transform_2, window_bounds = array<i64: 8, 1>}, {transform_indices = @transform_3, window_bounds = array<i64: 1, 223, 8, 598>}, {transform_indices = @transform_4, window_bounds = array<i64: 1, 1, 8, 1>}, {transform_indices = @transform_5, window_bounds = array<i64: 1, 1, 8, 1>}]} {
    %c223_i32 = arith.constant 223 : i32
    %0 = arith.muli %arg1, %c223_i32 : i32
    %c1_i32 = arith.constant 1 : i32
    %1 = arith.muli %0, %c1_i32 : i32
    %c0 = arith.constant 0 : index
    %c0_0 = arith.constant 0 : index
    %2 = vector.load %arg4[%c0, %c0_0] : memref<8x1xf32, #tpu.memory_space<vmem>>, vector<8x1xf32>
    %c0_1 = arith.constant 0 : index
    %c0_2 = arith.constant 0 : index
    %3 = vector.load %arg3[%c0_1, %c0_2] : memref<8x72xbf16, #tpu.memory_space<vmem>>, vector<8x72xbf16>
    %cst = arith.constant 0.000000e+00 : f32
    %4 = vector.broadcast %cst : f32 to vector<8x1xf32>
    %cst_3 = arith.constant 0.000000e+00 : f32
    %5 = vector.broadcast %cst_3 : f32 to vector<8x1xf32>
    %c0_i32 = arith.constant 0 : i32
    %c223_i32_4 = arith.constant 223 : i32
    %6 = arith.addi %c0_i32, %c223_i32_4 : i32
    %c1_i32_5 = arith.constant 1 : i32
    %7:2 = scf.for %arg8 = %c0_i32 to %6 step %c1_i32_5 iter_args(%arg9 = %4, %arg10 = %5) -> (vector<8x1xf32>, vector<8x1xf32>)  : i32 {
      %c1_i32_15 = arith.constant 1 : i32
      %14 = arith.muli %arg8, %c1_i32_15 : i32
      %15 = arith.addi %1, %14 : i32
      %c0_16 = arith.constant 0 : index
      %16 = arith.index_cast %15 : i32 to index
      %c0_17 = arith.constant 0 : index
      %c0_18 = arith.constant 0 : index
      %17 = vector.load %arg2[%c0_16, %16, %c0_17, %c0_18] : memref<1x448x8x600xbf16, #tpu.memory_space<vmem>>, vector<1x1x8x600xbf16>
      %18 = vector.shape_cast %17 : vector<1x1x8x600xbf16> to vector<8x600xbf16>
      %19 = arith.extf %18 : vector<8x600xbf16> to vector<8x600xf32>
      %c1_i32_19 = arith.constant 1 : i32
      %20 = arith.addi %15, %c1_i32_19 : i32
      %c0_20 = arith.constant 0 : index
      %21 = arith.index_cast %20 : i32 to index
      %c0_21 = arith.constant 0 : index
      %c0_22 = arith.constant 0 : index
      %22 = vector.load %arg2[%c0_20, %21, %c0_21, %c0_22] : memref<1x448x8x600xbf16, #tpu.memory_space<vmem>>, vector<1x1x8x600xbf16>
      %23 = vector.shape_cast %22 : vector<1x1x8x600xbf16> to vector<8x600xbf16>
      %24 = arith.extf %23 : vector<8x600xbf16> to vector<8x600xf32>
      %c2_i32 = arith.constant 2 : i32
      %25 = arith.addi %15, %c2_i32 : i32
      %c0_23 = arith.constant 0 : index
      %26 = arith.index_cast %25 : i32 to index
      %c0_24 = arith.constant 0 : index
      %c0_25 = arith.constant 0 : index
      %27 = vector.load %arg2[%c0_23, %26, %c0_24, %c0_25] : memref<1x448x8x600xbf16, #tpu.memory_space<vmem>>, vector<1x1x8x600xbf16>
      %28 = vector.shape_cast %27 : vector<1x1x8x600xbf16> to vector<8x600xbf16>
      %29 = arith.extf %28 : vector<8x600xbf16> to vector<8x600xf32>
      %30 = vector.extract_strided_slice %19 {offsets = [0, 0], sizes = [8, 598], strides = [1, 1]} : vector<8x600xf32> to vector<8x598xf32>
      %31 = vector.extract_strided_slice %19 {offsets = [0, 1], sizes = [8, 598], strides = [1, 1]} : vector<8x600xf32> to vector<8x598xf32>
      %32 = vector.extract_strided_slice %19 {offsets = [0, 2], sizes = [8, 598], strides = [1, 1]} : vector<8x600xf32> to vector<8x598xf32>
      %33 = vector.extract_strided_slice %24 {offsets = [0, 0], sizes = [8, 598], strides = [1, 1]} : vector<8x600xf32> to vector<8x598xf32>
      %34 = vector.extract_strided_slice %24 {offsets = [0, 1], sizes = [8, 598], strides = [1, 1]} : vector<8x600xf32> to vector<8x598xf32>
      %35 = vector.extract_strided_slice %24 {offsets = [0, 2], sizes = [8, 598], strides = [1, 1]} : vector<8x600xf32> to vector<8x598xf32>
      %36 = vector.extract_strided_slice %29 {offsets = [0, 0], sizes = [8, 598], strides = [1, 1]} : vector<8x600xf32> to vector<8x598xf32>
      %37 = vector.extract_strided_slice %29 {offsets = [0, 1], sizes = [8, 598], strides = [1, 1]} : vector<8x600xf32> to vector<8x598xf32>
      %38 = vector.extract_strided_slice %29 {offsets = [0, 2], sizes = [8, 598], strides = [1, 1]} : vector<8x600xf32> to vector<8x598xf32>
      %39 = tpu.concatenate %30, %31, %32, %33, %34, %35, %36, %37, %38 in 0 : vector<8x598xf32>, vector<8x598xf32>, vector<8x598xf32>, vector<8x598xf32>, vector<8x598xf32>, vector<8x598xf32>, vector<8x598xf32>, vector<8x598xf32>, vector<8x598xf32> -> vector<72x598xf32>
      %40 = arith.truncf %39 : vector<72x598xf32> to vector<72x598xbf16>
      %cst_26 = arith.constant dense<0.000000e+00> : vector<8x598xf32>
      %41 = tpu.matmul %3, %40, %cst_26 {dimension_numbers = #tpu.dot_dimension_numbers<[1], [0], [0], [1], [0, 0, 1, 1], [], []>} : vector<8x72xbf16>, vector<72x598xbf16>, vector<8x598xf32> -> vector<8x598xf32>
      %42 = vector.broadcast %2 : vector<8x1xf32> to vector<8x598xf32>
      %43 = arith.addf %41, %42 : vector<8x598xf32>
      %cst_27 = arith.constant 0.000000e+00 : f32
      %44 = vector.broadcast %cst_27 : f32 to vector<8x598xf32>
      %45 = arith.maximumf %43, %44 : vector<8x598xf32>
      %cst_28 = arith.constant dense<0.000000e+00> : vector<8xf32>
      %46 = vector.multi_reduction <add>, %45, %cst_28 [1] : vector<8x598xf32> to vector<8xf32>
      %47 = vector.shape_cast %46 : vector<8xf32> to vector<8x1xf32>
      %48 = arith.addf %arg9, %47 : vector<8x1xf32>
      %49 = arith.mulf %45, %45 : vector<8x598xf32>
      %cst_29 = arith.constant dense<0.000000e+00> : vector<8xf32>
      %50 = vector.multi_reduction <add>, %49, %cst_29 [1] : vector<8x598xf32> to vector<8xf32>
      %51 = vector.shape_cast %50 : vector<8xf32> to vector<8x1xf32>
      %52 = arith.addf %arg10, %51 : vector<8x1xf32>
      %53 = arith.truncf %45 : vector<8x598xf32> to vector<8x598xbf16>
      %c0_30 = arith.constant 0 : index
      %54 = arith.index_cast %arg8 : i32 to index
      %c0_31 = arith.constant 0 : index
      %c0_32 = arith.constant 0 : index
      %55 = vector.load %arg5[%c0_30, %54, %c0_31, %c0_32] : memref<1x223x8x598xbf16, #tpu.memory_space<vmem>>, vector<1x1x8x598xbf16>
      %56 = vector.shape_cast %55 : vector<1x1x8x598xbf16> to vector<8x598xbf16>
      %57 = vector.shape_cast %53 : vector<8x598xbf16> to vector<1x1x8x598xbf16>
      tpu.vector_store %arg5[%c0_30, %54, %c0_31, %c0_32], %57 {strides = array<i32>} : memref<1x223x8x598xbf16, #tpu.memory_space<vmem>>, vector<1x1x8x598xbf16>,
      scf.yield %48, %52 : vector<8x1xf32>, vector<8x1xf32>
    }
    %c223_i32_6 = arith.constant 223 : i32
    %c0_7 = arith.constant 0 : index
    %c0_8 = arith.constant 0 : index
    %c0_9 = arith.constant 0 : index
    %c0_10 = arith.constant 0 : index
    %8 = vector.load %arg6[%c0_7, %c0_8, %c0_9, %c0_10] : memref<1x1x8x1xf32, #tpu.memory_space<vmem>>, vector<1x1x8x1xf32>
    %9 = vector.shape_cast %8 : vector<1x1x8x1xf32> to vector<8x1xf32>
    %10 = vector.shape_cast %7#0 : vector<8x1xf32> to vector<1x1x8x1xf32>
    tpu.vector_store %arg6[%c0_7, %c0_8, %c0_9, %c0_10], %10 {strides = array<i32>} : memref<1x1x8x1xf32, #tpu.memory_space<vmem>>, vector<1x1x8x1xf32>,
    %c0_11 = arith.constant 0 : index
    %c0_12 = arith.constant 0 : index
    %c0_13 = arith.constant 0 : index
    %c0_14 = arith.constant 0 : index
    %11 = vector.load %arg7[%c0_11, %c0_12, %c0_13, %c0_14] : memref<1x1x8x1xf32, #tpu.memory_space<vmem>>, vector<1x1x8x1xf32>
    %12 = vector.shape_cast %11 : vector<1x1x8x1xf32> to vector<8x1xf32>
    %13 = vector.shape_cast %7#1 : vector<8x1xf32> to vector<1x1x8x1xf32>
    tpu.vector_store %arg7[%c0_11, %c0_12, %c0_13, %c0_14], %13 {strides = array<i32>} : memref<1x1x8x1xf32, #tpu.memory_space<vmem>>, vector<1x1x8x1xf32>,
    return
  }
  func.func @transform_0(%arg0: i32, %arg1: i32) -> (i32, i32, i32, i32) {
    %c0_i32 = arith.constant 0 : i32
    %c0_i32_0 = arith.constant 0 : i32
    %c0_i32_1 = arith.constant 0 : i32
    %c0_i32_2 = arith.constant 0 : i32
    return %arg0, %c0_i32, %c0_i32_0, %c0_i32_1 : i32, i32, i32, i32
  }
  func.func @transform_1(%arg0: i32, %arg1: i32) -> (i32, i32) {
    %c0_i32 = arith.constant 0 : i32
    %c0_i32_0 = arith.constant 0 : i32
    %c0_i32_1 = arith.constant 0 : i32
    return %c0_i32, %c0_i32_0 : i32, i32
  }
  func.func @transform_2(%arg0: i32, %arg1: i32) -> (i32, i32) {
    %c0_i32 = arith.constant 0 : i32
    %c0_i32_0 = arith.constant 0 : i32
    %c0_i32_1 = arith.constant 0 : i32
    return %c0_i32, %c0_i32_0 : i32, i32
  }
  func.func @transform_3(%arg0: i32, %arg1: i32) -> (i32, i32, i32, i32) {
    %c0_i32 = arith.constant 0 : i32
    %c0_i32_0 = arith.constant 0 : i32
    %c0_i32_1 = arith.constant 0 : i32
    return %arg0, %arg1, %c0_i32, %c0_i32_0 : i32, i32, i32, i32
  }
  func.func @transform_4(%arg0: i32, %arg1: i32) -> (i32, i32, i32, i32) {
    %c0_i32 = arith.constant 0 : i32
    %c0_i32_0 = arith.constant 0 : i32
    %c0_i32_1 = arith.constant 0 : i32
    return %arg0, %arg1, %c0_i32, %c0_i32_0 : i32, i32, i32, i32
  }
  func.func @transform_5(%arg0: i32, %arg1: i32) -> (i32, i32, i32, i32) {
    %c0_i32 = arith.constant 0 : i32
    %c0_i32_0 = arith.constant 0 : i32
    %c0_i32_1 = arith.constant 0 : i32
    return %arg0, %arg1, %c0_i32, %c0_i32_0 : i32, i32, i32, i32
  }
}

module attributes {stable_mosaic.version = 11 : i64} {
  func.func @_conv_kernel(%arg0: i32, %arg1: i32, %arg2: memref<1x446x8x598xbf16, #tpu.memory_space<vmem>>, %arg3: memref<32x72xbf16, #tpu.memory_space<vmem>>, %arg4: memref<32x1xf32, #tpu.memory_space<vmem>>, %arg5: memref<1x37x32x596xbf16, #tpu.memory_space<vmem>>, %arg6: memref<1x1x32x1xf32, #tpu.memory_space<vmem>>, %arg7: memref<1x1x32x1xf32, #tpu.memory_space<vmem>>) attributes {dimension_semantics = [#tpu.dimension_semantics<parallel>, #tpu.dimension_semantics<parallel>], iteration_bounds = array<i64: 2, 6>, scalar_prefetch = 0 : i64, scratch_operands = 0 : i64, tpu.core_type = #tpu.core_type<tc>, window_params = [{transform_indices = @transform_0, window_bounds = array<i64: 1, 446, 8, 598>}, {pipeline_mode = #tpu.pipeline_mode<synchronous>, transform_indices = @transform_1, window_bounds = array<i64: 32, 72>}, {pipeline_mode = #tpu.pipeline_mode<synchronous>, transform_indices = @transform_2, window_bounds = array<i64: 32, 1>}, {transform_indices = @transform_3, window_bounds = array<i64: 1, 37, 32, 596>}, {transform_indices = @transform_4, window_bounds = array<i64: 1, 1, 32, 1>}, {transform_indices = @transform_5, window_bounds = array<i64: 1, 1, 32, 1>}]} {
    %c37_i32 = arith.constant 37 : i32
    %0 = arith.muli %arg1, %c37_i32 : i32
    %c2_i32 = arith.constant 2 : i32
    %1 = arith.muli %0, %c2_i32 : i32
    %c0 = arith.constant 0 : index
    %c0_0 = arith.constant 0 : index
    %2 = vector.load %arg4[%c0, %c0_0] : memref<32x1xf32, #tpu.memory_space<vmem>>, vector<32x1xf32>
    %c0_1 = arith.constant 0 : index
    %c0_2 = arith.constant 0 : index
    %3 = vector.load %arg3[%c0_1, %c0_2] : memref<32x72xbf16, #tpu.memory_space<vmem>>, vector<32x72xbf16>
    %cst = arith.constant 0.000000e+00 : f32
    %4 = vector.broadcast %cst : f32 to vector<32x1xf32>
    %cst_3 = arith.constant 0.000000e+00 : f32
    %5 = vector.broadcast %cst_3 : f32 to vector<32x1xf32>
    %c0_i32 = arith.constant 0 : i32
    %c37_i32_4 = arith.constant 37 : i32
    %6 = arith.addi %c0_i32, %c37_i32_4 : i32
    %c1_i32 = arith.constant 1 : i32
    %7:2 = scf.for %arg8 = %c0_i32 to %6 step %c1_i32 iter_args(%arg9 = %4, %arg10 = %5) -> (vector<32x1xf32>, vector<32x1xf32>)  : i32 {
      %c2_i32_14 = arith.constant 2 : i32
      %14 = arith.muli %arg8, %c2_i32_14 : i32
      %15 = arith.addi %1, %14 : i32
      %c0_15 = arith.constant 0 : index
      %16 = arith.index_cast %15 : i32 to index
      %c0_16 = arith.constant 0 : index
      %c0_17 = arith.constant 0 : index
      %17 = vector.load %arg2[%c0_15, %16, %c0_16, %c0_17] : memref<1x446x8x598xbf16, #tpu.memory_space<vmem>>, vector<1x1x8x598xbf16>
      %18 = vector.shape_cast %17 : vector<1x1x8x598xbf16> to vector<8x598xbf16>
      %19 = arith.extf %18 : vector<8x598xbf16> to vector<8x598xf32>
      %c1_i32_18 = arith.constant 1 : i32
      %20 = arith.addi %15, %c1_i32_18 : i32
      %c0_19 = arith.constant 0 : index
      %21 = arith.index_cast %20 : i32 to index
      %c0_20 = arith.constant 0 : index
      %c0_21 = arith.constant 0 : index
      %22 = vector.load %arg2[%c0_19, %21, %c0_20, %c0_21] : memref<1x446x8x598xbf16, #tpu.memory_space<vmem>>, vector<1x1x8x598xbf16>
      %23 = vector.shape_cast %22 : vector<1x1x8x598xbf16> to vector<8x598xbf16>
      %24 = arith.extf %23 : vector<8x598xbf16> to vector<8x598xf32>
      %c2_i32_22 = arith.constant 2 : i32
      %25 = arith.addi %15, %c2_i32_22 : i32
      %c0_23 = arith.constant 0 : index
      %26 = arith.index_cast %25 : i32 to index
      %c0_24 = arith.constant 0 : index
      %c0_25 = arith.constant 0 : index
      %27 = vector.load %arg2[%c0_23, %26, %c0_24, %c0_25] : memref<1x446x8x598xbf16, #tpu.memory_space<vmem>>, vector<1x1x8x598xbf16>
      %28 = vector.shape_cast %27 : vector<1x1x8x598xbf16> to vector<8x598xbf16>
      %29 = arith.extf %28 : vector<8x598xbf16> to vector<8x598xf32>
      %30 = vector.extract_strided_slice %19 {offsets = [0, 0], sizes = [8, 596], strides = [1, 1]} : vector<8x598xf32> to vector<8x596xf32>
      %31 = vector.extract_strided_slice %19 {offsets = [0, 1], sizes = [8, 596], strides = [1, 1]} : vector<8x598xf32> to vector<8x596xf32>
      %32 = vector.extract_strided_slice %19 {offsets = [0, 2], sizes = [8, 596], strides = [1, 1]} : vector<8x598xf32> to vector<8x596xf32>
      %33 = vector.extract_strided_slice %24 {offsets = [0, 0], sizes = [8, 596], strides = [1, 1]} : vector<8x598xf32> to vector<8x596xf32>
      %34 = vector.extract_strided_slice %24 {offsets = [0, 1], sizes = [8, 596], strides = [1, 1]} : vector<8x598xf32> to vector<8x596xf32>
      %35 = vector.extract_strided_slice %24 {offsets = [0, 2], sizes = [8, 596], strides = [1, 1]} : vector<8x598xf32> to vector<8x596xf32>
      %36 = vector.extract_strided_slice %29 {offsets = [0, 0], sizes = [8, 596], strides = [1, 1]} : vector<8x598xf32> to vector<8x596xf32>
      %37 = vector.extract_strided_slice %29 {offsets = [0, 1], sizes = [8, 596], strides = [1, 1]} : vector<8x598xf32> to vector<8x596xf32>
      %38 = vector.extract_strided_slice %29 {offsets = [0, 2], sizes = [8, 596], strides = [1, 1]} : vector<8x598xf32> to vector<8x596xf32>
      %39 = tpu.concatenate %30, %31, %32, %33, %34, %35, %36, %37, %38 in 0 : vector<8x596xf32>, vector<8x596xf32>, vector<8x596xf32>, vector<8x596xf32>, vector<8x596xf32>, vector<8x596xf32>, vector<8x596xf32>, vector<8x596xf32>, vector<8x596xf32> -> vector<72x596xf32>
      %40 = arith.truncf %39 : vector<72x596xf32> to vector<72x596xbf16>
      %cst_26 = arith.constant dense<0.000000e+00> : vector<32x596xf32>
      %41 = tpu.matmul %3, %40, %cst_26 {dimension_numbers = #tpu.dot_dimension_numbers<[1], [0], [0], [1], [0, 0, 1, 1], [], []>} : vector<32x72xbf16>, vector<72x596xbf16>, vector<32x596xf32> -> vector<32x596xf32>
      %42 = vector.broadcast %2 : vector<32x1xf32> to vector<32x596xf32>
      %43 = arith.addf %41, %42 : vector<32x596xf32>
      %cst_27 = arith.constant dense<0.000000e+00> : vector<32xf32>
      %44 = vector.multi_reduction <add>, %43, %cst_27 [1] : vector<32x596xf32> to vector<32xf32>
      %45 = vector.shape_cast %44 : vector<32xf32> to vector<32x1xf32>
      %46 = arith.addf %arg9, %45 : vector<32x1xf32>
      %47 = arith.mulf %43, %43 : vector<32x596xf32>
      %cst_28 = arith.constant dense<0.000000e+00> : vector<32xf32>
      %48 = vector.multi_reduction <add>, %47, %cst_28 [1] : vector<32x596xf32> to vector<32xf32>
      %49 = vector.shape_cast %48 : vector<32xf32> to vector<32x1xf32>
      %50 = arith.addf %arg10, %49 : vector<32x1xf32>
      %c1_i32_29 = arith.constant 1 : i32
      %51 = arith.addi %15, %c1_i32_29 : i32
      %c0_30 = arith.constant 0 : index
      %52 = arith.index_cast %51 : i32 to index
      %c0_31 = arith.constant 0 : index
      %c0_32 = arith.constant 0 : index
      %53 = vector.load %arg2[%c0_30, %52, %c0_31, %c0_32] : memref<1x446x8x598xbf16, #tpu.memory_space<vmem>>, vector<1x1x8x598xbf16>
      %54 = vector.shape_cast %53 : vector<1x1x8x598xbf16> to vector<8x598xbf16>
      %55 = arith.extf %54 : vector<8x598xbf16> to vector<8x598xf32>
      %c1_i32_33 = arith.constant 1 : i32
      %56 = arith.addi %51, %c1_i32_33 : i32
      %c0_34 = arith.constant 0 : index
      %57 = arith.index_cast %56 : i32 to index
      %c0_35 = arith.constant 0 : index
      %c0_36 = arith.constant 0 : index
      %58 = vector.load %arg2[%c0_34, %57, %c0_35, %c0_36] : memref<1x446x8x598xbf16, #tpu.memory_space<vmem>>, vector<1x1x8x598xbf16>
      %59 = vector.shape_cast %58 : vector<1x1x8x598xbf16> to vector<8x598xbf16>
      %60 = arith.extf %59 : vector<8x598xbf16> to vector<8x598xf32>
      %c2_i32_37 = arith.constant 2 : i32
      %61 = arith.addi %51, %c2_i32_37 : i32
      %c0_38 = arith.constant 0 : index
      %62 = arith.index_cast %61 : i32 to index
      %c0_39 = arith.constant 0 : index
      %c0_40 = arith.constant 0 : index
      %63 = vector.load %arg2[%c0_38, %62, %c0_39, %c0_40] : memref<1x446x8x598xbf16, #tpu.memory_space<vmem>>, vector<1x1x8x598xbf16>
      %64 = vector.shape_cast %63 : vector<1x1x8x598xbf16> to vector<8x598xbf16>
      %65 = arith.extf %64 : vector<8x598xbf16> to vector<8x598xf32>
      %66 = vector.extract_strided_slice %55 {offsets = [0, 0], sizes = [8, 596], strides = [1, 1]} : vector<8x598xf32> to vector<8x596xf32>
      %67 = vector.extract_strided_slice %55 {offsets = [0, 1], sizes = [8, 596], strides = [1, 1]} : vector<8x598xf32> to vector<8x596xf32>
      %68 = vector.extract_strided_slice %55 {offsets = [0, 2], sizes = [8, 596], strides = [1, 1]} : vector<8x598xf32> to vector<8x596xf32>
      %69 = vector.extract_strided_slice %60 {offsets = [0, 0], sizes = [8, 596], strides = [1, 1]} : vector<8x598xf32> to vector<8x596xf32>
      %70 = vector.extract_strided_slice %60 {offsets = [0, 1], sizes = [8, 596], strides = [1, 1]} : vector<8x598xf32> to vector<8x596xf32>
      %71 = vector.extract_strided_slice %60 {offsets = [0, 2], sizes = [8, 596], strides = [1, 1]} : vector<8x598xf32> to vector<8x596xf32>
      %72 = vector.extract_strided_slice %65 {offsets = [0, 0], sizes = [8, 596], strides = [1, 1]} : vector<8x598xf32> to vector<8x596xf32>
      %73 = vector.extract_strided_slice %65 {offsets = [0, 1], sizes = [8, 596], strides = [1, 1]} : vector<8x598xf32> to vector<8x596xf32>
      %74 = vector.extract_strided_slice %65 {offsets = [0, 2], sizes = [8, 596], strides = [1, 1]} : vector<8x598xf32> to vector<8x596xf32>
      %75 = tpu.concatenate %66, %67, %68, %69, %70, %71, %72, %73, %74 in 0 : vector<8x596xf32>, vector<8x596xf32>, vector<8x596xf32>, vector<8x596xf32>, vector<8x596xf32>, vector<8x596xf32>, vector<8x596xf32>, vector<8x596xf32>, vector<8x596xf32> -> vector<72x596xf32>
      %76 = arith.truncf %75 : vector<72x596xf32> to vector<72x596xbf16>
      %cst_41 = arith.constant dense<0.000000e+00> : vector<32x596xf32>
      %77 = tpu.matmul %3, %76, %cst_41 {dimension_numbers = #tpu.dot_dimension_numbers<[1], [0], [0], [1], [0, 0, 1, 1], [], []>} : vector<32x72xbf16>, vector<72x596xbf16>, vector<32x596xf32> -> vector<32x596xf32>
      %78 = vector.broadcast %2 : vector<32x1xf32> to vector<32x596xf32>
      %79 = arith.addf %77, %78 : vector<32x596xf32>
      %cst_42 = arith.constant dense<0.000000e+00> : vector<32xf32>
      %80 = vector.multi_reduction <add>, %79, %cst_42 [1] : vector<32x596xf32> to vector<32xf32>
      %81 = vector.shape_cast %80 : vector<32xf32> to vector<32x1xf32>
      %82 = arith.addf %46, %81 : vector<32x1xf32>
      %83 = arith.mulf %79, %79 : vector<32x596xf32>
      %cst_43 = arith.constant dense<0.000000e+00> : vector<32xf32>
      %84 = vector.multi_reduction <add>, %83, %cst_43 [1] : vector<32x596xf32> to vector<32xf32>
      %85 = vector.shape_cast %84 : vector<32xf32> to vector<32x1xf32>
      %86 = arith.addf %50, %85 : vector<32x1xf32>
      %87 = arith.maximumf %43, %79 : vector<32x596xf32>
      %88 = arith.truncf %87 : vector<32x596xf32> to vector<32x596xbf16>
      %c0_44 = arith.constant 0 : index
      %89 = arith.index_cast %arg8 : i32 to index
      %c0_45 = arith.constant 0 : index
      %c0_46 = arith.constant 0 : index
      %90 = vector.load %arg5[%c0_44, %89, %c0_45, %c0_46] : memref<1x37x32x596xbf16, #tpu.memory_space<vmem>>, vector<1x1x32x596xbf16>
      %91 = vector.shape_cast %90 : vector<1x1x32x596xbf16> to vector<32x596xbf16>
      %92 = vector.shape_cast %88 : vector<32x596xbf16> to vector<1x1x32x596xbf16>
      tpu.vector_store %arg5[%c0_44, %89, %c0_45, %c0_46], %92 {strides = array<i32>} : memref<1x37x32x596xbf16, #tpu.memory_space<vmem>>, vector<1x1x32x596xbf16>,
      scf.yield %82, %86 : vector<32x1xf32>, vector<32x1xf32>
    }
    %c37_i32_5 = arith.constant 37 : i32
    %c0_6 = arith.constant 0 : index
    %c0_7 = arith.constant 0 : index
    %c0_8 = arith.constant 0 : index
    %c0_9 = arith.constant 0 : index
    %8 = vector.load %arg6[%c0_6, %c0_7, %c0_8, %c0_9] : memref<1x1x32x1xf32, #tpu.memory_space<vmem>>, vector<1x1x32x1xf32>
    %9 = vector.shape_cast %8 : vector<1x1x32x1xf32> to vector<32x1xf32>
    %10 = vector.shape_cast %7#0 : vector<32x1xf32> to vector<1x1x32x1xf32>
    tpu.vector_store %arg6[%c0_6, %c0_7, %c0_8, %c0_9], %10 {strides = array<i32>} : memref<1x1x32x1xf32, #tpu.memory_space<vmem>>, vector<1x1x32x1xf32>,
    %c0_10 = arith.constant 0 : index
    %c0_11 = arith.constant 0 : index
    %c0_12 = arith.constant 0 : index
    %c0_13 = arith.constant 0 : index
    %11 = vector.load %arg7[%c0_10, %c0_11, %c0_12, %c0_13] : memref<1x1x32x1xf32, #tpu.memory_space<vmem>>, vector<1x1x32x1xf32>
    %12 = vector.shape_cast %11 : vector<1x1x32x1xf32> to vector<32x1xf32>
    %13 = vector.shape_cast %7#1 : vector<32x1xf32> to vector<1x1x32x1xf32>
    tpu.vector_store %arg7[%c0_10, %c0_11, %c0_12, %c0_13], %13 {strides = array<i32>} : memref<1x1x32x1xf32, #tpu.memory_space<vmem>>, vector<1x1x32x1xf32>,
    return
  }
  func.func @transform_0(%arg0: i32, %arg1: i32) -> (i32, i32, i32, i32) {
    %c0_i32 = arith.constant 0 : i32
    %c0_i32_0 = arith.constant 0 : i32
    %c0_i32_1 = arith.constant 0 : i32
    %c0_i32_2 = arith.constant 0 : i32
    return %arg0, %c0_i32, %c0_i32_0, %c0_i32_1 : i32, i32, i32, i32
  }
  func.func @transform_1(%arg0: i32, %arg1: i32) -> (i32, i32) {
    %c0_i32 = arith.constant 0 : i32
    %c0_i32_0 = arith.constant 0 : i32
    %c0_i32_1 = arith.constant 0 : i32
    return %c0_i32, %c0_i32_0 : i32, i32
  }
  func.func @transform_2(%arg0: i32, %arg1: i32) -> (i32, i32) {
    %c0_i32 = arith.constant 0 : i32
    %c0_i32_0 = arith.constant 0 : i32
    %c0_i32_1 = arith.constant 0 : i32
    return %c0_i32, %c0_i32_0 : i32, i32
  }
  func.func @transform_3(%arg0: i32, %arg1: i32) -> (i32, i32, i32, i32) {
    %c0_i32 = arith.constant 0 : i32
    %c0_i32_0 = arith.constant 0 : i32
    %c0_i32_1 = arith.constant 0 : i32
    return %arg0, %arg1, %c0_i32, %c0_i32_0 : i32, i32, i32, i32
  }
  func.func @transform_4(%arg0: i32, %arg1: i32) -> (i32, i32, i32, i32) {
    %c0_i32 = arith.constant 0 : i32
    %c0_i32_0 = arith.constant 0 : i32
    %c0_i32_1 = arith.constant 0 : i32
    return %arg0, %arg1, %c0_i32, %c0_i32_0 : i32, i32, i32, i32
  }
  func.func @transform_5(%arg0: i32, %arg1: i32) -> (i32, i32, i32, i32) {
    %c0_i32 = arith.constant 0 : i32
    %c0_i32_0 = arith.constant 0 : i32
    %c0_i32_1 = arith.constant 0 : i32
    return %arg0, %arg1, %c0_i32, %c0_i32_0 : i32, i32, i32, i32
  }
}

module attributes {stable_mosaic.version = 11 : i64} {
  func.func @_conv_kernel(%arg0: i32, %arg1: i32, %arg2: memref<1x222x32x298xbf16, #tpu.memory_space<vmem>>, %arg3: memref<56x288xbf16, #tpu.memory_space<vmem>>, %arg4: memref<56x1xf32, #tpu.memory_space<vmem>>, %arg5: memref<1x55x56x296xbf16, #tpu.memory_space<vmem>>, %arg6: memref<1x1x56x1xf32, #tpu.memory_space<vmem>>, %arg7: memref<1x1x56x1xf32, #tpu.memory_space<vmem>>) attributes {dimension_semantics = [#tpu.dimension_semantics<parallel>, #tpu.dimension_semantics<parallel>], iteration_bounds = array<i64: 2, 2>, scalar_prefetch = 0 : i64, scratch_operands = 0 : i64, tpu.core_type = #tpu.core_type<tc>, window_params = [{transform_indices = @transform_0, window_bounds = array<i64: 1, 222, 32, 298>}, {pipeline_mode = #tpu.pipeline_mode<synchronous>, transform_indices = @transform_1, window_bounds = array<i64: 56, 288>}, {pipeline_mode = #tpu.pipeline_mode<synchronous>, transform_indices = @transform_2, window_bounds = array<i64: 56, 1>}, {transform_indices = @transform_3, window_bounds = array<i64: 1, 55, 56, 296>}, {transform_indices = @transform_4, window_bounds = array<i64: 1, 1, 56, 1>}, {transform_indices = @transform_5, window_bounds = array<i64: 1, 1, 56, 1>}]} {
    %c55_i32 = arith.constant 55 : i32
    %0 = arith.muli %arg1, %c55_i32 : i32
    %c2_i32 = arith.constant 2 : i32
    %1 = arith.muli %0, %c2_i32 : i32
    %c0 = arith.constant 0 : index
    %c0_0 = arith.constant 0 : index
    %2 = vector.load %arg4[%c0, %c0_0] : memref<56x1xf32, #tpu.memory_space<vmem>>, vector<56x1xf32>
    %c0_1 = arith.constant 0 : index
    %c0_2 = arith.constant 0 : index
    %3 = vector.load %arg3[%c0_1, %c0_2] : memref<56x288xbf16, #tpu.memory_space<vmem>>, vector<56x288xbf16>
    %cst = arith.constant 0.000000e+00 : f32
    %4 = vector.broadcast %cst : f32 to vector<56x1xf32>
    %cst_3 = arith.constant 0.000000e+00 : f32
    %5 = vector.broadcast %cst_3 : f32 to vector<56x1xf32>
    %c0_i32 = arith.constant 0 : i32
    %c55_i32_4 = arith.constant 55 : i32
    %6 = arith.addi %c0_i32, %c55_i32_4 : i32
    %c1_i32 = arith.constant 1 : i32
    %7:2 = scf.for %arg8 = %c0_i32 to %6 step %c1_i32 iter_args(%arg9 = %4, %arg10 = %5) -> (vector<56x1xf32>, vector<56x1xf32>)  : i32 {
      %c2_i32_14 = arith.constant 2 : i32
      %14 = arith.muli %arg8, %c2_i32_14 : i32
      %15 = arith.addi %1, %14 : i32
      %c0_15 = arith.constant 0 : index
      %16 = arith.index_cast %15 : i32 to index
      %c0_16 = arith.constant 0 : index
      %c0_17 = arith.constant 0 : index
      %17 = vector.load %arg2[%c0_15, %16, %c0_16, %c0_17] : memref<1x222x32x298xbf16, #tpu.memory_space<vmem>>, vector<1x1x32x298xbf16>
      %18 = vector.shape_cast %17 : vector<1x1x32x298xbf16> to vector<32x298xbf16>
      %19 = arith.extf %18 : vector<32x298xbf16> to vector<32x298xf32>
      %c1_i32_18 = arith.constant 1 : i32
      %20 = arith.addi %15, %c1_i32_18 : i32
      %c0_19 = arith.constant 0 : index
      %21 = arith.index_cast %20 : i32 to index
      %c0_20 = arith.constant 0 : index
      %c0_21 = arith.constant 0 : index
      %22 = vector.load %arg2[%c0_19, %21, %c0_20, %c0_21] : memref<1x222x32x298xbf16, #tpu.memory_space<vmem>>, vector<1x1x32x298xbf16>
      %23 = vector.shape_cast %22 : vector<1x1x32x298xbf16> to vector<32x298xbf16>
      %24 = arith.extf %23 : vector<32x298xbf16> to vector<32x298xf32>
      %c2_i32_22 = arith.constant 2 : i32
      %25 = arith.addi %15, %c2_i32_22 : i32
      %c0_23 = arith.constant 0 : index
      %26 = arith.index_cast %25 : i32 to index
      %c0_24 = arith.constant 0 : index
      %c0_25 = arith.constant 0 : index
      %27 = vector.load %arg2[%c0_23, %26, %c0_24, %c0_25] : memref<1x222x32x298xbf16, #tpu.memory_space<vmem>>, vector<1x1x32x298xbf16>
      %28 = vector.shape_cast %27 : vector<1x1x32x298xbf16> to vector<32x298xbf16>
      %29 = arith.extf %28 : vector<32x298xbf16> to vector<32x298xf32>
      %30 = vector.extract_strided_slice %19 {offsets = [0, 0], sizes = [32, 296], strides = [1, 1]} : vector<32x298xf32> to vector<32x296xf32>
      %31 = vector.extract_strided_slice %19 {offsets = [0, 1], sizes = [32, 296], strides = [1, 1]} : vector<32x298xf32> to vector<32x296xf32>
      %32 = vector.extract_strided_slice %19 {offsets = [0, 2], sizes = [32, 296], strides = [1, 1]} : vector<32x298xf32> to vector<32x296xf32>
      %33 = vector.extract_strided_slice %24 {offsets = [0, 0], sizes = [32, 296], strides = [1, 1]} : vector<32x298xf32> to vector<32x296xf32>
      %34 = vector.extract_strided_slice %24 {offsets = [0, 1], sizes = [32, 296], strides = [1, 1]} : vector<32x298xf32> to vector<32x296xf32>
      %35 = vector.extract_strided_slice %24 {offsets = [0, 2], sizes = [32, 296], strides = [1, 1]} : vector<32x298xf32> to vector<32x296xf32>
      %36 = vector.extract_strided_slice %29 {offsets = [0, 0], sizes = [32, 296], strides = [1, 1]} : vector<32x298xf32> to vector<32x296xf32>
      %37 = vector.extract_strided_slice %29 {offsets = [0, 1], sizes = [32, 296], strides = [1, 1]} : vector<32x298xf32> to vector<32x296xf32>
      %38 = vector.extract_strided_slice %29 {offsets = [0, 2], sizes = [32, 296], strides = [1, 1]} : vector<32x298xf32> to vector<32x296xf32>
      %39 = tpu.concatenate %30, %31, %32, %33, %34, %35, %36, %37, %38 in 0 : vector<32x296xf32>, vector<32x296xf32>, vector<32x296xf32>, vector<32x296xf32>, vector<32x296xf32>, vector<32x296xf32>, vector<32x296xf32>, vector<32x296xf32>, vector<32x296xf32> -> vector<288x296xf32>
      %40 = arith.truncf %39 : vector<288x296xf32> to vector<288x296xbf16>
      %cst_26 = arith.constant dense<0.000000e+00> : vector<56x296xf32>
      %41 = tpu.matmul %3, %40, %cst_26 {dimension_numbers = #tpu.dot_dimension_numbers<[1], [0], [0], [1], [0, 0, 1, 1], [], []>} : vector<56x288xbf16>, vector<288x296xbf16>, vector<56x296xf32> -> vector<56x296xf32>
      %42 = vector.broadcast %2 : vector<56x1xf32> to vector<56x296xf32>
      %43 = arith.addf %41, %42 : vector<56x296xf32>
      %cst_27 = arith.constant dense<0.000000e+00> : vector<56xf32>
      %44 = vector.multi_reduction <add>, %43, %cst_27 [1] : vector<56x296xf32> to vector<56xf32>
      %45 = vector.shape_cast %44 : vector<56xf32> to vector<56x1xf32>
      %46 = arith.addf %arg9, %45 : vector<56x1xf32>
      %47 = arith.mulf %43, %43 : vector<56x296xf32>
      %cst_28 = arith.constant dense<0.000000e+00> : vector<56xf32>
      %48 = vector.multi_reduction <add>, %47, %cst_28 [1] : vector<56x296xf32> to vector<56xf32>
      %49 = vector.shape_cast %48 : vector<56xf32> to vector<56x1xf32>
      %50 = arith.addf %arg10, %49 : vector<56x1xf32>
      %c1_i32_29 = arith.constant 1 : i32
      %51 = arith.addi %15, %c1_i32_29 : i32
      %c0_30 = arith.constant 0 : index
      %52 = arith.index_cast %51 : i32 to index
      %c0_31 = arith.constant 0 : index
      %c0_32 = arith.constant 0 : index
      %53 = vector.load %arg2[%c0_30, %52, %c0_31, %c0_32] : memref<1x222x32x298xbf16, #tpu.memory_space<vmem>>, vector<1x1x32x298xbf16>
      %54 = vector.shape_cast %53 : vector<1x1x32x298xbf16> to vector<32x298xbf16>
      %55 = arith.extf %54 : vector<32x298xbf16> to vector<32x298xf32>
      %c1_i32_33 = arith.constant 1 : i32
      %56 = arith.addi %51, %c1_i32_33 : i32
      %c0_34 = arith.constant 0 : index
      %57 = arith.index_cast %56 : i32 to index
      %c0_35 = arith.constant 0 : index
      %c0_36 = arith.constant 0 : index
      %58 = vector.load %arg2[%c0_34, %57, %c0_35, %c0_36] : memref<1x222x32x298xbf16, #tpu.memory_space<vmem>>, vector<1x1x32x298xbf16>
      %59 = vector.shape_cast %58 : vector<1x1x32x298xbf16> to vector<32x298xbf16>
      %60 = arith.extf %59 : vector<32x298xbf16> to vector<32x298xf32>
      %c2_i32_37 = arith.constant 2 : i32
      %61 = arith.addi %51, %c2_i32_37 : i32
      %c0_38 = arith.constant 0 : index
      %62 = arith.index_cast %61 : i32 to index
      %c0_39 = arith.constant 0 : index
      %c0_40 = arith.constant 0 : index
      %63 = vector.load %arg2[%c0_38, %62, %c0_39, %c0_40] : memref<1x222x32x298xbf16, #tpu.memory_space<vmem>>, vector<1x1x32x298xbf16>
      %64 = vector.shape_cast %63 : vector<1x1x32x298xbf16> to vector<32x298xbf16>
      %65 = arith.extf %64 : vector<32x298xbf16> to vector<32x298xf32>
      %66 = vector.extract_strided_slice %55 {offsets = [0, 0], sizes = [32, 296], strides = [1, 1]} : vector<32x298xf32> to vector<32x296xf32>
      %67 = vector.extract_strided_slice %55 {offsets = [0, 1], sizes = [32, 296], strides = [1, 1]} : vector<32x298xf32> to vector<32x296xf32>
      %68 = vector.extract_strided_slice %55 {offsets = [0, 2], sizes = [32, 296], strides = [1, 1]} : vector<32x298xf32> to vector<32x296xf32>
      %69 = vector.extract_strided_slice %60 {offsets = [0, 0], sizes = [32, 296], strides = [1, 1]} : vector<32x298xf32> to vector<32x296xf32>
      %70 = vector.extract_strided_slice %60 {offsets = [0, 1], sizes = [32, 296], strides = [1, 1]} : vector<32x298xf32> to vector<32x296xf32>
      %71 = vector.extract_strided_slice %60 {offsets = [0, 2], sizes = [32, 296], strides = [1, 1]} : vector<32x298xf32> to vector<32x296xf32>
      %72 = vector.extract_strided_slice %65 {offsets = [0, 0], sizes = [32, 296], strides = [1, 1]} : vector<32x298xf32> to vector<32x296xf32>
      %73 = vector.extract_strided_slice %65 {offsets = [0, 1], sizes = [32, 296], strides = [1, 1]} : vector<32x298xf32> to vector<32x296xf32>
      %74 = vector.extract_strided_slice %65 {offsets = [0, 2], sizes = [32, 296], strides = [1, 1]} : vector<32x298xf32> to vector<32x296xf32>
      %75 = tpu.concatenate %66, %67, %68, %69, %70, %71, %72, %73, %74 in 0 : vector<32x296xf32>, vector<32x296xf32>, vector<32x296xf32>, vector<32x296xf32>, vector<32x296xf32>, vector<32x296xf32>, vector<32x296xf32>, vector<32x296xf32>, vector<32x296xf32> -> vector<288x296xf32>
      %76 = arith.truncf %75 : vector<288x296xf32> to vector<288x296xbf16>
      %cst_41 = arith.constant dense<0.000000e+00> : vector<56x296xf32>
      %77 = tpu.matmul %3, %76, %cst_41 {dimension_numbers = #tpu.dot_dimension_numbers<[1], [0], [0], [1], [0, 0, 1, 1], [], []>} : vector<56x288xbf16>, vector<288x296xbf16>, vector<56x296xf32> -> vector<56x296xf32>
      %78 = vector.broadcast %2 : vector<56x1xf32> to vector<56x296xf32>
      %79 = arith.addf %77, %78 : vector<56x296xf32>
      %cst_42 = arith.constant dense<0.000000e+00> : vector<56xf32>
      %80 = vector.multi_reduction <add>, %79, %cst_42 [1] : vector<56x296xf32> to vector<56xf32>
      %81 = vector.shape_cast %80 : vector<56xf32> to vector<56x1xf32>
      %82 = arith.addf %46, %81 : vector<56x1xf32>
      %83 = arith.mulf %79, %79 : vector<56x296xf32>
      %cst_43 = arith.constant dense<0.000000e+00> : vector<56xf32>
      %84 = vector.multi_reduction <add>, %83, %cst_43 [1] : vector<56x296xf32> to vector<56xf32>
      %85 = vector.shape_cast %84 : vector<56xf32> to vector<56x1xf32>
      %86 = arith.addf %50, %85 : vector<56x1xf32>
      %87 = arith.maximumf %43, %79 : vector<56x296xf32>
      %88 = arith.truncf %87 : vector<56x296xf32> to vector<56x296xbf16>
      %c0_44 = arith.constant 0 : index
      %89 = arith.index_cast %arg8 : i32 to index
      %c0_45 = arith.constant 0 : index
      %c0_46 = arith.constant 0 : index
      %90 = vector.load %arg5[%c0_44, %89, %c0_45, %c0_46] : memref<1x55x56x296xbf16, #tpu.memory_space<vmem>>, vector<1x1x56x296xbf16>
      %91 = vector.shape_cast %90 : vector<1x1x56x296xbf16> to vector<56x296xbf16>
      %92 = vector.shape_cast %88 : vector<56x296xbf16> to vector<1x1x56x296xbf16>
      tpu.vector_store %arg5[%c0_44, %89, %c0_45, %c0_46], %92 {strides = array<i32>} : memref<1x55x56x296xbf16, #tpu.memory_space<vmem>>, vector<1x1x56x296xbf16>,
      scf.yield %82, %86 : vector<56x1xf32>, vector<56x1xf32>
    }
    %c55_i32_5 = arith.constant 55 : i32
    %c0_6 = arith.constant 0 : index
    %c0_7 = arith.constant 0 : index
    %c0_8 = arith.constant 0 : index
    %c0_9 = arith.constant 0 : index
    %8 = vector.load %arg6[%c0_6, %c0_7, %c0_8, %c0_9] : memref<1x1x56x1xf32, #tpu.memory_space<vmem>>, vector<1x1x56x1xf32>
    %9 = vector.shape_cast %8 : vector<1x1x56x1xf32> to vector<56x1xf32>
    %10 = vector.shape_cast %7#0 : vector<56x1xf32> to vector<1x1x56x1xf32>
    tpu.vector_store %arg6[%c0_6, %c0_7, %c0_8, %c0_9], %10 {strides = array<i32>} : memref<1x1x56x1xf32, #tpu.memory_space<vmem>>, vector<1x1x56x1xf32>,
    %c0_10 = arith.constant 0 : index
    %c0_11 = arith.constant 0 : index
    %c0_12 = arith.constant 0 : index
    %c0_13 = arith.constant 0 : index
    %11 = vector.load %arg7[%c0_10, %c0_11, %c0_12, %c0_13] : memref<1x1x56x1xf32, #tpu.memory_space<vmem>>, vector<1x1x56x1xf32>
    %12 = vector.shape_cast %11 : vector<1x1x56x1xf32> to vector<56x1xf32>
    %13 = vector.shape_cast %7#1 : vector<56x1xf32> to vector<1x1x56x1xf32>
    tpu.vector_store %arg7[%c0_10, %c0_11, %c0_12, %c0_13], %13 {strides = array<i32>} : memref<1x1x56x1xf32, #tpu.memory_space<vmem>>, vector<1x1x56x1xf32>,
    return
  }
  func.func @transform_0(%arg0: i32, %arg1: i32) -> (i32, i32, i32, i32) {
    %c0_i32 = arith.constant 0 : i32
    %c0_i32_0 = arith.constant 0 : i32
    %c0_i32_1 = arith.constant 0 : i32
    %c0_i32_2 = arith.constant 0 : i32
    return %arg0, %c0_i32, %c0_i32_0, %c0_i32_1 : i32, i32, i32, i32
  }
  func.func @transform_1(%arg0: i32, %arg1: i32) -> (i32, i32) {
    %c0_i32 = arith.constant 0 : i32
    %c0_i32_0 = arith.constant 0 : i32
    %c0_i32_1 = arith.constant 0 : i32
    return %c0_i32, %c0_i32_0 : i32, i32
  }
  func.func @transform_2(%arg0: i32, %arg1: i32) -> (i32, i32) {
    %c0_i32 = arith.constant 0 : i32
    %c0_i32_0 = arith.constant 0 : i32
    %c0_i32_1 = arith.constant 0 : i32
    return %c0_i32, %c0_i32_0 : i32, i32
  }
  func.func @transform_3(%arg0: i32, %arg1: i32) -> (i32, i32, i32, i32) {
    %c0_i32 = arith.constant 0 : i32
    %c0_i32_0 = arith.constant 0 : i32
    %c0_i32_1 = arith.constant 0 : i32
    return %arg0, %arg1, %c0_i32, %c0_i32_0 : i32, i32, i32, i32
  }
  func.func @transform_4(%arg0: i32, %arg1: i32) -> (i32, i32, i32, i32) {
    %c0_i32 = arith.constant 0 : i32
    %c0_i32_0 = arith.constant 0 : i32
    %c0_i32_1 = arith.constant 0 : i32
    return %arg0, %arg1, %c0_i32, %c0_i32_0 : i32, i32, i32, i32
  }
  func.func @transform_5(%arg0: i32, %arg1: i32) -> (i32, i32, i32, i32) {
    %c0_i32 = arith.constant 0 : i32
    %c0_i32_0 = arith.constant 0 : i32
    %c0_i32_1 = arith.constant 0 : i32
    return %arg0, %arg1, %c0_i32, %c0_i32_0 : i32, i32, i32, i32
  }
}

module attributes {stable_mosaic.version = 11 : i64} {
  func.func @_conv_kernel(%arg0: i32, %arg1: i32, %arg2: memref<1x110x56x148xbf16, #tpu.memory_space<vmem>>, %arg3: memref<50x504xbf16, #tpu.memory_space<vmem>>, %arg4: memref<50x1xf32, #tpu.memory_space<vmem>>, %arg5: memref<1x27x50x146xbf16, #tpu.memory_space<vmem>>, %arg6: memref<1x1x50x1xf32, #tpu.memory_space<vmem>>, %arg7: memref<1x1x50x1xf32, #tpu.memory_space<vmem>>) attributes {dimension_semantics = [#tpu.dimension_semantics<parallel>, #tpu.dimension_semantics<parallel>], iteration_bounds = array<i64: 2, 2>, scalar_prefetch = 0 : i64, scratch_operands = 0 : i64, tpu.core_type = #tpu.core_type<tc>, window_params = [{transform_indices = @transform_0, window_bounds = array<i64: 1, 110, 56, 148>}, {pipeline_mode = #tpu.pipeline_mode<synchronous>, transform_indices = @transform_1, window_bounds = array<i64: 50, 504>}, {pipeline_mode = #tpu.pipeline_mode<synchronous>, transform_indices = @transform_2, window_bounds = array<i64: 50, 1>}, {transform_indices = @transform_3, window_bounds = array<i64: 1, 27, 50, 146>}, {transform_indices = @transform_4, window_bounds = array<i64: 1, 1, 50, 1>}, {transform_indices = @transform_5, window_bounds = array<i64: 1, 1, 50, 1>}]} {
    %c27_i32 = arith.constant 27 : i32
    %0 = arith.muli %arg1, %c27_i32 : i32
    %c2_i32 = arith.constant 2 : i32
    %1 = arith.muli %0, %c2_i32 : i32
    %c0 = arith.constant 0 : index
    %c0_0 = arith.constant 0 : index
    %2 = vector.load %arg4[%c0, %c0_0] : memref<50x1xf32, #tpu.memory_space<vmem>>, vector<50x1xf32>
    %c0_1 = arith.constant 0 : index
    %c0_2 = arith.constant 0 : index
    %3 = vector.load %arg3[%c0_1, %c0_2] : memref<50x504xbf16, #tpu.memory_space<vmem>>, vector<50x504xbf16>
    %cst = arith.constant 0.000000e+00 : f32
    %4 = vector.broadcast %cst : f32 to vector<50x1xf32>
    %cst_3 = arith.constant 0.000000e+00 : f32
    %5 = vector.broadcast %cst_3 : f32 to vector<50x1xf32>
    %c0_i32 = arith.constant 0 : i32
    %c27_i32_4 = arith.constant 27 : i32
    %6 = arith.addi %c0_i32, %c27_i32_4 : i32
    %c1_i32 = arith.constant 1 : i32
    %7:2 = scf.for %arg8 = %c0_i32 to %6 step %c1_i32 iter_args(%arg9 = %4, %arg10 = %5) -> (vector<50x1xf32>, vector<50x1xf32>)  : i32 {
      %c2_i32_14 = arith.constant 2 : i32
      %14 = arith.muli %arg8, %c2_i32_14 : i32
      %15 = arith.addi %1, %14 : i32
      %c0_15 = arith.constant 0 : index
      %16 = arith.index_cast %15 : i32 to index
      %c0_16 = arith.constant 0 : index
      %c0_17 = arith.constant 0 : index
      %17 = vector.load %arg2[%c0_15, %16, %c0_16, %c0_17] : memref<1x110x56x148xbf16, #tpu.memory_space<vmem>>, vector<1x1x56x148xbf16>
      %18 = vector.shape_cast %17 : vector<1x1x56x148xbf16> to vector<56x148xbf16>
      %19 = arith.extf %18 : vector<56x148xbf16> to vector<56x148xf32>
      %c1_i32_18 = arith.constant 1 : i32
      %20 = arith.addi %15, %c1_i32_18 : i32
      %c0_19 = arith.constant 0 : index
      %21 = arith.index_cast %20 : i32 to index
      %c0_20 = arith.constant 0 : index
      %c0_21 = arith.constant 0 : index
      %22 = vector.load %arg2[%c0_19, %21, %c0_20, %c0_21] : memref<1x110x56x148xbf16, #tpu.memory_space<vmem>>, vector<1x1x56x148xbf16>
      %23 = vector.shape_cast %22 : vector<1x1x56x148xbf16> to vector<56x148xbf16>
      %24 = arith.extf %23 : vector<56x148xbf16> to vector<56x148xf32>
      %c2_i32_22 = arith.constant 2 : i32
      %25 = arith.addi %15, %c2_i32_22 : i32
      %c0_23 = arith.constant 0 : index
      %26 = arith.index_cast %25 : i32 to index
      %c0_24 = arith.constant 0 : index
      %c0_25 = arith.constant 0 : index
      %27 = vector.load %arg2[%c0_23, %26, %c0_24, %c0_25] : memref<1x110x56x148xbf16, #tpu.memory_space<vmem>>, vector<1x1x56x148xbf16>
      %28 = vector.shape_cast %27 : vector<1x1x56x148xbf16> to vector<56x148xbf16>
      %29 = arith.extf %28 : vector<56x148xbf16> to vector<56x148xf32>
      %30 = vector.extract_strided_slice %19 {offsets = [0, 0], sizes = [56, 146], strides = [1, 1]} : vector<56x148xf32> to vector<56x146xf32>
      %31 = vector.extract_strided_slice %19 {offsets = [0, 1], sizes = [56, 146], strides = [1, 1]} : vector<56x148xf32> to vector<56x146xf32>
      %32 = vector.extract_strided_slice %19 {offsets = [0, 2], sizes = [56, 146], strides = [1, 1]} : vector<56x148xf32> to vector<56x146xf32>
      %33 = vector.extract_strided_slice %24 {offsets = [0, 0], sizes = [56, 146], strides = [1, 1]} : vector<56x148xf32> to vector<56x146xf32>
      %34 = vector.extract_strided_slice %24 {offsets = [0, 1], sizes = [56, 146], strides = [1, 1]} : vector<56x148xf32> to vector<56x146xf32>
      %35 = vector.extract_strided_slice %24 {offsets = [0, 2], sizes = [56, 146], strides = [1, 1]} : vector<56x148xf32> to vector<56x146xf32>
      %36 = vector.extract_strided_slice %29 {offsets = [0, 0], sizes = [56, 146], strides = [1, 1]} : vector<56x148xf32> to vector<56x146xf32>
      %37 = vector.extract_strided_slice %29 {offsets = [0, 1], sizes = [56, 146], strides = [1, 1]} : vector<56x148xf32> to vector<56x146xf32>
      %38 = vector.extract_strided_slice %29 {offsets = [0, 2], sizes = [56, 146], strides = [1, 1]} : vector<56x148xf32> to vector<56x146xf32>
      %39 = tpu.concatenate %30, %31, %32, %33, %34, %35, %36, %37, %38 in 0 : vector<56x146xf32>, vector<56x146xf32>, vector<56x146xf32>, vector<56x146xf32>, vector<56x146xf32>, vector<56x146xf32>, vector<56x146xf32>, vector<56x146xf32>, vector<56x146xf32> -> vector<504x146xf32>
      %40 = arith.truncf %39 : vector<504x146xf32> to vector<504x146xbf16>
      %cst_26 = arith.constant dense<0.000000e+00> : vector<50x146xf32>
      %41 = tpu.matmul %3, %40, %cst_26 {dimension_numbers = #tpu.dot_dimension_numbers<[1], [0], [0], [1], [0, 0, 1, 1], [], []>} : vector<50x504xbf16>, vector<504x146xbf16>, vector<50x146xf32> -> vector<50x146xf32>
      %42 = vector.broadcast %2 : vector<50x1xf32> to vector<50x146xf32>
      %43 = arith.addf %41, %42 : vector<50x146xf32>
      %cst_27 = arith.constant dense<0.000000e+00> : vector<50xf32>
      %44 = vector.multi_reduction <add>, %43, %cst_27 [1] : vector<50x146xf32> to vector<50xf32>
      %45 = vector.shape_cast %44 : vector<50xf32> to vector<50x1xf32>
      %46 = arith.addf %arg9, %45 : vector<50x1xf32>
      %47 = arith.mulf %43, %43 : vector<50x146xf32>
      %cst_28 = arith.constant dense<0.000000e+00> : vector<50xf32>
      %48 = vector.multi_reduction <add>, %47, %cst_28 [1] : vector<50x146xf32> to vector<50xf32>
      %49 = vector.shape_cast %48 : vector<50xf32> to vector<50x1xf32>
      %50 = arith.addf %arg10, %49 : vector<50x1xf32>
      %c1_i32_29 = arith.constant 1 : i32
      %51 = arith.addi %15, %c1_i32_29 : i32
      %c0_30 = arith.constant 0 : index
      %52 = arith.index_cast %51 : i32 to index
      %c0_31 = arith.constant 0 : index
      %c0_32 = arith.constant 0 : index
      %53 = vector.load %arg2[%c0_30, %52, %c0_31, %c0_32] : memref<1x110x56x148xbf16, #tpu.memory_space<vmem>>, vector<1x1x56x148xbf16>
      %54 = vector.shape_cast %53 : vector<1x1x56x148xbf16> to vector<56x148xbf16>
      %55 = arith.extf %54 : vector<56x148xbf16> to vector<56x148xf32>
      %c1_i32_33 = arith.constant 1 : i32
      %56 = arith.addi %51, %c1_i32_33 : i32
      %c0_34 = arith.constant 0 : index
      %57 = arith.index_cast %56 : i32 to index
      %c0_35 = arith.constant 0 : index
      %c0_36 = arith.constant 0 : index
      %58 = vector.load %arg2[%c0_34, %57, %c0_35, %c0_36] : memref<1x110x56x148xbf16, #tpu.memory_space<vmem>>, vector<1x1x56x148xbf16>
      %59 = vector.shape_cast %58 : vector<1x1x56x148xbf16> to vector<56x148xbf16>
      %60 = arith.extf %59 : vector<56x148xbf16> to vector<56x148xf32>
      %c2_i32_37 = arith.constant 2 : i32
      %61 = arith.addi %51, %c2_i32_37 : i32
      %c0_38 = arith.constant 0 : index
      %62 = arith.index_cast %61 : i32 to index
      %c0_39 = arith.constant 0 : index
      %c0_40 = arith.constant 0 : index
      %63 = vector.load %arg2[%c0_38, %62, %c0_39, %c0_40] : memref<1x110x56x148xbf16, #tpu.memory_space<vmem>>, vector<1x1x56x148xbf16>
      %64 = vector.shape_cast %63 : vector<1x1x56x148xbf16> to vector<56x148xbf16>
      %65 = arith.extf %64 : vector<56x148xbf16> to vector<56x148xf32>
      %66 = vector.extract_strided_slice %55 {offsets = [0, 0], sizes = [56, 146], strides = [1, 1]} : vector<56x148xf32> to vector<56x146xf32>
      %67 = vector.extract_strided_slice %55 {offsets = [0, 1], sizes = [56, 146], strides = [1, 1]} : vector<56x148xf32> to vector<56x146xf32>
      %68 = vector.extract_strided_slice %55 {offsets = [0, 2], sizes = [56, 146], strides = [1, 1]} : vector<56x148xf32> to vector<56x146xf32>
      %69 = vector.extract_strided_slice %60 {offsets = [0, 0], sizes = [56, 146], strides = [1, 1]} : vector<56x148xf32> to vector<56x146xf32>
      %70 = vector.extract_strided_slice %60 {offsets = [0, 1], sizes = [56, 146], strides = [1, 1]} : vector<56x148xf32> to vector<56x146xf32>
      %71 = vector.extract_strided_slice %60 {offsets = [0, 2], sizes = [56, 146], strides = [1, 1]} : vector<56x148xf32> to vector<56x146xf32>
      %72 = vector.extract_strided_slice %65 {offsets = [0, 0], sizes = [56, 146], strides = [1, 1]} : vector<56x148xf32> to vector<56x146xf32>
      %73 = vector.extract_strided_slice %65 {offsets = [0, 1], sizes = [56, 146], strides = [1, 1]} : vector<56x148xf32> to vector<56x146xf32>
      %74 = vector.extract_strided_slice %65 {offsets = [0, 2], sizes = [56, 146], strides = [1, 1]} : vector<56x148xf32> to vector<56x146xf32>
      %75 = tpu.concatenate %66, %67, %68, %69, %70, %71, %72, %73, %74 in 0 : vector<56x146xf32>, vector<56x146xf32>, vector<56x146xf32>, vector<56x146xf32>, vector<56x146xf32>, vector<56x146xf32>, vector<56x146xf32>, vector<56x146xf32>, vector<56x146xf32> -> vector<504x146xf32>
      %76 = arith.truncf %75 : vector<504x146xf32> to vector<504x146xbf16>
      %cst_41 = arith.constant dense<0.000000e+00> : vector<50x146xf32>
      %77 = tpu.matmul %3, %76, %cst_41 {dimension_numbers = #tpu.dot_dimension_numbers<[1], [0], [0], [1], [0, 0, 1, 1], [], []>} : vector<50x504xbf16>, vector<504x146xbf16>, vector<50x146xf32> -> vector<50x146xf32>
      %78 = vector.broadcast %2 : vector<50x1xf32> to vector<50x146xf32>
      %79 = arith.addf %77, %78 : vector<50x146xf32>
      %cst_42 = arith.constant dense<0.000000e+00> : vector<50xf32>
      %80 = vector.multi_reduction <add>, %79, %cst_42 [1] : vector<50x146xf32> to vector<50xf32>
      %81 = vector.shape_cast %80 : vector<50xf32> to vector<50x1xf32>
      %82 = arith.addf %46, %81 : vector<50x1xf32>
      %83 = arith.mulf %79, %79 : vector<50x146xf32>
      %cst_43 = arith.constant dense<0.000000e+00> : vector<50xf32>
      %84 = vector.multi_reduction <add>, %83, %cst_43 [1] : vector<50x146xf32> to vector<50xf32>
      %85 = vector.shape_cast %84 : vector<50xf32> to vector<50x1xf32>
      %86 = arith.addf %50, %85 : vector<50x1xf32>
      %87 = arith.maximumf %43, %79 : vector<50x146xf32>
      %88 = arith.truncf %87 : vector<50x146xf32> to vector<50x146xbf16>
      %c0_44 = arith.constant 0 : index
      %89 = arith.index_cast %arg8 : i32 to index
      %c0_45 = arith.constant 0 : index
      %c0_46 = arith.constant 0 : index
      %90 = vector.load %arg5[%c0_44, %89, %c0_45, %c0_46] : memref<1x27x50x146xbf16, #tpu.memory_space<vmem>>, vector<1x1x50x146xbf16>
      %91 = vector.shape_cast %90 : vector<1x1x50x146xbf16> to vector<50x146xbf16>
      %92 = vector.shape_cast %88 : vector<50x146xbf16> to vector<1x1x50x146xbf16>
      tpu.vector_store %arg5[%c0_44, %89, %c0_45, %c0_46], %92 {strides = array<i32>} : memref<1x27x50x146xbf16, #tpu.memory_space<vmem>>, vector<1x1x50x146xbf16>,
      scf.yield %82, %86 : vector<50x1xf32>, vector<50x1xf32>
    }
    %c27_i32_5 = arith.constant 27 : i32
    %c0_6 = arith.constant 0 : index
    %c0_7 = arith.constant 0 : index
    %c0_8 = arith.constant 0 : index
    %c0_9 = arith.constant 0 : index
    %8 = vector.load %arg6[%c0_6, %c0_7, %c0_8, %c0_9] : memref<1x1x50x1xf32, #tpu.memory_space<vmem>>, vector<1x1x50x1xf32>
    %9 = vector.shape_cast %8 : vector<1x1x50x1xf32> to vector<50x1xf32>
    %10 = vector.shape_cast %7#0 : vector<50x1xf32> to vector<1x1x50x1xf32>
    tpu.vector_store %arg6[%c0_6, %c0_7, %c0_8, %c0_9], %10 {strides = array<i32>} : memref<1x1x50x1xf32, #tpu.memory_space<vmem>>, vector<1x1x50x1xf32>,
    %c0_10 = arith.constant 0 : index
    %c0_11 = arith.constant 0 : index
    %c0_12 = arith.constant 0 : index
    %c0_13 = arith.constant 0 : index
    %11 = vector.load %arg7[%c0_10, %c0_11, %c0_12, %c0_13] : memref<1x1x50x1xf32, #tpu.memory_space<vmem>>, vector<1x1x50x1xf32>
    %12 = vector.shape_cast %11 : vector<1x1x50x1xf32> to vector<50x1xf32>
    %13 = vector.shape_cast %7#1 : vector<50x1xf32> to vector<1x1x50x1xf32>
    tpu.vector_store %arg7[%c0_10, %c0_11, %c0_12, %c0_13], %13 {strides = array<i32>} : memref<1x1x50x1xf32, #tpu.memory_space<vmem>>, vector<1x1x50x1xf32>,
    return
  }
  func.func @transform_0(%arg0: i32, %arg1: i32) -> (i32, i32, i32, i32) {
    %c0_i32 = arith.constant 0 : i32
    %c0_i32_0 = arith.constant 0 : i32
    %c0_i32_1 = arith.constant 0 : i32
    %c0_i32_2 = arith.constant 0 : i32
    return %arg0, %c0_i32, %c0_i32_0, %c0_i32_1 : i32, i32, i32, i32
  }
  func.func @transform_1(%arg0: i32, %arg1: i32) -> (i32, i32) {
    %c0_i32 = arith.constant 0 : i32
    %c0_i32_0 = arith.constant 0 : i32
    %c0_i32_1 = arith.constant 0 : i32
    return %c0_i32, %c0_i32_0 : i32, i32
  }
  func.func @transform_2(%arg0: i32, %arg1: i32) -> (i32, i32) {
    %c0_i32 = arith.constant 0 : i32
    %c0_i32_0 = arith.constant 0 : i32
    %c0_i32_1 = arith.constant 0 : i32
    return %c0_i32, %c0_i32_0 : i32, i32
  }
  func.func @transform_3(%arg0: i32, %arg1: i32) -> (i32, i32, i32, i32) {
    %c0_i32 = arith.constant 0 : i32
    %c0_i32_0 = arith.constant 0 : i32
    %c0_i32_1 = arith.constant 0 : i32
    return %arg0, %arg1, %c0_i32, %c0_i32_0 : i32, i32, i32, i32
  }
  func.func @transform_4(%arg0: i32, %arg1: i32) -> (i32, i32, i32, i32) {
    %c0_i32 = arith.constant 0 : i32
    %c0_i32_0 = arith.constant 0 : i32
    %c0_i32_1 = arith.constant 0 : i32
    return %arg0, %arg1, %c0_i32, %c0_i32_0 : i32, i32, i32, i32
  }
  func.func @transform_5(%arg0: i32, %arg1: i32) -> (i32, i32, i32, i32) {
    %c0_i32 = arith.constant 0 : i32
    %c0_i32_0 = arith.constant 0 : i32
    %c0_i32_1 = arith.constant 0 : i32
    return %arg0, %arg1, %c0_i32, %c0_i32_0 : i32, i32, i32, i32
  }
}

module attributes {stable_mosaic.version = 11 : i64} {
  func.func @_linear_kernel(%arg0: i32, %arg1: memref<2x19712xbf16, #tpu.memory_space<vmem>>, %arg2: memref<7x19712xbf16, #tpu.memory_space<vmem>>, %arg3: memref<1x7xf32, #tpu.memory_space<vmem>>, %arg4: memref<2x7xf32, #tpu.memory_space<vmem>>) attributes {dimension_semantics = [#tpu.dimension_semantics<arbitrary>], iteration_bounds = array<i64: 10>, scalar_prefetch = 0 : i64, scratch_operands = 0 : i64, tpu.core_type = #tpu.core_type<tc>, window_params = [{transform_indices = @transform_0, window_bounds = array<i64: 2, 19712>}, {transform_indices = @transform_1, window_bounds = array<i64: 7, 19712>}, {pipeline_mode = #tpu.pipeline_mode<synchronous>, transform_indices = @transform_2, window_bounds = array<i64: 1, 7>}, {pipeline_mode = #tpu.pipeline_mode<synchronous>, transform_indices = @transform_3, window_bounds = array<i64: 2, 7>}]} {
    %c0_i32 = arith.constant 0 : i32
    %0 = arith.cmpi eq, %arg0, %c0_i32 : i32
    %1 = arith.extui %0 : i1 to i32
    %c0_i32_0 = arith.constant 0 : i32
    %2 = arith.cmpi ne, %1, %c0_i32_0 : i32
    scf.if %2 {
      %cst_8 = arith.constant 0.000000e+00 : f32
      %9 = vector.broadcast %cst_8 : f32 to vector<2x7xf32>
      %c0_9 = arith.constant 0 : index
      %c0_10 = arith.constant 0 : index
      %10 = vector.load %arg3[%c0_9, %c0_10] : memref<1x7xf32, #tpu.memory_space<vmem>>, vector<1x7xf32>
      %11 = vector.broadcast %10 : vector<1x7xf32> to vector<2x7xf32>
      %12 = arith.addf %9, %11 : vector<2x7xf32>
      %c0_11 = arith.constant 0 : index
      %c0_12 = arith.constant 0 : index
      %13 = vector.load %arg4[%c0_11, %c0_12] : memref<2x7xf32, #tpu.memory_space<vmem>>, vector<2x7xf32>
      tpu.vector_store %arg4[%c0_11, %c0_12], %12 {strides = array<i32>} : memref<2x7xf32, #tpu.memory_space<vmem>>, vector<2x7xf32>,
    } else {
    }
    %c0 = arith.constant 0 : index
    %c0_1 = arith.constant 0 : index
    %3 = vector.load %arg4[%c0, %c0_1] : memref<2x7xf32, #tpu.memory_space<vmem>>, vector<2x7xf32>
    %c0_2 = arith.constant 0 : index
    %c0_3 = arith.constant 0 : index
    %4 = vector.load %arg1[%c0_2, %c0_3] : memref<2x19712xbf16, #tpu.memory_space<vmem>>, vector<2x19712xbf16>
    %c0_4 = arith.constant 0 : index
    %c0_5 = arith.constant 0 : index
    %5 = vector.load %arg2[%c0_4, %c0_5] : memref<7x19712xbf16, #tpu.memory_space<vmem>>, vector<7x19712xbf16>
    %cst = arith.constant dense<0.000000e+00> : vector<2x7xf32>
    %6 = tpu.matmul %4, %5, %cst {dimension_numbers = #tpu.dot_dimension_numbers<[1], [1], [0], [0], [0, 0, 1, 0], [], []>} : vector<2x19712xbf16>, vector<7x19712xbf16>, vector<2x7xf32> -> vector<2x7xf32>
    %7 = arith.addf %3, %6 : vector<2x7xf32>
    %c0_6 = arith.constant 0 : index
    %c0_7 = arith.constant 0 : index
    %8 = vector.load %arg4[%c0_6, %c0_7] : memref<2x7xf32, #tpu.memory_space<vmem>>, vector<2x7xf32>
    tpu.vector_store %arg4[%c0_6, %c0_7], %7 {strides = array<i32>} : memref<2x7xf32, #tpu.memory_space<vmem>>, vector<2x7xf32>,
    return
  }
  func.func @transform_0(%arg0: i32) -> (i32, i32) {
    %c0_i32 = arith.constant 0 : i32
    %c0_i32_0 = arith.constant 0 : i32
    return %c0_i32, %arg0 : i32, i32
  }
  func.func @transform_1(%arg0: i32) -> (i32, i32) {
    %c0_i32 = arith.constant 0 : i32
    %c0_i32_0 = arith.constant 0 : i32
    return %c0_i32, %arg0 : i32, i32
  }
  func.func @transform_2(%arg0: i32) -> (i32, i32) {
    %c0_i32 = arith.constant 0 : i32
    %c0_i32_0 = arith.constant 0 : i32
    %c0_i32_1 = arith.constant 0 : i32
    return %c0_i32, %c0_i32_0 : i32, i32
  }
  func.func @transform_3(%arg0: i32) -> (i32, i32) {
    %c0_i32 = arith.constant 0 : i32
    %c0_i32_0 = arith.constant 0 : i32
    %c0_i32_1 = arith.constant 0 : i32
    return %c0_i32, %c0_i32_0 : i32, i32
  }
}

</mosaic_0001>

<bundles_post_ra>
// kernel: forward.5
= control target key start
LH: loop header
LB: loop body
LE: loop exit
PB: predicated region body
PF: predicated region fallthrough
CT: control target
= control target key end

     0   :  { %s1700_s0 = inlined_call_operand.vmem [shape: bf16[2,448,8,600], index: 0, kind: input, shape index: {}]   ;;  %s1701_s1 = inlined_call_operand.vmem [shape: bf16[8,72], index: 1, kind: input, shape index: {}]   ;;  %s1702_s2 = inlined_call_operand.vmem [shape: f32[8,1], index: 2, kind: input, shape index: {}]   ;;  %s1703_s3 = inlined_call_operand.hbm [shape: bf16[2,446,8,598], index: 3, kind: output, shape index: {0}]   ;;  %s1704_s4 = inlined_call_operand.vmem [shape: f32[2,2,8,1], index: 4, kind: output, shape index: {1}]   ;;  %s1705_s5 = inlined_call_operand.vmem [shape: f32[2,2,8,1], index: 5, kind: output, shape index: {2}]  }
   0x1   :  { %1710 = sst [smem:[#allocation8_spill]] %s1701_s1 }
   0x2   :  { %1711 = sst [smem:[#allocation9_spill]] %s1702_s2 }
   0x3   :  { %11 = vsyncpa [#allocation3], 0 }
   0x4   :  { %13 = vsyncpa [#allocation3 + $0x1], 0  ;;  %s1292_s18 = smov 0   ;;  %s1294_s19 = smov 0  }
   0x5   :  { %s1296_s20 = smov 0   ;;  %s1298_s21 = smov 0  }
   0x6   :  { %s1300_s22 = smov 0   ;;  %s1302_s23 = smov 0  }
   0x7   :  { %s1304_s24 = smov 0   ;;  %s1306_s25 = smov 0  }
   0x8 LB: > { %1712 = sst [smem:[#allocation5_spill]] %s1236_s24  ;;  %s902_s26 = sadd.s32 4294967295, %s1240_s25   ;;  %s1240_s25 = sphi %s1306_s25, %s19_s25   ;;  %s1236_s24 = sphi %s1304_s24, %s1725_s24   ;;  %s1232_s23 = sphi %s1302_s23, %s1730_s23   ;;  %s1228_s22 = sphi %s1300_s22, %s1723_s22   ;;  %s1224_s21 = sphi %s1298_s21, %s1729_s21   ;;  %s1220_s20 = sphi %s1296_s20, %s1728_s20   ;;  %s1216_s19 = sphi %s1294_s19, %s1727_s19   ;;  %s1212_s18 = sphi %s1292_s18, %s1726_s18  }
   0x9   : > { %s903_s27 = sadd.s32 4294967294, %s1240_s25   ;;  %s28_s28 = sadd.s32 1, %s1232_s23 }
   0xa   : > { %p29_p0 = scmp.ge.s32.totalorder %s28_s28, 2  ;;  %s31_s29 = sadd.s32 1, %s1236_s24 }
   0xb   : > { %p118_p1 = scmp.ne.s32.totalorder %s1220_s20, %s1216_s19  ;;  %p119_p2 = scmp.eq.s32.totalorder %s902_s26, 3 }
   0xc   : > { %s1732_s28 = smov (%p29_p0, %s28_s28), 0  ;;  %s1734_s29 = smov (!%p29_p0, %s31_s29), %s1236_s24 }
   0xd   : > { %1713 = sst [smem:[#allocation6_spill]] %s1732_s28  ;;  %s104_s30 = ssub.s32 %s1232_s23, %s1732_s28 }
   0xe   : > { %p1343_p3 = por %p119_p2, %p118_p1  ;;  %p33_p4 = scmp.ge.s32.totalorder %s1734_s29, 2 }
   0xf   : > { %p124_p5 = scmp.ne.s32.totalorder %s1216_s19, %s1212_s18  ;;  %p125_p6 = scmp.eq.s32.totalorder %s903_s27, 3 }
  0x10   : > { %p906_p7 = scmp.ge.s32.totalorder %s1240_s25, 1  ;;  %s1736_s29 = smov (%p33_p4, %s1734_s29), 0 }
  0x11   : > { %1715 = sst [smem:[#allocation7_spill]] %s1736_s29  ;;  %p1352_p8 = por %p125_p6, %p124_p5 }
  0x12   : > { %p213_p9 = scmp.lt.s32.totalorder %s1240_s25, 5  ;;  %s103_s8 = ssub.s32 %s1236_s24, %s1736_s29 }
  0x13   : > { %s108_s9 = sadd.s32 1, %s1220_s20  ;;  %s105_s10 = sor.u32 %s104_s30, %s103_s8 }
  0x14   : > { %p214_p10 = pnand %p906_p7, %p213_p9  ;;  %p106_p11 = scmp.eq.s32.totalorder %s105_s10, 0 }
  0x15   : > { %s1707_s12 = sand.u32 (!%p214_p10), 1, %s1216_s19   ;;  %p257_p12 = scmp.lt.s32.totalorder (!%p214_p10), %s1228_s22, 1  ;;  %v1399_v2 = vmov (!%p214_p10), 0.0   ;;  %v1401_v3 = vmov (!%p214_p10), 0.0  }
  0x16   : > { %s1361_s11 = scalar_select %p106_p11, %s1220_s20, %s108_s9  }
  0x17   : > { %217 = sbr.rel (%p214_p10) target bundleno = 596 (0x254), region = 32  ;;  %s1717_s2 = sld [smem:[#allocation9_spill]] (!%p214_p10) }
  0x18   : > { %s1718_s1 = sld [smem:[#allocation8_spill]] (!%p214_p10)  ;;  %s1377_s17 = smul.u32 (!%p214_p10), 4460, %s1707_s12 }
  0x19   : > { %p265_p13 = scmp.lt.s32.totalorder (!%p214_p10), %s1224_s21, 1  ;;  %s1403_s29 = smov (!%p214_p10), 0  }
  0x1a   : > { %s236_s27 = scalar_lea.vmem (!%p214_p10), [#allocation2], %s1377_s17 }
  0x1d   : > { %v1368_v0 = vld [vmem:[%s1717_s2] sm:$0xff] (!%p214_p10) }
  0x1e   : > { %v1373_v1 = vld [vmem:[%s1718_s1] sm:$0xf]  ;;  %s258_s26 = scalar_select %p257_p12, %s1228_s22, 1 }
  0x1f   : > { %s266_s9 = scalar_select %p265_p13, %s1224_s21, 1 }
  0x20   : > { %s957_s30 = smul.u32 8960, %s258_s26  ;;  %s908_s8 = sshll.u32 %s258_s26, 1 }
  0x21   : > { %s268_s14 = sadd.s32 %s908_s8, %s266_s9 }
  0x22   : > { %s1386_s13 = scalar_lea.vmem %s1700_s0, %s957_s30  ;;  %s909_s2 = sshll.u32 %s268_s14, 3 }
  0x23   : > { %s1391_s1 = scalar_lea.vmem %s1704_s4, %s909_s2  ;;  %s1396_s24 = scalar_lea.vmem %s1705_s5, %s909_s2 }
  0x24 LB: >> { %s1719_s2 = smul.u32 223, %s1224_s21  ;;  %s1254_s30 = smov 126   ;;  %v1256_v28 = vmov 0   ;;  %vm342_vm0 = vcmask 1039360   ;;  %vm362_vm1 = vcmask 1031168   ;;  %vm492_vm2 = vcmask 1043456   ;;  %s1252_s29 = sphi %s1403_s29, %s288_s29   ;;  %v1248_v3 = vphi %v1401_v3, %v1721_v3   ;;  %v1244_v2 = vphi %v1399_v2, %v1720_v2  }
  0x25   : >> { %s1255_s8 = smov 127   ;;  %540 = vmatprep.mubr.bf16.mxu0 %v1256_v28  ;;  %581 = vmatprep.mubr.bf16.mxu1 %v1256_v28  ;;  %vm488_vm3 = vcmask 588800   ;;  %vm1258_vm4 = vmmov 0   ;;  %s935_s9 = smul.u32 20, %s1252_s29  ;;  %vm638_vm5 = vcmask 703488   ;;  %vm683_vm6 = vcmask 699392  }
  0x26   : >> { %s291_s28 = sadd.s32 %s1252_s29, %s1719_s2  ;;  %1133 = vset.pattern.permute.xlu0 %v1256_v28  ;;  %s288_s29 = sadd.s32 1, %s1252_s29  }
  0x27   : >> { %s931_s12 = smul.u32 20, %s291_s28  ;;  %s1619_s10 = scalar_lea.vmem %s236_s27, %s935_s9 [#allocation2] }
  0x28   : >> { %p285_p0 = scmp.ge.s32.totalorder %s288_s29, 223  }
  0x29   : >> { %s1418_s26 = scalar_lea.vmem %s1386_s13, %s931_s12  ;;  %vm685_vm7 = vcmask (%p285_p0), 7168   ;;  %s966_s14 = smul.u32 (%p285_p0), 1115, %s1224_s21 }
  0x2a   : >> { %v1421_v4 = vld [vmem:[%s1418_s26] sm:$0xff]  ;;  %v1424_v5 = vld [vmem:[%s1418_s26 + $0x8] sm:$0xff]  ;;  %v1427_v6 = vld [vmem:[%s1418_s26 + $0x14] sm:$0xff]  ;;  %s959_s15 = smul.u32 (%p285_p0), 2230, %s1228_s22  ;;  %s721_s16 = sshll.u32 (%p285_p0), %s236_s27, 4  ;;  %s1639_s16 = int_to_ptr.vmem [resolvable:$true] %s721_s16 }
  0x2b   : >> { %v299_v7 = vunpack.c.h.bf16 %v1421_v4  ;;  %v300_v8 = vunpack.c.l.bf16 %v1424_v5  ;;  %v298_v9 = vunpack.c.l.bf16 %v1421_v4  ;;  %v311_v10 = vunpack.c.h.bf16 %v1427_v6  ;;  %v1434_v11 = vld [vmem:[%s1418_s26 + $0x1c] sm:$0xff]  ;;  %v916_v16 = vld [vmem:[%s1418_s26 + $0x28] sm:$0xff]  ;;  %v1450_v17 = vld [vmem:[%s1418_s26 + $0x30] sm:$0xff]  ;;  %s1259_s21 = smov (%p285_p0), [#allocation2]  }
  0x2c   : >> { %v310_v14 = vunpack.c.l.bf16 %v1427_v6  ;;  %v312_v15 = vunpack.c.l.bf16 %v1434_v11  ;;  %v1453_v18 = vunpack.c.h.bf16 %v1424_v5  ;;  %v1455_v19 = vunpack.c.l.bf16 %v916_v16  ;;  %v1481_v27 = vld [vmem:[%s1418_s26 + $0x10] ss:$20 sps:$4 sm:$0xff]   ;;  %v1491_v32 = vld [vmem:[%s1418_s26 + $0x38] sm:$0xf]  ;;  %s718_s29 = sadd.s32 (%p285_p0), %s966_s14, %s959_s15  ;;  %s1722_s26 = sand.u32 (%p285_p0), 1, %s1216_s19  }
  0x2d   : >> { %v1073_v12 = vpack.i.bf16 %v300_v8, %v299_v7  ;;  %v1078_v13 = vpack.i.bf16 %v311_v10, %v298_v9  ;;  %v1463_v21 = vunpack.c.h.bf16 %v916_v16  ;;  %v1466_v22 = vunpack.c.l.bf16 %v1450_v17  ;;  %s928_s13 = sshll.u32 (%p285_p0), %s718_s29, 6  ;;  %s1138_s22 = sshll.u32 (%p285_p0), %s1259_s21, 4  ;;  %s1139_s22 = int_to_ptr.vmem [resolvable:$false] %s1138_s22 }
  0x2e   : >> { %v1088_v20 = vpack.i.bf16 %v310_v14, %v312_v15  ;;  %v1098_v23 = vpack.i.bf16 %v1453_v18, %v1455_v19  ;;  %v1486_v29 = vunpack.c.l.bf16 %v1481_v27  ;;  %v313_v30 = vunpack.c.h.bf16 %v1434_v11  ;;  %s1644_s12 = scalar_lea.hbm (%p285_p0), %s1703_s3, %s928_s13  ;;  %p1141_p5 = scmp.lt.s32.totalorder (%p285_p0), %s1639_s16, %s1139_s22 }
  0x2f   : >> { %1074 = vrot.lane.b32.xlu1 %v1073_v12, %s1254_s30  ;;  %1064 = vrot.lane.b32.xlu0 %v1073_v12, %s1255_s8  ;;  %v1093_v24 = vpack.i.bf16 %v1466_v22, %v1463_v21  ;;  %v1108_v25 = vpack.i.bf16 %v1453_v18, %v1466_v22  ;;  %v1103_v26 = vpack.i.bf16 %v1463_v21, %v1455_v19  ;;  %v314_v31 = vunpack.c.h.bf16 %v1481_v27 }
  0x30   : >> { %v325_v34 = vunpack.c.h.bf16 %v1450_v17  ;;  %v326_v35 = vunpack.c.l.bf16 %v1491_v32 }
  0x31   : >> { %v1118_v33 = vpack.i.bf16 %v314_v31, %v313_v30 }
  0x32   : >> { %v1128_v36 = vpack.i.bf16 %v326_v35, %v325_v34 }
  0x33   : >> { %1079 = vrot.lane.b32.xlu1 %v1078_v13, %s1254_s30  ;;  %1069 = vrot.lane.b32.xlu0 %v1078_v13, %s1255_s8 }
  0x37   : >> { %1089 = vrot.lane.b32.xlu1 %v1088_v20, %s1254_s30  ;;  %1084 = vrot.lane.b32.xlu0 %v1088_v20, %s1255_s8 }
  0x3b   : >> { %1099 = vrot.lane.b32.xlu1 %v1098_v23, %s1255_s8  ;;  %1094 = vrot.lane.b32.xlu0 %v1093_v24, %s1255_s8 }
  0x3f   : >> { %1109 = vrot.lane.b32.xlu1 %v1108_v25, %s1254_s30  ;;  %1104 = vrot.lane.b32.xlu0 %v1103_v26, %s1254_s30 }
  0x43   : >> { %360 = vrot.lane.b32.xlu1 %v1486_v29, %s1254_s30  ;;  %340 = vrot.lane.b32.xlu0 %v1486_v29, %s1255_s8 }
  0x47   : >> { %1119 = vrot.lane.b32.xlu1 %v1118_v33, %s1254_s30  ;;  %1114 = vrot.lane.b32.xlu0 %v1118_v33, %s1255_s8 }
  0x4b   : >> { %1129 = vrot.lane.b32.xlu1 %v1128_v36, %s1254_s30  ;;  %1124 = vrot.lane.b32.xlu0 %v1128_v36, %s1255_s8  ;;  %s1648_s30 = scalar_lea.sflag (%p285_p0), [#allocation3], %s1722_s26 }
  0x4f   : >> { %485 = vperm.xlu0 %1133, %v1368_v0  }
  0xa1   : >> { %v1512_v37 = vpop.permute.xlu1 %1074  ;;  %v1514_v38 = vpop.permute.xlu0 %1064 }
  0xa2   : >> { %v1077_v39 = vunpack.i.h.bf16 %v1512_v37  ;;  %v1076_v40 = vunpack.i.l.bf16 %v1512_v37  ;;  %v1067_v41 = vunpack.i.h.bf16 %v1514_v38  ;;  %v1066_v42 = vunpack.i.l.bf16 %v1514_v38 }
  0xa4   : >> { %v344_v43 = vsel %vm342_vm0, %v1066_v42, %v1067_v41  ;;  %v364_v49 = vsel %vm362_vm1, %v1076_v40, %v1077_v39 }
  0xa5   : >> { %v1080_v44 = vpop.permute.xlu1 %1079  ;;  %v1070_v45 = vpop.permute.xlu0 %1069  ;;  %v459_v46 = vpack.c.bf16 %v344_v43, %v299_v7  ;;  %v464_v56 = vpack.c.bf16 %v311_v10, %v364_v49 }
  0xa6   : >> { %v1081_v47 = vunpack.i.l.bf16 %v1080_v44  ;;  %v1071_v48 = vunpack.i.l.bf16 %v1070_v45  ;;  %v1082_v50 = vunpack.i.h.bf16 %v1080_v44  ;;  %v1072_v52 = vunpack.i.h.bf16 %v1070_v45 }
  0xa7   : >> { %508 = vmatprep.subr.bf16.mxu0 %v459_v46 }
  0xa8   : >> { %v343_v51 = vsel %vm342_vm0, %v1071_v48, %v1066_v42  ;;  %v363_v57 = vsel %vm362_vm1, %v1081_v47, %v1076_v40 }
  0xa9   : >> { %v1527_v53 = vpop.permute.xlu1 %1089  ;;  %v1529_v54 = vpop.permute.xlu0 %1084  ;;  %v458_v55 = vpack.c.bf16 %v343_v51, %v298_v9  ;;  %v463_v9 = vpack.c.bf16 %v310_v14, %v363_v57 }
  0xaa   : >> { %v1092_v58 = vunpack.i.h.bf16 %v1527_v53  ;;  %v1091_v59 = vunpack.i.l.bf16 %v1527_v53  ;;  %v1087_v60 = vunpack.i.h.bf16 %v1529_v54  ;;  %v1086_v61 = vunpack.i.l.bf16 %v1529_v54 }
  0xab   : >> { %509 = vmatpush1.bf16.msra.mxu0 %v458_v55 }
  0xac   : >> { %510 = vmatprep.subr.bf16.mxu0 %v464_v56  ;;  %v388_v62 = vsel %vm342_vm0, %v1072_v52, %v1086_v61  ;;  %v407_v63 = vsel %vm362_vm1, %v1082_v50, %v1091_v59  ;;  %v387_v12 = vsel %vm342_vm0, %v1087_v60, %v1072_v52  ;;  %v406_v23 = vsel %vm362_vm1, %v1092_v58, %v1082_v50 }
  0xad   : >> { %v1100_v4 = vpop.permute.xlu1 %1099  ;;  %v1546_v7 = vpop.permute.xlu0 %1094  ;;  %v469_v10 = vpack.c.bf16 %v407_v63, %v388_v62  ;;  %v468_v14 = vpack.c.bf16 %v406_v23, %v387_v12 }
  0xae   : >> { %v1101_v13 = vunpack.i.l.bf16 %v1100_v4  ;;  %v1097_v16 = vunpack.i.h.bf16 %v1546_v7  ;;  %v1096_v20 = vunpack.i.l.bf16 %v1546_v7  ;;  %v1102_v25 = vunpack.i.h.bf16 %v1100_v4 }
  0xaf   : >> { %511 = vmatpush1.bf16.msra.mxu0 %v463_v9 }
  0xb0   : >> { %512 = vmatprep.subr.bf16.mxu0 %v469_v10  ;;  %v431_v24 = vsel %vm342_vm0, %v1096_v20, %v1097_v16  ;;  %v430_v40 = vsel %vm342_vm0, %v1101_v13, %v1096_v20  ;;  %v345_v48 = vsel %vm342_vm0, %v1067_v41, %v1102_v25 }
  0xb1   : >> { %v1557_v26 = vpop.permute.xlu1 %1109  ;;  %v1105_v6 = vpop.permute.xlu0 %1104  ;;  %v474_v28 = vpack.c.bf16 %v431_v24, %v1463_v21  ;;  %v473_v47 = vpack.c.bf16 %v430_v40, %v1455_v19  ;;  %v460_v56 = vpack.c.bf16 %v345_v48, %v300_v8  ;;  %v1257_v8 = vmov 0.0  }
  0xb2   : >> { %v1111_v33 = vunpack.i.l.bf16 %v1557_v26  ;;  %v1107_v36 = vunpack.i.h.bf16 %v1105_v6  ;;  %v1106_v38 = vunpack.i.l.bf16 %v1105_v6  ;;  %v1112_v42 = vunpack.i.h.bf16 %v1557_v26 }
  0xb3   : >> { %513 = vmatpush1.bf16.msra.mxu0 %v468_v14 }
  0xb4   : >> { %v450_v43 = vsel %vm362_vm1, %v1107_v36, %v1111_v33  ;;  %514 = vmatprep.subr.bf16.mxu0 %v474_v28  ;;  %v449_v44 = vsel %vm362_vm1, %v1106_v38, %v1107_v36  ;;  %v365_v58 = vsel %vm362_vm1, %v1077_v39, %v1112_v42 }
  0xb5   : >> { %v479_v45 = vpack.c.bf16 %v450_v43, %v450_v43  ;;  %v361_v46 = vpop.permute.xlu1 %360  ;;  %v341_v21 = vpop.permute.xlu0 %340  ;;  %v478_v49 = vpack.c.bf16 %v449_v44, %v449_v44  ;;  %v465_v5 = vpack.c.bf16 %v312_v15, %v365_v58 }
  0xb6   : >> { %v366_v50 = vsel %vm362_vm1, %v1112_v42, %v361_v46  ;;  %v346_v51 = vsel %vm342_vm0, %v1102_v25, %v341_v21  ;;  %v462_v37 = vpack.c.bf16 %v341_v21, %v1486_v29  ;;  %v467_v53 = vpack.c.bf16 %v314_v31, %v361_v46 }
  0xb7   : >> { %v466_v52 = vpack.c.bf16 %v313_v30, %v366_v50  ;;  %515 = vmatpush1.bf16.msra.mxu0 %v473_v47  ;;  %v461_v55 = vpack.c.bf16 %v346_v51, %v1453_v18  ;;  %v494_v19 = vsel %vm492_vm2, %v478_v49, 0 }
  0xb8   : >> { %919 = vmatprep.subr.msk.bf16.mxu0 %vm492_vm2, %v479_v45 }
  0xb9   : >> { %v1120_v57 = vpop.permute.xlu1 %1119  ;;  %549 = vmatprep.subr.bf16.mxu1 %v461_v55  ;;  %v1115_v41 = vpop.permute.xlu0 %1114 }
  0xba   : >> { %v1122_v60 = vunpack.i.h.bf16 %v1120_v57  ;;  %v1121_v62 = vunpack.i.l.bf16 %v1120_v57  ;;  %v1117_v30 = vunpack.i.h.bf16 %v1115_v41  ;;  %v1116_v63 = vunpack.i.l.bf16 %v1115_v41  ;;  %550 = vmatpush1.bf16.msra.mxu1 %v460_v56 }
  0xbb   : >> { %517 = vmatpush1.bf16.msra.mxu0 %v494_v19  ;;  %551 = vmatprep.subr.bf16.mxu1 %v466_v52 }
  0xbc   : >> { %942 = vmatprep.subr.bf16.mxu0 %v1257_v8  ;;  %v390_v18 = vsel %vm342_vm0, %v1116_v63, %v1117_v30  ;;  %v409_v4 = vsel %vm362_vm1, %v1121_v62, %v1122_v60  ;;  %v389_v12 = vsel %vm342_vm0, %v1086_v61, %v1116_v63  ;;  %v408_v11 = vsel %vm362_vm1, %v1091_v59, %v1121_v62 }
  0xbd   : >> { %v1130_v39 = vpop.permute.xlu1 %1129  ;;  %v1125_v9 = vpop.permute.xlu0 %1124  ;;  %v471_v10 = vpack.c.bf16 %v409_v4, %v390_v18  ;;  %v470_v24 = vpack.c.bf16 %v408_v11, %v389_v12  ;;  %v472_v31 = vpack.c.bf16 %v1122_v60, %v1117_v30 }
  0xbe   : >> { %v1132_v15 = vunpack.i.h.bf16 %v1130_v39  ;;  %v1131_v13 = vunpack.i.l.bf16 %v1130_v39  ;;  %v1127_v20 = vunpack.i.h.bf16 %v1125_v9  ;;  %v1126_v23 = vunpack.i.l.bf16 %v1125_v9  ;;  %920 = vmatmul.mubr.msk.bf16.vlgmr.msra.gmra.mrb[0].mxu0 %vm488_vm3, %v1373_v1  ;;  %552 = vmatpush1.bf16.msra.mxu1 %v465_v5 }
  0xbf   : >> { %943 = vmatpush3.bf16.msra.mxu0 %v462_v37  ;;  %553 = vmatprep.subr.bf16.mxu1 %v471_v10 }
  0xc0   : >> { %v452_v29 = vsel %vm362_vm1, %v1131_v13, %v1132_v15  ;;  %944 = vmatprep.subr.bf16.mxu0 %v1257_v8  ;;  %v433_v54 = vsel %vm342_vm0, %v1126_v23, %v1127_v20  ;;  %v432_v61 = vsel %vm342_vm0, %v1097_v16, %v1126_v23  ;;  %952 = vmatprep.mubr.msk.bf16.mxu0 %vm1258_vm4, %v1257_v8 }
  0xc1   : >> { %v476_v59 = vpack.c.bf16 %v433_v54, %v325_v34  ;;  %v451_v25 = vsel %vm362_vm1, %v1111_v33, %v1131_v13  ;;  %v481_v6 = vpack.c.bf16 %v452_v29, %v452_v29  ;;  %v475_v27 = vpack.c.bf16 %v432_v61, %v1466_v22 }
  0xc2   : >> { %554 = vmatpush1.bf16.msra.mxu1 %v470_v24  ;;  %v480_v17 = vpack.c.bf16 %v451_v25, %v451_v25  ;;  %v477_v34 = vpack.c.bf16 %v1127_v20, %v326_v35  ;;  %v482_v16 = vpack.c.bf16 %v1132_v15, %v1132_v15 }
  0xc3   : >> { %945 = vmatpush3.bf16.msra.mxu0 %v467_v53  ;;  %555 = vmatprep.subr.bf16.mxu1 %v476_v59 }
  0xc4   : >> { %946 = vmatprep.subr.bf16.mxu0 %v1257_v8  ;;  %v500_v7 = vsel %vm492_vm2, %v480_v17, 0  ;;  %v506_v22 = vsel %vm492_vm2, %v482_v16, 0 }
  0xc6   : >> { %556 = vmatpush1.bf16.msra.mxu1 %v475_v27 }
  0xc7   : >> { %947 = vmatpush3.bf16.msra.mxu0 %v472_v31  ;;  %921 = vmatprep.subr.msk.bf16.mxu1 %vm492_vm2, %v481_v6 }
  0xc8   : >> { %948 = vmatprep.subr.bf16.mxu0 %v1257_v8 }
  0xca   : >> { %558 = vmatpush1.bf16.msra.mxu1 %v500_v7 }
  0xcb   : >> { %949 = vmatpush3.bf16.msra.mxu0 %v477_v34 }
  0xcc   : >> { %950 = vmatprep.subr.bf16.mxu0 %v1257_v8 }
  0xcd   : >> { %922 = vmatmul.mubr.msk.bf16.vlgmr.msra.gmra.mrb[0].mxu1 %vm488_vm3, %v1373_v1 }
  0xce   : >> { %v486_v26 = vpop.permute.xlu0 %485 }
  0xcf   : >> { %951 = vmatpush3.bf16.msra.mxu0 %v506_v22 }
  0xd2   : >> { %953 = vmatmul.mubr.msk.bf16.vlgmr.msra.gmra.mrb[4].mxu0 %vm488_vm3, %v1373_v1 }
 0x191   : >> { %v542_v14 = vpop.f32.mrb[0].mxu0 }
 0x192   : >> { %v543_v32 = vadd.f32 %v542_v14, %v486_v26  ;;  %v544_v35 = vpop.f32.mrb[1].mxu0 }
 0x193   : >> { %v545_v28 = vadd.f32 %v544_v35, %v486_v26  ;;  %v546_v33 = vpop.f32.mrb[2].mxu0 }
 0x194   : >> { %v630_v36 = vmax.f32 %v543_v32, 0.0  ;;  %v547_v38 = vpop.f32.mrb[3].mxu0 }
 0x195   : >> { %v631_v40 = vmax.f32 %v545_v28, 0.0 }
 0x196   : >> { %v644_v42 = vmul.f32 %v630_v36, %v630_v36 }
 0x197   : >> { %v635_v43 = vadd.f32 %v631_v40, %v630_v36  ;;  %v645_v44 = vmul.f32 %v631_v40, %v631_v40  ;;  %v932_v45 = vpack.c.bf16 %v631_v40, %v630_v36 }
 0x199   : >> { %681 = vst [vmem:[%s1619_s10] sm:$0xff] %v932_v45  ;;  %v649_v46 = vadd.f32 %v645_v44, %v644_v42 }
 0x1a0   : >> { %v583_v21 = vpop.f32.mrb[0].mxu1 }
 0x1a1   : >> { %v584_v47 = vadd.f32 %v583_v21, %v486_v26  ;;  %v585_v48 = vpop.f32.mrb[1].mxu1 }
 0x1a2   : >> { %v586_v49 = vadd.f32 %v585_v48, %v486_v26  ;;  %v587_v50 = vpop.f32.mrb[2].mxu1 }
 0x1a3   : >> { %v632_v51 = vmax.f32 %v584_v47, 0.0  ;;  %v588_v52 = vpop.f32.mrb[3].mxu1 }
 0x1a4   : >> { %v633_v55 = vmax.f32 %v586_v49, 0.0 }
 0x1a5   : >> { %v646_v56 = vmul.f32 %v632_v51, %v632_v51  ;;  %v624_v19 = vpop.f32.mrb[4].mxu0  ;;  %v636_v57 = vadd.f32 %v635_v43, %v632_v51 }
 0x1a6   : >> { %v933_v41 = vpack.c.bf16 %v633_v55, %v632_v51  ;;  %v625_v58 = vadd.f32 %v624_v19, %v486_v26  ;;  %v954_v60 = vpop.f32.mrb[5].mxu0  ;;  %v647_v62 = vmul.f32 %v633_v55, %v633_v55 }
 0x1a7   : >> { %v627_v30 = vpop.f32.mrb[6].mxu0  ;;  %v637_v63 = vadd.f32 %v636_v57, %v633_v55  ;;  %v650_v5 = vadd.f32 %v649_v46, %v646_v56 }
 0x1a8   : >> { %682 = vst [vmem:[%s1619_s10 + $0x8] sm:$0xff] %v933_v41  ;;  %v634_v8 = vmax.f32 %v625_v58, 0.0  ;;  %v955_v18 = vpop.f32.mrb[7].mxu0 }
 0x1a9   : >> { %v651_v4 = vadd.f32 %v650_v5, %v647_v62 }
 0x1aa   : >> { %v934_v37 = vpack.c.bf16 %v634_v8, %v634_v8  ;;  %v639_v39 = vsel %vm638_vm5, %v634_v8, 0.0  ;;  %v648_v9 = vmul.f32 %v634_v8, %v634_v8 }
 0x1ab   : >> { %v640_v10 = vadd.f32 %v639_v39, %v637_v63 }
 0x1ac   : >> { %684 = vst.msk [vmem:[%s1619_s10 + $0x10] sm:$0xf] %vm683_vm6, %v934_v37  ;;  %v652_v12 = vsel %vm638_vm5, %v648_v9, 0.0 }
 0x1ad   : >> { %641 = vadd.xlane.f32.xlu1 %v640_v10  ;;  %v653_v11 = vadd.f32 %v652_v12, %v651_v4 }
 0x1af   : >> { %654 = vadd.xlane.f32.xlu0 %v653_v11 }
 0x239   : > { %287 = sbr.rel (!%p285_p0) target bundleno = 36 (0x24), region = 102 }
 0x23a   : >> { %v642_v15 = vpop.xlane.xlu1 %641 }
 0x23b   : >> { %v643_v13 = vadd.f32 %v1248_v3, %v642_v15  }
 0x23c   : >> { %v655_v20 = vpop.xlane.xlu0 %654 }
 0x23d   : >> { %v656_v23 = vadd.f32 %v1244_v2, %v655_v20   ;;  %v1721_v3 = vmov %v643_v13  ;;  %686 = vst.msk [vmem:[%s1391_s1] sm:$0xff] (%p285_p0), %vm685_vm7, %v643_v13  ;;  %s1134_s1 = scalar_lea.vmem (%p285_p0), %s1639_s16, 71360 }
 0x23e   : > { %p1135_p1 = scmp.ne.s32.totalorder (%p285_p0), %s1639_s16, %s1134_s1 }
 0x23f   : >> { %v1720_v2 = vmov %v656_v23  ;;  %687 = vst.msk [vmem:[%s1396_s24] sm:$0xff] (%p285_p0), %vm685_vm7, %v656_v23  ;;  %s1140_s24 = scalar_lea.vmem (%p285_p0), %s1139_s22, 142720 }
 0x240   : > { %p1136_p2 = pnand %p1135_p1, %p1343_p3  ;;  %p1142_p6 = scmp.lt.s32.totalorder %s1140_s24, %s1134_s1 }
 0x242   : > { %p1137_p4 = pneg %p1136_p2  ;;  %p1143_p7 = por %p1142_p6, %p1141_p5 }
 0x244   : > { %p1144_p9 = pnand %p1143_p7, %p1137_p4 }
 0x246   : > { %1147 = shalt.err (!%p1144_p9)
}
 0x247   : > { %s1148_s17 = scalar_lea.hbm %s1644_s12, 71360  ;;  %s1152_s9 = scalar_lea.hbm %s1703_s3, 285440 }
 0x248   : > { %p1149_p10 = scmp.ne.s32.totalorder %s1644_s12, %s1148_s17  ;;  %p1153_p13 = scmp.lt.u32.totalorder %s1644_s12, %s1703_s3 }
 0x249   : > { %p1154_p0 = scmp.lt.u32.totalorder %s1152_s9, %s1148_s17  ;;  %p1156_p2 = scmp.lt.u32.totalorder %s1148_s17, %s1644_s12 }
 0x24a   : > { %p1150_p11 = pnand %p1149_p10, %p1343_p3 }
 0x24b   : > { %p1155_p1 = por %p1154_p0, %p1153_p13 }
 0x24c   : > { %p1151_p12 = pneg %p1150_p11 }
 0x24d   : > { %p1157_p4 = por %p1156_p2, %p1155_p1 }
 0x24f   : > { %p1158_p5 = pnand %p1157_p4, %p1151_p12 }
 0x251   : > { %1161 = shalt.err (!%p1158_p5)
}
 0x252   : > { %s1260_s15 = smov 320   ;;  %s1261_s29 = smov 20  }
 0x253   : > { %960 = dma.vmem_to_hbm [thread:$0]  (%p1343_p3), %s1639_s16, 71360, %s1644_s12, %s1648_s30, %s1260_s15, %s1260_s15, %s1261_s29  }
 0x254 PF: > { %p967_p6 = scmp.ge.s32.totalorder %s1240_s25, 2  ;;  %s742_s13 = sand.u32 1, %s1212_s18  }
 0x255   : > { %s743_s2 = scalar_lea.sflag [#allocation3], %s742_s13 }
 0x256   : > { %p963_p7 = pnand %p967_p6, %p1352_p8 }
 0x258   : > { %1207 = dma.done.wait (!%p963_p7), %s743_s2, 71360  }
 0x259   : > { %1209 = vsyncadd (!%p963_p7), %s743_s2, 4294895936  ;;  %s19_s25 = sadd.s32 1, %s1240_s25   ;;  %s1723_s22 = sld [smem:[#allocation5_spill]] }
 0x25a   : > { %p16_p9 = scmp.ge.s32.totalorder %s19_s25, 6   ;;  %s1724_s6 = sld [smem:[#allocation6_spill]] }
 0x25b   : > { %s1725_s24 = sld [smem:[#allocation7_spill]]  ;;  %s1726_s18 = smov %s1216_s19 }
 0x25c   : > { %s1727_s19 = smov %s1220_s20  ;;  %s1728_s20 = smov %s1361_s11 }
 0x25d   : > { %s1729_s21 = smov %s1232_s23  ;;  %18 = sbr.rel (!%p16_p9) target bundleno = 8 (0x8), region = 113 }
 0x260   : > { %s1730_s23 = smov %s1724_s6 }
 0x264   :  { %770 = vsyncpa [#allocation3], 1 }
 0x265   :  { %772 = vsyncpa [#allocation3 + $0x1], 1 }

// kernel: tile.13
= control target key start
LH: loop header
LB: loop body
LE: loop exit
PB: predicated region body
PF: predicated region fallthrough
CT: control target
= control target key end

     0   :  { %s28_s0 = inlined_call_operand.vmem [shape: f32[8], index: 0, kind: input, shape index: {}]   ;;  %s29_s1 = inlined_call_operand.vmem [shape: f32[9,8], index: 1, kind: output, shape index: {}]  }
   0x1   :  { %v4_v0 = vld [vmem:[%s28_s0] ss:$0 sm:$0xff] }
   0x2   :  { %5 = vst [vmem:[%s29_s1] sm:$0xff] %v4_v0  ;;  %8 = vst [vmem:[%s29_s1 + $0x8] sm:$0xff] %v4_v0 }

// kernel: mul.32
= control target key start
LH: loop header
LB: loop body
LE: loop exit
PB: predicated region body
PF: predicated region fallthrough
CT: control target
= control target key end

     0   :  { %s75_s10 = smov 64   ;;  %s76_s11 = smov 48   ;;  %vm3_vm0 = vcmask 64512   ;;  %vm9_vm1 = vcmask 589312   ;;  %vm15_vm2 = vcmask 523712   ;;  %vm21_vm3 = vcmask 458112   ;;  %s123_s0 = inlined_call_operand.vmem [shape: f32[9,8], index: 0, kind: input, shape index: {}]   ;;  %s124_s1 = inlined_call_operand.vmem [shape: f32[72], index: 1, kind: output, shape index: {}]  }
   0x1   :  { %v59_v0 = vld [vmem:[%s123_s0 + $0x8] sm:$0x1]   ;;  %v61_v1 = vld [vmem:[%s123_s0 + $0x6] sm:$0x1]   ;;  %v60_v2 = vld [vmem:[%s123_s0 + $0x7] sm:$0x1]  }
   0x2   :  { %7 = vrot.lane.b32.xlu0 %v59_v0, %s75_s10  ;;  %19 = vrot.lane.b32.xlu1 %v61_v1, %s76_s11  ;;  %v62_v3 = vld [vmem:[%s123_s0 + $0x5] sm:$0x1]   ;;  %v2_v4 = vld [vmem:[%s123_s0] sm:$0x1]   ;;  %s77_s18 = smov 56   ;;  %s78_s19 = smov 40  }
   0x3   :  { %4 = vst.msk [vmem:[#allocation0] sm:$0x1] %vm3_vm0, %v2_v4   ;;  %v63_v5 = vld [vmem:[%s123_s0 + $0x4] sm:$0x1]   ;;  %v64_v6 = vld [vmem:[%s123_s0 + $0x3] sm:$0x1]  }
   0x4   :  { %s79_s24 = smov 32   ;;  %s80_s25 = smov 24   ;;  %v65_v7 = vld [vmem:[%s123_s0 + $0x2] sm:$0x1]   ;;  %v66_v8 = vld [vmem:[%s123_s0 + $0x1] sm:$0x1]  }
   0x5   :  { %s81_s0 = smov 16   ;;  %s82_s30 = smov 8   ;;  %vm27_vm4 = vcmask 392512   ;;  %vm33_vm5 = vcmask 326912   ;;  %vm39_vm6 = vcmask 261312   ;;  %vm45_vm7 = vcmask 195712  }
   0x6   :  { %13 = vrot.lane.b32.xlu0 %v60_v2, %s77_s18  ;;  %25 = vrot.lane.b32.xlu1 %v62_v3, %s78_s19  ;;  %vm51_vm8 = vcmask 130112  }
   0xa   :  { %31 = vrot.lane.b32.xlu0 %v63_v5, %s79_s24  ;;  %37 = vrot.lane.b32.xlu1 %v64_v6, %s80_s25 }
   0xe   :  { %43 = vrot.lane.b32.xlu0 %v65_v7, %s81_s0  ;;  %49 = vrot.lane.b32.xlu1 %v66_v8, %s82_s30 }
  0x74   :  { %v8_v9 = vpop.permute.xlu0 %7   ;;  %v20_v10 = vpop.permute.xlu1 %19  }
  0x75   :  { %10 = vst.msk [vmem:[#allocation0] sm:$0x1] %vm9_vm1, %v8_v9  }
  0x78   :  { %v14_v11 = vpop.permute.xlu0 %13   ;;  %v26_v12 = vpop.permute.xlu1 %25  }
  0x79   :  { %16 = vst.msk [vmem:[#allocation0] sm:$0x1] %vm15_vm2, %v14_v11  }
  0x7a   :  { %22 = vst.msk [vmem:[#allocation0] sm:$0x1] %vm21_vm3, %v20_v10  }
  0x7b   :  { %28 = vst.msk [vmem:[#allocation0] sm:$0x1] %vm27_vm4, %v26_v12  }
  0x7c   :  { %v32_v13 = vpop.permute.xlu0 %31   ;;  %v38_v14 = vpop.permute.xlu1 %37  }
  0x7d   :  { %34 = vst.msk [vmem:[#allocation0] sm:$0x1] %vm33_vm5, %v32_v13  }
  0x7e   :  { %40 = vst.msk [vmem:[#allocation0] sm:$0x1] %vm39_vm6, %v38_v14  }
  0x80   :  { %v44_v15 = vpop.permute.xlu0 %43   ;;  %v50_v16 = vpop.permute.xlu1 %49  }
  0x81   :  { %46 = vst.msk [vmem:[#allocation0] sm:$0x1] %vm45_vm7, %v44_v15  }
  0x82   :  { %52 = vst.msk [vmem:[#allocation0] sm:$0x1] %vm51_vm8, %v50_v16  }
  0x89   :  { %v56_v17 = vld [vmem:[#allocation0] sm:$0x1] }
  0x8a   :  { %58 = vst [vmem:[%s124_s1] sm:$0x1] %v56_v17 }

// kernel: forward.6
= control target key start
LH: loop header
LB: loop body
LE: loop exit
PB: predicated region body
PF: predicated region fallthrough
CT: control target
= control target key end

     0   :  { %s3139_s0 = inlined_call_operand.hbm [shape: bf16[2,446,8,598], index: 0, kind: input, shape index: {}]   ;;  %s3140_s1 = inlined_call_operand.vmem [shape: bf16[32,72], index: 1, kind: input, shape index: {}]   ;;  %s3141_s2 = inlined_call_operand.vmem [shape: f32[32,1], index: 2, kind: input, shape index: {}]   ;;  %s3142_s3 = inlined_call_operand.hbm [shape: bf16[2,222,32,596], index: 3, kind: output, shape index: {0}]   ;;  %s3143_s4 = inlined_call_operand.vmem [shape: f32[2,6,32,1], index: 4, kind: output, shape index: {1}]   ;;  %s3144_s5 = inlined_call_operand.vmem [shape: f32[2,6,32,1], index: 5, kind: output, shape index: {2}]  }
   0x1   :  { %3155 = sst [smem:[#allocation15_spill]] %s3139_s0 }
   0x2   :  { %11 = vsyncpa [#allocation3], 0 }
   0x3   :  { %13 = vsyncpa [#allocation3 + $0x1], 0 }
   0x4   :  { %14 = vsyncpa [#allocation4], 0 }
   0x5   :  { %16 = vsyncpa [#allocation4 + $0x1], 0  ;;  %s2182_s18 = smov 0   ;;  %s2184_s19 = smov 0  }
   0x6   :  { %s2186_s20 = smov 0   ;;  %s2188_s21 = smov 0  }
   0x7   :  { %s2190_s22 = smov 0   ;;  %s2192_s23 = smov 0  }
   0x8   :  { %s2194_s24 = smov 0   ;;  %s2196_s25 = smov 0  }
   0x9   :  { %s2198_s26 = smov 0   ;;  %s2200_s27 = smov 0  }
   0xa   :  { %s2202_s28 = smov 0  }
   0xb LB: > { %3156 = sst [smem:[#allocation8_spill]] %s2097_s26  ;;  %s1520_s29 = sadd.s32 4294967295, %s2105_s28   ;;  %s2105_s28 = sphi %s2202_s28, %s22_s28   ;;  %s2101_s27 = sphi %s2200_s27, %s3192_s27   ;;  %s2097_s26 = sphi %s2198_s26, %s3191_s26   ;;  %s2093_s25 = sphi %s2196_s25, %s3190_s25   ;;  %s2089_s24 = sphi %s2194_s24, %s3189_s24   ;;  %s2085_s23 = sphi %s2192_s23, %s3198_s23   ;;  %s2081_s22 = sphi %s2190_s22, %s3197_s22   ;;  %s2077_s21 = sphi %s2188_s21, %s3196_s21   ;;  %s2073_s20 = sphi %s2186_s20, %s3195_s20   ;;  %s2069_s19 = sphi %s2184_s19, %s3194_s19   ;;  %s2065_s18 = sphi %s2182_s18, %s3193_s18  }
   0xc   : > { %3157 = sst [smem:[#allocation9_spill]] %s2101_s27  ;;  %s1521_s30 = sadd.s32 4294967294, %s2105_s28  }
   0xd   : > { %s31_s6 = sadd.s32 1, %s2097_s26  ;;  %s34_s7 = sadd.s32 1, %s2101_s27 }
   0xe   : > { %p32_p0 = scmp.ge.s32.totalorder %s31_s6, 6  ;;  %s41_s8 = sadd.s32 1, %s2085_s23 }
   0xf   : > { %p48_p1 = scmp.ne.s32.totalorder %s2085_s23, %s2081_s22  ;;  %p49_p2 = scmp.eq.s32.totalorder %s2105_s28, 0 }
  0x10   : > { %s3200_s6 = smov (%p32_p0, %s31_s6), 0  ;;  %s3202_s7 = smov (!%p32_p0, %s34_s7), %s2101_s27 }
  0x11   : > { %3158 = sst [smem:[#allocation10_spill]] %s3200_s6  ;;  %p2246_p3 = por %p49_p2, %p48_p1 }
  0x12   : > { %p54_p4 = scmp.ne.s32.totalorder %s2081_s22, %s2077_s21  ;;  %p36_p5 = scmp.ge.s32.totalorder %s3202_s7, 2 }
  0x13   : > { %p55_p6 = scmp.eq.s32.totalorder %s1520_s29, 0  ;;  %s107_s10 = ssub.s32 %s2097_s26, %s3200_s6 }
  0x14   : > { %s111_s11 = sadd.s32 1, %s2073_s20  ;;  %s3204_s7 = smov (%p36_p5, %s3202_s7), 0 }
  0x15   : > { %3160 = sst [smem:[#allocation11_spill]] %s3204_s7  ;;  %p2256_p7 = por %p55_p6, %p54_p4 }
  0x16   : > { %p121_p8 = scmp.ne.s32.totalorder %s2073_s20, %s2069_s19  ;;  %s38_s13 = ssub.s32 %s2101_s27, %s3204_s7 }
  0x17   : > { %p122_p9 = scmp.eq.s32.totalorder %s1520_s29, 11  ;;  %p39_p10 = scmp.eq.s32.totalorder %s38_s13, 0 }
  0x18   : > { %s108_s14 = sor.u32 %s107_s10, %s38_s13  ;;  %p127_p13 = scmp.ne.s32.totalorder %s2069_s19, %s2065_s18 }
  0x19   : > { %p109_p11 = scmp.eq.s32.totalorder %s108_s14, 0  ;;  %p2264_p12 = por %p122_p9, %p121_p8 }
  0x1a   : > { %s2269_s16 = scalar_select %p39_p10, %s2085_s23, %s41_s8  }
  0x1b   : > { %s3162_s15 = scalar_select %p2264_p12, 1, 0 }
  0x1c   : > { %3163 = sst [smem:[#allocation12_spill]] %s2269_s16  ;;  %p128_p0 = scmp.eq.s32.totalorder %s1521_s30, 11 }
  0x1d   : > { %s2272_s17 = scalar_select %p109_p11, %s2073_s20, %s111_s11  }
  0x1e   : > { %p1655_p1 = scmp.lt.s32.totalorder %s2105_s28, 12  ;;  %p2277_p2 = por %p128_p0, %p127_p13 }
  0x1f   : > { %s210_s29 = sand.u32 1, %s2085_s23   ;;  %s1637_s10 = smul.u32 142720, %s2101_s27 }
  0x20   : > { %s3164_s21 = scalar_select %p2277_p2, 1, 0 }
  0x21   : > { %s1636_s7 = smul.u32 8920, %s210_s29  ;;  %p2285_p4 = pnand %p1655_p1, %p2246_p3 }
  0x22   : > { %s3166_s0 = sld [smem:[#allocation15_spill]]  ;;  %s2297_s9 = scalar_lea.sflag [#allocation3], %s210_s29 }
  0x23   : > { %s214_s30 = scalar_lea.vmem [#allocation2], %s1636_s7  ;;  %p1919_p6 = pneg %p2285_p4 }
  0x24   : > { %s221_s6 = sshll.u32 %s214_s30, 4  ;;  %s2294_s6 = int_to_ptr.vmem [resolvable:$true] %s221_s6 }
  0x28   : > { %s2292_s11 = scalar_lea.hbm %s3166_s0, %s1637_s10  ;;  %s1922_s8 = scalar_lea.hbm %s3166_s0, 285440 }
  0x29   : > { %s1917_s27 = scalar_lea.hbm %s2292_s11, 142720  ;;  %p1923_p10 = scmp.lt.u32.totalorder %s2292_s11, %s3166_s0 }
  0x2a   : > { %p1918_p3 = scmp.ne.s32.totalorder %s2292_s11, %s1917_s27  ;;  %p1924_p11 = scmp.lt.u32.totalorder %s1922_s8, %s1917_s27 }
  0x2b   : > { %p1926_p0 = scmp.lt.u32.totalorder %s1917_s27, %s2292_s11 }
  0x2c   : > { %p1920_p8 = pnand %p1919_p6, %p1918_p3  ;;  %p1925_p13 = por %p1924_p11, %p1923_p10 }
  0x2e   : > { %p1921_p9 = pneg %p1920_p8  ;;  %p1927_p1 = por %p1926_p0, %p1925_p13 }
  0x30   : > { %p1928_p5 = pnand %p1927_p1, %p1921_p9 }
  0x32   : > { %1931 = shalt.err (!%p1928_p5)
}
  0x33   : > { %s1932_s29 = scalar_lea.vmem %s2294_s6, 142720  ;;  %s2143_s30 = smov [#allocation2]  }
  0x34   : > { %p1933_p3 = scmp.ne.s32.totalorder %s2294_s6, %s1932_s29  ;;  %s1937_s10 = sshll.u32 %s2143_s30, 4  ;;  %s1938_s10 = int_to_ptr.vmem [resolvable:$false] %s1937_s10 }
  0x35   : > { %s1939_s26 = scalar_lea.vmem %s1938_s10, 285440  ;;  %p1940_p12 = scmp.lt.s32.totalorder %s2294_s6, %s1938_s10 }
  0x36   : > { %p1935_p8 = pnand %p1933_p3, %p1919_p6  ;;  %p1941_p10 = scmp.lt.s32.totalorder %s1939_s26, %s1932_s29 }
  0x38   : > { %p1936_p2 = pneg %p1935_p8  ;;  %p1942_p11 = por %p1941_p10, %p1940_p12 }
  0x3a   : > { %p1943_p13 = pnand %p1942_p11, %p1936_p2 }
  0x3c   : > { %1946 = shalt.err (!%p1943_p13)
}
  0x3d   : > { %s2144_s27 = smov 320   ;;  %s2145_s14 = smov 20  }
  0x3e   : > { %1650 = dma.hbm_to_vmem [thread:$0]  (!%p2285_p4), %s2292_s11, 142720, %s2294_s6, %s2297_s9, %s2144_s27, %s2144_s27, %s2145_s14  }
  0x3f   : > { %p229_p5 = scmp.lt.s32.totalorder %s2105_s28, 13  ;;  %p3167_p6 = scmp.ge.s32.totalorder %s2105_s28, 1 }
  0x41   : > { %p230_p9 = pnand %p3167_p6, %p229_p5 }
  0x43   : > { %233 = sbr.rel (%p230_p9) target bundleno = 693 (0x2b5), region = 32 }
  0x4a   : > { %s235_s8 = sand.u32 1, %s2081_s22  }
  0x4b   : > { %s2329_s7 = smul.u32 8920, %s235_s8  ;;  %s236_s29 = scalar_lea.sflag [#allocation3], %s235_s8 }
  0x4c   : > { %2056 = dma.done.wait (%p2256_p7), %s236_s29, 142720  }
  0x4d   : > { %2058 = vsyncadd (%p2256_p7), %s236_s29, 4294824576  ;;  %s3150_s6 = sand.u32 1, %s2069_s19   ;;  %p285_p12 = scmp.lt.s32.totalorder %s2093_s25, 1  ;;  %v2349_v0 = vld [vmem:[%s3141_s2] sm:$0xff]  ;;  %v2354_v1 = vld [vmem:[%s3141_s2 + $0x8] sm:$0xff]  ;;  %v2397_v8 = vmov 0.0  }
  0x4e   : > { %s2340_s13 = smul.u32 2960, %s3150_s6  ;;  %p287_p2 = scmp.lt.s32.totalorder %s2089_s24, 5  ;;  %3168 = vst [vmem:[#allocation13_spill] sm:$0xff] %v2349_v0  ;;  %3169 = vst [vmem:[#allocation14_spill] sm:$0xff] %v2354_v1  ;;  %v2359_v2 = vld [vmem:[%s3141_s2 + $0x10] sm:$0xff]  ;;  %v2364_v3 = vld [vmem:[%s3141_s2 + $0x18] sm:$0xff] }
  0x4f   : > { %s286_s11 = scalar_select %p285_p12, %s2093_s25, 1  ;;  %v2369_v4 = vld [vmem:[%s3140_s1] sm:$0xf]  ;;  %v2374_v5 = vld [vmem:[%s3140_s1 + $0x4] sm:$0xf]  ;;  %v2399_v9 = vmov 0.0  }
  0x50   : > { %s288_s10 = scalar_select %p287_p2, %s2089_s24, 5  ;;  %v2379_v6 = vld [vmem:[%s3140_s1 + $0x8] sm:$0xf]  ;;  %v2384_v7 = vld [vmem:[%s3140_s1 + $0xc] sm:$0xf]  ;;  %v2401_v10 = vmov 0.0  }
  0x51   : > { %s1640_s26 = smul.u32 24, %s286_s11  ;;  %v2403_v11 = vmov 0.0   ;;  %v2405_v12 = vmov 0.0   ;;  %v2407_v13 = vmov 0.0   ;;  %v2409_v14 = vmov 0.0   ;;  %s2413_s14 = smov 0  }
  0x52   : > { %s1526_s12 = sshll.u32 %s288_s10, 2  ;;  %v2411_v15 = vmov 0.0  }
  0x53   : > { %s291_s9 = sadd.s32 %s1640_s26, %s1526_s12 }
  0x54   : > { %s1527_s8 = sshll.u32 %s291_s9, 3  ;;  %s261_s9 = scalar_lea.vmem [#allocation5], %s2340_s13 }
  0x55   : > { %s2389_s29 = scalar_lea.vmem %s3143_s4, %s1527_s8  ;;  %s2394_s27 = scalar_lea.vmem %s3144_s5, %s1527_s8 }
  0x56 LB: >> { %s1530_s8 = sshll.u32 %s2141_s14, 1  ;;  %s3170_s30 = smul.u32 74, %s2089_s24  ;;  %v3153_v44 = vmov 0   ;;  %v3172_v0 = vld [vmem:[#allocation13_spill] sm:$0xff]  ;;  %v3173_v1 = vld [vmem:[#allocation14_spill] sm:$0xff]  ;;  %vm379_vm0 = vcmask 1039360   ;;  %s2141_s14 = sphi %s2413_s14, %s318_s14   ;;  %v2137_v15 = vphi %v2411_v15, %v3184_v15   ;;  %v2133_v14 = vphi %v2409_v14, %v3183_v14   ;;  %v2129_v13 = vphi %v2407_v13, %v3182_v13   ;;  %v2125_v12 = vphi %v2405_v12, %v3181_v12   ;;  %v2121_v11 = vphi %v2403_v11, %v3180_v11   ;;  %v2117_v10 = vphi %v2401_v10, %v3179_v10   ;;  %v2113_v9 = vphi %v2399_v9, %v3178_v9   ;;  %v2109_v8 = vphi %v2397_v8, %v3177_v8  }
  0x57   : >> { %s3171_s0 = scalar_lea.vmem [#allocation2], %s2329_s7  ;;  %s2146_s12 = smov 126   ;;  %605 = vmatprep.mubr.bf16.mxu0 %v3153_v44  ;;  %658 = vmatprep.mubr.bf16.mxu1 %v3153_v44  ;;  %vm399_vm1 = vcmask 1031168   ;;  %vm557_vm2 = vcmask 1043456   ;;  %vm550_vm3 = vcmask 588800   ;;  %vm731_vm4 = vcmask 687104  }
  0x58   : >> { %s328_s6 = sadd.s32 %s1530_s8, %s3170_s30  ;;  %s2147_s11 = smov 127   ;;  %1915 = vset.pattern.permute.xlu0 %v3153_v44  ;;  %1916 = vset.pattern.permute.xlu1 %v3153_v44  ;;  %vm1236_vm5 = vcmask 683008  }
  0x59   : >> { %s1578_s26 = smul.u32 20, %s328_s6 }
  0x5a   : >> { %s1591_s10 = smul.u32 80, %s2141_s14  ;;  %s318_s14 = sadd.s32 1, %s2141_s14  }
  0x5b   : >> { %s2447_s16 = scalar_lea.vmem %s3171_s0, %s1578_s26 [#allocation2]  ;;  %p315_p7 = scmp.ge.s32.totalorder %s318_s14, 37  }
  0x5c   : >> { %v2450_v16 = vld [vmem:[%s2447_s16] sm:$0xff]  ;;  %v2453_v17 = vld [vmem:[%s2447_s16 + $0x8] sm:$0xff]  ;;  %v1533_v18 = vld [vmem:[%s2447_s16 + $0x14] sm:$0xff]  ;;  %s2955_s8 = scalar_lea.vmem %s261_s9, %s1591_s10 [#allocation5]  ;;  %vm1247_vm6 = vcmask (%p315_p7), 7168   ;;  %s1656_s7 = smul.u32 (%p315_p7), 740, %s2089_s24 }
  0x5d   : >> { %v336_v19 = vunpack.c.h.bf16 %v2450_v16  ;;  %v337_v20 = vunpack.c.l.bf16 %v2453_v17  ;;  %v335_v21 = vunpack.c.l.bf16 %v2450_v16  ;;  %v2459_v22 = vunpack.c.h.bf16 %v1533_v18  ;;  %v1534_v23 = vld [vmem:[%s2447_s16 + $0x1c] sm:$0xff]  ;;  %v1537_v28 = vld [vmem:[%s2447_s16 + $0x28] sm:$0xff]  ;;  %v1538_v29 = vld [vmem:[%s2447_s16 + $0x30] sm:$0xff]  ;;  %s1291_s14 = sshll.u32 (%p315_p7), %s261_s9, 4  ;;  %s1642_s30 = smul.u32 (%p315_p7), 4440, %s2093_s25  ;;  %s3069_s14 = int_to_ptr.vmem [resolvable:$true] %s1291_s14 }
  0x5e   : >> { %v2471_v26 = vunpack.c.l.bf16 %v1533_v18  ;;  %v2473_v27 = vunpack.c.l.bf16 %v1534_v23  ;;  %v2478_v30 = vld [vmem:[%s2447_s16 + $0x10] ss:$20 sps:$4 sm:$0xff]   ;;  %v338_v31 = vunpack.c.h.bf16 %v2453_v17  ;;  %v2481_v32 = vunpack.c.h.bf16 %v1537_v28  ;;  %v2513_v43 = vld [vmem:[%s2447_s16 + $0x38] ss:$20 sps:$4 sm:$0xff]   ;;  %v1551_v48 = vld [vmem:[%s2447_s16 + $0x3c] sm:$0xff]  ;;  %p3186_p0 = scmp.ne.s32.totalorder (%p315_p7), %s3162_s15, 0 }
  0x5f   : >> { %v1835_v24 = vpack.i.bf16 %v337_v20, %v336_v19  ;;  %v1840_v25 = vpack.i.bf16 %v2459_v22, %v335_v21  ;;  %v2487_v34 = vunpack.c.l.bf16 %v1538_v29  ;;  %v339_v35 = vunpack.c.l.bf16 %v2478_v30  ;;  %v2531_v49 = vld [vmem:[%s2447_s16 + $0x44] sm:$0xff]  ;;  %s1288_s6 = sadd.s32 (%p315_p7), %s1656_s7, %s1642_s30  ;;  %s2149_s24 = smov (%p315_p7), [#allocation5]  }
  0x60   : >> { %v1850_v33 = vpack.i.bf16 %v2471_v26, %v2473_v27  ;;  %v2498_v38 = vunpack.c.h.bf16 %v1534_v23  ;;  %v2500_v39 = vunpack.c.l.bf16 %v1537_v28  ;;  %v2522_v45 = vunpack.c.h.bf16 %v2478_v30  ;;  %s1575_s26 = sshll.u32 (%p315_p7), %s1288_s6, 6  ;;  %s1951_s25 = sshll.u32 (%p315_p7), %s2149_s24, 4  ;;  %s1952_s25 = int_to_ptr.vmem [resolvable:$false] %s1951_s25 }
  0x61   : >> { %1836 = vrot.lane.b32.xlu1 %v1835_v24, %s2146_s12  ;;  %1826 = vrot.lane.b32.xlu0 %v1835_v24, %s2147_s11  ;;  %v1860_v36 = vpack.i.bf16 %v2487_v34, %v2481_v32  ;;  %v1855_v37 = vpack.i.bf16 %v339_v35, %v338_v31  ;;  %v2524_v46 = vunpack.c.h.bf16 %v1538_v29  ;;  %v2527_v47 = vunpack.c.l.bf16 %v2513_v43  ;;  %s1953_s13 = scalar_lea.vmem (%p315_p7), %s1952_s25, 94720  ;;  %p1954_p8 = scmp.lt.s32.totalorder (%p315_p7), %s3069_s14, %s1952_s25 }
  0x62   : >> { %v1865_v40 = vpack.i.bf16 %v2498_v38, %v2500_v39  ;;  %v1880_v41 = vpack.i.bf16 %v2498_v38, %v2487_v34  ;;  %v1875_v42 = vpack.i.bf16 %v2481_v32, %v2500_v39  ;;  %v2539_v51 = vunpack.c.h.bf16 %v1551_v48 }
  0x63   : >> { %v1890_v50 = vpack.i.bf16 %v2527_v47, %v2524_v46  ;;  %v2542_v52 = vunpack.c.l.bf16 %v2531_v49  ;;  %v2548_v54 = vunpack.c.l.bf16 %v1551_v48  ;;  %v3152_v56 = vunpack.c.h.bf16 %v2531_v49 }
  0x64   : >> { %v3151_v57 = vunpack.c.h.bf16 %v2513_v43 }
  0x65   : >> { %1841 = vrot.lane.b32.xlu1 %v1840_v25, %s2146_s12  ;;  %1831 = vrot.lane.b32.xlu0 %v1840_v25, %s2147_s11  ;;  %v1895_v53 = vpack.i.bf16 %v2542_v52, %v2539_v51  ;;  %v1900_v55 = vpack.i.bf16 %v2539_v51, %v2548_v54 }
  0x66   : >> { %v1905_v58 = vpack.i.bf16 %v3151_v57, %v3152_v56 }
  0x69   : >> { %1851 = vrot.lane.b32.xlu1 %v1850_v33, %s2146_s12  ;;  %1846 = vrot.lane.b32.xlu0 %v1850_v33, %s2147_s11 }
  0x6d   : >> { %1861 = vrot.lane.b32.xlu1 %v1860_v36, %s2147_s11  ;;  %1856 = vrot.lane.b32.xlu0 %v1855_v37, %s2147_s11 }
  0x71   : >> { %1871 = vrot.lane.b32.xlu1 %v1855_v37, %s2146_s12  ;;  %1866 = vrot.lane.b32.xlu0 %v1865_v40, %s2147_s11 }
  0x75   : >> { %1881 = vrot.lane.b32.xlu1 %v1880_v41, %s2146_s12  ;;  %1876 = vrot.lane.b32.xlu0 %v1875_v42, %s2146_s12 }
  0x79   : >> { %441 = vrot.lane.b32.xlu1 %v2522_v45, %s2146_s12  ;;  %422 = vrot.lane.b32.xlu0 %v2522_v45, %s2147_s11 }
  0x7d   : >> { %1891 = vrot.lane.b32.xlu1 %v1890_v50, %s2146_s12  ;;  %1886 = vrot.lane.b32.xlu0 %v1890_v50, %s2147_s11 }
  0x81   : >> { %1896 = vrot.lane.b32.xlu0 %v1895_v53, %s2147_s11  ;;  %830 = vrot.lane.b32.xlu1 %v2548_v54, %s2147_s11 }
  0x85   : >> { %1901 = vrot.lane.b32.xlu0 %v1900_v55, %s2146_s12  ;;  %853 = vrot.lane.b32.xlu1 %v2542_v52, %s2146_s12 }
  0x89   : >> { %1906 = vrot.lane.b32.xlu0 %v1905_v58, %s2147_s11  ;;  %1911 = vrot.lane.b32.xlu1 %v1905_v58, %s2146_s12  ;;  %s3074_s12 = scalar_lea.hbm (%p315_p7), %s3142_s3, %s1575_s26 }
  0x8d   : >> { %522 = vperm.xlu0 %1915, %v3172_v0   ;;  %527 = vperm.xlu1 %1916, %v3173_v1  }
  0x91   : >> { %532 = vperm.xlu1 %1916, %v2359_v2   ;;  %537 = vperm.xlu0 %1915, %v2364_v3  }
  0xd3   : >> { %v2570_v59 = vpop.permute.xlu1 %1836  ;;  %v1827_v60 = vpop.permute.xlu0 %1826 }
  0xd4   : >> { %v1839_v61 = vunpack.i.h.bf16 %v2570_v59  ;;  %v1838_v62 = vunpack.i.l.bf16 %v2570_v59  ;;  %v1829_v63 = vunpack.i.h.bf16 %v1827_v60  ;;  %v1828_v18 = vunpack.i.l.bf16 %v1827_v60 }
  0xd6   : >> { %v381_v23 = vsel %vm379_vm0, %v1828_v18, %v1829_v63  ;;  %v401_v29 = vsel %vm399_vm1, %v1838_v62, %v1839_v61 }
  0xd7   : >> { %v1842_v24 = vpop.permute.xlu1 %1841  ;;  %v1832_v25 = vpop.permute.xlu0 %1831  ;;  %v496_v28 = vpack.c.bf16 %v381_v23, %v336_v19  ;;  %v501_v40 = vpack.c.bf16 %v2459_v22, %v401_v29 }
  0xd8   : >> { %v1843_v33 = vunpack.i.l.bf16 %v1842_v24  ;;  %v1833_v36 = vunpack.i.l.bf16 %v1832_v25  ;;  %v1844_v41 = vunpack.i.h.bf16 %v1842_v24  ;;  %v1834_v42 = vunpack.i.h.bf16 %v1832_v25 }
  0xd9   : >> { %573 = vmatprep.subr.bf16.mxu0 %v496_v28 }
  0xda   : >> { %v380_v37 = vsel %vm379_vm0, %v1833_v36, %v1828_v18  ;;  %v400_v53 = vsel %vm399_vm1, %v1843_v33, %v1838_v62 }
  0xdb   : >> { %v2582_v48 = vpop.permute.xlu1 %1851  ;;  %v2584_v50 = vpop.permute.xlu0 %1846  ;;  %v495_v19 = vpack.c.bf16 %v380_v37, %v335_v21  ;;  %v500_v24 = vpack.c.bf16 %v2471_v26, %v400_v53 }
  0xdc   : >> { %v1854_v55 = vunpack.i.h.bf16 %v2582_v48  ;;  %v1853_v58 = vunpack.i.l.bf16 %v2582_v48  ;;  %v1849_v60 = vunpack.i.h.bf16 %v2584_v50  ;;  %v1848_v18 = vunpack.i.l.bf16 %v2584_v50 }
  0xdd   : >> { %574 = vmatpush1.bf16.msra.mxu0 %v495_v19 }
  0xde   : >> { %575 = vmatprep.subr.bf16.mxu0 %v501_v40  ;;  %v2596_v23 = vsel %vm379_vm0, %v1834_v42, %v1848_v18  ;;  %v2599_v16 = vsel %vm399_vm1, %v1844_v41, %v1853_v58  ;;  %v2607_v28 = vsel %vm379_vm0, %v1849_v60, %v1834_v42  ;;  %v2610_v29 = vsel %vm399_vm1, %v1854_v55, %v1844_v41 }
  0xdf   : >> { %v2601_v21 = vpop.permute.xlu1 %1861  ;;  %v1857_v62 = vpop.permute.xlu0 %1856  ;;  %v506_v25 = vpack.c.bf16 %v2599_v16, %v2596_v23  ;;  %v505_v55 = vpack.c.bf16 %v2610_v29, %v2607_v28 }
  0xe0   : >> { %v1864_v33 = vunpack.i.h.bf16 %v2601_v21  ;;  %v1863_v36 = vunpack.i.l.bf16 %v2601_v21  ;;  %v1859_v37 = vunpack.i.h.bf16 %v1857_v62  ;;  %v1858_v40 = vunpack.i.l.bf16 %v1857_v62 }
  0xe1   : >> { %576 = vmatpush1.bf16.msra.mxu0 %v500_v24 }
  0xe2   : >> { %577 = vmatprep.subr.bf16.mxu0 %v506_v25  ;;  %v383_v48 = vsel %vm379_vm0, %v1858_v40, %v1859_v37  ;;  %v382_v19 = vsel %vm379_vm0, %v1829_v63, %v1858_v40  ;;  %v2619_v42 = vsel %vm379_vm0, %v1863_v36, %v1864_v33 }
  0xe3   : >> { %v1872_v53 = vpop.permute.xlu1 %1871  ;;  %v1867_v41 = vpop.permute.xlu0 %1866  ;;  %v498_v60 = vpack.c.bf16 %v383_v48, %v338_v31  ;;  %v497_v62 = vpack.c.bf16 %v382_v19, %v337_v20  ;;  %v511_v24 = vpack.c.bf16 %v2619_v42, %v2481_v32 }
  0xe4   : >> { %v1874_v63 = vunpack.i.h.bf16 %v1872_v53  ;;  %v1873_v25 = vunpack.i.l.bf16 %v1872_v53  ;;  %v1868_v40 = vunpack.i.l.bf16 %v1867_v41 }
  0xe5   : >> { %578 = vmatpush1.bf16.msra.mxu0 %v505_v55  ;;  %626 = vmatprep.subr.bf16.mxu1 %v498_v60 }
  0xe6   : >> { %627 = vmatpush1.bf16.msra.mxu1 %v497_v62  ;;  %579 = vmatprep.subr.bf16.mxu0 %v511_v24  ;;  %v2630_v57 = vsel %vm379_vm0, %v1868_v40, %v1863_v36  ;;  %v403_v56 = vsel %vm399_vm1, %v1873_v25, %v1874_v63  ;;  %v402_v48 = vsel %vm399_vm1, %v1839_v61, %v1873_v25  ;;  %v1869_v62 = vunpack.i.h.bf16 %v1867_v41 }
  0xe7   : >> { %v1882_v44 = vpop.permute.xlu1 %1881  ;;  %v1877_v31 = vpop.permute.xlu0 %1876  ;;  %v510_v17 = vpack.c.bf16 %v2630_v57, %v2500_v39  ;;  %v503_v20 = vpack.c.bf16 %v2498_v38, %v403_v56  ;;  %v502_v36 = vpack.c.bf16 %v2473_v27, %v402_v48  ;;  %v504_v50 = vpack.c.bf16 %v2522_v45, %v1874_v63 }
  0xe8   : >> { %v1884_v19 = vunpack.i.h.bf16 %v1882_v44  ;;  %v1883_v53 = vunpack.i.l.bf16 %v1882_v44  ;;  %v1879_v55 = vunpack.i.h.bf16 %v1877_v31  ;;  %v1878_v60 = vunpack.i.l.bf16 %v1877_v31 }
  0xe9   : >> { %580 = vmatpush1.bf16.msra.mxu0 %v510_v17  ;;  %628 = vmatprep.subr.bf16.mxu1 %v503_v20  ;;  %v2667_v17 = vcombine.low %v2369_v4, %v2374_v5  ;;  %v499_v20 = vpack.c.bf16 %v1859_v37, %v339_v35 }
  0xea   : >> { %v2641_v24 = vsel %vm399_vm1, %v1879_v55, %v1883_v53  ;;  %v2644_v40 = vsel %vm399_vm1, %v1878_v60, %v1879_v55  ;;  %629 = vmatpush1.bf16.msra.mxu1 %v502_v36  ;;  %v2655_v41 = vsel %vm399_vm1, %v1853_v58, %v1884_v19 }
  0xeb   : >> { %v516_v56 = vpack.c.bf16 %v2641_v24, %v2641_v24  ;;  %v2648_v59 = vpop.permute.xlu1 %441  ;;  %v2650_v44 = vpop.permute.xlu0 %422  ;;  %v515_v61 = vpack.c.bf16 %v2644_v40, %v2644_v40 }
  0xec   : >> { %v2659_v25 = vsel %vm399_vm1, %v1884_v19, %v2648_v59  ;;  %v2663_v31 = vsel %vm379_vm0, %v1869_v62, %v2650_v44  ;;  %v2678_v19 = vsel %vm379_vm0, %v1848_v18, %v1869_v62  ;;  %v509_v21 = vpack.c.bf16 %v2648_v59, %v2650_v44 }
  0xed   : >> { %1542 = vmatprep.subr.msk.bf16.mxu0 %vm557_vm2, %v516_v56  ;;  %v559_v58 = vsel %vm557_vm2, %v515_v61, 0  ;;  %v508_v48 = vpack.c.bf16 %v2659_v25, %v2663_v31  ;;  %v507_v55 = vpack.c.bf16 %v2655_v41, %v2678_v19 }
  0xee   : >> { %582 = vmatpush1.bf16.msra.mxu0 %v559_v58 }
  0xef   : >> { %v1892_v60 = vpop.permute.xlu1 %1891  ;;  %v1887_v30 = vpop.permute.xlu0 %1886  ;;  %630 = vmatprep.subr.bf16.mxu1 %v508_v48  ;;  %1606 = vmatprep.subr.bf16.mxu0 %v499_v20 }
  0xf0   : >> { %v2682_v35 = vunpack.i.h.bf16 %v1892_v60  ;;  %v1893_v37 = vunpack.i.l.bf16 %v1892_v60  ;;  %v2684_v36 = vunpack.i.h.bf16 %v1887_v30  ;;  %v1888_v56 = vunpack.i.l.bf16 %v1887_v30  ;;  %631 = vmatpush1.bf16.msra.mxu1 %v507_v55 }
  0xf1   : >> { %1543 = vmatmul.mubr.msk.bf16.vlgmr.msra.gmra.mrb[0].mxu0 %vm550_vm3, %v2667_v17  ;;  %v3174_v55 = vmov 0   ;;  %v2718_v60 = vcombine.low %v2379_v6, %v2384_v7 }
  0xf2   : >> { %v2691_v18 = vsel %vm399_vm1, %v1893_v37, %v2682_v35  ;;  %1607 = vmatpush3.bf16.msra.mxu0 %v499_v20  ;;  %v2695_v62 = vsel %vm379_vm0, %v1888_v56, %v2684_v36  ;;  %v2700_v61 = vsel %vm379_vm0, %v1864_v33, %v1888_v56  ;;  %v2709_v20 = vsel %vm399_vm1, %v1883_v53, %v1893_v37 }
  0xf3   : >> { %v518_v63 = vpack.c.bf16 %v2691_v18, %v2691_v18  ;;  %1608 = vmatprep.subr.bf16.mxu0 %v504_v50  ;;  %v513_v58 = vpack.c.bf16 %v2695_v62, %v2524_v46  ;;  %v512_v48 = vpack.c.bf16 %v2700_v61, %v2487_v34  ;;  %615 = vmatprep.mubr.bf16.mxu0 %v3174_v55  ;;  %v2721_v53 = vpop.permute.xlu0 %1896 }
  0xf4   : >> { %v517_v33 = vpack.c.bf16 %v2709_v20, %v2709_v20  ;;  %v514_v37 = vpack.c.bf16 %v2684_v36, %v2527_v47  ;;  %v869_v56 = vpack.c.bf16 %v2596_v23, %v2459_v22  ;;  %v519_v22 = vpack.c.bf16 %v2682_v35, %v2682_v35 }
  0xf5   : >> { %632 = vmatprep.subr.bf16.mxu1 %v513_v58  ;;  %v1899_v58 = vunpack.i.h.bf16 %v2721_v53 }
  0xf6   : >> { %633 = vmatpush1.bf16.msra.mxu1 %v512_v48  ;;  %1609 = vmatpush3.bf16.msra.mxu0 %v504_v50  ;;  %v565_v30 = vsel %vm557_vm2, %v517_v33, 0  ;;  %v831_v50 = vpop.permute.xlu1 %830  ;;  %v1898_v48 = vunpack.i.l.bf16 %v2721_v53 }
  0xf7   : >> { %1610 = vmatprep.subr.bf16.mxu0 %v509_v21  ;;  %1545 = vmatprep.subr.msk.bf16.mxu1 %vm557_vm2, %v518_v63  ;;  %v868_v63 = vpack.c.bf16 %v2607_v28, %v2471_v26  ;;  %v1902_v23 = vpop.permute.xlu0 %1901  ;;  %v873_v26 = vpack.c.bf16 %v2500_v39, %v2610_v29  ;;  %v870_v39 = vpack.c.bf16 %v2678_v19, %v2473_v27 }
  0xf8   : >> { %v1904_v28 = vunpack.i.h.bf16 %v1902_v23  ;;  %v1903_v33 = vunpack.i.l.bf16 %v1902_v23  ;;  %v841_v53 = vsel %vm379_vm0, %v1898_v48, %v1899_v58  ;;  %v840_v29 = vsel %vm379_vm0, %v831_v50, %v1898_v48 }
  0xf9   : >> { %1544 = vmatmul.mubr.msk.bf16.gmra.mrb[4].mxu0 %vm550_vm3, %v2718_v60  ;;  %v876_v27 = vpack.c.bf16 %v2524_v46, %v2659_v25  ;;  %v875_v50 = vpack.c.bf16 %v2487_v34, %v2655_v41  ;;  %v881_v46 = vpack.c.bf16 %v2691_v18, %v2695_v62  ;;  %v3175_v34 = vunpack.c.h.bf16 %v2531_v49 }
  0xfa   : >> { %635 = vmatpush1.bf16.msra.mxu1 %v565_v30  ;;  %1611 = vmatpush3.bf16.msra.mxu0 %v509_v21  ;;  %v874_v21 = vpack.c.bf16 %v2481_v32, %v2599_v16  ;;  %v571_v30 = vsel %vm557_vm2, %v519_v22, 0  ;;  %v879_v32 = vpack.c.bf16 %v2641_v24, %v2619_v42  ;;  %v871_v16 = vpack.c.bf16 %v2663_v31, %v2498_v38 }
  0xfb   : >> { %1612 = vmatprep.subr.bf16.mxu0 %v514_v37  ;;  %908 = vmatprep.subr.bf16.mxu1 %v869_v56  ;;  %v854_v56 = vpop.permute.xlu1 %853  ;;  %v859_v38 = vsel %vm399_vm1, %v1903_v33, %v1904_v28  ;;  %v883_v31 = vpack.c.bf16 %v840_v29, %v2548_v54 }
  0xfc   : >> { %1616 = vmatprep.mubr.msk.bf16.mxu0 %vm550_vm3, %v2667_v17  ;;  %v860_v42 = vsel %vm399_vm1, %v1904_v28, %v854_v56  ;;  %v888_v19 = vpack.c.bf16 %v859_v38, %v859_v38  ;;  %v872_v28 = vpack.c.bf16 %v2650_v44, %v2522_v45  ;;  %v882_v44 = vpack.c.bf16 %v2682_v35, %v2684_v36 }
  0xfd   : >> { %1546 = vmatmul.mubr.msk.bf16.vlgmr.msra.gmra.mrb[0].mxu1 %vm550_vm3, %v2667_v17 }
  0xfe   : >> { %1613 = vmatpush3.bf16.msra.mxu0 %v514_v37  ;;  %909 = vmatpush1.bf16.msra.mxu1 %v868_v63  ;;  %v1907_v37 = vpop.permute.xlu0 %1906  ;;  %v884_v63 = vpack.c.bf16 %v841_v53, %v2539_v51  ;;  %v894_v25 = vsel %vm557_vm2, %v888_v19, 0  ;;  %v877_v53 = vpack.c.bf16 %v2527_v47, %v2648_v59  ;;  %v3176_v47 = vunpack.c.h.bf16 %v2513_v43 }
  0xff   : >> { %1634 = vmatprep.subr.msk.bf16.mxu0 %vm557_vm2, %v519_v22  ;;  %910 = vmatprep.subr.bf16.mxu1 %v874_v21  ;;  %v878_v22 = vpack.c.bf16 %v2644_v40, %v2630_v57  ;;  %v1909_v24 = vunpack.i.h.bf16 %v1907_v37  ;;  %v1908_v51 = vunpack.i.l.bf16 %v1907_v37  ;;  %v889_v57 = vpack.c.bf16 %v860_v42, %v860_v42  ;;  %v1912_v40 = vpop.permute.xlu1 %1911 }
 0x100   : >> { %668 = vmatprep.mubr.bf16.mxu1 %v3174_v55  ;;  %v1914_v48 = vunpack.i.h.bf16 %v1912_v40  ;;  %v1913_v54 = vunpack.i.l.bf16 %v1912_v40  ;;  %v880_v21 = vpack.c.bf16 %v2709_v20, %v2700_v61 }
 0x101   : >> { %v843_v23 = vsel %vm379_vm0, %v1908_v51, %v1909_v24  ;;  %v842_v18 = vsel %vm379_vm0, %v1899_v58, %v1908_v51 }
 0x102   : >> { %1615 = vmatpush3.bf16.msra.mxu0 %v571_v30  ;;  %911 = vmatpush1.bf16.msra.mxu1 %v873_v26  ;;  %v886_v41 = vpack.c.bf16 %v843_v23, %v3175_v34  ;;  %v862_v26 = vsel %vm399_vm1, %v1913_v54, %v1914_v48  ;;  %v861_v62 = vsel %vm399_vm1, %v854_v56, %v1913_v54 }
 0x103   : >> { %912 = vmatprep.subr.bf16.mxu1 %v879_v32  ;;  %961 = vmatprep.subr.bf16.mxu0 %v871_v16  ;;  %v891_v33 = vpack.c.bf16 %v862_v26, %v862_v26  ;;  %v885_v49 = vpack.c.bf16 %v842_v18, %v2542_v52  ;;  %v890_v61 = vpack.c.bf16 %v861_v62, %v861_v62 }
 0x104   : >> { %v887_v52 = vpack.c.bf16 %v1909_v24, %v3176_v47  ;;  %v892_v59 = vpack.c.bf16 %v1914_v48, %v1914_v48 }
 0x105   : >> { %1547 = vmatmul.mubr.msk.bf16.gmra.mrb[4].mxu1 %vm550_vm3, %v2718_v60  ;;  %1617 = vmatmul.mubr.msk.bf16.vlgmr.msra.gmra.mrb[8].mxu0 %vm550_vm3, %v2718_v60  ;;  %v900_v45 = vsel %vm557_vm2, %v890_v61, 0 }
 0x106   : >> { %913 = vmatpush1.bf16.msra.mxu1 %v878_v22  ;;  %962 = vmatpush1.bf16.msra.mxu0 %v870_v39  ;;  %v906_v43 = vsel %vm557_vm2, %v892_v59, 0 }
 0x107   : >> { %963 = vmatprep.subr.bf16.mxu0 %v876_v27  ;;  %914 = vmatprep.subr.bf16.mxu1 %v884_v63 }
 0x108   : >> { %940 = vmatprep.mubr.bf16.mxu1 %v3174_v55  ;;  %993 = vmatprep.mubr.bf16.mxu0 %v3174_v55 }
 0x10a   : >> { %915 = vmatpush1.bf16.msra.mxu1 %v883_v31  ;;  %964 = vmatpush1.bf16.msra.mxu0 %v875_v50 }
 0x10b   : >> { %965 = vmatprep.subr.bf16.mxu0 %v881_v46  ;;  %1554 = vmatprep.subr.msk.bf16.mxu1 %vm557_vm2, %v889_v57 }
 0x10c   : >> { %v2810_v35 = vpop.permute.xlu0 %522  ;;  %v2812_v20 = vpop.permute.xlu1 %527 }
 0x10e   : >> { %917 = vmatpush1.bf16.msra.mxu1 %v894_v25  ;;  %966 = vmatpush1.bf16.msra.mxu0 %v880_v21 }
 0x10f   : >> { %1620 = vmatprep.subr.bf16.mxu1 %v872_v28  ;;  %967 = vmatprep.subr.bf16.mxu0 %v886_v41 }
 0x110   : >> { %v2838_v42 = vpop.permute.xlu1 %532  ;;  %v2840_v31 = vpop.permute.xlu0 %537 }
 0x111   : >> { %1555 = vmatmul.mubr.msk.bf16.vlgmr.msra.gmra.mrb[8].mxu1 %vm550_vm3, %v2667_v17 }
 0x112   : >> { %968 = vmatpush1.bf16.msra.mxu0 %v885_v49  ;;  %1621 = vmatpush3.bf16.msra.mxu1 %v872_v28 }
 0x113   : >> { %1622 = vmatprep.subr.bf16.mxu1 %v877_v53  ;;  %1557 = vmatprep.subr.msk.bf16.mxu0 %vm557_vm2, %v891_v33 }
 0x114   : >> { %950 = vmatprep.mubr.bf16.mxu1 %v3174_v55 }
 0x116   : >> { %970 = vmatpush1.bf16.msra.mxu0 %v900_v45  ;;  %1623 = vmatpush3.bf16.msra.mxu1 %v877_v53 }
 0x117   : >> { %1624 = vmatprep.subr.bf16.mxu1 %v882_v44 }
 0x119   : >> { %1556 = vmatmul.mubr.msk.bf16.gmra.mrb[12].mxu1 %vm550_vm3, %v2718_v60  ;;  %1558 = vmatmul.mubr.msk.bf16.vlgmr.msra.gmra.mrb[12].mxu0 %vm550_vm3, %v2667_v17 }
 0x11a   : >> { %1625 = vmatpush3.bf16.msra.mxu1 %v882_v44  ;;  %1003 = vmatprep.mubr.bf16.mxu0 %v3174_v55 }
 0x11b   : >> { %1626 = vmatprep.subr.bf16.mxu1 %v887_v52  ;;  %1630 = vmatprep.mubr.msk.bf16.mxu1 %vm550_vm3, %v2667_v17 }
 0x11e   : >> { %1627 = vmatpush3.bf16.msra.mxu1 %v887_v52 }
 0x11f   : >> { %1635 = vmatprep.subr.msk.bf16.mxu1 %vm557_vm2, %v892_v59 }
 0x121   : >> { %1559 = vmatmul.mubr.msk.bf16.gmra.mrb[16].mxu0 %vm550_vm3, %v2718_v60 }
 0x122   : >> { %1629 = vmatpush3.bf16.msra.mxu1 %v906_v43 }
 0x125   : >> { %1631 = vmatmul.mubr.msk.bf16.vlgmr.msra.gmra.mrb[16].mxu1 %vm550_vm3, %v2718_v60 }
 0x1c4   : >> { %v607_v36 = vpop.f32.mrb[0].mxu0 }
 0x1c5   : >> { %v609_v55 = vpop.f32.mrb[1].mxu0  ;;  %v2815_v17 = vadd.f32 %v607_v36, %v2810_v35 }
 0x1c6   : >> { %v611_v58 = vpop.f32.mrb[2].mxu0  ;;  %v2818_v30 = vadd.f32 %v609_v55, %v2810_v35 }
 0x1c7   : >> { %v2821_v56 = vadd.f32 %v611_v58, %v2812_v20  ;;  %v613_v32 = vpop.f32.mrb[3].mxu0  ;;  %v761_v60 = vmul.f32 %v2815_v17, %v2815_v17 }
 0x1c8   : >> { %v2826_v16 = vadd.f32 %v613_v32, %v2812_v20  ;;  %v728_v39 = vadd.f32 %v2818_v30, %v2815_v17  ;;  %v762_v29 = vmul.f32 %v2818_v30, %v2818_v30 }
 0x1c9   : >> { %v766_v37 = vmul.f32 %v2821_v56, %v2821_v56 }
 0x1ca   : >> { %v736_v63 = vadd.f32 %v2826_v16, %v2821_v56  ;;  %v767_v22 = vmul.f32 %v2826_v16, %v2826_v16  ;;  %v781_v24 = vadd.f32 %v762_v29, %v761_v60 }
 0x1cc   : >> { %v788_v38 = vadd.f32 %v767_v22, %v766_v37  ;;  %v617_v27 = vpop.f32.mrb[4].mxu0 }
 0x1cd   : >> { %v619_v51 = vpop.f32.mrb[5].mxu0  ;;  %v2843_v57 = vadd.f32 %v617_v27, %v2838_v42 }
 0x1ce   : >> { %v621_v40 = vpop.f32.mrb[6].mxu0  ;;  %v2846_v19 = vadd.f32 %v619_v51, %v2838_v42 }
 0x1cf   : >> { %v623_v50 = vpop.f32.mrb[7].mxu0  ;;  %v2849_v48 = vadd.f32 %v621_v40, %v2840_v31  ;;  %v771_v23 = vmul.f32 %v2843_v57, %v2843_v57 }
 0x1d0   : >> { %v660_v46 = vpop.f32.mrb[0].mxu1  ;;  %v743_v54 = vadd.f32 %v2846_v19, %v2843_v57  ;;  %v2856_v25 = vadd.f32 %v623_v50, %v2840_v31  ;;  %v772_v34 = vmul.f32 %v2846_v19, %v2846_v19 }
 0x1d1   : >> { %v2861_v41 = vadd.f32 %v660_v46, %v2810_v35  ;;  %v662_v21 = vpop.f32.mrb[1].mxu1  ;;  %v776_v26 = vmul.f32 %v2849_v48, %v2849_v48 }
 0x1d2   : >> { %v2866_v28 = vadd.f32 %v662_v21, %v2810_v35  ;;  %v664_v18 = vpop.f32.mrb[2].mxu1  ;;  %v750_v62 = vadd.f32 %v2856_v25, %v2849_v48  ;;  %v795_v33 = vadd.f32 %v772_v34, %v771_v23  ;;  %v777_v49 = vmul.f32 %v2856_v25, %v2856_v25 }
 0x1d3   : >> { %v729_v53 = vadd.f32 %v728_v39, %v2861_v41  ;;  %v763_v61 = vmul.f32 %v2861_v41, %v2861_v41  ;;  %v2876_v45 = vadd.f32 %v664_v18, %v2812_v20  ;;  %v666_v44 = vpop.f32.mrb[3].mxu1 }
 0x1d4   : >> { %v764_v47 = vmul.f32 %v2866_v28, %v2866_v28  ;;  %v2881_v52 = vadd.f32 %v666_v44, %v2812_v20  ;;  %v802_v59 = vadd.f32 %v777_v49, %v776_v26 }
 0x1d5   : >> { %v737_v43 = vadd.f32 %v736_v63, %v2876_v45  ;;  %v768_v36 = vmul.f32 %v2876_v45, %v2876_v45  ;;  %v730_v55 = vadd.f32 %v729_v53, %v2866_v28  ;;  %v782_v58 = vadd.f32 %v781_v24, %v763_v61 }
 0x1d6   : >> { %v769_v32 = vmul.f32 %v2881_v52, %v2881_v52 }
 0x1d7   : >> { %v738_v60 = vadd.f32 %v737_v43, %v2881_v52  ;;  %v789_v39 = vadd.f32 %v788_v38, %v768_v36  ;;  %v783_v29 = vadd.f32 %v782_v58, %v764_v47 }
 0x1d8   : >> { %v670_v37 = vpop.f32.mrb[4].mxu1  ;;  %v1618_v22 = vpop.f32.mrb[8].mxu0 }
 0x1d9   : >> { %v2891_v27 = vadd.f32 %v670_v37, %v2838_v42  ;;  %v672_v51 = vpop.f32.mrb[5].mxu1  ;;  %v713_v63 = vpop.f32.mrb[9].mxu0  ;;  %v790_v40 = vadd.f32 %v789_v39, %v769_v32  ;;  %v2894_v50 = vadd.f32 %v1618_v22, %v2838_v42 }
 0x1da   : >> { %v2897_v24 = vadd.f32 %v672_v51, %v2838_v42  ;;  %v2900_v23 = vadd.f32 %v713_v63, %v2810_v35  ;;  %v674_v38 = vpop.f32.mrb[6].mxu1  ;;  %v1619_v46 = vpop.f32.mrb[10].mxu0 }
 0x1db   : >> { %v744_v34 = vadd.f32 %v743_v54, %v2891_v27  ;;  %v773_v21 = vmul.f32 %v2891_v27, %v2891_v27  ;;  %v2906_v26 = vadd.f32 %v674_v38, %v2840_v31  ;;  %v2909_v18 = vadd.f32 %v1619_v46, %v2840_v31  ;;  %v716_v49 = vpop.f32.mrb[11].mxu0  ;;  %v676_v53 = vpop.f32.mrb[7].mxu1 }
 0x1dc   : >> { %v774_v61 = vmul.f32 %v2897_v24, %v2897_v24  ;;  %v2914_v44 = vadd.f32 %v716_v49, %v2812_v20  ;;  %v2917_v47 = vadd.f32 %v676_v53, %v2840_v31  ;;  %v732_v54 = vsel %vm731_vm4, %v2900_v23, 0.0 }
 0x1dd   : >> { %v751_v43 = vadd.f32 %v750_v62, %v2906_v26  ;;  %v778_v36 = vmul.f32 %v2906_v26, %v2906_v26  ;;  %v733_v58 = vadd.f32 %v732_v54, %v730_v55  ;;  %v745_v32 = vadd.f32 %v744_v34, %v2897_v24 }
 0x1de   : >> { %v779_v39 = vmul.f32 %v2917_v47, %v2917_v47  ;;  %v746_v37 = vsel %vm731_vm4, %v2894_v50, 0.0  ;;  %v753_v22 = vsel %vm731_vm4, %v2909_v18, 0.0  ;;  %v775_v51 = vmul.f32 %v2894_v50, %v2894_v50 }
 0x1df   : >> { %734 = vadd.xlane.f32.xlu1 %v733_v58  ;;  %v747_v62 = vadd.f32 %v746_v37, %v745_v32  ;;  %v752_v63 = vadd.f32 %v751_v43, %v2917_v47  ;;  %v796_v38 = vadd.f32 %v795_v33, %v773_v21  ;;  %v780_v55 = vmul.f32 %v2909_v18, %v2909_v18 }
 0x1e0   : >> { %v798_v46 = vsel %vm731_vm4, %v775_v51, 0.0  ;;  %v803_v34 = vadd.f32 %v802_v59, %v778_v36  ;;  %v739_v49 = vsel %vm731_vm4, %v2914_v44, 0.0  ;;  %v770_v53 = vmul.f32 %v2914_v44, %v2914_v44 }
 0x1e1   : >> { %748 = vadd.xlane.f32.xlu0 %v747_v62  ;;  %v754_v54 = vadd.f32 %v753_v22, %v752_v63  ;;  %v797_v58 = vadd.f32 %v796_v38, %v774_v61  ;;  %v805_v32 = vsel %vm731_vm4, %v780_v55, 0.0  ;;  %v740_v43 = vadd.f32 %v739_v49, %v738_v60 }
 0x1e2   : >> { %v804_v33 = vadd.f32 %v803_v34, %v779_v39  ;;  %v791_v21 = vsel %vm731_vm4, %v770_v53, 0.0  ;;  %v765_v37 = vmul.f32 %v2900_v23, %v2900_v23 }
 0x1e3   : >> { %755 = vadd.xlane.f32.xlu1 %v754_v54  ;;  %v799_v59 = vadd.f32 %v798_v46, %v797_v58  ;;  %v792_v36 = vadd.f32 %v791_v21, %v790_v40 }
 0x1e4   : >> { %v942_v51 = vpop.f32.mrb[8].mxu1  ;;  %v806_v0 = vadd.f32 %v805_v32, %v804_v33  ;;  %v784_v1 = vsel %vm731_vm4, %v765_v37, 0.0 }
 0x1e5   : >> { %v943_v62 = vadd.f32 %v942_v51, %v2810_v35  ;;  %v944_v61 = vpop.f32.mrb[9].mxu1  ;;  %800 = vadd.xlane.f32.xlu0 %v799_v59  ;;  %v785_v60 = vadd.f32 %v784_v1, %v783_v29 }
 0x1e6   : >> { %v945_v39 = vadd.f32 %v944_v61, %v2810_v35  ;;  %v946_v22 = vpop.f32.mrb[10].mxu1 }
 0x1e7   : >> { %v1095_v63 = vmul.f32 %v943_v62, %v943_v62  ;;  %v1147_v38 = vmax.f32 %v2815_v17, %v943_v62  ;;  %v947_v55 = vadd.f32 %v946_v22, %v2812_v20  ;;  %v948_v40 = vpop.f32.mrb[11].mxu1  ;;  %807 = vadd.xlane.f32.xlu1 %v806_v0 }
 0x1e8   : >> { %v1063_v46 = vadd.f32 %v945_v39, %v943_v62  ;;  %v1096_v34 = vmul.f32 %v945_v39, %v945_v39  ;;  %v1148_v49 = vmax.f32 %v2818_v30, %v945_v39  ;;  %v949_v53 = vadd.f32 %v948_v40, %v2812_v20 }
 0x1e9   : >> { %v1100_v1 = vmul.f32 %v947_v55, %v947_v55  ;;  %v1152_v29 = vmax.f32 %v2821_v56, %v947_v55  ;;  %741 = vadd.xlane.f32.xlu0 %v740_v43 }
 0x1ea   : >> { %v2958_v54 = vadd.f32 %v1096_v34, %v1095_v63  ;;  %v1579_v17 = vpack.c.bf16 %v1148_v49, %v1147_v38  ;;  %v1070_v58 = vadd.f32 %v949_v53, %v947_v55  ;;  %v1101_v32 = vmul.f32 %v949_v53, %v949_v53 }
 0x1eb   : >> { %v1153_v0 = vmax.f32 %v2826_v16, %v949_v53  ;;  %793 = vadd.xlane.f32.xlu1 %v792_v36 }
 0x1ec   : >> { %1234 = vst [vmem:[%s2955_s8] sm:$0xff] %v1579_v17  ;;  %v2962_v30 = vadd.f32 %v1101_v32, %v1100_v1  ;;  %v952_v33 = vpop.f32.mrb[12].mxu1  ;;  %v995_v21 = vpop.f32.mrb[12].mxu0 }
 0x1ed   : >> { %v1582_v37 = vpack.c.bf16 %v1153_v0, %v1152_v29  ;;  %v953_v59 = vadd.f32 %v952_v33, %v2838_v42  ;;  %v996_v56 = vadd.f32 %v995_v21, %v2810_v35  ;;  %v954_v43 = vpop.f32.mrb[13].mxu1  ;;  %v997_v51 = vpop.f32.mrb[13].mxu0  ;;  %786 = vadd.xlane.f32.xlu0 %v785_v60 }
 0x1ee   : >> { %v955_v62 = vadd.f32 %v954_v43, %v2838_v42  ;;  %v998_v61 = vadd.f32 %v997_v51, %v2810_v35  ;;  %v956_v16 = vpop.f32.mrb[14].mxu1  ;;  %v999_v39 = vpop.f32.mrb[14].mxu0 }
 0x1ef   : >> { %1238 = vst [vmem:[%s2955_s8 + $0x14] sm:$0xff] %v1582_v37  ;;  %v1105_v36 = vmul.f32 %v953_v59, %v953_v59  ;;  %v1157_v22 = vmax.f32 %v2843_v57, %v953_v59  ;;  %v1064_v63 = vadd.f32 %v1063_v46, %v996_v56  ;;  %v1097_v38 = vmul.f32 %v996_v56, %v996_v56  ;;  %v958_v55 = vpop.f32.mrb[15].mxu1  ;;  %v1001_v40 = vpop.f32.mrb[15].mxu0 }
 0x1f0   : >> { %v1149_v34 = vmax.f32 %v2861_v41, %v996_v56  ;;  %v1077_v49 = vadd.f32 %v955_v62, %v953_v59  ;;  %v1106_v53 = vmul.f32 %v955_v62, %v955_v62  ;;  %v1158_v60 = vmax.f32 %v2846_v19, %v955_v62 }
 0x1f1   : >> { %v1098_v1 = vmul.f32 %v998_v61, %v998_v61  ;;  %v1150_v29 = vmax.f32 %v2866_v28, %v998_v61  ;;  %v957_v17 = vadd.f32 %v956_v16, %v2840_v31  ;;  %v1000_v32 = vadd.f32 %v999_v39, %v2812_v20 }
 0x1f2   : >> { %v2975_v57 = vadd.f32 %v1106_v53, %v1105_v36  ;;  %v1585_v46 = vpack.c.bf16 %v1158_v60, %v1157_v22  ;;  %v959_v0 = vadd.f32 %v958_v55, %v2840_v31  ;;  %v1002_v41 = vadd.f32 %v1001_v40, %v2812_v20 }
 0x1f3   : >> { %v1580_v33 = vpack.c.bf16 %v1150_v29, %v1149_v34  ;;  %v1110_v21 = vmul.f32 %v957_v17, %v957_v17  ;;  %v1162_v37 = vmax.f32 %v2849_v48, %v957_v17  ;;  %v1071_v19 = vadd.f32 %v1070_v58, %v1000_v32 }
 0x1f4   : >> { %1241 = vst [vmem:[%s2955_s8 + $0x28] sm:$0xff] %v1585_v46  ;;  %v1102_v59 = vmul.f32 %v1000_v32, %v1000_v32  ;;  %v1154_v28 = vmax.f32 %v2876_v45, %v1000_v32  ;;  %v1084_v56 = vadd.f32 %v959_v0, %v957_v17  ;;  %v1111_v43 = vmul.f32 %v959_v0, %v959_v0  ;;  %v1005_v51 = vpop.f32.mrb[16].mxu0 }
 0x1f5   : >> { %1235 = vst [vmem:[%s2955_s8 + $0x8] sm:$0xff] %v1580_v33  ;;  %v1163_v62 = vmax.f32 %v2856_v25, %v959_v0  ;;  %v1103_v16 = vmul.f32 %v1002_v41, %v1002_v41  ;;  %v1155_v39 = vmax.f32 %v2881_v52, %v1002_v41  ;;  %v1006_v36 = vadd.f32 %v1005_v51, %v2838_v42  ;;  %v1007_v22 = vpop.f32.mrb[17].mxu0 }
 0x1f6   : >> { %v2986_v48 = vadd.f32 %v1111_v43, %v1110_v21  ;;  %v1008_v58 = vadd.f32 %v1007_v22, %v2838_v42  ;;  %v1009_v45 = vpop.f32.mrb[18].mxu0  ;;  %v1065_v55 = vadd.f32 %v1064_v63, %v998_v61  ;;  %v1072_v40 = vadd.f32 %v1071_v19, %v1002_v41 }
 0x1f7   : >> { %v1588_v34 = vpack.c.bf16 %v1163_v62, %v1162_v37  ;;  %v1583_v53 = vpack.c.bf16 %v1155_v39, %v1154_v28  ;;  %v1078_v60 = vadd.f32 %v1077_v49, %v1006_v36  ;;  %v1107_v29 = vmul.f32 %v1006_v36, %v1006_v36  ;;  %v1011_v25 = vpop.f32.mrb[19].mxu0 }
 0x1f8   : >> { %v1159_v17 = vmax.f32 %v2891_v27, %v1006_v36  ;;  %v2990_v52 = vmul.f32 %v1008_v58, %v1008_v58  ;;  %v1160_v32 = vmax.f32 %v2897_v24, %v1008_v58  ;;  %v1010_v46 = vadd.f32 %v1009_v45, %v2840_v31  ;;  %v1632_v0 = vpop.f32.mrb[16].mxu1 }
 0x1f9   : >> { %1244 = vst [vmem:[%s2955_s8 + $0x3c] sm:$0xff] %v1588_v34  ;;  %1239 = vst [vmem:[%s2955_s8 + $0x1c] sm:$0xff] %v1583_v53  ;;  %v1012_v61 = vadd.f32 %v1011_v25, %v2840_v31  ;;  %v1057_v63 = vadd.f32 %v1632_v0, %v2838_v42  ;;  %v1048_v41 = vpop.f32.mrb[17].mxu1  ;;  %v1116_v49 = vadd.f32 %v2958_v54, %v1097_v38 }
 0x1fa   : >> { %v1123_v33 = vadd.f32 %v2962_v30, %v1102_v59  ;;  %v1586_v27 = vpack.c.bf16 %v1160_v32, %v1159_v17  ;;  %v1085_v21 = vadd.f32 %v1084_v56, %v1010_v46  ;;  %v1112_v37 = vmul.f32 %v1010_v46, %v1010_v46  ;;  %v1633_v19 = vpop.f32.mrb[18].mxu1 }
 0x1fb   : >> { %v1164_v24 = vmax.f32 %v2906_v26, %v1010_v46  ;;  %v1113_v28 = vmul.f32 %v1012_v61, %v1012_v61  ;;  %v1165_v43 = vmax.f32 %v2917_v47, %v1012_v61  ;;  %v1161_v51 = vmax.f32 %v2894_v50, %v1057_v63  ;;  %v1051_v42 = vpop.f32.mrb[19].mxu1 }
 0x1fc   : >> { %v1049_v62 = vadd.f32 %v1048_v41, %v2810_v35  ;;  %1242 = vst [vmem:[%s2955_s8 + $0x30] sm:$0xff] %v1586_v27  ;;  %v1060_v54 = vadd.f32 %v1633_v19, %v2840_v31  ;;  %v1052_v30 = vadd.f32 %v1051_v42, %v2812_v20  ;;  %v1117_v38 = vadd.f32 %v1116_v49, %v1098_v1 }
 0x1fd   : >> { %v1124_v59 = vadd.f32 %v1123_v33, %v1103_v16  ;;  %v1589_v56 = vpack.c.bf16 %v1165_v43, %v1164_v24  ;;  %v1587_v26 = vpack.c.bf16 %v1161_v51, %v1161_v51  ;;  %v1079_v34 = vadd.f32 %v1078_v60, %v1008_v58 }
 0x1fe   : >> { %v1151_v39 = vmax.f32 %v2900_v23, %v1049_v62  ;;  %v1066_v47 = vsel %vm731_vm4, %v1049_v62, 0.0  ;;  %v1166_v50 = vmax.f32 %v2909_v18, %v1060_v54  ;;  %v1156_v35 = vmax.f32 %v2914_v44, %v1052_v30 }
 0x1ff   : >> { %v1067_v36 = vadd.f32 %v1066_v47, %v1065_v55  ;;  %v1073_v22 = vsel %vm731_vm4, %v1052_v30, 0.0  ;;  %1245 = vst [vmem:[%s2955_s8 + $0x44] sm:$0xff] %v1589_v56  ;;  %1243 = vst.msk [vmem:[%s2955_s8 + $0x38] sm:$0xf] %vm1236_vm5, %v1587_v26  ;;  %v1099_v1 = vmul.f32 %v1049_v62, %v1049_v62  ;;  %v1104_v16 = vmul.f32 %v1052_v30, %v1052_v30 }
 0x200   : >> { %v1581_v20 = vpack.c.bf16 %v1151_v39, %v1151_v39  ;;  %v1074_v31 = vadd.f32 %v1073_v22, %v1072_v40  ;;  %v1590_v23 = vpack.c.bf16 %v1166_v50, %v1166_v50  ;;  %v1584_v45 = vpack.c.bf16 %v1156_v35, %v1156_v35 }
 0x201   : >> { %1068 = vadd.xlane.f32.xlu0 %v1067_v36  ;;  %v1080_v18 = vsel %vm731_vm4, %v1057_v63, 0.0  ;;  %v1118_v44 = vsel %vm731_vm4, %v1099_v1, 0.0  ;;  %v1125_v55 = vsel %vm731_vm4, %v1104_v16, 0.0  ;;  %v1086_v53 = vadd.f32 %v1085_v21, %v1012_v61 }
 0x202   : >> { %1237 = vst.msk [vmem:[%s2955_s8 + $0x10] sm:$0xf] %vm1236_vm5, %v1581_v20  ;;  %1075 = vadd.xlane.f32.xlu1 %v1074_v31  ;;  %v1087_v25 = vsel %vm731_vm4, %v1060_v54, 0.0  ;;  %1246 = vst.msk [vmem:[%s2955_s8 + $0x4c] sm:$0xf] %vm1236_vm5, %v1590_v23  ;;  %v1119_v40 = vadd.f32 %v1118_v44, %v1117_v38  ;;  %v1126_v17 = vadd.f32 %v1125_v55, %v1124_v59 }
 0x203   : >> { %1240 = vst.msk [vmem:[%s2955_s8 + $0x24] sm:$0xf] %vm1236_vm5, %v1584_v45  ;;  %v1081_v32 = vadd.f32 %v1080_v18, %v1079_v34  ;;  %v1109_v58 = vmul.f32 %v1057_v63, %v1057_v63  ;;  %v1088_v60 = vadd.f32 %v1087_v25, %v1086_v53  ;;  %v1130_v46 = vadd.f32 %v2975_v57, %v1107_v29 }
 0x204   : >> { %v1114_v0 = vmul.f32 %v1060_v54, %v1060_v54  ;;  %v1137_v41 = vadd.f32 %v2986_v48, %v1112_v37 }
 0x205   : >> { %1120 = vadd.xlane.f32.xlu0 %v1119_v40  ;;  %v1132_v49 = vsel %vm731_vm4, %v1109_v58, 0.0  ;;  %v1131_v61 = vadd.f32 %v1130_v46, %v2990_v52 }
 0x206   : >> { %1127 = vadd.xlane.f32.xlu1 %v1126_v17  ;;  %v1138_v33 = vadd.f32 %v1137_v41, %v1113_v28  ;;  %v1139_v27 = vsel %vm731_vm4, %v1114_v0, 0.0 }
 0x207   : >> { %v1133_v21 = vadd.f32 %v1132_v49, %v1131_v61 }
 0x208   : >> { %v1140_v24 = vadd.f32 %v1139_v27, %v1138_v33 }
 0x209   : >> { %1082 = vadd.xlane.f32.xlu0 %v1081_v32 }
 0x20a   : >> { %1089 = vadd.xlane.f32.xlu1 %v1088_v60 }
 0x20d   : >> { %1134 = vadd.xlane.f32.xlu0 %v1133_v21 }
 0x20e   : >> { %1141 = vadd.xlane.f32.xlu1 %v1140_v24 }
 0x26c   : >> { %v735_v57 = vpop.xlane.xlu1 %734 }
 0x26d   : >> { %v757_v62 = vadd.f32 %v2137_v15, %v735_v57 }
 0x26e   : >> { %v749_v63 = vpop.xlane.xlu0 %748 }
 0x26f   : >> { %v759_v50 = vadd.f32 %v2129_v13, %v749_v63 }
 0x270   : >> { %v756_v19 = vpop.xlane.xlu1 %755 }
 0x271   : >> { %v760_v35 = vadd.f32 %v2125_v12, %v756_v19 }
 0x272   : >> { %v801_v29 = vpop.xlane.xlu0 %800 }
 0x274   : >> { %v808_v37 = vpop.xlane.xlu1 %807 }
 0x275   : >> { %v812_v31 = vadd.f32 %v2109_v8, %v808_v37 }
 0x276   : >> { %v742_v48 = vpop.xlane.xlu0 %741 }
 0x277   : >> { %v758_v52 = vadd.f32 %v2133_v14, %v742_v48  ;;  %v811_v14 = vadd.f32 %v2113_v9, %v801_v29 }
 0x278   : >> { %v794_v51 = vpop.xlane.xlu1 %793 }
 0x279   : >> { %v810_v59 = vadd.f32 %v2117_v10, %v794_v51 }
 0x27a   : >> { %v787_v43 = vpop.xlane.xlu0 %786 }
 0x27b   : >> { %v809_v38 = vadd.f32 %v2121_v11, %v787_v43 }
 0x28e   : >> { %v1069_v28 = vpop.xlane.xlu0 %1068 }
 0x28f   : >> { %v1091_v42 = vadd.f32 %v1069_v28, %v757_v62   ;;  %v1076_v54 = vpop.xlane.xlu1 %1075 }
 0x290   : >> { %v1092_v30 = vadd.f32 %v1076_v54, %v758_v52  }
 0x291   : > { %1248 = vst.msk [vmem:[%s2389_s29] sm:$0xff] (%p315_p7), %vm1247_vm6, %v1091_v42 }
 0x292   : >> { %v1121_v56 = vpop.xlane.xlu0 %1120  ;;  %1249 = vst.msk [vmem:[%s2389_s29 + $0x8] sm:$0xff] (%p315_p7), %vm1247_vm6, %v1092_v30 }
 0x293   : >> { %v1143_v26 = vadd.f32 %v1121_v56, %v809_v38   ;;  %v1128_v39 = vpop.xlane.xlu1 %1127 }
 0x294   : >> { %v1144_v47 = vadd.f32 %v1128_v39, %v810_v59  }
 0x295   : > { %1252 = vst.msk [vmem:[%s2394_s27] sm:$0xff] (%p315_p7), %vm1247_vm6, %v1143_v26 }
 0x296   : >> { %v1083_v36 = vpop.xlane.xlu0 %1082  ;;  %v3179_v10 = vmov %v1144_v47  ;;  %1253 = vst.msk [vmem:[%s2394_s27 + $0x8] sm:$0xff] (%p315_p7), %vm1247_vm6, %v1144_v47 }
 0x297   : >> { %v1093_v22 = vadd.f32 %v1083_v36, %v759_v50   ;;  %v1090_v15 = vpop.xlane.xlu1 %1089 }
 0x298   : >> { %v1094_v20 = vadd.f32 %v1090_v15, %v760_v35   ;;  %v3184_v15 = vmov %v1091_v42  ;;  %317 = sbr.rel (!%p315_p7) target bundleno = 86 (0x56), region = 113 }
 0x299   : >> { %v3182_v13 = vmov %v1093_v22  ;;  %1250 = vst.msk [vmem:[%s2389_s29 + $0x10] sm:$0xff] (%p315_p7), %vm1247_vm6, %v1093_v22 }
 0x29a   : >> { %v1135_v1 = vpop.xlane.xlu0 %1134  ;;  %v3181_v12 = vmov %v1094_v20  ;;  %1251 = vst.msk [vmem:[%s2389_s29 + $0x18] sm:$0xff] (%p315_p7), %vm1247_vm6, %v1094_v20  ;;  %s3185_s29 = sand.u32 (%p315_p7), 1, %s2069_s19  }
 0x29b   : >> { %v1145_v16 = vadd.f32 %v1135_v1, %v811_v14   ;;  %v1142_v11 = vpop.xlane.xlu1 %1141  ;;  %v3183_v14 = vmov %v1092_v30  ;;  %s3078_s11 = scalar_lea.sflag (%p315_p7), [#allocation4], %s3185_s29 }
 0x29c   : >> { %v1146_v23 = vadd.f32 %v1142_v11, %v812_v31   ;;  %v3180_v11 = vmov %v1143_v26 }
 0x29d   : >> { %v3178_v9 = vmov %v1145_v16  ;;  %1254 = vst.msk [vmem:[%s2394_s27 + $0x10] sm:$0xff] (%p315_p7), %vm1247_vm6, %v1145_v16 }
 0x29e   : >> { %v3177_v8 = vmov %v1146_v23  ;;  %1255 = vst.msk [vmem:[%s2394_s27 + $0x18] sm:$0xff] (%p315_p7), %vm1247_vm6, %v1146_v23  ;;  %s1947_s27 = scalar_lea.vmem (%p315_p7), %s3069_s14, 47360 }
 0x29f   : > { %p1948_p4 = scmp.ne.s32.totalorder %s3069_s14, %s1947_s27  ;;  %p1955_p10 = scmp.lt.s32.totalorder %s1953_s13, %s1947_s27 }
 0x2a1   : > { %p1949_p1 = pnand %p1948_p4, %p3186_p0  ;;  %p1956_p11 = por %p1955_p10, %p1954_p8 }
 0x2a3   : > { %p1950_p3 = pneg %p1949_p1 }
 0x2a5   : > { %p1957_p13 = pnand %p1956_p11, %p1950_p3 }
 0x2a7   : > { %1960 = shalt.err (!%p1957_p13)
}
 0x2a8   : > { %s1961_s9 = scalar_lea.hbm %s3074_s12, 47360  ;;  %s1965_s7 = scalar_lea.hbm %s3142_s3, 568320 }
 0x2a9   : > { %p1962_p5 = scmp.ne.s32.totalorder %s3074_s12, %s1961_s9  ;;  %p1966_p12 = scmp.lt.u32.totalorder %s3074_s12, %s3142_s3 }
 0x2aa   : > { %p1967_p2 = scmp.lt.u32.totalorder %s1965_s7, %s1961_s9  ;;  %p1969_p4 = scmp.lt.u32.totalorder %s1961_s9, %s3074_s12 }
 0x2ab   : > { %p1963_p6 = pnand %p1962_p5, %p3186_p0 }
 0x2ac   : > { %p1968_p7 = por %p1967_p2, %p1966_p12 }
 0x2ad   : > { %p1964_p9 = pneg %p1963_p6 }
 0x2ae   : > { %p1970_p1 = por %p1969_p4, %p1968_p7 }
 0x2b0   : > { %p1971_p3 = pnand %p1970_p1, %p1964_p9 }
 0x2b2   : > { %1974 = shalt.err (!%p1971_p3)
}
 0x2b3   : > { %s2150_s26 = smov 320   ;;  %s2151_s0 = smov 20  }
 0x2b4   : > { %1645 = dma.vmem_to_hbm [thread:$0]  (%p3186_p0), %s3069_s14, 47360, %s3074_s12, %s3078_s11, %s2150_s26, %s2150_s26, %s2151_s0  }
 0x2b5 PF: > { %p1657_p8 = scmp.ge.s32.totalorder %s2105_s28, 2  ;;  %s1312_s16 = sand.u32 1, %s2065_s18  }
 0x2b6   : > { %p3187_p10 = scmp.ne.s32.totalorder %s3164_s21, 0  ;;  %s1313_s29 = scalar_lea.sflag [#allocation4], %s1312_s16 }
 0x2b8   : > { %p1652_p11 = pnand %p1657_p8, %p3187_p10 }
 0x2ba   : > { %2060 = dma.done.wait (!%p1652_p11), %s1313_s29, 47360  }
 0x2bb   : > { %2062 = vsyncadd (!%p1652_p11), %s1313_s29, 4294919936  ;;  %s22_s28 = sadd.s32 1, %s2105_s28   ;;  %s3188_s15 = sld [smem:[#allocation12_spill]] }
 0x2bc   : > { %p19_p13 = scmp.ge.s32.totalorder %s22_s28, 14   ;;  %s3189_s24 = sld [smem:[#allocation8_spill]] }
 0x2bd   : > { %s3190_s25 = sld [smem:[#allocation9_spill]]  ;;  %s3191_s26 = sld [smem:[#allocation10_spill]] }
 0x2be   : > { %s3192_s27 = sld [smem:[#allocation11_spill]]  ;;  %s3193_s18 = smov %s2069_s19 }
 0x2bf   : > { %s3194_s19 = smov %s2073_s20  ;;  %s3195_s20 = smov %s2272_s17 }
 0x2c0   : > { %s3196_s21 = smov %s2081_s22  ;;  %s3197_s22 = smov %s2085_s23 }
 0x2c1   : > { %s3198_s23 = smov %s3188_s15  ;;  %21 = sbr.rel (!%p19_p13) target bundleno = 11 (0xb), region = 124 }
 0x2c8   :  { %1342 = vsyncpa [#allocation3], 1 }
 0x2c9   :  { %1344 = vsyncpa [#allocation3 + $0x1], 1 }
 0x2ca   :  { %1345 = vsyncpa [#allocation4], 1 }
 0x2cb   :  { %1347 = vsyncpa [#allocation4 + $0x1], 1 }

// kernel: forward.7
= control target key start
LH: loop header
LB: loop body
LE: loop exit
PB: predicated region body
PF: predicated region fallthrough
CT: control target
= control target key end

     0   :  { %s4517_s0 = inlined_call_operand.vmem [shape: bf16[2,222,32,298], index: 0, kind: input, shape index: {}]   ;;  %s4518_s1 = inlined_call_operand.vmem [shape: bf16[56,288], index: 1, kind: input, shape index: {}]   ;;  %s4519_s2 = inlined_call_operand.vmem [shape: f32[56,1], index: 2, kind: input, shape index: {}]   ;;  %s4520_s3 = inlined_call_operand.hbm [shape: bf16[2,110,56,296], index: 3, kind: output, shape index: {0}]   ;;  %s4521_s4 = inlined_call_operand.vmem [shape: f32[2,2,56,1], index: 4, kind: output, shape index: {1}]   ;;  %s4522_s5 = inlined_call_operand.vmem [shape: f32[2,2,56,1], index: 5, kind: output, shape index: {2}]  }
   0x1   :  { %4556 = sst [smem:[#allocation47_spill]] %s4517_s0 }
   0x2   :  { %4557 = sst [smem:[#allocation48_spill]] %s4519_s2 }
   0x3   :  { %11 = vsyncpa [#allocation3], 0 }
   0x4   :  { %13 = vsyncpa [#allocation3 + $0x1], 0  ;;  %s3169_s18 = smov 0   ;;  %s3171_s19 = smov 0  }
   0x5   :  { %s3173_s20 = smov 0   ;;  %s3175_s21 = smov 0  }
   0x6   :  { %s3177_s22 = smov 0   ;;  %s3179_s23 = smov 0  }
   0x7   :  { %s3181_s24 = smov 0   ;;  %s3183_s25 = smov 0  }
   0x8 LB: > { %4558 = sst [smem:[#allocation5_spill]] %s3067_s24  ;;  %s2149_s26 = sadd.s32 4294967295, %s3071_s25   ;;  %s3071_s25 = sphi %s3183_s25, %s19_s25   ;;  %s3067_s24 = sphi %s3181_s24, %s4682_s24   ;;  %s3063_s23 = sphi %s3179_s23, %s4687_s23   ;;  %s3059_s22 = sphi %s3177_s22, %s4680_s22   ;;  %s3055_s21 = sphi %s3175_s21, %s4686_s21   ;;  %s3051_s20 = sphi %s3173_s20, %s4685_s20   ;;  %s3047_s19 = sphi %s3171_s19, %s4684_s19   ;;  %s3043_s18 = sphi %s3169_s18, %s4683_s18  }
   0x9   : > { %s2150_s27 = sadd.s32 4294967294, %s3071_s25   ;;  %s28_s28 = sadd.s32 1, %s3063_s23 }
   0xa   : > { %p29_p0 = scmp.ge.s32.totalorder %s28_s28, 2  ;;  %s31_s29 = sadd.s32 1, %s3067_s24 }
   0xb   : > { %p118_p1 = scmp.ne.s32.totalorder %s3051_s20, %s3047_s19  ;;  %p119_p2 = scmp.eq.s32.totalorder %s2149_s26, 3 }
   0xc   : > { %s4689_s28 = smov (%p29_p0, %s28_s28), 0  ;;  %s4691_s29 = smov (!%p29_p0, %s31_s29), %s3067_s24 }
   0xd   : > { %4559 = sst [smem:[#allocation6_spill]] %s4689_s28  ;;  %s104_s30 = ssub.s32 %s3063_s23, %s4689_s28 }
   0xe   : > { %p3220_p3 = por %p119_p2, %p118_p1  ;;  %p33_p4 = scmp.ge.s32.totalorder %s4691_s29, 2 }
   0xf   : > { %p124_p5 = scmp.ne.s32.totalorder %s3047_s19, %s3043_s18  ;;  %p125_p6 = scmp.eq.s32.totalorder %s2150_s27, 3 }
  0x10   : > { %p2153_p7 = scmp.ge.s32.totalorder %s3071_s25, 1  ;;  %s4693_s29 = smov (%p33_p4, %s4691_s29), 0 }
  0x11   : > { %4561 = sst [smem:[#allocation7_spill]] %s4693_s29  ;;  %p3229_p8 = por %p125_p6, %p124_p5 }
  0x12   : > { %p213_p9 = scmp.lt.s32.totalorder %s3071_s25, 5  ;;  %s103_s8 = ssub.s32 %s3067_s24, %s4693_s29 }
  0x13   : > { %s108_s9 = sadd.s32 1, %s3051_s20  ;;  %s105_s10 = sor.u32 %s104_s30, %s103_s8 }
  0x14   : > { %p214_p10 = pnand %p2153_p7, %p213_p9  ;;  %p106_p11 = scmp.eq.s32.totalorder %s105_s10, 0 }
  0x16   : > { %s3238_s11 = scalar_select %p106_p11, %s3051_s20, %s108_s9  }
  0x17   : > { %217 = sbr.rel (%p214_p10) target bundleno = 762 (0x2fa), region = 32 }
  0x1e   : > { %s4523_s12 = sand.u32 1, %s3047_s19   ;;  %p259_p12 = scmp.lt.s32.totalorder %s3059_s22, 1  ;;  %v3286_v7 = vld [vmem:[%s4518_s1] sm:$0xff]  ;;  %v3291_v8 = vld [vmem:[%s4518_s1 + $0x8] sm:$0xf]  ;;  %v3297_v9 = vld [vmem:[%s4518_s1 + $0xc] sm:$0xff] }
  0x1f   : > { %s4563_s2 = sld [smem:[#allocation48_spill]]  ;;  %s3259_s27 = smul.u32 4620, %s4523_s12  ;;  %4571 = vst [vmem:[#allocation15_spill] sm:$0xff] %v3286_v7  ;;  %4572 = vst [vmem:[#allocation16_spill] sm:$0xff] %v3291_v8  ;;  %v3302_v10 = vld [vmem:[%s4518_s1 + $0x14] sm:$0xf] }
  0x20   : > { %p267_p13 = scmp.lt.s32.totalorder %s3055_s21, 1  ;;  %4573 = vst [vmem:[#allocation17_spill] sm:$0xff] %v3297_v9  ;;  %4574 = vst [vmem:[#allocation18_spill] sm:$0xff] %v3302_v10  ;;  %v3307_v11 = vld [vmem:[%s4518_s1 + $0x18] sm:$0xff]  ;;  %v3312_v12 = vld [vmem:[%s4518_s1 + $0x20] sm:$0xf] }
  0x21   : > { %s260_s15 = scalar_select %p259_p12, %s3059_s22, 1  ;;  %4575 = vst [vmem:[#allocation19_spill] sm:$0xff] %v3307_v11  ;;  %4576 = vst [vmem:[#allocation20_spill] sm:$0xff] %v3312_v12  ;;  %v3317_v13 = vld [vmem:[%s4518_s1 + $0x24] sm:$0xff]  ;;  %v3322_v14 = vld [vmem:[%s4518_s1 + $0x2c] sm:$0xf] }
  0x22   : > { %4577 = vst [vmem:[#allocation21_spill] sm:$0xff] %v3317_v13  ;;  %4578 = vst [vmem:[#allocation22_spill] sm:$0xff] %v3322_v14  ;;  %s268_s16 = scalar_select %p267_p13, %s3055_s21, 1  ;;  %v3330_v15 = vld [vmem:[%s4518_s1 + $0x30] sm:$0xff]  ;;  %v3335_v16 = vld [vmem:[%s4518_s1 + $0x38] sm:$0xf] }
  0x23   : > { %s2449_s30 = smul.u32 10656, %s260_s15  ;;  %4579 = vst [vmem:[#allocation23_spill] sm:$0xff] %v3330_v15  ;;  %4580 = vst [vmem:[#allocation24_spill] sm:$0xff] %v3335_v16  ;;  %v3340_v17 = vld [vmem:[%s4518_s1 + $0x3c] sm:$0xff]  ;;  %s4582_s0 = sld [smem:[#allocation47_spill]]  ;;  %v3355_v19 = vld [vmem:[%s4518_s1 + $0x48] sm:$0xff] }
  0x24   : > { %4581 = vst [vmem:[#allocation25_spill] sm:$0xff] %v3340_v17  ;;  %s2451_s29 = smul.u32 14, %s260_s15  ;;  %v3350_v18 = vld [vmem:[%s4518_s1 + $0x44] sm:$0xf]  ;;  %v3360_v20 = vld [vmem:[%s4518_s1 + $0x50] sm:$0xf] }
  0x25   : > { %v3245_v0 = vld [vmem:[%s4563_s2] sm:$0xff]  ;;  %v3250_v1 = vld [vmem:[%s4563_s2 + $0x8] sm:$0xff]  ;;  %v3255_v2 = vld [vmem:[%s4563_s2 + $0x10] sm:$0xff]  ;;  %4583 = vst [vmem:[#allocation26_spill] sm:$0xff] %v3350_v18  ;;  %s2450_s13 = smul.u32 7, %s268_s16  ;;  %s236_s26 = scalar_lea.vmem [#allocation2], %s3259_s27 }
  0x26   : > { %4564 = vst [vmem:[#allocation8_spill] sm:$0xff] %v3245_v0  ;;  %4565 = vst [vmem:[#allocation9_spill] sm:$0xff] %v3250_v1  ;;  %v3265_v3 = vld [vmem:[%s4563_s2 + $0x18] sm:$0xff]  ;;  %v3270_v4 = vld [vmem:[%s4563_s2 + $0x20] sm:$0xff]  ;;  %v3373_v21 = vmov 0.0   ;;  %v3375_v22 = vmov 0.0  }
  0x27   : > { %4566 = vst [vmem:[#allocation10_spill] sm:$0xff] %v3255_v2  ;;  %4567 = vst [vmem:[#allocation11_spill] sm:$0xff] %v3265_v3  ;;  %v3275_v5 = vld [vmem:[%s4563_s2 + $0x28] sm:$0xff]  ;;  %v3281_v6 = vld [vmem:[%s4563_s2 + $0x30] sm:$0xff]  ;;  %s271_s14 = sadd.s32 %s2451_s29, %s2450_s13  ;;  %v3377_v23 = vmov 0.0   ;;  %v3379_v24 = vmov 0.0  }
  0x28   : > { %4568 = vst [vmem:[#allocation12_spill] sm:$0xff] %v3270_v4  ;;  %4569 = vst [vmem:[#allocation13_spill] sm:$0xff] %v3275_v5  ;;  %v3381_v25 = vmov 0.0   ;;  %v3383_v26 = vmov 0.0   ;;  %v3385_v27 = vmov 0.0   ;;  %v3387_v28 = vmov 0.0  }
  0x29   : > { %4570 = vst [vmem:[#allocation14_spill] sm:$0xff] %v3281_v6  ;;  %s3345_s2 = scalar_lea.vmem %s4582_s0, %s2449_s30  ;;  %s2155_s30 = sshll.u32 %s271_s14, 3  ;;  %v3389_v29 = vmov 0.0   ;;  %v3391_v30 = vmov 0.0   ;;  %v3393_v31 = vmov 0.0   ;;  %v3395_v32 = vmov 0.0  }
  0x2a   : > { %s3365_s0 = scalar_lea.vmem %s4521_s4, %s2155_s30  ;;  %s3370_s24 = scalar_lea.vmem %s4522_s5, %s2155_s30  ;;  %v3397_v33 = vmov 0.0   ;;  %v3399_v34 = vmov 0.0  }
  0x2b   : > { %s3401_s29 = smov 0  }
  0x2c LB: >> { %v4584_v17 = vld [vmem:[#allocation25_spill] sm:$0xff]  ;;  %v4585_v15 = vld [vmem:[#allocation23_spill] sm:$0xff]  ;;  %4590 = vst [vmem:[#allocation27_spill] sm:$0xff] %v3075_v21  ;;  %4591 = vst [vmem:[#allocation28_spill] sm:$0xff] %v3079_v22  ;;  %s2157_s16 = sshll.u32 %s3131_s29, 1  ;;  %s4604_s8 = smul.u32 110, %s3055_s21  ;;  %v3095_v26 = vphi %v3383_v26, %v4670_v26   ;;  %v3091_v25 = vphi %v3381_v25, %v4669_v25   ;;  %v3087_v24 = vphi %v3379_v24, %v4668_v24   ;;  %v3083_v23 = vphi %v3377_v23, %v4667_v23   ;;  %v3079_v22 = vphi %v3375_v22, %v4666_v22   ;;  %v3075_v21 = vphi %v3373_v21, %v4665_v21   ;;  %s3131_s29 = sphi %s3401_s29, %s311_s29   ;;  %v3127_v34 = vphi %v3399_v34, %v4678_v34   ;;  %v3123_v33 = vphi %v3397_v33, %v4677_v33   ;;  %v3119_v32 = vphi %v3395_v32, %v4676_v32   ;;  %v3115_v31 = vphi %v3393_v31, %v4675_v31   ;;  %v3111_v30 = vphi %v3391_v30, %v4674_v30   ;;  %v3107_v29 = vphi %v3389_v29, %v4673_v29   ;;  %v3103_v28 = vphi %v3387_v28, %v4672_v28   ;;  %v3099_v27 = vphi %v3385_v27, %v4671_v27  }
  0x2d   : >> { %v4586_v13 = vld [vmem:[#allocation21_spill] sm:$0xff]  ;;  %v4587_v11 = vld [vmem:[#allocation19_spill] sm:$0xff]  ;;  %4592 = vst [vmem:[#allocation29_spill] sm:$0xff] %v3083_v23  ;;  %4593 = vst [vmem:[#allocation30_spill] sm:$0xff] %v3087_v24  ;;  %s3133_s14 = smov 126   ;;  %s3134_s30 = smov 127  }
  0x2e   : >> { %v4588_v9 = vld [vmem:[#allocation17_spill] sm:$0xff]  ;;  %v4589_v7 = vld [vmem:[#allocation15_spill] sm:$0xff]  ;;  %4594 = vst [vmem:[#allocation31_spill] sm:$0xff] %v3091_v25  ;;  %4595 = vst [vmem:[#allocation32_spill] sm:$0xff] %v3095_v26  ;;  %s327_s9 = sadd.s32 %s2157_s16, %s4604_s8  ;;  %vm435_vm0 = vcmask 1039360   ;;  %vm480_vm1 = vcmask 1031168  }
  0x2f   : >> { %4596 = vst [vmem:[#allocation33_spill] sm:$0xff] %v3099_v27  ;;  %4597 = vst [vmem:[#allocation34_spill] sm:$0xff] %v3103_v28  ;;  %s2256_s10 = smul.u32 48, %s327_s9  ;;  %v4609_v0 = vld [vmem:[#allocation8_spill] sm:$0xff]  ;;  %v4610_v1 = vld [vmem:[#allocation9_spill] sm:$0xff]  ;;  %vm845_vm2 = vcmask 261120  }
  0x30   : >> { %4598 = vst [vmem:[#allocation35_spill] sm:$0xff] %v3107_v29  ;;  %4599 = vst [vmem:[#allocation36_spill] sm:$0xff] %v3111_v30  ;;  %v4611_v3 = vld [vmem:[#allocation11_spill] sm:$0xff]  ;;  %v4612_v2 = vld [vmem:[#allocation10_spill] sm:$0xff]  ;;  %vm1129_vm3 = vcmask 326656   ;;  %s2271_s12 = smul.u32 84, %s3131_s29 }
  0x31   : >> { %4600 = vst [vmem:[#allocation37_spill] sm:$0xff] %v3115_v31  ;;  %4601 = vst [vmem:[#allocation38_spill] sm:$0xff] %v3119_v32  ;;  %s3452_s13 = scalar_lea.vmem %s3345_s2, %s2256_s10  ;;  %v4613_v5 = vld [vmem:[#allocation13_spill] sm:$0xff]  ;;  %v4614_v4 = vld [vmem:[#allocation12_spill] sm:$0xff]  ;;  %vm1849_vm4 = vcmask 322560   ;;  %s311_s29 = sadd.s32 1, %s3131_s29  }
  0x32   : >> { %4602 = vst [vmem:[#allocation39_spill] sm:$0xff] %v3123_v33  ;;  %4603 = vst [vmem:[#allocation40_spill] sm:$0xff] %v3127_v34  ;;  %v3455_v35 = vld [vmem:[%s3452_s13 + $0x38] sm:$0xf]  ;;  %v3458_v36 = vld [vmem:[%s3452_s13 + $0x44] sm:$0xf]  ;;  %s4244_s15 = scalar_lea.vmem %s236_s26, %s2271_s12 [#allocation2] }
  0x33   : >> { %v3461_v37 = vld [vmem:[%s3452_s13 + $0x50] sm:$0xf]  ;;  %v365_v38 = vunpack.c.l.bf16 %v3455_v35  ;;  %v368_v39 = vunpack.c.l.bf16 %v3458_v36  ;;  %v3466_v40 = vld [vmem:[%s3452_s13 + $0x5c] sm:$0xf]  ;;  %v3470_v42 = vld [vmem:[%s3452_s13 + $0x8] sm:$0xf] }
  0x34   : >> { %v371_v41 = vunpack.c.l.bf16 %v3461_v37  ;;  %v3473_v43 = vld [vmem:[%s3452_s13 + $0x14] sm:$0xf]  ;;  %v374_v44 = vunpack.c.l.bf16 %v3466_v40  ;;  %v341_v45 = vunpack.c.l.bf16 %v3470_v42  ;;  %v3479_v47 = vld [vmem:[%s3452_s13 + $0x20] sm:$0xf]  ;;  %v3482_v48 = vld [vmem:[%s3452_s13 + $0x2c] sm:$0xf] }
  0x35   : >> { %v344_v46 = vunpack.c.l.bf16 %v3473_v43  ;;  %v2661_v50 = vpack.i.bf16 %v368_v39, %v365_v38  ;;  %v347_v53 = vunpack.c.l.bf16 %v3479_v47  ;;  %v350_v54 = vunpack.c.l.bf16 %v3482_v48  ;;  %v331_v55 = vld [vmem:[%s3452_s13] sm:$0xff]  ;;  %v333_v56 = vld [vmem:[%s3452_s13 + $0xc] sm:$0xff]  ;;  %v2170_v63 = vld [vmem:[%s3452_s13 + $0x68] sm:$0xf]  ;;  %p4402_p0 = scmp.ge.s32.totalorder %s311_s29, 55  }
  0x36   : >> { %v2656_v51 = vpack.i.bf16 %v374_v44, %v371_v41  ;;  %v340_v58 = vunpack.c.h.bf16 %v331_v55  ;;  %v343_v59 = vunpack.c.h.bf16 %v333_v56  ;;  %v339_v61 = vunpack.c.l.bf16 %v331_v55  ;;  %v2172_v38 = vld [vmem:[%s3452_s13 + $0x74] sm:$0xf]  ;;  %v335_v39 = vld [vmem:[%s3452_s13 + $0x18] sm:$0xff]  ;;  %v337_v41 = vld [vmem:[%s3452_s13 + $0x24] sm:$0xff]  ;;  %s2460_s2 = smul.u32 (%p4402_p0), 1155, %s3055_s21  ;;  %s1913_s17 = sshll.u32 (%p4402_p0), %s236_s26, 4  ;;  %s4456_s17 = int_to_ptr.vmem [resolvable:$true] %s1913_s17 }
  0x37   : >> { %2662 = vrot.lane.b32.xlu1 %v2661_v50, %s3133_s14  ;;  %2652 = vrot.lane.b32.xlu0 %v2661_v50, %s3134_s30  ;;  %v2666_v52 = vpack.i.bf16 %v344_v46, %v341_v45  ;;  %v2676_v57 = vpack.i.bf16 %v350_v54, %v347_v53  ;;  %v342_v62 = vunpack.c.l.bf16 %v333_v56  ;;  %v389_v44 = vunpack.c.l.bf16 %v2170_v63  ;;  %v2174_v53 = vld [vmem:[%s3452_s13 + $0x80] sm:$0xf]  ;;  %v2176_v54 = vld [vmem:[%s3452_s13 + $0x8c] sm:$0xf]  ;;  %v4630_v8 = vld [vmem:[#allocation16_spill] sm:$0xff]  ;;  %s2453_s29 = smul.u32 (%p4402_p0), 2310, %s3059_s22 }
  0x38   : >> { %v2686_v60 = vpack.i.bf16 %v343_v59, %v340_v58  ;;  %v392_v45 = vunpack.c.l.bf16 %v2172_v38  ;;  %v346_v50 = vunpack.c.h.bf16 %v335_v39  ;;  %v345_v21 = vunpack.c.l.bf16 %v335_v39  ;;  %v3603_v25 = vld [vmem:[%s3452_s13 + $0xb4] sm:$0xff]  ;;  %v3606_v24 = vld [vmem:[%s3452_s13 + $0xbc] sm:$0xf]  ;;  %v4615_v6 = vld [vmem:[#allocation14_spill] sm:$0xff]  ;;  %s3136_s21 = smov (%p4402_p0), [#allocation2]  }
  0x39   : >> { %v2696_v46 = vpack.i.bf16 %v342_v62, %v339_v61  ;;  %v348_v59 = vunpack.c.l.bf16 %v337_v41  ;;  %v395_v22 = vunpack.c.l.bf16 %v2174_v53  ;;  %v398_v23 = vunpack.c.l.bf16 %v2176_v54  ;;  %4608 = vst [vmem:[#allocation44_spill] sm:$0xff] %v3606_v24  ;;  %v4629_v10 = vld [vmem:[#allocation18_spill] sm:$0xff]  ;;  %v4632_v12 = vld [vmem:[#allocation20_spill] sm:$0xff]  ;;  %s1910_s16 = sadd.s32 (%p4402_p0), %s2460_s2, %s2453_s29  ;;  %s2921_s22 = sshll.u32 (%p4402_p0), %s3136_s21, 4  ;;  %s2922_s22 = int_to_ptr.vmem [resolvable:$false] %s2921_s22 }
  0x3a   : >> { %v2701_v49 = vpack.i.bf16 %v392_v45, %v389_v44  ;;  %v2178_v28 = vcombine.high %v331_v55, %v333_v56  ;;  %v2177_v29 = vcombine.low %v331_v55, %v333_v56  ;;  %v2181_v61 = vcombine.high %v335_v39, %v337_v41  ;;  %v4631_v14 = vld [vmem:[#allocation22_spill] sm:$0xff]  ;;  %v4634_v16 = vld [vmem:[#allocation24_spill] sm:$0xff]  ;;  %s2253_s8 = sshll.u32 (%p4402_p0), %s1910_s16, 6  ;;  %s2923_s27 = scalar_lea.vmem (%p4402_p0), %s2922_s22, 147840 }
  0x3b   : >> { %2657 = vrot.lane.b32.xlu0 %v2656_v51, %s3134_s30  ;;  %2667 = vrot.lane.b32.xlu1 %v2666_v52, %s3134_s30  ;;  %v2711_v62 = vpack.i.bf16 %v348_v59, %v345_v21  ;;  %v3510_v44 = vcombine.low %v2170_v63, %v2172_v38  ;;  %v3512_v45 = vcombine.low %v2174_v53, %v2176_v54  ;;  %v2160_v21 = vld [vmem:[%s3452_s13 + $0x30] sm:$0xff]  ;;  %v1256_v32 = vunpack.c.h.bf16 %v3603_v25  ;;  %v4633_v18 = vld [vmem:[#allocation26_spill] sm:$0xff]  ;;  %s4461_s10 = scalar_lea.hbm (%p4402_p0), %s4520_s3, %s2253_s8  ;;  %p2924_p5 = scmp.lt.s32.totalorder (%p4402_p0), %s4456_s17, %s2922_s22 }
  0x3c   : >> { %858 = vmatprep.subr.bf16.mxu0 %v2178_v28  ;;  %v2180_v55 = vcombine.low %v335_v39, %v337_v41  ;;  %v3520_v56 = vcombine.low %v3461_v37, %v3466_v40  ;;  %v2164_v40 = vld [vmem:[%s3452_s13 + $0x48] sm:$0xff]  ;;  %v2166_v63 = vld [vmem:[%s3452_s13 + $0x54] sm:$0xff]  ;;  %vm1863_vm5 = vcmask (%p4402_p0), 7168  }
  0x3d   : >> { %4605 = vst [vmem:[#allocation41_spill] sm:$0xff] %v3510_v44  ;;  %4606 = vst [vmem:[#allocation42_spill] sm:$0xff] %v3512_v45  ;;  %859 = vmatpush1.bf16.msra.mxu0 %v2177_v29  ;;  %v364_v29 = vunpack.c.h.bf16 %v2160_v21  ;;  %v3540_v38 = vcombine.high %v2164_v40, %v2166_v63  ;;  %v370_v39 = vunpack.c.h.bf16 %v2164_v40  ;;  %v3542_v53 = vcombine.low %v2164_v40, %v2166_v63 }
  0x3e   : >> { %860 = vmatprep.subr.bf16.mxu0 %v2181_v61  ;;  %v369_v54 = vunpack.c.l.bf16 %v2164_v40  ;;  %v372_v59 = vunpack.c.l.bf16 %v2166_v63 }
  0x3f   : >> { %2672 = vrot.lane.b32.xlu0 %v2656_v51, %s3133_s14  ;;  %2677 = vrot.lane.b32.xlu1 %v2676_v57, %s3134_s30  ;;  %v349_v51 = vunpack.c.h.bf16 %v337_v41  ;;  %v373_v41 = vunpack.c.h.bf16 %v2166_v63 }
  0x41   : >> { %v2706_v58 = vpack.i.bf16 %v349_v51, %v346_v50  ;;  %v3516_v50 = vcombine.low %v3455_v35, %v3458_v36  ;;  %v3524_v51 = vcombine.high %v4589_v7, %v4588_v9  ;;  %861 = vmatpush1.bf16.msra.mxu0 %v2180_v55  ;;  %v363_v36 = vunpack.c.l.bf16 %v2160_v21 }
  0x42   : >> { %v2751_v61 = vpack.i.bf16 %v373_v41, %v370_v39  ;;  %v2756_v55 = vpack.i.bf16 %v372_v59, %v369_v54 }
  0x43   : >> { %2682 = vrot.lane.b32.xlu0 %v2666_v52, %s3133_s14  ;;  %2687 = vrot.lane.b32.xlu1 %v2686_v60, %s3134_s30 }
  0x44   : >> { %1032 = vmatprep.mubr.bf16.mxu1 %v3524_v51  ;;  %890 = vmatprep.mubr.bf16.mxu0 %v3524_v51 }
  0x47   : >> { %2692 = vrot.lane.b32.xlu0 %v2676_v57, %s3133_s14  ;;  %2697 = vrot.lane.b32.xlu1 %v2696_v46, %s3134_s30  ;;  %v2716_v57 = vpack.i.bf16 %v398_v23, %v395_v22  ;;  %v2162_v22 = vld [vmem:[%s3452_s13 + $0x3c] sm:$0xff] }
  0x48   : >> { %v3532_v23 = vcombine.high %v2160_v21, %v2162_v22  ;;  %v3534_v28 = vcombine.low %v2160_v21, %v2162_v22  ;;  %v367_v35 = vunpack.c.h.bf16 %v2162_v22  ;;  %v366_v37 = vunpack.c.l.bf16 %v2162_v22 }
  0x4b   : >> { %2702 = vrot.lane.b32.xlu0 %v2701_v49, %s3134_s30  ;;  %2707 = vrot.lane.b32.xlu1 %v2706_v58, %s3134_s30 }
  0x4f   : >> { %2712 = vrot.lane.b32.xlu0 %v2711_v62, %s3134_s30  ;;  %2717 = vrot.lane.b32.xlu1 %v2716_v57, %s3134_s30 }
  0x53   : >> { %2722 = vrot.lane.b32.xlu0 %v2686_v60, %s3133_s14  ;;  %2727 = vrot.lane.b32.xlu1 %v2696_v46, %s3133_s14  ;;  %v2741_v60 = vpack.i.bf16 %v367_v35, %v364_v29  ;;  %v2746_v46 = vpack.i.bf16 %v366_v37, %v363_v36  ;;  %v2173_v29 = vld [vmem:[%s3452_s13 + $0x78] sm:$0xff]  ;;  %v2175_v35 = vld [vmem:[%s3452_s13 + $0x84] sm:$0xff] }
  0x54   : >> { %v394_v63 = vunpack.c.h.bf16 %v2173_v29  ;;  %v397_v39 = vunpack.c.h.bf16 %v2175_v35  ;;  %v396_v54 = vunpack.c.l.bf16 %v2175_v35  ;;  %v3564_v59 = vcombine.high %v2173_v29, %v2175_v35 }
  0x57   : >> { %2732 = vrot.lane.b32.xlu0 %v2706_v58, %s3133_s14  ;;  %2737 = vrot.lane.b32.xlu1 %v2711_v62, %s3133_s14  ;;  %v2169_v58 = vld [vmem:[%s3452_s13 + $0x60] sm:$0xff]  ;;  %v2171_v62 = vld [vmem:[%s3452_s13 + $0x6c] sm:$0xff] }
  0x58   : >> { %v388_v21 = vunpack.c.h.bf16 %v2169_v58  ;;  %v391_v22 = vunpack.c.h.bf16 %v2171_v62  ;;  %v387_v36 = vunpack.c.l.bf16 %v2169_v58  ;;  %v390_v37 = vunpack.c.l.bf16 %v2171_v62 }
  0x59   : >> { %v3558_v40 = vcombine.high %v2169_v58, %v2171_v62  ;;  %v3560_v41 = vcombine.low %v2169_v58, %v2171_v62  ;;  %v3568_v62 = vcombine.low %v2173_v29, %v2175_v35 }
  0x5b   : >> { %2742 = vrot.lane.b32.xlu0 %v2741_v60, %s3134_s30  ;;  %2747 = vrot.lane.b32.xlu1 %v2746_v46, %s3134_s30 }
  0x5f   : >> { %2752 = vrot.lane.b32.xlu0 %v2751_v61, %s3134_s30  ;;  %2757 = vrot.lane.b32.xlu1 %v2756_v55, %s3134_s30 }
  0x63   : >> { %2762 = vrot.lane.b32.xlu0 %v2741_v60, %s3133_s14  ;;  %2767 = vrot.lane.b32.xlu1 %v2746_v46, %s3133_s14  ;;  %v2791_v60 = vpack.i.bf16 %v391_v22, %v388_v21  ;;  %v393_v46 = vunpack.c.l.bf16 %v2173_v29  ;;  %v3579_v21 = vld [vmem:[%s3452_s13 + $0x9c] sm:$0xff]  ;;  %v3582_v22 = vld [vmem:[%s3452_s13 + $0xa4] sm:$0xf] }
  0x65   : >> { %v2806_v58 = vpack.i.bf16 %v396_v54, %v393_v46 }
  0x67   : >> { %2772 = vrot.lane.b32.xlu0 %v2701_v49, %s3133_s14  ;;  %2777 = vrot.lane.b32.xlu1 %v2751_v61, %s3133_s14  ;;  %v2796_v49 = vpack.i.bf16 %v390_v37, %v387_v36  ;;  %v2801_v61 = vpack.i.bf16 %v397_v39, %v394_v63  ;;  %v1250_v36 = vunpack.c.h.bf16 %v3579_v21  ;;  %v1251_v37 = vunpack.c.l.bf16 %v3582_v22  ;;  %v3591_v63 = vld [vmem:[%s3452_s13 + $0xa8] sm:$0xff]  ;;  %v3594_v39 = vld [vmem:[%s3452_s13 + $0xb0] sm:$0xf] }
  0x68   : >> { %4607 = vst [vmem:[#allocation43_spill] sm:$0xff] %v3594_v39  ;;  %v1253_v52 = vunpack.c.h.bf16 %v3591_v63  ;;  %v1254_v30 = vunpack.c.l.bf16 %v3594_v39 }
  0x69   : >> { %v2836_v54 = vpack.i.bf16 %v1251_v37, %v1250_v36 }
  0x6b   : >> { %2782 = vrot.lane.b32.xlu0 %v2756_v55, %s3133_s14  ;;  %2787 = vrot.lane.b32.xlu1 %v2716_v57, %s3133_s14  ;;  %v3573_v57 = vld [vmem:[%s3452_s13 + $0x90] sm:$0xff]  ;;  %v3576_v55 = vld [vmem:[%s3452_s13 + $0x98] sm:$0xf]  ;;  %s4679_s13 = sand.u32 (%p4402_p0), 1, %s3047_s19  }
  0x6c   : >> { %v1247_v29 = vunpack.c.h.bf16 %v3573_v57  ;;  %v1248_v35 = vunpack.c.l.bf16 %v3576_v55  ;;  %v1246_v46 = vunpack.c.l.bf16 %v3573_v57 }
  0x6f   : >> { %2792 = vrot.lane.b32.xlu0 %v2791_v60, %s3134_s30  ;;  %2797 = vrot.lane.b32.xlu1 %v2796_v49, %s3134_s30 }
  0x73   : >> { %2802 = vrot.lane.b32.xlu0 %v2801_v61, %s3134_s30  ;;  %2807 = vrot.lane.b32.xlu1 %v2806_v58, %s3134_s30 }
  0x77   : >> { %2812 = vrot.lane.b32.xlu0 %v2791_v60, %s3133_s14  ;;  %2817 = vrot.lane.b32.xlu1 %v2796_v49, %s3133_s14  ;;  %v1249_v60 = vunpack.c.l.bf16 %v3579_v21  ;;  %v2831_v49 = vpack.i.bf16 %v1248_v35, %v1247_v29  ;;  %v1252_v29 = vunpack.c.l.bf16 %v3591_v63  ;;  %v1255_v35 = vunpack.c.l.bf16 %v3603_v25 }
  0x79   : >> { %v2841_v31 = vpack.i.bf16 %v1249_v60, %v1246_v46  ;;  %v2856_v37 = vpack.i.bf16 %v1255_v35, %v1252_v29 }
  0x7b   : >> { %2822 = vrot.lane.b32.xlu0 %v2801_v61, %s3133_s14  ;;  %2827 = vrot.lane.b32.xlu1 %v2806_v58, %s3133_s14  ;;  %v2846_v61 = vpack.i.bf16 %v1254_v30, %v1253_v52  ;;  %v1257_v58 = vunpack.c.l.bf16 %v3606_v24  ;;  %v4527_v30 = vmov 0  }
  0x7c   : >> { %2892 = vset.pattern.permute.xlu1 %v4527_v30  ;;  %2891 = vset.pattern.permute.xlu0 %v4527_v30 }
  0x7d   : >> { %v2851_v36 = vpack.i.bf16 %v1257_v58, %v1256_v32 }
  0x7f   : >> { %2832 = vrot.lane.b32.xlu0 %v2831_v49, %s3134_s30  ;;  %2837 = vrot.lane.b32.xlu1 %v2836_v54, %s3134_s30 }
  0x83   : >> { %2842 = vrot.lane.b32.xlu0 %v2841_v31, %s3134_s30  ;;  %2847 = vrot.lane.b32.xlu1 %v2846_v61, %s3134_s30 }
  0x87   : >> { %2852 = vrot.lane.b32.xlu0 %v2851_v36, %s3134_s30  ;;  %2857 = vrot.lane.b32.xlu1 %v2856_v37, %s3134_s30 }
  0x8b   : >> { %2862 = vrot.lane.b32.xlu0 %v2831_v49, %s3133_s14  ;;  %2867 = vrot.lane.b32.xlu1 %v2836_v54, %s3133_s14 }
  0x8f   : >> { %2872 = vrot.lane.b32.xlu0 %v2841_v31, %s3133_s14  ;;  %2877 = vrot.lane.b32.xlu1 %v2846_v61, %s3133_s14 }
  0x93   : >> { %2882 = vrot.lane.b32.xlu0 %v2851_v36, %s3133_s14  ;;  %2887 = vrot.lane.b32.xlu1 %v2856_v37, %s3133_s14  ;;  %v4616_v36 = vcombine.low %v3470_v42, %v3473_v43  ;;  %s4465_s14 = scalar_lea.sflag (%p4402_p0), [#allocation3], %s4679_s13 }
  0x97   : >> { %757 = vperm.xlu0 %2891, %v4609_v0   ;;  %762 = vperm.xlu1 %2892, %v4610_v1  }
  0x9b   : >> { %772 = vperm.xlu0 %2891, %v4611_v3   ;;  %767 = vperm.xlu1 %2892, %v4612_v2  }
  0x9f   : >> { %782 = vperm.xlu0 %2891, %v4613_v5   ;;  %777 = vperm.xlu1 %2892, %v4614_v4  }
  0xa3   : >> { %787 = vperm.xlu1 %2892, %v4615_v6  }
  0xa9   : >> { %v3633_v31 = vpop.permute.xlu1 %2662  ;;  %v3635_v32 = vpop.permute.xlu0 %2652 }
  0xaa   : >> { %v4529_v52 = vunpack.i.h.bf16 %v3635_v32  ;;  %v4530_v46 = vunpack.i.l.bf16 %v3635_v32  ;;  %v4533_v58 = vunpack.i.l.bf16 %v3633_v31  ;;  %v4617_v0 = vunpack.i.h.bf16 %v3633_v31 }
  0xac   : >> { %v3643_v60 = vpack.c.bf16 %v4529_v52, %v4530_v46  ;;  %v3667_v1 = vpack.c.bf16 %v4617_v0, %v4533_v58 }
  0xad   : >> { %v3645_v49 = vpop.permute.xlu0 %2657  ;;  %v2668_v54 = vpop.permute.xlu1 %2667 }
  0xae   : >> { %v4531_v29 = vunpack.i.h.bf16 %v3645_v49  ;;  %v4532_v35 = vunpack.i.l.bf16 %v3645_v49  ;;  %2272 = vmatprep.subr.bf16.mxu1 %v3643_v60  ;;  %v2670_v30 = vunpack.i.h.bf16 %v2668_v54  ;;  %v2669_v52 = vunpack.i.l.bf16 %v2668_v54  ;;  %4618 = vst [vmem:[#allocation45_spill] sm:$0xff] %v3667_v1 }
  0xaf   : >> { %2273 = vmatpush3.bf16.msra.mxu1 %v4616_v36  ;;  %v4619_v36 = vcombine.low %v3479_v47, %v3482_v48 }
  0xb0   : >> { %v3659_v37 = vpack.c.bf16 %v4531_v29, %v4532_v35  ;;  %v709_v54 = vpack.c.bf16 %v2670_v30, %v2669_v52 }
  0xb1   : >> { %v3661_v46 = vpop.permute.xlu0 %2672  ;;  %v2678_v61 = vpop.permute.xlu1 %2677 }
  0xb2   : >> { %v4534_v42 = vunpack.i.h.bf16 %v3661_v46  ;;  %v4535_v43 = vunpack.i.l.bf16 %v3661_v46  ;;  %2274 = vmatprep.subr.bf16.mxu1 %v3659_v37  ;;  %v2680_v29 = vunpack.i.h.bf16 %v2678_v61  ;;  %v2679_v35 = vunpack.i.l.bf16 %v2678_v61 }
  0xb3   : >> { %2275 = vmatpush3.bf16.msra.mxu1 %v4619_v36 }
  0xb4   : >> { %2276 = vmatprep.subr.bf16.mxu1 %v3667_v1  ;;  %v3682_v0 = vpack.c.bf16 %v4534_v42, %v4535_v43  ;;  %v712_v61 = vpack.c.bf16 %v2680_v29, %v2679_v35 }
  0xb5   : >> { %v3676_v2 = vpop.permute.xlu0 %2682  ;;  %v2688_v3 = vpop.permute.xlu1 %2687 }
  0xb6   : >> { %4620 = vst [vmem:[#allocation46_spill] sm:$0xff] %v3682_v0  ;;  %v2690_v58 = vunpack.i.h.bf16 %v2688_v3  ;;  %v2689_v4 = vunpack.i.l.bf16 %v2688_v3  ;;  %v2685_v36 = vunpack.i.h.bf16 %v3676_v2  ;;  %v2684_v5 = vunpack.i.l.bf16 %v3676_v2 }
  0xb7   : >> { %2277 = vmatpush3.bf16.msra.mxu1 %v709_v54 }
  0xb8   : >> { %2278 = vmatprep.subr.bf16.mxu1 %v3682_v0  ;;  %v437_v47 = vsel %vm435_vm0, %v2689_v4, %v2669_v52  ;;  %v439_v48 = vsel %vm435_vm0, %v2690_v58, %v2670_v30  ;;  %v715_v30 = vpack.c.bf16 %v2685_v36, %v2684_v5 }
  0xb9   : >> { %v3689_v6 = vpop.permute.xlu0 %2692  ;;  %v2698_v27 = vpop.permute.xlu1 %2697  ;;  %v708_v26 = vpack.c.bf16 %v439_v48, %v437_v47 }
  0xba   : >> { %v2700_v42 = vunpack.i.h.bf16 %v2698_v27  ;;  %v2699_v43 = vunpack.i.l.bf16 %v2698_v27  ;;  %v2695_v54 = vunpack.i.h.bf16 %v3689_v6  ;;  %v2694_v33 = vunpack.i.l.bf16 %v3689_v6 }
  0xbb   : >> { %862 = vmatprep.subr.bf16.mxu0 %v708_v26  ;;  %2279 = vmatpush3.bf16.msra.mxu1 %v712_v61 }
  0xbc   : >> { %2280 = vmatprep.subr.bf16.mxu1 %v3510_v44  ;;  %v436_v3 = vsel %vm435_vm0, %v2699_v43, %v2689_v4  ;;  %v438_v52 = vsel %vm435_vm0, %v2700_v42, %v2690_v58  ;;  %v718_v42 = vpack.c.bf16 %v2695_v54, %v2694_v33 }
  0xbd   : >> { %v3696_v2 = vpop.permute.xlu0 %2702  ;;  %v2708_v34 = vpop.permute.xlu1 %2707  ;;  %v707_v0 = vpack.c.bf16 %v438_v52, %v436_v3 }
  0xbe   : >> { %v4537_v47 = vunpack.i.h.bf16 %v3696_v2  ;;  %v4538_v26 = vunpack.i.l.bf16 %v3696_v2  ;;  %v2710_v27 = vunpack.i.h.bf16 %v2708_v34  ;;  %v2709_v48 = vunpack.i.l.bf16 %v2708_v34 }
  0xbf   : >> { %2281 = vmatpush3.bf16.msra.mxu1 %v715_v30  ;;  %863 = vmatpush1.bf16.msra.mxu0 %v707_v0 }
  0xc0   : >> { %2282 = vmatprep.subr.bf16.mxu1 %v3512_v45  ;;  %v441_v4 = vsel %vm435_vm0, %v2709_v48, %v2679_v35  ;;  %v443_v58 = vsel %vm435_vm0, %v2710_v27, %v2680_v29  ;;  %v3707_v6 = vpack.c.bf16 %v4537_v47, %v4538_v26 }
  0xc1   : >> { %v2713_v43 = vpop.permute.xlu0 %2712  ;;  %v3709_v61 = vpop.permute.xlu1 %2717  ;;  %v711_v3 = vpack.c.bf16 %v443_v58, %v441_v4 }
  0xc2   : >> { %v2715_v34 = vunpack.i.h.bf16 %v2713_v43  ;;  %v2714_v52 = vunpack.i.l.bf16 %v2713_v43  ;;  %v4540_v0 = vunpack.i.h.bf16 %v3709_v61  ;;  %v4541_v30 = vunpack.i.l.bf16 %v3709_v61 }
  0xc3   : >> { %864 = vmatprep.subr.bf16.mxu0 %v711_v3  ;;  %2283 = vmatpush3.bf16.msra.mxu1 %v718_v42 }
  0xc4   : >> { %v3717_v29 = vpack.c.bf16 %v4540_v0, %v4541_v30  ;;  %2284 = vmatprep.subr.bf16.mxu1 %v3707_v6  ;;  %v440_v35 = vsel %vm435_vm0, %v2714_v52, %v2709_v48  ;;  %v442_v4 = vsel %vm435_vm0, %v2715_v34, %v2710_v27 }
  0xc5   : >> { %v2723_v58 = vpop.permute.xlu0 %2722  ;;  %v2728_v43 = vpop.permute.xlu1 %2727  ;;  %v710_v47 = vpack.c.bf16 %v442_v4, %v440_v35 }
  0xc6   : >> { %v2725_v26 = vunpack.i.h.bf16 %v2723_v58  ;;  %v2724_v45 = vunpack.i.l.bf16 %v2723_v58  ;;  %v2730_v3 = vunpack.i.h.bf16 %v2728_v43  ;;  %v2729_v42 = vunpack.i.l.bf16 %v2728_v43 }
  0xc7   : >> { %865 = vmatpush1.bf16.msra.mxu0 %v710_v47  ;;  %2285 = vmatpush3.bf16.msra.mxu1 %v3516_v50  ;;  %v3730_v58 = vcombine.low %v4589_v7, %v4588_v9 }
  0xc8   : >> { %2286 = vmatprep.subr.bf16.mxu1 %v3717_v29  ;;  %v482_v0 = vsel %vm480_vm1, %v2724_v45, %v2684_v5  ;;  %v484_v30 = vsel %vm480_vm1, %v2725_v26, %v2685_v36  ;;  %v481_v48 = vsel %vm480_vm1, %v2729_v42, %v2724_v45  ;;  %v483_v27 = vsel %vm480_vm1, %v2730_v3, %v2725_v26 }
  0xc9   : >> { %v2733_v34 = vpop.permute.xlu0 %2732  ;;  %v2738_v52 = vpop.permute.xlu1 %2737  ;;  %v714_v35 = vpack.c.bf16 %v484_v30, %v482_v0  ;;  %v713_v4 = vpack.c.bf16 %v483_v27, %v481_v48  ;;  %v3735_v5 = vcombine.high %v4587_v11, %v4586_v13 }
  0xca   : >> { %v2735_v47 = vunpack.i.h.bf16 %v2733_v34  ;;  %v2734_v43 = vunpack.i.l.bf16 %v2733_v34  ;;  %v2740_v44 = vunpack.i.h.bf16 %v2738_v52  ;;  %v2739_v1 = vunpack.i.l.bf16 %v2738_v52 }
  0xcb   : >> { %866 = vmatprep.subr.bf16.mxu0 %v714_v35  ;;  %2287 = vmatpush3.bf16.msra.mxu1 %v3520_v56  ;;  %v3750_v35 = vcombine.high %v4585_v15, %v4584_v17 }
  0xcc   : >> { %867 = vmatpush1.bf16.msra.mxu0 %v713_v4  ;;  %v486_v45 = vsel %vm480_vm1, %v2734_v43, %v2694_v33  ;;  %v488_v36 = vsel %vm480_vm1, %v2735_v47, %v2695_v54  ;;  %v485_v26 = vsel %vm480_vm1, %v2739_v1, %v2734_v43  ;;  %v487_v0 = vsel %vm480_vm1, %v2740_v44, %v2735_v47 }
  0xcd   : >> { %v2743_v30 = vpop.permute.xlu0 %2742  ;;  %v2748_v3 = vpop.permute.xlu1 %2747  ;;  %v717_v42 = vpack.c.bf16 %v488_v36, %v486_v45  ;;  %v716_v48 = vpack.c.bf16 %v487_v0, %v485_v26  ;;  %v3746_v44 = vcombine.low %v4587_v11, %v4586_v13  ;;  %v4621_v43 = vunpack.i.l.bf16 %v3635_v32 }
  0xce   : >> { %1033 = vmatmul.mubr.bf16.vlgmr.msra.gmra.mrb[0].mxu1 %v3730_v58  ;;  %v2745_v27 = vunpack.i.h.bf16 %v2743_v30  ;;  %v2744_v34 = vunpack.i.l.bf16 %v2743_v30  ;;  %v2750_v54 = vunpack.i.h.bf16 %v2748_v3  ;;  %v2749_v1 = vunpack.i.l.bf16 %v2748_v3 }
  0xcf   : >> { %868 = vmatprep.subr.bf16.mxu0 %v717_v42  ;;  %1040 = vmatprep.mubr.bf16.mxu1 %v3735_v5  ;;  %v4622_v36 = vunpack.i.h.bf16 %v3635_v32 }
  0xd0   : >> { %869 = vmatpush1.bf16.msra.mxu0 %v716_v48  ;;  %v538_v45 = vsel %vm435_vm0, %v2744_v34, %v4621_v43  ;;  %v537_v48 = vsel %vm435_vm0, %v2749_v1, %v2744_v34  ;;  %v4623_v43 = vunpack.i.l.bf16 %v3645_v49  ;;  %v3784_v1 = vcombine.high %v3355_v19, %v3355_v19 }
  0xd1   : >> { %v2753_v52 = vpop.permute.xlu0 %2752  ;;  %v2758_v33 = vpop.permute.xlu1 %2757  ;;  %870 = vmatprep.subr.bf16.mxu0 %v3532_v23  ;;  %v540_v26 = vsel %vm435_vm0, %v2745_v27, %v4622_v36 }
  0xd2   : >> { %v2755_v4 = vunpack.i.h.bf16 %v2753_v52  ;;  %v2754_v47 = vunpack.i.l.bf16 %v2753_v52  ;;  %v2760_v3 = vunpack.i.h.bf16 %v2758_v33  ;;  %v2759_v42 = vunpack.i.l.bf16 %v2758_v33 }
  0xd3   : >> { %v539_v52 = vsel %vm435_vm0, %v2750_v54, %v2745_v27  ;;  %v3763_v9 = vpack.c.bf16 %v540_v26, %v538_v45  ;;  %v4624_v33 = vunpack.i.h.bf16 %v3645_v49  ;;  %v3780_v54 = vcombine.low %v4585_v15, %v4584_v17 }
  0xd4   : >> { %871 = vmatpush1.bf16.msra.mxu0 %v3534_v28  ;;  %v542_v36 = vsel %vm435_vm0, %v2754_v47, %v4623_v43  ;;  %v3776_v27 = vpack.c.bf16 %v539_v52, %v537_v48  ;;  %v541_v26 = vsel %vm435_vm0, %v2759_v42, %v2754_v47  ;;  %v4625_v52 = vunpack.i.l.bf16 %v3633_v31 }
  0xd5   : >> { %v2763_v0 = vpop.permute.xlu0 %2762  ;;  %v2768_v30 = vpop.permute.xlu1 %2767  ;;  %872 = vmatprep.subr.bf16.mxu0 %v3540_v38  ;;  %v544_v11 = vsel %vm435_vm0, %v2755_v4, %v4624_v33 }
  0xd6   : >> { %1041 = vmatmul.mubr.bf16.gmra.mrb[4].mxu1 %v3746_v44  ;;  %v2764_v7 = vunpack.i.l.bf16 %v2763_v0  ;;  %v2765_v32 = vunpack.i.h.bf16 %v2763_v0  ;;  %v543_v0 = vsel %vm435_vm0, %v2760_v3, %v2755_v4  ;;  %v2770_v43 = vunpack.i.h.bf16 %v2768_v30 }
  0xd7   : >> { %1048 = vmatprep.mubr.bf16.mxu1 %v3750_v35  ;;  %v2769_v33 = vunpack.i.l.bf16 %v2768_v30  ;;  %v3790_v48 = vpack.c.bf16 %v544_v11, %v542_v36  ;;  %v4626_v4 = vunpack.i.h.bf16 %v3633_v31  ;;  %v3806_v30 = vpack.c.bf16 %v543_v0, %v541_v26 }
  0xd8   : >> { %873 = vmatpush1.bf16.msra.mxu0 %v3542_v53  ;;  %v582_v15 = vsel %vm480_vm1, %v2764_v7, %v4625_v52  ;;  %v583_v26 = vsel %vm480_vm1, %v2770_v43, %v2765_v32 }
  0xd9   : >> { %v3773_v13 = vpop.permute.xlu0 %2772  ;;  %v2778_v34 = vpop.permute.xlu1 %2777  ;;  %874 = vmatprep.subr.bf16.mxu0 %v3763_v9  ;;  %v584_v47 = vsel %vm480_vm1, %v2765_v32, %v4626_v4  ;;  %v581_v4 = vsel %vm480_vm1, %v2769_v33, %v2764_v7 }
  0xda   : >> { %v4552_v45 = vunpack.i.h.bf16 %v3773_v13  ;;  %v4553_v49 = vunpack.i.l.bf16 %v3773_v13  ;;  %v2780_v39 = vunpack.i.h.bf16 %v2778_v34  ;;  %v2779_v24 = vunpack.i.l.bf16 %v2778_v34 }
  0xdb   : >> { %v3815_v31 = vpack.c.bf16 %v584_v47, %v582_v15  ;;  %v4628_v15 = vunpack.i.h.bf16 %v3661_v46 }
  0xdc   : >> { %v3799_v17 = vpack.c.bf16 %v4552_v45, %v4553_v49  ;;  %875 = vmatpush1.bf16.msra.mxu0 %v3776_v27  ;;  %v3836_v49 = vpack.c.bf16 %v583_v26, %v581_v4 }
  0xdd   : >> { %v2783_v11 = vpop.permute.xlu0 %2782  ;;  %876 = vmatprep.subr.bf16.mxu0 %v3790_v48  ;;  %v3808_v3 = vpop.permute.xlu1 %2787  ;;  %v588_v7 = vsel %vm480_vm1, %v2780_v39, %v4628_v15  ;;  %v3866_v15 = vcombine.low %v4634_v16, %v4633_v18 }
  0xde   : >> { %v2785_v42 = vunpack.i.h.bf16 %v2783_v11  ;;  %v2784_v36 = vunpack.i.l.bf16 %v2783_v11  ;;  %1049 = vmatmul.mubr.bf16.gmra.mrb[8].mxu1 %v3780_v54  ;;  %2364 = vmatprep.subr.bf16.mxu1 %v3799_v17  ;;  %v4554_v34 = vunpack.i.h.bf16 %v3808_v3  ;;  %v4555_v52 = vunpack.i.l.bf16 %v3808_v3 }
  0xdf   : >> { %2365 = vmatpush3.bf16.msra.mxu1 %v3799_v17  ;;  %1056 = vmatprep.mubr.bf16.mxu1 %v3784_v1  ;;  %v4627_v11 = vunpack.i.l.bf16 %v3661_v46  ;;  %v3848_v46 = vcombine.low %v4630_v8, %v4629_v10  ;;  %v4636_v8 = vunpack.i.h.bf16 %v3696_v2 }
  0xe0   : >> { %877 = vmatpush1.bf16.msra.mxu0 %v3806_v30  ;;  %v3825_v0 = vpack.c.bf16 %v4554_v34, %v4555_v52  ;;  %v585_v32 = vsel %vm480_vm1, %v2784_v36, %v2779_v24  ;;  %v587_v43 = vsel %vm480_vm1, %v2785_v42, %v2780_v39  ;;  %v3840_v34 = vcombine.low %v3355_v19, %v3355_v19 }
  0xe1   : >> { %v586_v45 = vsel %vm480_vm1, %v2779_v24, %v4627_v11  ;;  %v2793_v33 = vpop.permute.xlu0 %2792  ;;  %878 = vmatprep.subr.bf16.mxu0 %v3815_v31  ;;  %v2798_v47 = vpop.permute.xlu1 %2797  ;;  %v3851_v24 = vpack.c.bf16 %v587_v43, %v585_v32  ;;  %v4635_v43 = vunpack.i.l.bf16 %v3696_v2 }
  0xe2   : >> { %2366 = vmatprep.subr.bf16.mxu1 %v3825_v0  ;;  %v3843_v11 = vpack.c.bf16 %v588_v7, %v586_v45  ;;  %v2795_v42 = vunpack.i.h.bf16 %v2793_v33  ;;  %v2794_v36 = vunpack.i.l.bf16 %v2793_v33  ;;  %v2800_v4 = vunpack.i.h.bf16 %v2798_v47 }
  0xe3   : >> { %2367 = vmatpush3.bf16.msra.mxu1 %v3825_v0  ;;  %v2799_v26 = vunpack.i.l.bf16 %v2798_v47 }
  0xe4   : >> { %879 = vmatpush1.bf16.msra.mxu0 %v3836_v49  ;;  %1376 = vmatprep.subr.bf16.mxu1 %v3532_v23  ;;  %v3862_v23 = vcombine.low %v4632_v12, %v4631_v14  ;;  %v638_v52 = vsel %vm435_vm0, %v2794_v36, %v4635_v43  ;;  %v640_v47 = vsel %vm435_vm0, %v2795_v42, %v4636_v8  ;;  %v4637_v8 = vunpack.i.l.bf16 %v3709_v61 }
  0xe5   : >> { %v2803_v39 = vpop.permute.xlu0 %2802  ;;  %880 = vmatprep.subr.bf16.mxu0 %v3843_v11  ;;  %v2808_v45 = vpop.permute.xlu1 %2807  ;;  %v637_v14 = vsel %vm435_vm0, %v2799_v26, %v2794_v36  ;;  %v639_v16 = vsel %vm435_vm0, %v2800_v4, %v2795_v42  ;;  %v4638_v36 = vunpack.i.h.bf16 %v3709_v61  ;;  %v3900_v43 = vcombine.low %v3360_v20, %v3360_v20 }
  0xe6   : >> { %1057 = vmatmul.mubr.bf16.gmra.mrb[12].mxu1 %v3840_v34  ;;  %v2805_v7 = vunpack.i.h.bf16 %v2803_v39  ;;  %v2804_v32 = vunpack.i.l.bf16 %v2803_v39  ;;  %v2810_v10 = vunpack.i.h.bf16 %v2808_v45  ;;  %v2809_v12 = vunpack.i.l.bf16 %v2808_v45 }
  0xe7   : >> { %2368 = vmatprep.mubr.msk.bf16.mxu1 %vm845_vm2, %v3848_v46  ;;  %v3880_v39 = vpack.c.bf16 %v640_v47, %v638_v52  ;;  %v3883_v2 = vpack.c.bf16 %v639_v16, %v637_v14 }
  0xe8   : >> { %881 = vmatpush1.bf16.msra.mxu0 %v3851_v24  ;;  %v642_v45 = vsel %vm435_vm0, %v2804_v32, %v4637_v8  ;;  %v644_v42 = vsel %vm435_vm0, %v2805_v7, %v4638_v36  ;;  %v641_v14 = vsel %vm435_vm0, %v2809_v12, %v2804_v32  ;;  %v643_v16 = vsel %vm435_vm0, %v2810_v10, %v2805_v7 }
  0xe9   : >> { %882 = vmatprep.subr.bf16.mxu0 %v3558_v40  ;;  %v2813_v33 = vpop.permute.xlu0 %2812  ;;  %v2818_v18 = vpop.permute.xlu1 %2817  ;;  %v746_v8 = vpack.c.bf16 %v643_v16, %v641_v14  ;;  %v4639_v10 = vunpack.i.l.bf16 %v3773_v13 }
  0xea   : >> { %v2815_v4 = vunpack.i.h.bf16 %v2813_v33  ;;  %v2814_v26 = vunpack.i.l.bf16 %v2813_v33  ;;  %v2820_v52 = vunpack.i.h.bf16 %v2818_v18  ;;  %v2819_v61 = vunpack.i.l.bf16 %v2818_v18 }
  0xeb   : >> { %v747_v33 = vpack.c.bf16 %v644_v42, %v642_v45  ;;  %v4640_v18 = vunpack.i.h.bf16 %v3773_v13  ;;  %v4641_v13 = vunpack.i.l.bf16 %v3808_v3 }
  0xec   : >> { %883 = vmatpush1.bf16.msra.mxu0 %v3560_v41  ;;  %v682_v12 = vsel %vm480_vm1, %v2814_v26, %v4639_v10  ;;  %v683_v32 = vsel %vm480_vm1, %v2820_v52, %v2815_v4 }
  0xed   : >> { %884 = vmatprep.subr.bf16.mxu0 %v3564_v59  ;;  %v2828_v47 = vpop.permute.xlu1 %2827  ;;  %v684_v7 = vsel %vm480_vm1, %v2815_v4, %v4640_v18 }
  0xee   : >> { %2369 = vmatmul.mubr.msk.bf16.vlgmr.msra.gmra.mrb[16].mxu1 %vm845_vm2, %v3862_v23  ;;  %v2830_v45 = vunpack.i.h.bf16 %v2828_v47  ;;  %v2829_v42 = vunpack.i.l.bf16 %v2828_v47  ;;  %v2224_v47 = vcombine.low %v3573_v57, %v3579_v21 }
  0xef   : >> { %1377 = vmatpush1.bf16.msra.mxu1 %v3534_v28  ;;  %2372 = vmatprep.mubr.msk.bf16.mxu1 %vm845_vm2, %v3866_v15  ;;  %v2823_v28 = vpop.permute.xlu0 %2822 }
  0xf0   : >> { %885 = vmatpush1.bf16.msra.mxu0 %v3568_v62  ;;  %1378 = vmatprep.subr.bf16.mxu1 %v3540_v38  ;;  %v2825_v36 = vunpack.i.h.bf16 %v2823_v28  ;;  %v2824_v38 = vunpack.i.l.bf16 %v2823_v28 }
  0xf1   : >> { %886 = vmatprep.subr.bf16.mxu0 %v3880_v39 }
  0xf2   : >> { %v686_v4 = vsel %vm480_vm1, %v2824_v38, %v4641_v13  ;;  %v687_v28 = vsel %vm480_vm1, %v2830_v45, %v2825_v36 }
  0xf3   : >> { %1379 = vmatpush1.bf16.msra.mxu1 %v3542_v53  ;;  %v681_v53 = vsel %vm480_vm1, %v2819_v61, %v2814_v26  ;;  %v4642_v26 = vunpack.i.h.bf16 %v3808_v3 }
  0xf4   : >> { %1380 = vmatprep.subr.bf16.mxu1 %v3763_v9  ;;  %887 = vmatpush1.bf16.msra.mxu0 %v3883_v2  ;;  %v750_v9 = vpack.c.bf16 %v684_v7, %v682_v12  ;;  %v749_v14 = vpack.c.bf16 %v683_v32, %v681_v53  ;;  %v2227_v7 = vcombine.low %v3591_v63, %v3603_v25 }
  0xf5   : >> { %888 = vmatprep.subr.bf16.mxu0 %v747_v33  ;;  %v688_v16 = vsel %vm480_vm1, %v2825_v36, %v4642_v26 }
  0xf6   : >> { %2373 = vmatmul.mubr.msk.bf16.gmra.mrb[20].mxu1 %vm845_vm2, %v3900_v43  ;;  %v753_v52 = vpack.c.bf16 %v688_v16, %v686_v4 }
  0xf7   : >> { %1381 = vmatpush1.bf16.msra.mxu1 %v3776_v27  ;;  %1408 = vmatprep.mubr.bf16.mxu1 %v3524_v51  ;;  %v685_v27 = vsel %vm480_vm1, %v2829_v42, %v2824_v38 }
  0xf8   : >> { %1382 = vmatprep.subr.bf16.mxu1 %v3790_v48  ;;  %889 = vmatpush1.bf16.msra.mxu0 %v746_v8  ;;  %v752_v48 = vpack.c.bf16 %v687_v28, %v685_v27  ;;  %v2226_v28 = vcombine.low %v3576_v55, %v3582_v22 }
  0xf9   : >> { %929 = vmatprep.subr.bf16.mxu0 %v750_v9 }
  0xfb   : >> { %1383 = vmatpush1.bf16.msra.mxu1 %v3806_v30  ;;  %891 = vmatmul.mubr.bf16.vlgmr.msra.gmra.mrb[0].mxu0 %v3730_v58  ;;  %v3937_v30 = vpop.permute.xlu0 %2832 }
  0xfc   : >> { %1384 = vmatprep.subr.bf16.mxu1 %v3815_v31  ;;  %930 = vmatpush1.bf16.msra.mxu0 %v749_v14  ;;  %v2225_v31 = vcombine.high %v3573_v57, %v3579_v21 }
  0xfd   : >> { %931 = vmatprep.subr.bf16.mxu0 %v753_v52  ;;  %900 = vmatprep.mubr.bf16.mxu0 %v3735_v5 }
  0xff   : >> { %1385 = vmatpush1.bf16.msra.mxu1 %v3836_v49  ;;  %v3941_v49 = vpop.permute.xlu1 %2837 }
 0x100   : >> { %1386 = vmatprep.subr.bf16.mxu1 %v3843_v11  ;;  %932 = vmatpush1.bf16.msra.mxu0 %v752_v48  ;;  %v2835_v11 = vunpack.i.h.bf16 %v3937_v30 }
 0x101   : >> { %2318 = vmatprep.subr.bf16.mxu0 %v3707_v6  ;;  %v2843_v6 = vpop.permute.xlu0 %2842 }
 0x102   : >> { %v2844_v36 = vunpack.i.l.bf16 %v2843_v6 }
 0x103   : >> { %1387 = vmatpush1.bf16.msra.mxu1 %v3851_v24  ;;  %901 = vmatmul.mubr.bf16.gmra.mrb[4].mxu0 %v3746_v44  ;;  %v2834_v24 = vunpack.i.l.bf16 %v3937_v30  ;;  %v4648_v30 = vld [vmem:[#allocation41_spill] sm:$0xff] }
 0x104   : >> { %1388 = vmatprep.subr.bf16.mxu1 %v3558_v40  ;;  %910 = vmatprep.mubr.bf16.mxu0 %v3750_v35  ;;  %v3948_v40 = vpop.permute.xlu1 %2847 }
 0x105   : >> { %v3950_v3 = vpop.permute.xlu0 %2852  ;;  %v1295_v38 = vsel %vm435_vm0, %v2834_v24, %v2835_v11  ;;  %v2850_v57 = vunpack.i.h.bf16 %v3948_v40  ;;  %v2849_v21 = vunpack.i.l.bf16 %v3948_v40  ;;  %v1294_v45 = vsel %vm435_vm0, %v2844_v36, %v2834_v24  ;;  %v4645_v36 = vld [vmem:[#allocation43_spill] sm:$0xff] }
 0x106   : >> { %v2854_v18 = vunpack.i.l.bf16 %v3950_v3 }
 0x107   : >> { %1389 = vmatpush1.bf16.msra.mxu1 %v3560_v41  ;;  %v4643_v41 = vmov 0  }
 0x108   : >> { %1390 = vmatprep.subr.bf16.mxu1 %v3564_v59  ;;  %v2858_v59 = vpop.permute.xlu1 %2857 }
 0x109   : >> { %v2860_v32 = vunpack.i.h.bf16 %v2858_v59  ;;  %v2859_v42 = vunpack.i.l.bf16 %v2858_v59 }
 0x10b   : >> { %1391 = vmatpush1.bf16.msra.mxu1 %v3568_v62  ;;  %911 = vmatmul.mubr.bf16.gmra.mrb[8].mxu0 %v3780_v54  ;;  %v3954_v62 = vpop.permute.xlu0 %2862  ;;  %v1298_v27 = vsel %vm435_vm0, %v2859_v42, %v2849_v21  ;;  %v4647_v42 = vld [vmem:[#allocation46_spill] sm:$0xff] }
 0x10c   : >> { %1392 = vmatprep.subr.bf16.mxu1 %v3880_v39  ;;  %920 = vmatprep.mubr.bf16.mxu0 %v3784_v1  ;;  %v2840_v39 = vunpack.i.h.bf16 %v3941_v49  ;;  %v3962_v61 = vpop.permute.xlu1 %2867  ;;  %v2864_v13 = vunpack.i.l.bf16 %v3954_v62 }
 0x10d   : >> { %v2870_v4 = vunpack.i.h.bf16 %v3962_v61 }
 0x10f   : >> { %1393 = vmatpush1.bf16.msra.mxu1 %v3883_v2  ;;  %v2839_v2 = vunpack.i.l.bf16 %v3941_v49  ;;  %v2873_v12 = vpop.permute.xlu0 %2872 }
 0x110   : >> { %1394 = vmatprep.subr.bf16.mxu1 %v747_v33  ;;  %v2228_v33 = vcombine.high %v3591_v63, %v3603_v25  ;;  %v3985_v53 = vpop.permute.xlu1 %2877  ;;  %v2865_v63 = vunpack.i.h.bf16 %v3954_v62 }
 0x111   : >> { %v1297_v10 = vsel %vm435_vm0, %v2839_v2, %v2840_v39  ;;  %v2880_v59 = vunpack.i.h.bf16 %v3985_v53  ;;  %v2879_v62 = vunpack.i.l.bf16 %v3985_v53 }
 0x112   : >> { %v1372_v49 = vpack.c.bf16 %v2870_v4, %v2865_v63 }
 0x113   : >> { %1395 = vmatpush1.bf16.msra.mxu1 %v746_v8  ;;  %921 = vmatmul.mubr.bf16.gmra.mrb[12].mxu0 %v3840_v34  ;;  %v2845_v8 = vunpack.i.h.bf16 %v2843_v6  ;;  %v4001_v26 = vpop.permute.xlu0 %2882  ;;  %v2874_v6 = vunpack.i.l.bf16 %v2873_v12 }
 0x114   : >> { %1396 = vmatprep.subr.bf16.mxu1 %v750_v9  ;;  %961 = vmatprep.mubr.bf16.mxu0 %v4643_v41  ;;  %v1365_v9 = vpack.c.bf16 %v1297_v10, %v1295_v38  ;;  %v2884_v55 = vunpack.i.l.bf16 %v4001_v26  ;;  %v2888_v22 = vpop.permute.xlu1 %2887 }
 0x117   : >> { %1397 = vmatpush1.bf16.msra.mxu1 %v749_v14  ;;  %v1299_v14 = vsel %vm435_vm0, %v2849_v21, %v2850_v57 }
 0x118   : >> { %1398 = vmatprep.subr.bf16.mxu1 %v753_v52 }
 0x11b   : >> { %1399 = vmatpush1.bf16.msra.mxu1 %v752_v48  ;;  %2207 = vmatmul.mubr.msk.bf16.vlgmr.msra.gmra.mrb[0].mxu0 %vm845_vm2, %v3848_v46  ;;  %v2875_v48 = vunpack.i.h.bf16 %v2873_v12  ;;  %v1343_v12 = vsel %vm480_vm1, %v2879_v62, %v2880_v59 }
 0x11c   : >> { %2319 = vmatpush3.bf16.msra.mxu0 %v3516_v50  ;;  %1400 = vmatprep.subr.bf16.mxu1 %v2225_v31  ;;  %v2855_v50 = vunpack.i.h.bf16 %v3950_v3  ;;  %v2885_v31 = vunpack.i.h.bf16 %v4001_v26 }
 0x11d   : >> { %2320 = vmatprep.subr.bf16.mxu0 %v3717_v29  ;;  %971 = vmatprep.mubr.bf16.mxu0 %v4643_v41  ;;  %v1296_v29 = vsel %vm435_vm0, %v2845_v8, %v2839_v2  ;;  %v4644_v8 = vld [vmem:[#allocation44_spill] sm:$0xff] }
 0x11e   : >> { %v1301_v25 = vsel %vm435_vm0, %v2854_v18, %v2855_v50  ;;  %v1364_v16 = vpack.c.bf16 %v1296_v29, %v1294_v45  ;;  %v2229_v38 = vcombine.low %v4645_v36, %v4644_v8  ;;  %v1345_v21 = vsel %vm480_vm1, %v2884_v55, %v2885_v31 }
 0x11f   : >> { %1401 = vmatpush1.bf16.msra.mxu1 %v2224_v47  ;;  %v1368_v52 = vpack.c.bf16 %v1301_v25, %v1299_v14  ;;  %v2890_v47 = vunpack.i.h.bf16 %v2888_v22  ;;  %v1374_v53 = vpack.c.bf16 %v1345_v21, %v1343_v12  ;;  %v1366_v45 = vpack.c.bf16 %v2840_v39, %v2835_v11  ;;  %v4649_v11 = vld [vmem:[#allocation42_spill] sm:$0xff] }
 0x120   : >> { %2321 = vmatpush3.bf16.msra.mxu0 %v3520_v56  ;;  %1402 = vmatprep.subr.bf16.mxu1 %v2228_v33  ;;  %v2869_v56 = vunpack.i.l.bf16 %v3962_v61  ;;  %v2889_v33 = vunpack.i.l.bf16 %v2888_v22  ;;  %v1375_v40 = vpack.c.bf16 %v2885_v31, %v2880_v59 }
 0x121   : >> { %2322 = vmatprep.subr.bf16.mxu0 %v3799_v17  ;;  %v1300_v17 = vsel %vm435_vm0, %v2860_v32, %v2854_v18  ;;  %v4646_v18 = vld [vmem:[#allocation45_spill] sm:$0xff] }
 0x122   : >> { %v1341_v24 = vsel %vm480_vm1, %v2869_v56, %v2870_v4  ;;  %v1367_v2 = vpack.c.bf16 %v1300_v17, %v1298_v27  ;;  %v1340_v61 = vsel %vm480_vm1, %v2875_v48, %v2869_v56  ;;  %v1342_v32 = vsel %vm480_vm1, %v2889_v33, %v2879_v62 }
 0x123   : >> { %1403 = vmatpush1.bf16.msra.mxu1 %v2227_v7  ;;  %2208 = vmatmul.mubr.msk.bf16.gmra.mrb[4].mxu0 %vm845_vm2, %v3862_v23  ;;  %v1344_v7 = vsel %vm480_vm1, %v2890_v47, %v2884_v55 }
 0x124   : >> { %2323 = vmatpush3.bf16.msra.mxu0 %v3643_v60  ;;  %1404 = vmatprep.subr.bf16.mxu1 %v1365_v9  ;;  %v1339_v60 = vsel %vm480_vm1, %v2864_v13, %v2865_v63  ;;  %v1373_v29 = vpack.c.bf16 %v1344_v7, %v1342_v32  ;;  %v1369_v9 = vpack.c.bf16 %v2855_v50, %v2850_v57  ;;  %v4079_v63 = vpop.permute.xlu1 %762 }
 0x125   : >> { %2324 = vmatprep.subr.bf16.mxu0 %v3825_v0  ;;  %981 = vmatprep.mubr.bf16.mxu0 %v4643_v41  ;;  %v1338_v0 = vsel %vm480_vm1, %v2874_v6, %v2864_v13  ;;  %v1371_v10 = vpack.c.bf16 %v1341_v24, %v1339_v60  ;;  %v4081_v13 = vpop.permute.xlu0 %757 }
 0x127   : >> { %1405 = vmatpush1.bf16.msra.mxu1 %v1364_v16 }
 0x128   : >> { %2325 = vmatpush3.bf16.msra.mxu0 %v3659_v37  ;;  %1406 = vmatprep.subr.bf16.mxu1 %v1368_v52  ;;  %v1370_v37 = vpack.c.bf16 %v1340_v61, %v1338_v0  ;;  %v4083_v56 = vpop.permute.xlu1 %767 }
 0x129   : >> { %2326 = vmatprep.subr.bf16.mxu0 %v2226_v28  ;;  %v4085_v28 = vpop.permute.xlu0 %772 }
 0x12b   : >> { %1407 = vmatpush1.bf16.msra.mxu1 %v1367_v2  ;;  %2209 = vmatmul.mubr.msk.bf16.gmra.mrb[8].mxu0 %vm845_vm2, %v3866_v15 }
 0x12c   : >> { %2327 = vmatpush3.bf16.msra.mxu0 %v4646_v18  ;;  %991 = vmatprep.mubr.bf16.mxu0 %v4643_v41  ;;  %v4087_v27 = vpop.permute.xlu1 %777 }
 0x12d   : >> { %2328 = vmatprep.subr.bf16.mxu0 %v2229_v38  ;;  %1447 = vmatprep.subr.bf16.mxu1 %v1371_v10  ;;  %v4104_v33 = vpop.permute.xlu0 %782 }
 0x12e   : >> { %1409 = vmatmul.mubr.bf16.vlgmr.msra.gmra.mrb[24].mxu1 %v3730_v58 }
 0x12f   : >> { %1418 = vmatprep.mubr.bf16.mxu1 %v3735_v5  ;;  %1448 = vmatpush1.bf16.msra.mxu1 %v1370_v37 }
 0x130   : >> { %2329 = vmatpush3.bf16.msra.mxu0 %v4647_v42  ;;  %1449 = vmatprep.subr.bf16.mxu1 %v1374_v53  ;;  %v4097_v24 = vpop.permute.xlu1 %787 }
 0x131   : >> { %2330 = vmatprep.subr.bf16.mxu0 %v1366_v45 }
 0x133   : >> { %2210 = vmatmul.mubr.msk.bf16.gmra.mrb[12].mxu0 %vm845_vm2, %v3900_v43  ;;  %1450 = vmatpush1.bf16.msra.mxu1 %v1373_v29 }
 0x134   : >> { %2331 = vmatpush3.bf16.msra.mxu0 %v4648_v30  ;;  %1550 = vmatprep.mubr.bf16.mxu0 %v3524_v51 }
 0x135   : >> { %2332 = vmatprep.subr.bf16.mxu0 %v1369_v9 }
 0x136   : >> { %1419 = vmatmul.mubr.bf16.gmra.mrb[28].mxu1 %v3746_v44 }
 0x137   : >> { %1428 = vmatprep.mubr.bf16.mxu1 %v3750_v35 }
 0x138   : >> { %2333 = vmatpush3.bf16.msra.mxu0 %v4649_v11 }
 0x139   : >> { %2376 = vmatprep.subr.bf16.mxu0 %v1372_v49 }
 0x13b   : >> { %1551 = vmatmul.mubr.bf16.vlgmr.msra.gmra.mrb[16].mxu0 %v3730_v58 }
 0x13c   : >> { %2377 = vmatpush3.bf16.msra.mxu0 %v1372_v49  ;;  %1558 = vmatprep.mubr.bf16.mxu0 %v3735_v5 }
 0x13d   : >> { %2378 = vmatprep.subr.bf16.mxu0 %v1375_v40 }
 0x13e   : >> { %1429 = vmatmul.mubr.bf16.gmra.mrb[32].mxu1 %v3780_v54 }
 0x13f   : >> { %1438 = vmatprep.mubr.bf16.mxu1 %v3784_v1 }
 0x140   : >> { %2379 = vmatpush3.bf16.msra.mxu0 %v1375_v40 }
 0x143   : >> { %1559 = vmatmul.mubr.bf16.gmra.mrb[20].mxu0 %v3746_v44 }
 0x144   : >> { %1566 = vmatprep.mubr.bf16.mxu0 %v3750_v35 }
 0x146   : >> { %1439 = vmatmul.mubr.bf16.gmra.mrb[36].mxu1 %v3840_v34 }
 0x147   : >> { %1479 = vmatprep.mubr.bf16.mxu1 %v4643_v41 }
 0x14b   : >> { %1567 = vmatmul.mubr.bf16.gmra.mrb[24].mxu0 %v3780_v54 }
 0x14c   : >> { %1574 = vmatprep.mubr.bf16.mxu0 %v3784_v1 }
 0x14e   : >> { %2230 = vmatmul.mubr.msk.bf16.vlgmr.msra.gmra.mrb[24].mxu1 %vm845_vm2, %v3848_v46 }
 0x14f   : >> { %1489 = vmatprep.mubr.bf16.mxu1 %v4643_v41 }
 0x153   : >> { %1575 = vmatmul.mubr.bf16.gmra.mrb[28].mxu0 %v3840_v34 }
 0x154   : >> { %2380 = vmatprep.mubr.msk.bf16.mxu0 %vm845_vm2, %v3848_v46 }
 0x156   : >> { %2231 = vmatmul.mubr.msk.bf16.gmra.mrb[28].mxu1 %vm845_vm2, %v3862_v23 }
 0x157   : >> { %1499 = vmatprep.mubr.bf16.mxu1 %v4643_v41 }
 0x15b   : >> { %2381 = vmatmul.mubr.msk.bf16.vlgmr.msra.gmra.mrb[32].mxu0 %vm845_vm2, %v3862_v23 }
 0x15c   : >> { %2384 = vmatprep.mubr.msk.bf16.mxu0 %vm845_vm2, %v3866_v15 }
 0x15e   : >> { %2232 = vmatmul.mubr.msk.bf16.gmra.mrb[32].mxu1 %vm845_vm2, %v3866_v15 }
 0x15f   : >> { %1509 = vmatprep.mubr.bf16.mxu1 %v4643_v41 }
 0x163   : >> { %2385 = vmatmul.mubr.msk.bf16.gmra.mrb[36].mxu0 %vm845_vm2, %v3900_v43 }
 0x166   : >> { %2233 = vmatmul.mubr.msk.bf16.gmra.mrb[36].mxu1 %vm845_vm2, %v3900_v43 }
 0x1a1   : >> { %v2288_v51 = vpop.f32.mrb[0].mxu1 }
 0x1a2   : >> { %v2289_v58 = vpop.f32.mrb[1].mxu1 }
 0x1a3   : >> { %v2290_v5 = vadd.f32 %v2289_v58, %v2288_v51  ;;  %v2291_v44 = vpop.f32.mrb[2].mxu1 }
 0x1a4   : >> { %v2292_v35 = vpop.f32.mrb[3].mxu1 }
 0x1a5   : >> { %v2293_v54 = vadd.f32 %v2292_v35, %v2291_v44  ;;  %v1035_v6 = vadd.f32 %v2290_v5, %v4081_v13 }
 0x1a7   : >> { %v1038_v60 = vadd.f32 %v2293_v54, %v4079_v63 }
 0x1a9   : >> { %v2294_v1 = vpop.f32.mrb[4].mxu1 }
 0x1aa   : >> { %v2295_v34 = vpop.f32.mrb[5].mxu1 }
 0x1ab   : >> { %v2296_v46 = vadd.f32 %v2295_v34, %v2294_v1  ;;  %v2297_v23 = vpop.f32.mrb[6].mxu1 }
 0x1ac   : >> { %v2298_v3 = vpop.f32.mrb[7].mxu1 }
 0x1ad   : >> { %v2299_v15 = vadd.f32 %v2298_v3, %v2297_v23  ;;  %v1043_v52 = vadd.f32 %v2296_v46, %v4083_v56 }
 0x1af   : >> { %v1046_v31 = vadd.f32 %v2299_v15, %v4085_v28 }
 0x1b1   : >> { %v2300_v39 = vpop.f32.mrb[8].mxu1 }
 0x1b2   : >> { %v2301_v41 = vpop.f32.mrb[9].mxu1 }
 0x1b3   : >> { %v2302_v57 = vadd.f32 %v2301_v41, %v2300_v39  ;;  %v2303_v50 = vpop.f32.mrb[10].mxu1 }
 0x1b4   : >> { %v2304_v14 = vpop.f32.mrb[11].mxu1 }
 0x1b5   : >> { %v2305_v25 = vadd.f32 %v2304_v14, %v2303_v50  ;;  %v1051_v36 = vadd.f32 %v2302_v57, %v4087_v27 }
 0x1b7   : >> { %v1054_v37 = vadd.f32 %v2305_v25, %v4104_v33 }
 0x1b9   : >> { %v2306_v43 = vpop.f32.mrb[12].mxu1 }
 0x1ba   : >> { %v2307_v4 = vpop.f32.mrb[13].mxu1 }
 0x1bb   : >> { %v2308_v26 = vadd.f32 %v2307_v4, %v2306_v43  ;;  %v2309_v16 = vpop.f32.mrb[14].mxu1 }
 0x1bc   : >> { %v2310_v17 = vpop.f32.mrb[15].mxu1 }
 0x1bd   : >> { %v1059_v47 = vadd.f32 %v2308_v26, %v4097_v24 }
 0x1c1   : >> { %v2370_v48 = vpop.f32.mrb[16].mxu1 }
 0x1c2   : >> { %v4091_v59 = vadd.f32 %v2370_v48, %v1043_v52  ;;  %v1098_v62 = vpop.f32.mrb[17].mxu1 }
 0x1c3   : >> { %v4094_v55 = vadd.f32 %v1098_v62, %v1035_v6  ;;  %v2371_v22 = vpop.f32.mrb[18].mxu1 }
 0x1c4   : >> { %v4099_v2 = vadd.f32 %v2371_v22, %v1046_v31  ;;  %v1101_v0 = vpop.f32.mrb[19].mxu1  ;;  %v1179_v48 = vmul.f32 %v4091_v59, %v4091_v59 }
 0x1c5   : >> { %v4101_v61 = vadd.f32 %v1101_v0, %v1038_v60  ;;  %v1173_v11 = vmul.f32 %v4094_v55, %v4094_v55  ;;  %v1130_v44 = vsel %vm1129_vm3, %v4094_v55, 0.0  ;;  %v1140_v60 = vsel %vm1129_vm3, %v4091_v59, 0.0 }
 0x1c6   : >> { %v1182_v0 = vmul.f32 %v4099_v2, %v4099_v2 }
 0x1c7   : >> { %v1176_v35 = vmul.f32 %v4101_v61, %v4101_v61  ;;  %v1135_v23 = vsel %vm1129_vm3, %v4101_v61, 0.0  ;;  %v1193_v3 = vsel %vm1129_vm3, %v1173_v11, 0.0 }
 0x1c8   : >> { %v1208_v11 = vsel %vm1129_vm3, %v1182_v0, 0.0 }
 0x1c9   : >> { %v2374_v8 = vpop.f32.mrb[20].mxu1  ;;  %v1198_v25 = vsel %vm1129_vm3, %v1176_v35, 0.0 }
 0x1ca   : >> { %v1114_v38 = vpop.f32.mrb[21].mxu1  ;;  %v4107_v10 = vadd.f32 %v2374_v8, %v1059_v47 }
 0x1cb   : >> { %v4109_v12 = vadd.f32 %v1114_v38, %v1051_v36  ;;  %v2375_v21 = vpop.f32.mrb[22].mxu1 }
 0x1cc   : >> { %v1117_v18 = vpop.f32.mrb[23].mxu1  ;;  %v1145_v21 = vsel %vm1129_vm3, %v4099_v2, 0.0 }
 0x1cd   : >> { %v4112_v7 = vadd.f32 %v1117_v18, %v1054_v37  ;;  %v1203_v37 = vsel %vm1129_vm3, %v1179_v48, 0.0 }
 0x1ee   : >> { %v963_v32 = vpop.f32.mrb[0].mxu0 }
 0x1ef   : >> { %v4115_v53 = vadd.f32 %v963_v32, %v4081_v13  ;;  %v965_v45 = vpop.f32.mrb[1].mxu0 }
 0x1f0   : >> { %v4118_v29 = vadd.f32 %v965_v45, %v4081_v13  ;;  %v967_v42 = vpop.f32.mrb[2].mxu0 }
 0x1f1   : >> { %v1171_v9 = vmul.f32 %v4115_v53, %v4115_v53  ;;  %v4123_v30 = vadd.f32 %v967_v42, %v4079_v63  ;;  %v969_v49 = vpop.f32.mrb[3].mxu0 }
 0x1f2   : >> { %v1172_v40 = vmul.f32 %v4118_v29, %v4118_v29  ;;  %v4130_v51 = vadd.f32 %v969_v49, %v4079_v63  ;;  %v1128_v58 = vadd.f32 %v4118_v29, %v4115_v53 }
 0x1f3   : >> { %v1174_v5 = vmul.f32 %v4123_v30, %v4123_v30 }
 0x1f4   : >> { %v1175_v54 = vmul.f32 %v4130_v51, %v4130_v51  ;;  %v1131_v1 = vadd.f32 %v1130_v44, %v1128_v58  ;;  %v1134_v34 = vadd.f32 %v4130_v51, %v4123_v30  ;;  %v1192_v46 = vadd.f32 %v1172_v40, %v1171_v9 }
 0x1f6   : >> { %v973_v15 = vpop.f32.mrb[4].mxu0  ;;  %1132 = vadd.xlane.f32.xlu0 %v1131_v1  ;;  %v1136_v39 = vadd.f32 %v1135_v23, %v1134_v34  ;;  %v1194_v41 = vadd.f32 %v1193_v3, %v1192_v46  ;;  %v1197_v57 = vadd.f32 %v1175_v54, %v1174_v5  ;;  %v1185_v1 = vmul.f32 %v4109_v12, %v4109_v12 }
 0x1f7   : >> { %v4148_v50 = vadd.f32 %v973_v15, %v4083_v56  ;;  %v975_v14 = vpop.f32.mrb[5].mxu0  ;;  %v1150_v15 = vsel %vm1129_vm3, %v4109_v12, 0.0 }
 0x1f8   : >> { %v4152_v43 = vadd.f32 %v975_v14, %v4083_v56  ;;  %v977_v4 = vpop.f32.mrb[6].mxu0  ;;  %1137 = vadd.xlane.f32.xlu1 %v1136_v39  ;;  %v1199_v26 = vadd.f32 %v1198_v25, %v1197_v57  ;;  %v1188_v39 = vmul.f32 %v4112_v7, %v4112_v7 }
 0x1f9   : >> { %v1177_v16 = vmul.f32 %v4148_v50, %v4148_v50  ;;  %v4157_v17 = vadd.f32 %v977_v4, %v4085_v28  ;;  %v979_v52 = vpop.f32.mrb[7].mxu0  ;;  %v1155_v4 = vsel %vm1129_vm3, %v4112_v7, 0.0 }
 0x1fa   : >> { %v1178_v6 = vmul.f32 %v4152_v43, %v4152_v43  ;;  %v4164_v62 = vadd.f32 %v979_v52, %v4085_v28  ;;  %1195 = vadd.xlane.f32.xlu0 %v1194_v41  ;;  %v1139_v31 = vadd.f32 %v4152_v43, %v4148_v50 }
 0x1fb   : >> { %v1180_v22 = vmul.f32 %v4157_v17, %v4157_v17 }
 0x1fc   : >> { %v1181_v47 = vmul.f32 %v4164_v62, %v4164_v62  ;;  %1200 = vadd.xlane.f32.xlu1 %v1199_v26  ;;  %v1141_v8 = vadd.f32 %v1140_v60, %v1139_v31  ;;  %v1144_v36 = vadd.f32 %v4164_v62, %v4157_v17  ;;  %v1202_v38 = vadd.f32 %v1178_v6, %v1177_v16 }
 0x1fd   : >> { %v1213_v26 = vsel %vm1129_vm3, %v1185_v1, 0.0  ;;  %v1218_v60 = vsel %vm1129_vm3, %v1188_v39, 0.0 }
 0x1fe   : >> { %v983_v18 = vpop.f32.mrb[8].mxu0  ;;  %1142 = vadd.xlane.f32.xlu0 %v1141_v8  ;;  %v1207_v32 = vadd.f32 %v1181_v47, %v1180_v22  ;;  %v1146_v45 = vadd.f32 %v1145_v21, %v1144_v36  ;;  %v1204_v42 = vadd.f32 %v1203_v37, %v1202_v38  ;;  %v1191_v21 = vmul.f32 %v4107_v10, %v4107_v10 }
 0x1ff   : >> { %v4182_v9 = vadd.f32 %v983_v18, %v4087_v27  ;;  %v985_v49 = vpop.f32.mrb[9].mxu0 }
 0x200   : >> { %v4186_v40 = vadd.f32 %v985_v49, %v4087_v27  ;;  %v987_v58 = vpop.f32.mrb[10].mxu0  ;;  %v1209_v5 = vadd.f32 %v1208_v11, %v1207_v32  ;;  %v1160_v32 = vsel %vm1129_vm3, %v4107_v10, 0.0  ;;  %v1223_v49 = vsel %vm1129_vm3, %v1191_v21, 0.0 }
 0x201   : >> { %v1183_v44 = vmul.f32 %v4182_v9, %v4182_v9  ;;  %v4191_v35 = vadd.f32 %v987_v58, %v4104_v33  ;;  %v989_v54 = vpop.f32.mrb[11].mxu0 }
 0x202   : >> { %v1184_v34 = vmul.f32 %v4186_v40, %v4186_v40  ;;  %v4198_v46 = vadd.f32 %v989_v54, %v4104_v33  ;;  %1210 = vadd.xlane.f32.xlu1 %v1209_v5  ;;  %1147 = vadd.xlane.f32.xlu0 %v1146_v45  ;;  %v1149_v23 = vadd.f32 %v4186_v40, %v4182_v9 }
 0x203   : >> { %v1186_v3 = vmul.f32 %v4191_v35, %v4191_v35 }
 0x204   : >> { %v1187_v41 = vmul.f32 %v4198_v46, %v4198_v46  ;;  %v1151_v57 = vadd.f32 %v1150_v15, %v1149_v23  ;;  %v1154_v14 = vadd.f32 %v4198_v46, %v4191_v35  ;;  %v1212_v25 = vadd.f32 %v1184_v34, %v1183_v44 }
 0x206   : >> { %v993_v16 = vpop.f32.mrb[12].mxu0  ;;  %1152 = vadd.xlane.f32.xlu1 %v1151_v57  ;;  %1205 = vadd.xlane.f32.xlu0 %v1204_v42  ;;  %v1217_v52 = vadd.f32 %v1187_v41, %v1186_v3  ;;  %v1156_v48 = vadd.f32 %v1155_v4, %v1154_v14  ;;  %v1214_v6 = vadd.f32 %v1213_v26, %v1212_v25 }
 0x207   : >> { %v4216_v31 = vadd.f32 %v993_v16, %v4097_v24  ;;  %v995_v22 = vpop.f32.mrb[13].mxu0 }
 0x208   : >> { %v4220_v0 = vadd.f32 %v995_v22, %v4097_v24  ;;  %v997_v47 = vpop.f32.mrb[14].mxu0  ;;  %v1219_v8 = vadd.f32 %v1218_v60, %v1217_v52 }
 0x209   : >> { %v1189_v36 = vmul.f32 %v4216_v31, %v4216_v31  ;;  %v998_v38 = vpop.f32.mrb[15].mxu0 }
 0x20a   : >> { %v1190_v37 = vmul.f32 %v4220_v0, %v4220_v0  ;;  %1220 = vadd.xlane.f32.xlu1 %v1219_v8  ;;  %1157 = vadd.xlane.f32.xlu0 %v1156_v48  ;;  %v1159_v18 = vadd.f32 %v4220_v0, %v4216_v31 }
 0x20c   : >> { %v1161_v45 = vadd.f32 %v1160_v32, %v1159_v18  ;;  %v1222_v42 = vadd.f32 %v1190_v37, %v1189_v36 }
 0x20e   : >> { %1162 = vadd.xlane.f32.xlu1 %v1161_v45  ;;  %1215 = vadd.xlane.f32.xlu0 %v1214_v6  ;;  %v2334_v11 = vpop.f32.mrb[16].mxu0  ;;  %v1224_v58 = vadd.f32 %v1223_v49, %v1222_v42 }
 0x20f   : >> { %v2335_v5 = vpop.f32.mrb[17].mxu0 }
 0x210   : >> { %v2336_v44 = vadd.f32 %v2335_v5, %v2334_v11  ;;  %v2337_v54 = vpop.f32.mrb[18].mxu0 }
 0x211   : >> { %v2338_v1 = vpop.f32.mrb[19].mxu0 }
 0x212   : >> { %1225 = vadd.xlane.f32.xlu0 %v1224_v58  ;;  %v2339_v34 = vadd.f32 %v2338_v1, %v2337_v54 }
 0x216   : >> { %v2340_v23 = vpop.f32.mrb[20].mxu0 }
 0x217   : >> { %v2341_v3 = vpop.f32.mrb[21].mxu0 }
 0x218   : >> { %v2342_v15 = vadd.f32 %v2341_v3, %v2340_v23  ;;  %v2343_v39 = vpop.f32.mrb[22].mxu0 }
 0x219   : >> { %v2344_v41 = vpop.f32.mrb[23].mxu0 }
 0x21a   : >> { %v2345_v57 = vadd.f32 %v2344_v41, %v2343_v39 }
 0x21e   : >> { %v2346_v14 = vpop.f32.mrb[24].mxu0 }
 0x21f   : >> { %v2347_v25 = vpop.f32.mrb[25].mxu0 }
 0x220   : >> { %v2348_v4 = vadd.f32 %v2347_v25, %v2346_v14  ;;  %v2349_v26 = vpop.f32.mrb[26].mxu0 }
 0x221   : >> { %v1481_v16 = vpop.f32.mrb[24].mxu1  ;;  %v2350_v52 = vpop.f32.mrb[27].mxu0 }
 0x222   : >> { %v2402_v48 = vadd.f32 %v1481_v16, %v4081_v13  ;;  %v1483_v6 = vpop.f32.mrb[25].mxu1  ;;  %v2351_v22 = vadd.f32 %v2350_v52, %v2349_v26  ;;  %v1561_v52 = vadd.f32 %v2342_v15, %v4083_v56 }
 0x223   : >> { %v2403_v60 = vadd.f32 %v1483_v6, %v4081_v13  ;;  %v1485_v47 = vpop.f32.mrb[26].mxu1  ;;  %v1556_v6 = vadd.f32 %v2339_v34, %v4079_v63 }
 0x224   : >> { %v1688_v8 = vmul.f32 %v2402_v48, %v2402_v48  ;;  %v1751_v36 = vmax.f32 %v4115_v53, %v2402_v48  ;;  %v2404_v38 = vadd.f32 %v1485_v47, %v4079_v63  ;;  %v1487_v21 = vpop.f32.mrb[27].mxu1 }
 0x225   : >> { %v1689_v37 = vmul.f32 %v2403_v60, %v2403_v60  ;;  %v1752_v18 = vmax.f32 %v4118_v29, %v2403_v60  ;;  %v2405_v32 = vadd.f32 %v1487_v21, %v4079_v63  ;;  %v4240_v45 = vadd.f32 %v2403_v60, %v2402_v48 }
 0x226   : >> { %v1691_v42 = vmul.f32 %v2404_v38, %v2404_v38  ;;  %v1754_v49 = vmax.f32 %v4123_v30, %v2404_v38  ;;  %v2352_v11 = vpop.f32.mrb[28].mxu0  ;;  %v1553_v48 = vadd.f32 %v2336_v44, %v4081_v13  ;;  %v4272_v44 = vadd.f32 %v2351_v22, %v4104_v33 }
 0x227   : >> { %v2257_v58 = vpack.c.bf16 %v1752_v18, %v1751_v36  ;;  %v1692_v53 = vmul.f32 %v2405_v32, %v2405_v32  ;;  %v1755_v5 = vmax.f32 %v4130_v51, %v2405_v32  ;;  %v2353_v54 = vpop.f32.mrb[29].mxu0  ;;  %v4248_v1 = vadd.f32 %v2405_v32, %v2404_v38 }
 0x228   : >> { %v2354_v29 = vadd.f32 %v2353_v54, %v2352_v11  ;;  %v2355_v23 = vpop.f32.mrb[30].mxu0  ;;  %v4250_v3 = vadd.f32 %v1689_v37, %v1688_v8  ;;  %v1564_v38 = vadd.f32 %v2345_v57, %v4085_v28 }
 0x229   : >> { %1848 = vst [vmem:[%s4244_s15] sm:$0xff] %v2257_v58  ;;  %v2259_v39 = vpack.c.bf16 %v1755_v5, %v1754_v49  ;;  %v1491_v41 = vpop.f32.mrb[28].mxu1  ;;  %v2356_v14 = vpop.f32.mrb[31].mxu0  ;;  %v4253_v25 = vadd.f32 %v1692_v53, %v1691_v42 }
 0x22a   : >> { %v2406_v30 = vadd.f32 %v1491_v41, %v4083_v56  ;;  %v1493_v26 = vpop.f32.mrb[29].mxu1  ;;  %v1577_v63 = vadd.f32 %v2354_v29, %v4097_v24 }
 0x22b   : >> { %1851 = vst [vmem:[%s4244_s15 + $0xc] sm:$0xff] %v2259_v39  ;;  %v2407_v51 = vadd.f32 %v1493_v26, %v4083_v56  ;;  %v1495_v16 = vpop.f32.mrb[30].mxu1 }
 0x22c   : >> { %v1694_v60 = vmul.f32 %v2406_v30, %v2406_v30  ;;  %v1757_v47 = vmax.f32 %v4148_v50, %v2406_v30  ;;  %v2408_v8 = vadd.f32 %v1495_v16, %v4085_v28  ;;  %v1497_v36 = vpop.f32.mrb[31].mxu1  ;;  %v1569_v50 = vadd.f32 %v2348_v4, %v4087_v27 }
 0x22d   : >> { %v1695_v21 = vmul.f32 %v2407_v51, %v2407_v51  ;;  %v1758_v37 = vmax.f32 %v4152_v43, %v2407_v51  ;;  %v2409_v18 = vadd.f32 %v1497_v36, %v4085_v28  ;;  %v4266_v32 = vadd.f32 %v2407_v51, %v2406_v30 }
 0x22e   : >> { %v1760_v13 = vmax.f32 %v4157_v17, %v2408_v8  ;;  %v2382_v56 = vpop.f32.mrb[32].mxu0  ;;  %v4274_v15 = vmul.f32 %v2408_v8, %v2408_v8 }
 0x22f   : >> { %v2261_v34 = vpack.c.bf16 %v1758_v37, %v1757_v47  ;;  %v1761_v43 = vmax.f32 %v4164_v62, %v2409_v18  ;;  %v4277_v57 = vadd.f32 %v2382_v56, %v1561_v52  ;;  %v1616_v28 = vpop.f32.mrb[33].mxu0  ;;  %v4279_v42 = vmul.f32 %v2409_v18, %v2409_v18 }
 0x230   : >> { %v1617_v49 = vadd.f32 %v1616_v28, %v1553_v48  ;;  %v2383_v17 = vpop.f32.mrb[34].mxu0  ;;  %v4281_v11 = vadd.f32 %v2409_v18, %v2408_v8  ;;  %v4283_v58 = vadd.f32 %v1695_v21, %v1694_v60 }
 0x231   : >> { %1853 = vst [vmem:[%s4244_s15 + $0x18] sm:$0xff] %v2261_v34  ;;  %v2263_v4 = vpack.c.bf16 %v1761_v43, %v1760_v13  ;;  %v1759_v22 = vmax.f32 %v4091_v59, %v4277_v57  ;;  %v1501_v53 = vpop.f32.mrb[32].mxu1  ;;  %v4288_v5 = vadd.f32 %v2383_v17, %v1564_v38  ;;  %v1619_v62 = vpop.f32.mrb[35].mxu0  ;;  %v1657_v54 = vsel %vm1129_vm3, %v4277_v57, 0.0 }
 0x232   : >> { %v1753_v29 = vmax.f32 %v4094_v55, %v1617_v49  ;;  %v4294_v23 = vadd.f32 %v1501_v53, %v4087_v27  ;;  %v1503_v39 = vpop.f32.mrb[33].mxu1  ;;  %v1620_v41 = vadd.f32 %v1619_v62, %v1556_v6  ;;  %v1647_v14 = vsel %vm1129_vm3, %v1617_v49, 0.0 }
 0x233   : >> { %1855 = vst [vmem:[%s4244_s15 + $0x24] sm:$0xff] %v2263_v4  ;;  %v2262_v30 = vpack.c.bf16 %v1759_v22, %v1759_v22  ;;  %v1762_v59 = vmax.f32 %v4099_v2, %v4288_v5  ;;  %v4301_v26 = vadd.f32 %v1503_v39, %v4087_v27  ;;  %v1505_v51 = vpop.f32.mrb[34].mxu1  ;;  %v1648_v55 = vadd.f32 %v1647_v14, %v4240_v45 }
 0x234   : >> { %v2258_v16 = vpack.c.bf16 %v1753_v29, %v1753_v29  ;;  %v4306_v52 = vmul.f32 %v4294_v23, %v4294_v23  ;;  %v1763_v48 = vmax.f32 %v4182_v9, %v4294_v23  ;;  %v1756_v6 = vmax.f32 %v4101_v61, %v1620_v41  ;;  %v1507_v60 = vpop.f32.mrb[35].mxu1 }
 0x235   : >> { %1854 = vst.msk [vmem:[%s4244_s15 + $0x20] sm:$0xf] %vm1849_vm4, %v2262_v30  ;;  %v2264_v2 = vpack.c.bf16 %v1762_v59, %v1762_v59  ;;  %v4315_v27 = vmul.f32 %v4301_v26, %v4301_v26  ;;  %v1764_v45 = vmax.f32 %v4186_v40, %v4301_v26  ;;  %v2412_v47 = vadd.f32 %v1505_v51, %v4104_v33 }
 0x236   : >> { %1649 = vadd.xlane.f32.xlu1 %v1648_v55  ;;  %1850 = vst.msk [vmem:[%s4244_s15 + $0x8] sm:$0xf] %vm1849_vm4, %v2258_v16  ;;  %v2260_v9 = vpack.c.bf16 %v1756_v6, %v1756_v6  ;;  %v2413_v61 = vadd.f32 %v1507_v60, %v4104_v33  ;;  %v2386_v8 = vpop.f32.mrb[36].mxu0  ;;  %v1652_v36 = vsel %vm1129_vm3, %v1620_v41, 0.0  ;;  %v1693_v38 = vmul.f32 %v1620_v41, %v1620_v41 }
 0x237   : >> { %1856 = vst.msk [vmem:[%s4244_s15 + $0x2c] sm:$0xf] %vm1849_vm4, %v2264_v2  ;;  %v2265_v21 = vpack.c.bf16 %v1764_v45, %v1763_v48  ;;  %v4326_v37 = vmul.f32 %v2412_v47, %v2412_v47  ;;  %v1766_v40 = vmax.f32 %v4191_v35, %v2412_v47  ;;  %v4329_v18 = vadd.f32 %v2386_v8, %v1577_v63  ;;  %v1632_v13 = vpop.f32.mrb[37].mxu0 }
 0x238   : >> { %1852 = vst.msk [vmem:[%s4244_s15 + $0x14] sm:$0xf] %vm1849_vm4, %v2260_v9  ;;  %v4333_v56 = vmul.f32 %v2413_v61, %v2413_v61  ;;  %v1767_v33 = vmax.f32 %v4198_v46, %v2413_v61  ;;  %v1633_v34 = vadd.f32 %v1632_v13, %v1569_v50  ;;  %v1653_v43 = vadd.f32 %v1652_v36, %v4248_v1  ;;  %v2387_v28 = vpop.f32.mrb[38].mxu0 }
 0x239   : >> { %1857 = vst [vmem:[%s4244_s15 + $0x30] sm:$0xff] %v2265_v21  ;;  %v1771_v17 = vmax.f32 %v4107_v10, %v4329_v18  ;;  %v1511_v4 = vpop.f32.mrb[36].mxu1  ;;  %v1635_v35 = vpop.f32.mrb[39].mxu0  ;;  %v1715_v63 = vsel %vm1129_vm3, %v1693_v38, 0.0  ;;  %v1690_v22 = vmul.f32 %v1617_v49, %v1617_v49  ;;  %v1658_v53 = vadd.f32 %v1657_v54, %v4266_v32 }
 0x23a   : >> { %v2267_v62 = vpack.c.bf16 %v1767_v33, %v1766_v40  ;;  %v1765_v29 = vmax.f32 %v4109_v12, %v1633_v34  ;;  %1654 = vadd.xlane.f32.xlu0 %v1653_v43  ;;  %v2414_v46 = vadd.f32 %v1511_v4, %v4097_v24  ;;  %v1513_v1 = vpop.f32.mrb[37].mxu1  ;;  %v1636_v50 = vadd.f32 %v1635_v35, %v4272_v44 }
 0x23b   : >> { %v2270_v39 = vpack.c.bf16 %v1771_v17, %v1771_v17  ;;  %v2415_v10 = vadd.f32 %v1513_v1, %v4097_v24  ;;  %v1716_v41 = vadd.f32 %v1715_v63, %v4253_v25  ;;  %v1515_v14 = vpop.f32.mrb[38].mxu1  ;;  %v1710_v49 = vsel %vm1129_vm3, %v1690_v22, 0.0 }
 0x23c   : >> { %1859 = vst [vmem:[%s4244_s15 + $0x3c] sm:$0xff] %v2267_v62  ;;  %v2266_v32 = vpack.c.bf16 %v1765_v29, %v1765_v29  ;;  %v1706_v54 = vmul.f32 %v2414_v46, %v2414_v46  ;;  %v1769_v12 = vmax.f32 %v4216_v31, %v2414_v46  ;;  %v1768_v30 = vmax.f32 %v4112_v7, %v1636_v50  ;;  %v1516_v59 = vpop.f32.mrb[39].mxu1  ;;  %v4650_v29 = vld [vmem:[#allocation40_spill] sm:$0xff] }
 0x23d   : >> { %1862 = vst.msk [vmem:[%s4244_s15 + $0x50] sm:$0xf] %vm1849_vm4, %v2270_v39  ;;  %v1707_v44 = vmul.f32 %v2415_v10, %v2415_v10  ;;  %v1770_v24 = vmax.f32 %v4220_v0, %v2415_v10  ;;  %1717 = vadd.xlane.f32.xlu1 %v1716_v41  ;;  %v1711_v25 = vadd.f32 %v1710_v49, %v4250_v3  ;;  %v1662_v51 = vsel %vm1129_vm3, %v4288_v5, 0.0 }
 0x23e   : >> { %1858 = vst.msk [vmem:[%s4244_s15 + $0x38] sm:$0xf] %vm1849_vm4, %v2266_v32  ;;  %v2268_v55 = vpack.c.bf16 %v1768_v30, %v1768_v30  ;;  %v1663_v31 = vadd.f32 %v1662_v51, %v4281_v11  ;;  %v1699_v7 = vmul.f32 %v4288_v5, %v4288_v5  ;;  %v1724_v16 = vadd.f32 %v4279_v42, %v4274_v15  ;;  %v4652_v32 = vld [vmem:[#allocation32_spill] sm:$0xff]  ;;  %v4653_v30 = vld [vmem:[#allocation33_spill] sm:$0xff] }
 0x23f   : >> { %v2269_v48 = vpack.c.bf16 %v1770_v24, %v1769_v12  ;;  %1712 = vadd.xlane.f32.xlu0 %v1711_v25  ;;  %v1696_v0 = vmul.f32 %v4277_v57, %v4277_v57  ;;  %v1666_v3 = vadd.f32 %v4301_v26, %v4294_v23  ;;  %v1667_v6 = vsel %vm1129_vm3, %v1633_v34, 0.0  ;;  %v4654_v25 = vld [vmem:[#allocation38_spill] sm:$0xff] }
 0x240   : >> { %1860 = vst.msk [vmem:[%s4244_s15 + $0x44] sm:$0xf] %vm1849_vm4, %v2268_v55  ;;  %v1725_v11 = vsel %vm1129_vm3, %v1699_v7, 0.0  ;;  %v1671_v60 = vadd.f32 %v2413_v61, %v2412_v47  ;;  %v1672_v5 = vsel %vm1129_vm3, %v1636_v50, 0.0  ;;  %v1676_v2 = vadd.f32 %v2415_v10, %v2414_v46  ;;  %v4651_v10 = vld [vmem:[#allocation39_spill] sm:$0xff]  ;;  %v4655_v7 = vld [vmem:[#allocation37_spill] sm:$0xff] }
 0x241   : >> { %1861 = vst [vmem:[%s4244_s15 + $0x48] sm:$0xff] %v2269_v48  ;;  %1659 = vadd.xlane.f32.xlu1 %v1658_v53  ;;  %v1726_v15 = vadd.f32 %v1725_v11, %v1724_v16  ;;  %v1720_v42 = vsel %vm1129_vm3, %v1696_v0, 0.0  ;;  %v1668_v45 = vadd.f32 %v1667_v6, %v1666_v3  ;;  %v1677_v57 = vsel %vm1129_vm3, %v4329_v18, 0.0  ;;  %v4656_v3 = vld [vmem:[#allocation30_spill] sm:$0xff] }
 0x242   : >> { %v1721_v23 = vadd.f32 %v1720_v42, %v4283_v58  ;;  %v1673_v26 = vadd.f32 %v1672_v5, %v1671_v60  ;;  %v1678_v9 = vadd.f32 %v1677_v57, %v1676_v2  ;;  %v1702_v8 = vmul.f32 %v1633_v34, %v1633_v34  ;;  %v4657_v5 = vld [vmem:[#allocation31_spill] sm:$0xff] }
 0x243   : >> { %1664 = vadd.xlane.f32.xlu0 %v1663_v31  ;;  %v1729_v47 = vadd.f32 %v4315_v27, %v4306_v52  ;;  %v1705_v61 = vmul.f32 %v1636_v50, %v1636_v50  ;;  %v1734_v36 = vadd.f32 %v4333_v56, %v4326_v37  ;;  %v1708_v38 = vmul.f32 %v4329_v18, %v4329_v18 }
 0x244   : >> { %v1730_v21 = vsel %vm1129_vm3, %v1702_v8, 0.0  ;;  %v1739_v40 = vadd.f32 %v1707_v44, %v1706_v54 }
 0x245   : >> { %1727 = vadd.xlane.f32.xlu1 %v1726_v15  ;;  %v1731_v13 = vadd.f32 %v1730_v21, %v1729_v47  ;;  %v1735_v58 = vsel %vm1129_vm3, %v1705_v61, 0.0  ;;  %v1740_v33 = vsel %vm1129_vm3, %v1708_v38, 0.0 }
 0x246   : >> { %v1736_v34 = vadd.f32 %v1735_v58, %v1734_v36  ;;  %v1741_v43 = vadd.f32 %v1740_v33, %v1739_v40  ;;  %v4660_v36 = vld [vmem:[#allocation34_spill] sm:$0xff] }
 0x247   : >> { %1722 = vadd.xlane.f32.xlu0 %v1721_v23 }
 0x249   : >> { %1669 = vadd.xlane.f32.xlu1 %v1668_v45  ;;  %v4658_v45 = vld [vmem:[#allocation36_spill] sm:$0xff] }
 0x24b   : >> { %1674 = vadd.xlane.f32.xlu0 %v1673_v26  ;;  %v4659_v26 = vld [vmem:[#allocation35_spill] sm:$0xff] }
 0x24d   : >> { %1679 = vadd.xlane.f32.xlu1 %v1678_v9 }
 0x24f   : >> { %1732 = vadd.xlane.f32.xlu0 %v1731_v13  ;;  %v4661_v13 = vld [vmem:[#allocation29_spill] sm:$0xff] }
 0x251   : >> { %1737 = vadd.xlane.f32.xlu1 %v1736_v34  ;;  %v4662_v34 = vld [vmem:[#allocation28_spill] sm:$0xff] }
 0x253   : >> { %1742 = vadd.xlane.f32.xlu0 %v1741_v43 }
 0x283   : >> { %v1133_v52 = vpop.xlane.xlu0 %1132 }
 0x284   : >> { %v1164_v46 = vadd.f32 %v4650_v29, %v1133_v52 }
 0x285   : >> { %v1138_v37 = vpop.xlane.xlu1 %1137 }
 0x286   : >> { %v1165_v41 = vadd.f32 %v4651_v10, %v1138_v37 }
 0x287   : >> { %v1196_v27 = vpop.xlane.xlu0 %1195 }
 0x288   : >> { %v1227_v59 = vadd.f32 %v4653_v30, %v1196_v27 }
 0x289   : >> { %v1201_v56 = vpop.xlane.xlu1 %1200 }
 0x28a   : >> { %v1228_v54 = vadd.f32 %v4652_v32, %v1201_v56 }
 0x28b   : >> { %v1143_v18 = vpop.xlane.xlu0 %1142 }
 0x28c   : >> { %v1166_v51 = vadd.f32 %v4654_v25, %v1143_v18  ;;  %v4663_v18 = vld [vmem:[#allocation27_spill] sm:$0xff] }
 0x28f   : >> { %v1148_v28 = vpop.xlane.xlu0 %1147  ;;  %v1211_v17 = vpop.xlane.xlu1 %1210 }
 0x290   : >> { %v1167_v16 = vadd.f32 %v4655_v7, %v1148_v28  ;;  %v1230_v6 = vadd.f32 %v4656_v3, %v1211_v17 }
 0x293   : >> { %v1206_v4 = vpop.xlane.xlu0 %1205  ;;  %v1153_v35 = vpop.xlane.xlu1 %1152 }
 0x294   : >> { %v1229_v2 = vadd.f32 %v4657_v5, %v1206_v4  ;;  %v1168_v57 = vadd.f32 %v4658_v45, %v1153_v35 }
 0x297   : >> { %v1158_v63 = vpop.xlane.xlu0 %1157  ;;  %v1221_v22 = vpop.xlane.xlu1 %1220 }
 0x298   : >> { %v1169_v8 = vadd.f32 %v4659_v26, %v1158_v63  ;;  %v1232_v52 = vadd.f32 %v4662_v34, %v1221_v22 }
 0x29b   : >> { %v1216_v53 = vpop.xlane.xlu0 %1215  ;;  %v1163_v62 = vpop.xlane.xlu1 %1162 }
 0x29c   : >> { %v1170_v38 = vadd.f32 %v4660_v36, %v1163_v62  ;;  %v1231_v58 = vadd.f32 %v4661_v13, %v1216_v53 }
 0x29f   : >> { %v1226_v50 = vpop.xlane.xlu0 %1225 }
 0x2a0   : >> { %v1233_v56 = vadd.f32 %v4663_v18, %v1226_v50 }
 0x2c3   : >> { %v1650_v1 = vpop.xlane.xlu1 %1649 }
 0x2c4   : >> { %v1681_v39 = vadd.f32 %v1650_v1, %v1164_v46  }
 0x2c6   : >> { %v4678_v34 = vmov %v1681_v39  ;;  %1864 = vst.msk [vmem:[%s3365_s0] sm:$0xff] (%p4402_p0), %vm1863_vm5, %v1681_v39 }
 0x2c7   : >> { %v1655_v14 = vpop.xlane.xlu0 %1654 }
 0x2c8   : >> { %v1682_v49 = vadd.f32 %v1655_v14, %v1165_v41  }
 0x2ca   : >> { %v1718_v12 = vpop.xlane.xlu1 %1717  ;;  %1865 = vst.msk [vmem:[%s3365_s0 + $0x8] sm:$0xff] (%p4402_p0), %vm1863_vm5, %v1682_v49 }
 0x2cb   : >> { %v1745_v44 = vadd.f32 %v1718_v12, %v1228_v54  }
 0x2cc   : >> { %v1713_v24 = vpop.xlane.xlu0 %1712 }
 0x2cd   : >> { %v1744_v55 = vadd.f32 %v1713_v24, %v1227_v59   ;;  %v4670_v26 = vmov %v1745_v44  ;;  %1872 = vst.msk [vmem:[%s3370_s24 + $0x8] sm:$0xff] (%p4402_p0), %vm1863_vm5, %v1745_v44 }
 0x2ce   : >> { %v1660_v31 = vpop.xlane.xlu1 %1659 }
 0x2cf   : >> { %v1683_v48 = vadd.f32 %v1660_v31, %v1166_v51   ;;  %1871 = vst.msk [vmem:[%s3370_s24] sm:$0xff] (%p4402_p0), %vm1863_vm5, %v1744_v55 }
 0x2d0   : >> { %v1665_v0 = vpop.xlane.xlu0 %1664 }
 0x2d1   : >> { %v1684_v11 = vadd.f32 %v1665_v0, %v1167_v16   ;;  %v4676_v32 = vmov %v1683_v48  ;;  %1866 = vst.msk [vmem:[%s3365_s0 + $0x10] sm:$0xff] (%p4402_p0), %vm1863_vm5, %v1683_v48 }
 0x2d2   : >> { %v1728_v60 = vpop.xlane.xlu1 %1727 }
 0x2d3   : >> { %v1747_v15 = vadd.f32 %v1728_v60, %v1230_v6   ;;  %v4675_v31 = vmov %v1684_v11  ;;  %1867 = vst.msk [vmem:[%s3365_s0 + $0x18] sm:$0xff] (%p4402_p0), %vm1863_vm5, %v1684_v11 }
 0x2d4   : >> { %v1723_v42 = vpop.xlane.xlu0 %1722 }
 0x2d5   : >> { %v1746_v9 = vadd.f32 %v1723_v42, %v1229_v2   ;;  %v4668_v24 = vmov %v1747_v15  ;;  %1874 = vst.msk [vmem:[%s3370_s24 + $0x18] sm:$0xff] (%p4402_p0), %vm1863_vm5, %v1747_v15 }
 0x2d6   : >> { %v1670_v23 = vpop.xlane.xlu1 %1669 }
 0x2d7   : >> { %v1685_v47 = vadd.f32 %v1670_v23, %v1168_v57   ;;  %v4669_v25 = vmov %v1746_v9  ;;  %1873 = vst.msk [vmem:[%s3370_s24 + $0x10] sm:$0xff] (%p4402_p0), %vm1863_vm5, %v1746_v9 }
 0x2d8   : >> { %v1675_v61 = vpop.xlane.xlu0 %1674 }
 0x2d9   : >> { %v1686_v40 = vadd.f32 %v1675_v61, %v1169_v8   ;;  %v4674_v30 = vmov %v1685_v47  ;;  %1868 = vst.msk [vmem:[%s3365_s0 + $0x20] sm:$0xff] (%p4402_p0), %vm1863_vm5, %v1685_v47 }
 0x2da   : >> { %v1680_v21 = vpop.xlane.xlu1 %1679 }
 0x2db   : >> { %v1687_v43 = vadd.f32 %v1680_v21, %v1170_v38   ;;  %v4673_v29 = vmov %v1686_v40  ;;  %1869 = vst.msk [vmem:[%s3365_s0 + $0x28] sm:$0xff] (%p4402_p0), %vm1863_vm5, %v1686_v40 }
 0x2dc   : >> { %v1733_v33 = vpop.xlane.xlu0 %1732 }
 0x2dd   : >> { %v1748_v37 = vadd.f32 %v1733_v33, %v1231_v58   ;;  %v4677_v33 = vmov %v1682_v49  ;;  %310 = sbr.rel (!%p4402_p0) target bundleno = 44 (0x2c), region = 103  ;;  %1870 = vst.msk [vmem:[%s3365_s0 + $0x30] sm:$0xff] (%p4402_p0), %vm1863_vm5, %v1687_v43 }
 0x2de   : >> { %v1738_v27 = vpop.xlane.xlu1 %1737 }
 0x2df   : >> { %v1749_v17 = vadd.f32 %v1738_v27, %v1232_v52   ;;  %v4667_v23 = vmov %v1748_v37  ;;  %v4671_v27 = vmov %v1744_v55  ;;  %1875 = vst.msk [vmem:[%s3370_s24 + $0x20] sm:$0xff] (%p4402_p0), %vm1863_vm5, %v1748_v37 }
 0x2e0   : >> { %v1743_v28 = vpop.xlane.xlu0 %1742 }
 0x2e1   : >> { %v1750_v4 = vadd.f32 %v1743_v28, %v1233_v56   ;;  %v4666_v22 = vmov %v1749_v17  ;;  %v4672_v28 = vmov %v1687_v43  ;;  %1876 = vst.msk [vmem:[%s3370_s24 + $0x28] sm:$0xff] (%p4402_p0), %vm1863_vm5, %v1749_v17 }
 0x2e3   : >> { %v4665_v21 = vmov %v1750_v4  ;;  %1877 = vst.msk [vmem:[%s3370_s24 + $0x30] sm:$0xff] (%p4402_p0), %vm1863_vm5, %v1750_v4  ;;  %s2917_s24 = scalar_lea.vmem (%p4402_p0), %s4456_s17, 73920 }
 0x2e4   : > { %p2918_p1 = scmp.ne.s32.totalorder %s4456_s17, %s2917_s24  ;;  %p2925_p6 = scmp.lt.s32.totalorder %s2923_s27, %s2917_s24 }
 0x2e6   : > { %p2919_p2 = pnand %p2918_p1, %p3220_p3  ;;  %p2926_p7 = por %p2925_p6, %p2924_p5 }
 0x2e8   : > { %p2920_p4 = pneg %p2919_p2 }
 0x2ea   : > { %p2927_p9 = pnand %p2926_p7, %p2920_p4 }
 0x2ec   : > { %2930 = shalt.err (!%p2927_p9)
}
 0x2ed   : > { %s2931_s26 = scalar_lea.hbm %s4461_s10, 73920  ;;  %s2935_s15 = scalar_lea.hbm %s4520_s3, 295680 }
 0x2ee   : > { %p2932_p10 = scmp.ne.s32.totalorder %s4461_s10, %s2931_s26  ;;  %p2936_p13 = scmp.lt.u32.totalorder %s4461_s10, %s4520_s3 }
 0x2ef   : > { %p2937_p0 = scmp.lt.u32.totalorder %s2935_s15, %s2931_s26  ;;  %p2939_p2 = scmp.lt.u32.totalorder %s2931_s26, %s4461_s10 }
 0x2f0   : > { %p2933_p11 = pnand %p2932_p10, %p3220_p3 }
 0x2f1   : > { %p2938_p1 = por %p2937_p0, %p2936_p13 }
 0x2f2   : > { %p2934_p12 = pneg %p2933_p11 }
 0x2f3   : > { %p2940_p4 = por %p2939_p2, %p2938_p1 }
 0x2f5   : > { %p2941_p5 = pnand %p2940_p4, %p2934_p12 }
 0x2f7   : > { %2944 = shalt.err (!%p2941_p5)
}
 0x2f8   : > { %s3137_s29 = smov 192   ;;  %s3138_s16 = smov 12  }
 0x2f9   : > { %2454 = dma.vmem_to_hbm [thread:$0]  (%p3220_p3), %s4456_s17, 73920, %s4461_s10, %s4465_s14, %s3137_s29, %s3137_s29, %s3138_s16  }
 0x2fa PF: > { %p2461_p6 = scmp.ge.s32.totalorder %s3071_s25, 2  ;;  %s1934_s8 = sand.u32 1, %s3043_s18  }
 0x2fb   : > { %s1935_s0 = scalar_lea.sflag [#allocation3], %s1934_s8 }
 0x2fc   : > { %p2457_p7 = pnand %p2461_p6, %p3229_p8 }
 0x2fe   : > { %3038 = dma.done.wait (!%p2457_p7), %s1935_s0, 73920  }
 0x2ff   : > { %3040 = vsyncadd (!%p2457_p7), %s1935_s0, 4294893376  ;;  %s19_s25 = sadd.s32 1, %s3071_s25   ;;  %s4680_s22 = sld [smem:[#allocation5_spill]] }
 0x300   : > { %p16_p9 = scmp.ge.s32.totalorder %s19_s25, 6   ;;  %s4681_s6 = sld [smem:[#allocation6_spill]] }
 0x301   : > { %s4682_s24 = sld [smem:[#allocation7_spill]]  ;;  %s4683_s18 = smov %s3047_s19 }
 0x302   : > { %s4684_s19 = smov %s3051_s20  ;;  %s4685_s20 = smov %s3238_s11 }
 0x303   : > { %s4686_s21 = smov %s3063_s23  ;;  %18 = sbr.rel (!%p16_p9) target bundleno = 8 (0x8), region = 114 }
 0x306   : > { %s4687_s23 = smov %s4681_s6 }
 0x30a   :  { %1964 = vsyncpa [#allocation3], 1 }
 0x30b   :  { %1966 = vsyncpa [#allocation3 + $0x1], 1 }

// kernel: forward.8
= control target key start
LH: loop header
LB: loop body
LE: loop exit
PB: predicated region body
PF: predicated region fallthrough
CT: control target
= control target key end

     0   :  { %s2818_s18 = smov 0   ;;  %s2820_s19 = smov 0   ;;  %s4048_s0 = inlined_call_operand.vmem [shape: bf16[2,110,56,148], index: 0, kind: input, shape index: {}]   ;;  %s4049_s1 = inlined_call_operand.vmem [shape: bf16[50,504], index: 1, kind: input, shape index: {}]   ;;  %s4050_s2 = inlined_call_operand.vmem [shape: f32[50,1], index: 2, kind: input, shape index: {}]   ;;  %s4051_s3 = inlined_call_operand.vmem [shape: bf16[2,54,50,146], index: 3, kind: output, shape index: {0}]   ;;  %s4052_s4 = inlined_call_operand.vmem [shape: f32[2,2,50,1], index: 4, kind: output, shape index: {1}]   ;;  %s4053_s5 = inlined_call_operand.vmem [shape: f32[2,2,50,1], index: 5, kind: output, shape index: {2}]  }
   0x1   :  { %4088 = sst [smem:[#allocation39_spill]] %s4048_s0  ;;  %s2822_s20 = smov 0  }
   0x2   :  { %s2824_s21 = smov 0   ;;  %s2826_s22 = smov 0  }
   0x3 LB: > { %s25_s23 = sadd.s32 1, %s2715_s20  ;;  %s28_s24 = sadd.s32 1, %s2719_s21  ;;  %s2723_s22 = sphi %s2826_s22, %s16_s22   ;;  %s2719_s21 = sphi %s2824_s21, %s4212_s21   ;;  %s2715_s20 = sphi %s2822_s20, %s4211_s20   ;;  %s2711_s19 = sphi %s2820_s19, %s4210_s19   ;;  %s2707_s18 = sphi %s2818_s18, %s4209_s18  }
   0x4   : > { %p26_p0 = scmp.ge.s32.totalorder %s25_s23, 2  ;;  %p1967_p1 = scmp.ge.s32.totalorder %s2723_s22, 1 }
   0x5   : > { %p210_p2 = scmp.lt.s32.totalorder %s2723_s22, 5 }
   0x6   : > { %s4214_s23 = smov (%p26_p0, %s25_s23), 0  ;;  %s4216_s24 = smov (!%p26_p0, %s28_s24), %s2719_s21 }
   0x7   : > { %p211_p3 = pnand %p1967_p1, %p210_p2  ;;  %p30_p4 = scmp.ge.s32.totalorder %s4216_s24, 2 }
   0x9   : > { %s4218_s24 = smov (%p30_p4, %s4216_s24), 0  ;;  %214 = sbr.rel (%p211_p3) target bundleno = 721 (0x2d1), region = 32 }
  0x10   : > { %p261_p5 = scmp.lt.s32.totalorder %s2711_s19, 1  ;;  %s266_s25 = smul.u32 27, %s2707_s18  ;;  %v2854_v0 = vld [vmem:[%s4050_s2] sm:$0xff]  ;;  %v2859_v1 = vld [vmem:[%s4050_s2 + $0x8] sm:$0xff]  ;;  %v2864_v2 = vld [vmem:[%s4050_s2 + $0x10] sm:$0xff]  ;;  %v2986_v21 = vmov 0.0  }
  0x11   : > { %4089 = vst [vmem:[#allocation2_spill] sm:$0xff] %v2854_v0  ;;  %4090 = vst [vmem:[#allocation3_spill] sm:$0xff] %v2859_v1  ;;  %v2870_v3 = vld [vmem:[%s4050_s2 + $0x18] sm:$0xff]  ;;  %v2875_v4 = vld [vmem:[%s4050_s2 + $0x20] sm:$0xff]  ;;  %p279_p7 = scmp.lt.s32.totalorder %s2707_s18, 1  ;;  %s4101_s0 = sld [smem:[#allocation39_spill]] }
  0x12   : > { %4091 = vst [vmem:[#allocation4_spill] sm:$0xff] %v2864_v2  ;;  %4092 = vst [vmem:[#allocation5_spill] sm:$0xff] %v2870_v3  ;;  %v2880_v5 = vld [vmem:[%s4050_s2 + $0x28] sm:$0xff]  ;;  %s4220_s19 = smov (!%p261_p5, %s2711_s19), 1  ;;  %v2887_v6 = vld [vmem:[%s4050_s2 + $0x30] sm:$0x3] }
  0x13   : > { %4093 = vst [vmem:[#allocation6_spill] sm:$0xff] %v2875_v4  ;;  %4094 = vst [vmem:[#allocation7_spill] sm:$0xff] %v2880_v5  ;;  %v2892_v7 = vld [vmem:[%s4049_s1] sm:$0xff]  ;;  %v2897_v8 = vld [vmem:[%s4049_s1 + $0x8] sm:$0xff]  ;;  %p269_p6 = scmp.lt.s32.totalorder %s266_s25, 53  ;;  %s2139_s10 = smul.u32 6160, %s4220_s19 }
  0x14   : > { %4095 = vst [vmem:[#allocation8_spill] sm:$0xff] %v2887_v6  ;;  %4096 = vst [vmem:[#allocation9_spill] sm:$0xff] %v2897_v8  ;;  %v2902_v9 = vld [vmem:[%s4049_s1 + $0x10] sm:$0xff]  ;;  %v2907_v10 = vld [vmem:[%s4049_s1 + $0x18] sm:$0xff]  ;;  %s2141_s11 = smul.u32 756, %s4220_s19  ;;  %v2988_v22 = vmov 0.0  }
  0x15   : > { %4097 = vst [vmem:[#allocation10_spill] sm:$0xff] %v2907_v10  ;;  %v2912_v11 = vld [vmem:[%s4049_s1 + $0x20] sm:$0xff]  ;;  %v2919_v12 = vld [vmem:[%s4049_s1 + $0x28] sm:$0xff]  ;;  %v2924_v13 = vld [vmem:[%s4049_s1 + $0x30] sm:$0xff]  ;;  %s4222_s25 = smov (!%p269_p6, %s266_s25), 53  ;;  %s2143_s28 = smul.u32 14, %s4220_s19 }
  0x16   : > { %4098 = vst [vmem:[#allocation11_spill] sm:$0xff] %v2919_v12  ;;  %v2929_v14 = vld [vmem:[%s4049_s1 + $0x38] sm:$0xff]  ;;  %v2934_v15 = vld [vmem:[%s4049_s1 + $0x40] sm:$0xff]  ;;  %v2939_v16 = vld [vmem:[%s4049_s1 + $0x48] sm:$0xff]  ;;  %s2140_s26 = smul.u32 14, %s4222_s25  ;;  %v2990_v23 = vmov 0.0  }
  0x17   : > { %4099 = vst [vmem:[#allocation12_spill] sm:$0xff] %v2929_v14  ;;  %4100 = vst [vmem:[#allocation13_spill] sm:$0xff] %v2939_v16  ;;  %v2944_v17 = vld [vmem:[%s4049_s1 + $0x50] sm:$0xff]  ;;  %s2949_s9 = scalar_lea.vmem %s4101_s0, %s2139_s10  ;;  %v2955_v18 = vld [vmem:[%s4049_s1 + $0x58] sm:$0xff]  ;;  %v2992_v24 = vmov 0.0   ;;  %v2994_v25 = vmov 0.0  }
  0x18   : > { %4102 = vst [vmem:[#allocation14_spill] sm:$0xff] %v2955_v18  ;;  %v2960_v19 = vld [vmem:[%s4049_s1 + $0x60] sm:$0x11]  ;;  %v2965_v20 = vld [vmem:[%s4049_s1 + $0x68] sm:$0x11]  ;;  %s280_s10 = scalar_select %p279_p7, %s2707_s18, 1 }
  0x19   : > { %4103 = vst [vmem:[#allocation15_spill] sm:$0xff] %v2960_v19  ;;  %4104 = vst [vmem:[#allocation16_spill] sm:$0xff] %v2965_v20  ;;  %s273_s27 = sadd.s32 %s2141_s11, %s2140_s26  ;;  %v2996_v26 = vmov 0.0   ;;  %v2998_v27 = vmov 0.0   ;;  %v3000_v28 = vmov 0.0   ;;  %v3002_v29 = vmov 0.0  }
  0x1a   : > { %s1969_s29 = sshll.u32 %s273_s27, 2  ;;  %s2142_s30 = smul.u32 7, %s280_s10  ;;  %v3004_v30 = vmov 0.0   ;;  %v3006_v31 = vmov 0.0   ;;  %v3008_v32 = vmov 0.0   ;;  %v3010_v33 = vmov 0.0  }
  0x1b   : > { %s2974_s12 = scalar_lea.vmem %s4051_s3, %s1969_s29  ;;  %v3012_v34 = vmov 0.0   ;;  %s3014_s19 = smov 0  }
  0x1c   : > { %s283_s13 = sadd.s32 %s2143_s28, %s2142_s30 }
  0x1d   : > { %s1970_s14 = sshll.u32 %s283_s13, 3 }
  0x1e   : > { %s2979_s16 = scalar_lea.vmem %s4052_s4, %s1970_s14  ;;  %s2984_s0 = scalar_lea.vmem %s4053_s5, %s1970_s14 }
  0x1f LB: >> { %4105 = vst [vmem:[#allocation17_spill] sm:$0xff] %v2727_v21  ;;  %4106 = vst [vmem:[#allocation18_spill] sm:$0xff] %v2731_v22  ;;  %s1972_s7 = sshll.u32 %s2783_s19, 1  ;;  %s4119_s11 = smul.u32 54, %s2707_s18  ;;  %vm455_vm0 = vcmask 1039360   ;;  %vm505_vm1 = vcmask 1031168   ;;  %s2783_s19 = sphi %s3014_s19, %s322_s19   ;;  %v2779_v34 = vphi %v3012_v34, %v4208_v34   ;;  %v2775_v33 = vphi %v3010_v33, %v4207_v33   ;;  %v2771_v32 = vphi %v3008_v32, %v4206_v32   ;;  %v2767_v31 = vphi %v3006_v31, %v4205_v31   ;;  %v2763_v30 = vphi %v3004_v30, %v4204_v30   ;;  %v2759_v29 = vphi %v3002_v29, %v4203_v29   ;;  %v2755_v28 = vphi %v3000_v28, %v4202_v28   ;;  %v2751_v27 = vphi %v2998_v27, %v4201_v27   ;;  %v2747_v26 = vphi %v2996_v26, %v4200_v26   ;;  %v2743_v25 = vphi %v2994_v25, %v4199_v25   ;;  %v2739_v24 = vphi %v2992_v24, %v4198_v24   ;;  %v2735_v23 = vphi %v2990_v23, %v4197_v23   ;;  %v2731_v22 = vphi %v2988_v22, %v4196_v22   ;;  %v2727_v21 = vphi %v2986_v21, %v4195_v21  }
  0x20   : >> { %4107 = vst [vmem:[#allocation19_spill] sm:$0xff] %v2735_v23  ;;  %4108 = vst [vmem:[#allocation20_spill] sm:$0xff] %v2739_v24  ;;  %s2785_s28 = smov 127   ;;  %s2786_s29 = smov 126   ;;  %v4134_v0 = vld [vmem:[#allocation2_spill] sm:$0xff]  ;;  %v4135_v1 = vld [vmem:[#allocation3_spill] sm:$0xff] }
  0x21   : >> { %4109 = vst [vmem:[#allocation21_spill] sm:$0xff] %v2743_v25  ;;  %4110 = vst [vmem:[#allocation22_spill] sm:$0xff] %v2747_v26  ;;  %s338_s26 = sadd.s32 %s1972_s7, %s4119_s11  ;;  %v4136_v3 = vld [vmem:[#allocation5_spill] sm:$0xff]  ;;  %v4137_v2 = vld [vmem:[#allocation4_spill] sm:$0xff]  ;;  %vm920_vm2 = vcmask 982016   ;;  %vm933_vm3 = vcmask 1043456  }
  0x22   : >> { %4111 = vst [vmem:[#allocation23_spill] sm:$0xff] %v2751_v27  ;;  %4112 = vst [vmem:[#allocation24_spill] sm:$0xff] %v2755_v28  ;;  %s2070_s10 = smul.u32 56, %s338_s26  ;;  %v4138_v5 = vld [vmem:[#allocation7_spill] sm:$0xff]  ;;  %v4139_v4 = vld [vmem:[#allocation6_spill] sm:$0xff]  ;;  %vm1082_vm4 = vcmask 146432  }
  0x23   : >> { %4113 = vst [vmem:[#allocation25_spill] sm:$0xff] %v2759_v29  ;;  %4114 = vst [vmem:[#allocation26_spill] sm:$0xff] %v2763_v30  ;;  %v4145_v6 = vld [vmem:[#allocation8_spill] sm:$0xff]  ;;  %s2078_s30 = smul.u32 56, %s2783_s19  ;;  %vm1667_vm5 = vcmask 146436   ;;  %vm1107_vm7 = vcmask 1041408  }
  0x24   : >> { %4115 = vst [vmem:[#allocation27_spill] sm:$0xff] %v2767_v31  ;;  %4116 = vst [vmem:[#allocation28_spill] sm:$0xff] %v2771_v32  ;;  %s3065_s27 = scalar_lea.vmem %s2949_s9, %s2070_s10  ;;  %vm1109_vm8 = vcmask 140288   ;;  %vm1675_vm9 = vcmask 1040384   ;;  %vm1676_vm10 = vcmask 143364   ;;  %s322_s19 = sadd.s32 1, %s2783_s19  }
  0x25   : >> { %4117 = vst [vmem:[#allocation29_spill] sm:$0xff] %v2775_v33  ;;  %4118 = vst [vmem:[#allocation30_spill] sm:$0xff] %v2779_v34  ;;  %v3068_v35 = vld [vmem:[%s3065_s27 + $0x8] sm:$0xff]  ;;  %v3071_v36 = vld [vmem:[%s3065_s27] sm:$0xff]  ;;  %s3818_s6 = scalar_lea.vmem %s2974_s12, %s2078_s30  ;;  %p3975_p8 = scmp.ge.s32.totalorder %s322_s19, 27  }
  0x26   : >> { %v3074_v37 = vld [vmem:[%s3065_s27 + $0x10] sm:$0xff]  ;;  %v351_v38 = vunpack.c.l.bf16 %v3068_v35  ;;  %v352_v39 = vunpack.c.h.bf16 %v3068_v35  ;;  %v349_v40 = vunpack.c.l.bf16 %v3071_v36  ;;  %v350_v41 = vunpack.c.h.bf16 %v3071_v36  ;;  %v3081_v42 = vld [vmem:[%s3065_s27 + $0x38] sm:$0xff]  ;;  %v3084_v43 = vld [vmem:[%s3065_s27 + $0x48] sm:$0xff] }
  0x27   : >> { %v353_v44 = vunpack.c.l.bf16 %v3074_v37  ;;  %v354_v45 = vunpack.c.h.bf16 %v3074_v37  ;;  %v4054_v46 = vunpack.c.l.bf16 %v3081_v42  ;;  %v4055_v47 = vunpack.c.h.bf16 %v3081_v42  ;;  %v3091_v48 = vld [vmem:[%s3065_s27 + $0x40] sm:$0xff]  ;;  %v345_v58 = vld [vmem:[%s3065_s27 + $0x18] sm:$0xff]  ;;  %vm3813_vm6 = vmor %vm1667_vm5, %vm933_vm3 }
  0x28   : >> { %v3093_v49 = vpack.i.bf16 %v352_v39, %v351_v38  ;;  %v3095_v50 = vpack.i.bf16 %v350_v41, %v349_v40  ;;  %v378_v51 = vunpack.c.l.bf16 %v3084_v43  ;;  %v379_v52 = vunpack.c.h.bf16 %v3084_v43  ;;  %v3114_v57 = vld [vmem:[%s3065_s27 + $0x20] sm:$0xff]  ;;  %v3128_v39 = vld [vmem:[%s3065_s27 + $0x58] sm:$0xff]  ;;  %v3131_v40 = vld [vmem:[%s3065_s27 + $0x50] sm:$0xff] }
  0x29   : >> { %v3103_v53 = vpack.i.bf16 %v354_v45, %v353_v44  ;;  %v3109_v54 = vpack.i.bf16 %v4055_v47, %v4054_v46  ;;  %v376_v55 = vunpack.c.l.bf16 %v3091_v48  ;;  %v377_v56 = vunpack.c.h.bf16 %v3091_v48  ;;  %v347_v46 = vld [vmem:[%s3065_s27 + $0x28] sm:$0xff]  ;;  %v3158_v22 = vld [vmem:[%s3065_s27 + $0x60] sm:$0xff]  ;;  %vm1677_vm11 = vmor %vm1676_vm10, %vm1675_vm9 }
  0x2a   : >> { %2318 = vrot.lane.b32.xlu1 %v3093_v49, %s2785_s28  ;;  %2308 = vrot.lane.b32.xlu0 %v3095_v50, %s2785_s28  ;;  %v3117_v59 = vpack.i.bf16 %v379_v52, %v378_v51  ;;  %v357_v60 = vunpack.c.l.bf16 %v3114_v57  ;;  %v358_v62 = vunpack.c.h.bf16 %v3114_v57  ;;  %v355_v63 = vunpack.c.l.bf16 %v345_v58 }
  0x2b   : >> { %v3124_v61 = vpack.i.bf16 %v377_v56, %v376_v55  ;;  %v356_v38 = vunpack.c.h.bf16 %v345_v58  ;;  %v382_v41 = vunpack.c.l.bf16 %v3128_v39  ;;  %v383_v44 = vunpack.c.h.bf16 %v3128_v39  ;;  %v3144_v56 = vld [vmem:[%s3065_s27 + $0x30] sm:$0xff] }
  0x2c   : >> { %v3139_v45 = vpack.i.bf16 %v358_v62, %v357_v60  ;;  %v380_v52 = vunpack.c.l.bf16 %v3131_v40  ;;  %v381_v55 = vunpack.c.h.bf16 %v3131_v40  ;;  %v4056_v21 = vunpack.c.l.bf16 %v3144_v56 }
  0x2d   : >> { %v2337_v51 = vpack.i.bf16 %v356_v38, %v355_v63  ;;  %v3147_v47 = vpack.i.bf16 %v383_v44, %v382_v41  ;;  %v4057_v60 = vunpack.c.h.bf16 %v3144_v56  ;;  %v359_v62 = vunpack.c.l.bf16 %v347_v46  ;;  %v3155_v38 = vld [vmem:[%s3065_s27 + $0x68] sm:$0xff] }
  0x2e   : >> { %2323 = vrot.lane.b32.xlu1 %v3103_v53, %s2785_s28  ;;  %2313 = vrot.lane.b32.xlu0 %v3109_v54, %s2785_s28  ;;  %v2347_v23 = vpack.i.bf16 %v381_v55, %v380_v52  ;;  %v360_v63 = vunpack.c.h.bf16 %v347_v46  ;;  %v384_v55 = vunpack.c.l.bf16 %v3158_v22  ;;  %v385_v28 = vunpack.c.h.bf16 %v3158_v22 }
  0x2f   : >> { %v2362_v44 = vpack.i.bf16 %v4057_v60, %v4056_v21  ;;  %v1991_v29 = vcombine.high %v3071_v36, %v3068_v35  ;;  %v1990_v41 = vcombine.low %v3071_v36, %v3068_v35  ;;  %v2038_v25 = vcombine.high %v3081_v42, %v3091_v48 }
  0x30   : >> { %v2357_v52 = vpack.i.bf16 %v360_v63, %v359_v62  ;;  %v1993_v30 = vcombine.high %v3074_v37, %v345_v58  ;;  %v2037_v21 = vcombine.low %v3081_v42, %v3091_v48  ;;  %v4120_v62 = vunpack.c.l.bf16 %v3155_v38 }
  0x31   : >> { %940 = vmatprep.subr.bf16.mxu0 %v1991_v29  ;;  %v4121_v63 = vunpack.c.h.bf16 %v3155_v38  ;;  %v2367_v31 = vpack.i.bf16 %v385_v28, %v384_v55  ;;  %v2040_v35 = vcombine.high %v3084_v43, %v3131_v40  ;;  %1378 = vmatprep.subr.bf16.mxu1 %v2038_v25  ;;  %v1992_v29 = vcombine.low %v3074_v37, %v345_v58 }
  0x32   : >> { %2333 = vrot.lane.b32.xlu1 %v3117_v59, %s2785_s28  ;;  %2328 = vrot.lane.b32.xlu0 %v3124_v61, %s2785_s28  ;;  %v1995_v36 = vcombine.high %v3114_v57, %v347_v46  ;;  %v2039_v24 = vcombine.low %v3084_v43, %v3131_v40  ;;  %v2042_v32 = vcombine.high %v3128_v39, %v3158_v22  ;;  %vm1679_vm12 = vcmask (%p3975_p8), 7168  }
  0x33   : >> { %v2372_v60 = vpack.i.bf16 %v4121_v63, %v4120_v62  ;;  %941 = vmatpush1.bf16.msra.mxu0 %v1990_v41  ;;  %1379 = vmatpush1.bf16.msra.mxu1 %v2037_v21  ;;  %v1994_v25 = vcombine.low %v3114_v57, %v347_v46  ;;  %v2041_v21 = vcombine.low %v3128_v39, %v3158_v22  ;;  %v3316_v41 = vld [vmem:[%s3065_s27 + $0xd0] sm:$0xff]  ;;  %vm1686_vm13 = vcmask (%p3975_p8), 1024  }
  0x34   : >> { %942 = vmatprep.subr.bf16.mxu0 %v1993_v30  ;;  %1380 = vmatprep.subr.bf16.mxu1 %v2040_v35  ;;  %v3222_v30 = vld [vmem:[%s3065_s27 + $0x70] sm:$0xff]  ;;  %4128 = vst [vmem:[#allocation37_spill] sm:$0xff] %v3316_v41 }
  0x35   : >> { %v4062_v46 = vunpack.c.l.bf16 %v3222_v30 }
  0x36   : >> { %2343 = vrot.lane.b32.xlu1 %v3139_v45, %s2785_s28  ;;  %2338 = vrot.lane.b32.xlu0 %v2337_v51, %s2785_s28 }
  0x37   : >> { %943 = vmatpush1.bf16.msra.mxu0 %v1992_v29  ;;  %1381 = vmatpush1.bf16.msra.mxu1 %v2039_v24  ;;  %v3217_v24 = vld [vmem:[%s3065_s27 + $0x78] sm:$0xff] }
  0x38   : >> { %944 = vmatprep.subr.bf16.mxu0 %v1995_v36  ;;  %1382 = vmatprep.subr.bf16.mxu1 %v2042_v32  ;;  %v402_v37 = vunpack.c.h.bf16 %v3217_v24  ;;  %v3270_v36 = vld [vmem:[%s3065_s27 + $0xa0] sm:$0xff] }
  0x39   : >> { %4122 = vst [vmem:[#allocation31_spill] sm:$0xff] %v3270_v36 }
  0x3a   : >> { %2353 = vrot.lane.b32.xlu1 %v3147_v47, %s2785_s28  ;;  %2348 = vrot.lane.b32.xlu0 %v2347_v23, %s2785_s28 }
  0x3b   : >> { %945 = vmatpush1.bf16.msra.mxu0 %v1994_v25  ;;  %1383 = vmatpush1.bf16.msra.mxu1 %v2041_v21 }
  0x3e   : >> { %2363 = vrot.lane.b32.xlu1 %v2362_v44, %s2785_s28  ;;  %2358 = vrot.lane.b32.xlu0 %v2357_v52, %s2785_s28 }
  0x42   : >> { %2373 = vrot.lane.b32.xlu1 %v2372_v60, %s2785_s28  ;;  %2368 = vrot.lane.b32.xlu0 %v2367_v31, %s2785_s28 }
  0x46   : >> { %2383 = vrot.lane.b32.xlu1 %v3093_v49, %s2786_s29  ;;  %2378 = vrot.lane.b32.xlu0 %v3095_v50, %s2786_s29  ;;  %v4063_v49 = vunpack.c.h.bf16 %v3222_v30  ;;  %v3234_v50 = vld [vmem:[%s3065_s27 + $0x88] sm:$0xff] }
  0x47   : >> { %v406_v57 = vunpack.c.h.bf16 %v3234_v50 }
  0x4a   : >> { %2393 = vrot.lane.b32.xlu1 %v3124_v61, %s2786_s29  ;;  %2388 = vrot.lane.b32.xlu0 %v3109_v54, %s2786_s29  ;;  %v2447_v61 = vpack.i.bf16 %v4063_v49, %v4062_v46 }
  0x4e   : >> { %2403 = vrot.lane.b32.xlu1 %v2337_v51, %s2786_s29  ;;  %2398 = vrot.lane.b32.xlu0 %v3103_v53, %s2786_s29  ;;  %v3237_v53 = vld [vmem:[%s3065_s27 + $0x80] sm:$0xff]  ;;  %v3254_v51 = vld [vmem:[%s3065_s27 + $0x98] sm:$0xff] }
  0x4f   : >> { %v403_v58 = vunpack.c.l.bf16 %v3237_v53  ;;  %v410_v55 = vunpack.c.h.bf16 %v3254_v51 }
  0x52   : >> { %2413 = vrot.lane.b32.xlu1 %v2347_v23, %s2786_s29  ;;  %2408 = vrot.lane.b32.xlu0 %v3117_v59, %s2786_s29  ;;  %v401_v23 = vunpack.c.l.bf16 %v3217_v24 }
  0x54   : >> { %v2452_v59 = vpack.i.bf16 %v402_v37, %v401_v23  ;;  %v4058_v23 = vunpack.c.l.bf16 %v3270_v36  ;;  %v4059_v37 = vunpack.c.h.bf16 %v3270_v36 }
  0x56   : >> { %2423 = vrot.lane.b32.xlu1 %v2357_v52, %s2786_s29  ;;  %2418 = vrot.lane.b32.xlu0 %v3139_v45, %s2786_s29  ;;  %v404_v45 = vunpack.c.h.bf16 %v3237_v53  ;;  %v3259_v52 = vld [vmem:[%s3065_s27 + $0x90] sm:$0xff] }
  0x57   : >> { %v407_v35 = vunpack.c.l.bf16 %v3259_v52  ;;  %v408_v29 = vunpack.c.h.bf16 %v3259_v52 }
  0x58   : >> { %v2457_v63 = vpack.i.bf16 %v404_v45, %v403_v58  ;;  %v3289_v58 = vld [vmem:[%s3065_s27 + $0xa8] sm:$0xff]  ;;  %v3292_v45 = vld [vmem:[%s3065_s27 + $0xb0] sm:$0xff] }
  0x59   : >> { %v2467_v21 = vpack.i.bf16 %v408_v29, %v407_v35  ;;  %4123 = vst [vmem:[#allocation32_spill] sm:$0xff] %v3289_v58  ;;  %4124 = vst [vmem:[#allocation33_spill] sm:$0xff] %v3292_v45  ;;  %v3301_v35 = vld [vmem:[%s3065_s27 + $0xb8] sm:$0xff] }
  0x5a   : >> { %2433 = vrot.lane.b32.xlu1 %v2367_v31, %s2786_s29  ;;  %2428 = vrot.lane.b32.xlu0 %v3147_v47, %s2786_s29  ;;  %v405_v47 = vunpack.c.l.bf16 %v3234_v50  ;;  %4125 = vst [vmem:[#allocation34_spill] sm:$0xff] %v3301_v35  ;;  %v1186_v29 = vunpack.c.l.bf16 %v3301_v35 }
  0x5c   : >> { %v2462_v62 = vpack.i.bf16 %v406_v57, %v405_v47  ;;  %v2477_v47 = vpack.i.bf16 %v4059_v37, %v4058_v23  ;;  %v2009_v57 = vcombine.high %v2892_v7, %v2902_v9 }
  0x5e   : >> { %2443 = vrot.lane.b32.xlu1 %v2372_v60, %s2786_s29  ;;  %2438 = vrot.lane.b32.xlu0 %v2362_v44, %s2786_s29  ;;  %v409_v44 = vunpack.c.l.bf16 %v3254_v51  ;;  %v3313_v60 = vld [vmem:[%s3065_s27 + $0xc8] sm:$0xff] }
  0x5f   : >> { %972 = vmatprep.mubr.bf16.mxu0 %v2009_v57  ;;  %1410 = vmatprep.mubr.bf16.mxu1 %v2009_v57  ;;  %v1187_v57 = vunpack.c.h.bf16 %v3301_v35  ;;  %4127 = vst [vmem:[#allocation36_spill] sm:$0xff] %v3313_v60  ;;  %v1190_v54 = vunpack.c.l.bf16 %v3313_v60 }
  0x60   : >> { %v2472_v25 = vpack.i.bf16 %v410_v55, %v409_v44  ;;  %v1182_v44 = vunpack.c.l.bf16 %v3289_v58  ;;  %v1184_v55 = vunpack.c.l.bf16 %v3292_v45 }
  0x61   : >> { %v2527_v31 = vpack.i.bf16 %v1187_v57, %v1186_v29 }
  0x62   : >> { %2453 = vrot.lane.b32.xlu1 %v2452_v59, %s2785_s28  ;;  %2448 = vrot.lane.b32.xlu0 %v2447_v61, %s2785_s28 }
  0x66   : >> { %2463 = vrot.lane.b32.xlu1 %v2462_v62, %s2785_s28  ;;  %2458 = vrot.lane.b32.xlu0 %v2457_v63, %s2785_s28 }
  0x6a   : >> { %2473 = vrot.lane.b32.xlu1 %v2472_v25, %s2785_s28  ;;  %2468 = vrot.lane.b32.xlu0 %v2467_v21, %s2785_s28 }
  0x6e   : >> { %2483 = vrot.lane.b32.xlu1 %v2447_v61, %s2786_s29  ;;  %2478 = vrot.lane.b32.xlu0 %v2477_v47, %s2785_s28  ;;  %v1183_v61 = vunpack.c.h.bf16 %v3289_v58 }
  0x72   : >> { %2493 = vrot.lane.b32.xlu1 %v2457_v63, %s2786_s29  ;;  %2488 = vrot.lane.b32.xlu0 %v2452_v59, %s2786_s29  ;;  %v1185_v63 = vunpack.c.h.bf16 %v3292_v45  ;;  %v3304_v59 = vld [vmem:[%s3065_s27 + $0xc0] sm:$0xff] }
  0x73   : >> { %4126 = vst [vmem:[#allocation35_spill] sm:$0xff] %v3304_v59  ;;  %v1188_v23 = vunpack.c.l.bf16 %v3304_v59  ;;  %v1189_v37 = vunpack.c.h.bf16 %v3304_v59 }
  0x76   : >> { %2503 = vrot.lane.b32.xlu1 %v2467_v21, %s2786_s29  ;;  %2498 = vrot.lane.b32.xlu0 %v2462_v62, %s2786_s29  ;;  %v2517_v62 = vpack.i.bf16 %v1183_v61, %v1182_v44  ;;  %v2522_v21 = vpack.i.bf16 %v1185_v63, %v1184_v55  ;;  %v1192_v44 = vunpack.c.l.bf16 %v3316_v41  ;;  %v1193_v61 = vunpack.c.h.bf16 %v3316_v41  ;;  %v3325_v55 = vld [vmem:[%s3065_s27 + $0xd8] sm:$0xff] }
  0x77   : >> { %4129 = vst [vmem:[#allocation38_spill] sm:$0xff] %v3325_v55  ;;  %v4060_v57 = vunpack.c.l.bf16 %v3325_v55  ;;  %v4061_v32 = vunpack.c.h.bf16 %v3325_v55 }
  0x78   : >> { %v2542_v29 = vpack.i.bf16 %v1193_v61, %v1192_v44 }
  0x7a   : >> { %2513 = vrot.lane.b32.xlu1 %v2477_v47, %s2786_s29  ;;  %2508 = vrot.lane.b32.xlu0 %v2472_v25, %s2786_s29  ;;  %v2532_v47 = vpack.i.bf16 %v1189_v37, %v1188_v23  ;;  %v1191_v25 = vunpack.c.h.bf16 %v3313_v60  ;;  %v2547_v23 = vpack.i.bf16 %v4061_v32, %v4060_v57 }
  0x7c   : >> { %v2537_v63 = vpack.i.bf16 %v1191_v25, %v1190_v54 }
  0x7e   : >> { %2518 = vrot.lane.b32.xlu0 %v2517_v62, %s2785_s28  ;;  %2523 = vrot.lane.b32.xlu1 %v2522_v21, %s2785_s28 }
  0x82   : >> { %2528 = vrot.lane.b32.xlu0 %v2527_v31, %s2785_s28  ;;  %2533 = vrot.lane.b32.xlu1 %v2532_v47, %s2785_s28 }
  0x86   : >> { %2538 = vrot.lane.b32.xlu0 %v2537_v63, %s2785_s28  ;;  %2543 = vrot.lane.b32.xlu1 %v2542_v29, %s2785_s28 }
  0x8a   : >> { %2548 = vrot.lane.b32.xlu0 %v2547_v23, %s2785_s28  ;;  %2553 = vrot.lane.b32.xlu1 %v2517_v62, %s2786_s29  ;;  %v4130_v62 = vunpack.c.h.bf16 %v3144_v56 }
  0x8e   : >> { %2558 = vrot.lane.b32.xlu0 %v2522_v21, %s2786_s29  ;;  %2563 = vrot.lane.b32.xlu1 %v2527_v31, %s2786_s29 }
  0x92   : >> { %2568 = vrot.lane.b32.xlu0 %v2532_v47, %s2786_s29  ;;  %2573 = vrot.lane.b32.xlu1 %v2537_v63, %s2786_s29  ;;  %v4131_v63 = vunpack.c.l.bf16 %v3144_v56 }
  0x96   : >> { %2578 = vrot.lane.b32.xlu0 %v2542_v29, %s2786_s29  ;;  %2583 = vrot.lane.b32.xlu1 %v2547_v23, %s2786_s29 }
  0x9c   : >> { %v2319_v54 = vpop.permute.xlu1 %2318  ;;  %v2309_v37 = vpop.permute.xlu0 %2308 }
  0x9d   : >> { %v2321_v25 = vunpack.i.h.bf16 %v2319_v54  ;;  %v2320_v44 = vunpack.i.l.bf16 %v2319_v54  ;;  %v2311_v61 = vunpack.i.h.bf16 %v2309_v37  ;;  %v2310_v57 = vunpack.i.l.bf16 %v2309_v37 }
  0x9e   : >> { %v4132_v37 = vunpack.c.h.bf16 %v3155_v38 }
  0x9f   : >> { %v758_v21 = vpack.c.bf16 %v2311_v61, %v4130_v62  ;;  %v456_v31 = vsel %vm455_vm0, %v2310_v57, %v2311_v61  ;;  %v457_v29 = vsel %vm455_vm0, %v2320_v44, %v2321_v25 }
  0xa0   : >> { %v2324_v32 = vpop.permute.xlu1 %2323  ;;  %v2314_v47 = vpop.permute.xlu0 %2313  ;;  %v757_v28 = vpack.c.bf16 %v456_v31, %v4131_v63 }
  0xa1   : >> { %v2326_v23 = vunpack.i.h.bf16 %v2324_v32  ;;  %v2325_v46 = vunpack.i.l.bf16 %v2324_v32  ;;  %v3351_v49 = vunpack.i.h.bf16 %v2314_v47  ;;  %v2315_v27 = vunpack.i.l.bf16 %v2314_v47  ;;  %946 = vmatprep.subr.bf16.mxu0 %v758_v21 }
  0xa2   : >> { %947 = vmatpush1.bf16.msra.mxu0 %v757_v28  ;;  %v4133_v32 = vunpack.c.l.bf16 %v3155_v38 }
  0xa3   : >> { %v760_v54 = vpack.c.bf16 %v2326_v23, %v2321_v25  ;;  %v1315_v62 = vpack.c.bf16 %v3351_v49, %v4132_v37  ;;  %v458_v57 = vsel %vm455_vm0, %v2325_v46, %v2326_v23  ;;  %v3359_v56 = vsel %vm455_vm0, %v2315_v27, %v3351_v49 }
  0xa4   : >> { %v2334_v61 = vpop.permute.xlu1 %2333  ;;  %v2329_v44 = vpop.permute.xlu0 %2328  ;;  %v759_v31 = vpack.c.bf16 %v458_v57, %v457_v29  ;;  %v1314_v47 = vpack.c.bf16 %v3359_v56, %v4133_v32 }
  0xa5   : >> { %v3364_v21 = vunpack.i.h.bf16 %v2334_v61  ;;  %v2335_v28 = vunpack.i.l.bf16 %v2334_v61  ;;  %v3366_v25 = vunpack.i.h.bf16 %v2329_v44  ;;  %v2330_v63 = vunpack.i.l.bf16 %v2329_v44  ;;  %948 = vmatprep.subr.bf16.mxu0 %v760_v54  ;;  %1384 = vmatprep.subr.bf16.mxu1 %v1315_v62 }
  0xa6   : >> { %949 = vmatpush1.bf16.msra.mxu0 %v759_v31  ;;  %1385 = vmatpush1.bf16.msra.mxu1 %v1314_v47 }
  0xa7   : >> { %v1317_v27 = vpack.c.bf16 %v3364_v21, %v3366_v25  ;;  %v3372_v46 = vsel %vm455_vm0, %v2330_v63, %v3366_v25  ;;  %v3376_v29 = vsel %vm455_vm0, %v2335_v28, %v3364_v21 }
  0xa8   : >> { %v2344_v23 = vpop.permute.xlu1 %2343  ;;  %v2339_v37 = vpop.permute.xlu0 %2338  ;;  %v1316_v57 = vpack.c.bf16 %v3376_v29, %v3372_v46 }
  0xa9   : >> { %v2346_v54 = vunpack.i.h.bf16 %v2344_v23  ;;  %v2345_v62 = vunpack.i.l.bf16 %v2344_v23  ;;  %v2341_v61 = vunpack.i.h.bf16 %v2339_v37  ;;  %v2340_v44 = vunpack.i.l.bf16 %v2339_v37  ;;  %1386 = vmatprep.subr.bf16.mxu1 %v1317_v27 }
  0xaa   : >> { %1387 = vmatpush1.bf16.msra.mxu1 %v1316_v57 }
  0xab   : >> { %v762_v31 = vpack.c.bf16 %v2346_v54, %v2341_v61  ;;  %v459_v32 = vsel %vm455_vm0, %v2340_v44, %v2341_v61  ;;  %v460_v47 = vsel %vm455_vm0, %v2345_v62, %v2346_v54 }
  0xac   : >> { %v2354_v63 = vpop.permute.xlu1 %2353  ;;  %v2349_v26 = vpop.permute.xlu0 %2348  ;;  %v761_v28 = vpack.c.bf16 %v460_v47, %v459_v32 }
  0xad   : >> { %v3382_v33 = vunpack.i.h.bf16 %v2354_v63  ;;  %v2355_v34 = vunpack.i.l.bf16 %v2354_v63  ;;  %v3384_v20 = vunpack.i.h.bf16 %v2349_v26  ;;  %v2350_v16 = vunpack.i.l.bf16 %v2349_v26  ;;  %950 = vmatprep.subr.bf16.mxu0 %v762_v31 }
  0xae   : >> { %951 = vmatpush1.bf16.msra.mxu0 %v761_v28 }
  0xaf   : >> { %v1319_v27 = vpack.c.bf16 %v3382_v33, %v3384_v20  ;;  %v3390_v23 = vsel %vm455_vm0, %v2350_v16, %v3384_v20  ;;  %v3394_v37 = vsel %vm455_vm0, %v2355_v34, %v3382_v33 }
  0xb0   : >> { %v2364_v57 = vpop.permute.xlu1 %2363  ;;  %v2359_v54 = vpop.permute.xlu0 %2358  ;;  %v1318_v62 = vpack.c.bf16 %v3394_v37, %v3390_v23 }
  0xb1   : >> { %v2366_v61 = vunpack.i.h.bf16 %v2364_v57  ;;  %v2365_v26 = vunpack.i.l.bf16 %v2364_v57  ;;  %v2361_v44 = vunpack.i.h.bf16 %v2359_v54  ;;  %v2360_v31 = vunpack.i.l.bf16 %v2359_v54  ;;  %1388 = vmatprep.subr.bf16.mxu1 %v1319_v27 }
  0xb2   : >> { %1389 = vmatpush1.bf16.msra.mxu1 %v1318_v62 }
  0xb3   : >> { %v764_v32 = vpack.c.bf16 %v2366_v61, %v2361_v44  ;;  %v461_v47 = vsel %vm455_vm0, %v2360_v31, %v2361_v44  ;;  %v462_v16 = vsel %vm455_vm0, %v2365_v26, %v2366_v61 }
  0xb4   : >> { %v2374_v63 = vpop.permute.xlu1 %2373  ;;  %v2369_v28 = vpop.permute.xlu0 %2368  ;;  %v763_v34 = vpack.c.bf16 %v462_v16, %v461_v47 }
  0xb5   : >> { %v3400_v18 = vunpack.i.h.bf16 %v2374_v63  ;;  %v2375_v12 = vunpack.i.l.bf16 %v2374_v63  ;;  %v3402_v14 = vunpack.i.h.bf16 %v2369_v28  ;;  %v2370_v55 = vunpack.i.l.bf16 %v2369_v28  ;;  %952 = vmatprep.subr.bf16.mxu0 %v764_v32 }
  0xb6   : >> { %953 = vmatpush1.bf16.msra.mxu0 %v763_v34 }
  0xb7   : >> { %v1321_v27 = vpack.c.bf16 %v3400_v18, %v3402_v14  ;;  %v3408_v57 = vsel %vm455_vm0, %v2370_v55, %v3402_v14  ;;  %v3412_v54 = vsel %vm455_vm0, %v2375_v12, %v3400_v18 }
  0xb8   : >> { %v2384_v62 = vpop.permute.xlu1 %2383  ;;  %v2379_v61 = vpop.permute.xlu0 %2378  ;;  %v1320_v26 = vpack.c.bf16 %v3412_v54, %v3408_v57 }
  0xb9   : >> { %v2386_v44 = vunpack.i.h.bf16 %v2384_v62  ;;  %v2385_v31 = vunpack.i.l.bf16 %v2384_v62  ;;  %v2381_v32 = vunpack.i.h.bf16 %v2379_v61  ;;  %v2380_v47 = vunpack.i.l.bf16 %v2379_v61  ;;  %1390 = vmatprep.subr.bf16.mxu1 %v1321_v27 }
  0xba   : >> { %1391 = vmatpush1.bf16.msra.mxu1 %v1320_v26 }
  0xbb   : >> { %v766_v16 = vpack.c.bf16 %v2386_v44, %v2381_v32  ;;  %v506_v55 = vsel %vm505_vm1, %v2380_v47, %v2381_v32  ;;  %v507_v63 = vsel %vm505_vm1, %v2385_v31, %v2386_v44 }
  0xbc   : >> { %v2394_v28 = vpop.permute.xlu1 %2393  ;;  %v2389_v12 = vpop.permute.xlu0 %2388  ;;  %v765_v34 = vpack.c.bf16 %v507_v63, %v506_v55 }
  0xbd   : >> { %v3418_v8 = vunpack.i.h.bf16 %v2394_v28  ;;  %v2395_v10 = vunpack.i.l.bf16 %v2394_v28  ;;  %v3420_v60 = vunpack.i.h.bf16 %v2389_v12  ;;  %v2390_v41 = vunpack.i.l.bf16 %v2389_v12  ;;  %954 = vmatprep.subr.bf16.mxu0 %v766_v16 }
  0xbe   : >> { %955 = vmatpush1.bf16.msra.mxu0 %v765_v34 }
  0xbf   : >> { %v1323_v27 = vpack.c.bf16 %v3418_v8, %v3420_v60  ;;  %v3426_v62 = vsel %vm505_vm1, %v2390_v41, %v3420_v60  ;;  %v3430_v61 = vsel %vm505_vm1, %v2395_v10, %v3418_v8 }
  0xc0   : >> { %v2404_v26 = vpop.permute.xlu1 %2403  ;;  %v2399_v44 = vpop.permute.xlu0 %2398  ;;  %v1322_v31 = vpack.c.bf16 %v3430_v61, %v3426_v62 }
  0xc1   : >> { %v2406_v32 = vunpack.i.h.bf16 %v2404_v26  ;;  %v2405_v47 = vunpack.i.l.bf16 %v2404_v26  ;;  %v2401_v16 = vunpack.i.h.bf16 %v2399_v44  ;;  %v2400_v55 = vunpack.i.l.bf16 %v2399_v44  ;;  %1392 = vmatprep.subr.bf16.mxu1 %v1323_v27 }
  0xc2   : >> { %1393 = vmatpush1.bf16.msra.mxu1 %v1322_v31  ;;  %v2787_v31 = vmov 0  }
  0xc3   : >> { %v768_v63 = vpack.c.bf16 %v2406_v32, %v2401_v16  ;;  %v508_v28 = vsel %vm505_vm1, %v2400_v55, %v2401_v16  ;;  %v509_v41 = vsel %vm505_vm1, %v2405_v47, %v2406_v32  ;;  %2587 = vset.pattern.permute.xlu0 %v2787_v31  ;;  %2588 = vset.pattern.permute.xlu1 %v2787_v31 }
  0xc4   : >> { %v2414_v12 = vpop.permute.xlu1 %2413  ;;  %v2409_v34 = vpop.permute.xlu0 %2408  ;;  %v767_v10 = vpack.c.bf16 %v509_v41, %v508_v28  ;;  %817 = vperm.xlu0 %2587, %v4134_v0   ;;  %822 = vperm.xlu1 %2588, %v4135_v1  }
  0xc5   : >> { %v3436_v35 = vunpack.i.h.bf16 %v2414_v12  ;;  %v2415_v59 = vunpack.i.l.bf16 %v2414_v12  ;;  %v3438_v19 = vunpack.i.h.bf16 %v2409_v34  ;;  %v2410_v58 = vunpack.i.l.bf16 %v2409_v34  ;;  %956 = vmatprep.subr.bf16.mxu0 %v768_v63 }
  0xc6   : >> { %957 = vmatpush1.bf16.msra.mxu0 %v767_v10 }
  0xc7   : >> { %v1325_v27 = vpack.c.bf16 %v3436_v35, %v3438_v19  ;;  %v3444_v26 = vsel %vm505_vm1, %v2410_v58, %v3438_v19  ;;  %v3448_v44 = vsel %vm505_vm1, %v2415_v59, %v3436_v35 }
  0xc8   : >> { %v2424_v32 = vpop.permute.xlu1 %2423  ;;  %v2419_v47 = vpop.permute.xlu0 %2418  ;;  %v1324_v16 = vpack.c.bf16 %v3448_v44, %v3444_v26  ;;  %832 = vperm.xlu0 %2587, %v4136_v3   ;;  %827 = vperm.xlu1 %2588, %v4137_v2  }
  0xc9   : >> { %v2426_v55 = vunpack.i.h.bf16 %v2424_v32  ;;  %v2425_v63 = vunpack.i.l.bf16 %v2424_v32  ;;  %v2421_v28 = vunpack.i.h.bf16 %v2419_v47  ;;  %v2420_v41 = vunpack.i.l.bf16 %v2419_v47  ;;  %1394 = vmatprep.subr.bf16.mxu1 %v1325_v27 }
  0xca   : >> { %1395 = vmatpush1.bf16.msra.mxu1 %v1324_v16 }
  0xcb   : >> { %v770_v58 = vpack.c.bf16 %v2426_v55, %v2421_v28  ;;  %v510_v59 = vsel %vm505_vm1, %v2420_v41, %v2421_v28  ;;  %v511_v12 = vsel %vm505_vm1, %v2425_v63, %v2426_v55 }
  0xcc   : >> { %v2434_v34 = vpop.permute.xlu1 %2433  ;;  %v2429_v10 = vpop.permute.xlu0 %2428  ;;  %v769_v45 = vpack.c.bf16 %v511_v12, %v510_v59  ;;  %842 = vperm.xlu0 %2587, %v4138_v5   ;;  %837 = vperm.xlu1 %2588, %v4139_v4  }
  0xcd   : >> { %v3457_v0 = vunpack.i.h.bf16 %v2434_v34  ;;  %v2435_v31 = vunpack.i.l.bf16 %v2434_v34  ;;  %v3459_v32 = vunpack.i.h.bf16 %v2429_v10  ;;  %v2430_v47 = vunpack.i.l.bf16 %v2429_v10  ;;  %958 = vmatprep.subr.bf16.mxu0 %v770_v58 }
  0xce   : >> { %959 = vmatpush1.bf16.msra.mxu0 %v769_v45  ;;  %v2044_v34 = vcombine.high %v3217_v24, %v3237_v53  ;;  %v4140_v10 = vunpack.c.h.bf16 %v3081_v42 }
  0xcf   : >> { %v1327_v27 = vpack.c.bf16 %v3457_v0, %v3459_v32  ;;  %v3466_v16 = vsel %vm505_vm1, %v2430_v47, %v3459_v32  ;;  %v3470_v55 = vsel %vm505_vm1, %v2435_v31, %v3457_v0  ;;  %v4141_v47 = vunpack.c.h.bf16 %v3222_v30 }
  0xd0   : >> { %v2444_v63 = vpop.permute.xlu1 %2443  ;;  %v2439_v28 = vpop.permute.xlu0 %2438  ;;  %v1326_v41 = vpack.c.bf16 %v3470_v55, %v3466_v16  ;;  %847 = vperm.xlu1 %2588, %v4145_v6   ;;  %v4149_v6 = vcombine.high %v3158_v22, %v3155_v38 }
  0xd1   : >> { %v3475_v58 = vunpack.i.h.bf16 %v2444_v63  ;;  %v2445_v45 = vunpack.i.l.bf16 %v2444_v63  ;;  %v2441_v59 = vunpack.i.h.bf16 %v2439_v28  ;;  %v2440_v12 = vunpack.i.l.bf16 %v2439_v28  ;;  %1396 = vmatprep.subr.bf16.mxu1 %v1327_v27 }
  0xd2   : >> { %1397 = vmatpush1.bf16.msra.mxu1 %v1326_v41  ;;  %v4142_v27 = vunpack.c.l.bf16 %v3081_v42  ;;  %v4143_v41 = vunpack.c.l.bf16 %v3222_v30 }
  0xd3   : >> { %v772_v31 = vpack.c.bf16 %v4140_v10, %v2441_v59  ;;  %v1329_v1 = vpack.c.bf16 %v4141_v47, %v3475_v58  ;;  %v512_v2 = vsel %vm505_vm1, %v2440_v12, %v2441_v59  ;;  %v3488_v63 = vsel %vm505_vm1, %v2445_v45, %v3475_v58 }
  0xd4   : >> { %v771_v28 = vpack.c.bf16 %v4142_v27, %v512_v2  ;;  %v1328_v3 = vpack.c.bf16 %v4143_v41, %v3488_v63  ;;  %v2454_v4 = vpop.permute.xlu1 %2453  ;;  %v2449_v5 = vpop.permute.xlu0 %2448  ;;  %v2043_v59 = vcombine.low %v3217_v24, %v3237_v53  ;;  %v4144_v45 = vcombine.high %v3091_v48, %v3084_v43 }
  0xd5   : >> { %960 = vmatprep.subr.bf16.mxu0 %v772_v31  ;;  %1398 = vmatprep.subr.bf16.mxu1 %v1329_v1  ;;  %v2046_v2 = vcombine.high %v3234_v50, %v3259_v52  ;;  %v3503_v10 = vunpack.i.h.bf16 %v2454_v4  ;;  %v2455_v1 = vunpack.i.l.bf16 %v2454_v4  ;;  %v3505_v31 = vunpack.i.h.bf16 %v2449_v5 }
  0xd6   : >> { %961 = vmatpush1.bf16.msra.mxu0 %v771_v28  ;;  %1399 = vmatpush1.bf16.msra.mxu1 %v1328_v3  ;;  %v2450_v3 = vunpack.i.l.bf16 %v2449_v5  ;;  %v4146_v47 = vcombine.low %v3091_v48, %v3084_v43  ;;  %v4147_v27 = vcombine.high %v3131_v40, %v3128_v39  ;;  %v2048_v28 = vcombine.high %v3254_v51, %v3270_v36 }
  0xd7   : >> { %962 = vmatprep.subr.bf16.mxu0 %v4144_v45  ;;  %1400 = vmatprep.subr.bf16.mxu1 %v2044_v34  ;;  %v2045_v34 = vcombine.low %v3234_v50, %v3259_v52  ;;  %v2047_v5 = vcombine.low %v3254_v51, %v3270_v36  ;;  %v3525_v48 = vsel %vm455_vm0, %v2455_v1, %v3503_v10 }
  0xd8   : >> { %v2464_v42 = vpop.permute.xlu1 %2463  ;;  %v2459_v12 = vpop.permute.xlu0 %2458  ;;  %v3521_v43 = vsel %vm455_vm0, %v2450_v3, %v3505_v31  ;;  %v1337_v1 = vpack.c.bf16 %v3503_v10, %v3505_v31 }
  0xd9   : >> { %v3530_v45 = vunpack.i.h.bf16 %v2464_v42 }
  0xda   : >> { %963 = vmatpush1.bf16.msra.mxu0 %v4146_v47  ;;  %1401 = vmatpush1.bf16.msra.mxu1 %v2043_v59  ;;  %v4148_v59 = vcombine.low %v3131_v40, %v3128_v39  ;;  %v3532_v47 = vunpack.i.h.bf16 %v2459_v12  ;;  %v780_v39 = vpack.c.bf16 %v3366_v25, %v3351_v49  ;;  %v1336_v40 = vpack.c.bf16 %v3525_v48, %v3521_v43 }
  0xdb   : >> { %964 = vmatprep.subr.bf16.mxu0 %v4147_v27  ;;  %1402 = vmatprep.subr.bf16.mxu1 %v2046_v2  ;;  %v2465_v2 = vunpack.i.l.bf16 %v2464_v42  ;;  %v2460_v27 = vunpack.i.l.bf16 %v2459_v12  ;;  %v4150_v42 = vcombine.low %v3158_v22, %v3155_v38  ;;  %v779_v38 = vpack.c.bf16 %v3372_v46, %v3359_v56 }
  0xdc   : >> { %v2474_v4 = vpop.permute.xlu1 %2473  ;;  %v2469_v41 = vpop.permute.xlu0 %2468 }
  0xdd   : >> { %v3550_v12 = vsel %vm455_vm0, %v2460_v27, %v3532_v47  ;;  %v3556_v49 = vunpack.i.h.bf16 %v2474_v4  ;;  %v2475_v25 = vunpack.i.l.bf16 %v2474_v4  ;;  %v2470_v22 = vunpack.i.l.bf16 %v2469_v41 }
  0xde   : >> { %965 = vmatpush1.bf16.msra.mxu0 %v4148_v59  ;;  %1403 = vmatpush1.bf16.msra.mxu1 %v2045_v34  ;;  %v3554_v34 = vsel %vm455_vm0, %v2465_v2, %v3530_v45  ;;  %v782_v27 = vpack.c.bf16 %v3384_v20, %v3364_v21  ;;  %v781_v21 = vpack.c.bf16 %v3390_v23, %v3376_v29 }
  0xdf   : >> { %966 = vmatprep.subr.bf16.mxu0 %v4149_v6  ;;  %1404 = vmatprep.subr.bf16.mxu1 %v2048_v28  ;;  %v1339_v6 = vpack.c.bf16 %v3530_v45, %v3532_v47  ;;  %v3558_v28 = vunpack.i.h.bf16 %v2469_v41  ;;  %v1338_v2 = vpack.c.bf16 %v3554_v34, %v3550_v12  ;;  %v3572_v56 = vsel %vm455_vm0, %v2475_v25, %v3556_v49 }
  0xe0   : >> { %v2484_v3 = vpop.permute.xlu1 %2483  ;;  %v2479_v36 = vpop.permute.xlu0 %2478  ;;  %v784_v41 = vpack.c.bf16 %v3402_v14, %v3382_v33 }
  0xe1   : >> { %v3568_v4 = vunpack.i.h.bf16 %v2479_v36  ;;  %v3576_v46 = vsel %vm455_vm0, %v2470_v22, %v3558_v28  ;;  %v1341_v20 = vpack.c.bf16 %v3556_v49, %v3558_v28 }
  0xe2   : >> { %967 = vmatpush1.bf16.msra.mxu0 %v4150_v42  ;;  %1405 = vmatpush1.bf16.msra.mxu1 %v2047_v5  ;;  %v2480_v42 = vunpack.i.l.bf16 %v2479_v36  ;;  %v2008_v36 = vcombine.low %v2892_v7, %v2902_v9 }
  0xe3   : >> { %968 = vmatprep.subr.bf16.mxu0 %v780_v39  ;;  %1406 = vmatprep.subr.bf16.mxu1 %v1337_v1  ;;  %v3566_v1 = vunpack.i.h.bf16 %v2484_v3  ;;  %v2485_v39 = vunpack.i.l.bf16 %v2484_v3 }
  0xe4   : >> { %v2494_v5 = vpop.permute.xlu1 %2493  ;;  %v2489_v59 = vpop.permute.xlu0 %2488  ;;  %v3598_v14 = vsel %vm455_vm0, %v2480_v42, %v3568_v4 }
  0xe5   : >> { %v3586_v3 = vunpack.i.h.bf16 %v2494_v5  ;;  %v3588_v25 = vunpack.i.h.bf16 %v2489_v59  ;;  %v2490_v22 = vunpack.i.l.bf16 %v2489_v59  ;;  %v3594_v29 = vsel %vm505_vm1, %v2485_v39, %v3566_v1 }
  0xe6   : >> { %969 = vmatpush1.bf16.msra.mxu0 %v779_v38  ;;  %1407 = vmatpush1.bf16.msra.mxu1 %v1336_v40  ;;  %v2495_v40 = vunpack.i.l.bf16 %v2494_v5  ;;  %v1343_v38 = vpack.c.bf16 %v3566_v1, %v3568_v4  ;;  %v783_v5 = vpack.c.bf16 %v3408_v57, %v3394_v37  ;;  %v786_v59 = vpack.c.bf16 %v3420_v60, %v3400_v18 }
  0xe7   : >> { %970 = vmatprep.subr.bf16.mxu0 %v782_v27  ;;  %1408 = vmatprep.subr.bf16.mxu1 %v1339_v6  ;;  %v1340_v6 = vpack.c.bf16 %v3572_v56, %v3576_v46  ;;  %v2013_v27 = vcombine.high %v2912_v11, %v2924_v13  ;;  %v3616_v42 = vsel %vm505_vm1, %v2490_v22, %v3588_v25 }
  0xe8   : >> { %v2504_v33 = vpop.permute.xlu1 %2503  ;;  %v2499_v23 = vpop.permute.xlu0 %2498  ;;  %v3612_v39 = vsel %vm505_vm1, %v2495_v40, %v3586_v3  ;;  %v788_v22 = vpack.c.bf16 %v3438_v19, %v3418_v8 }
  0xe9   : >> { %v3618_v37 = vunpack.i.h.bf16 %v2504_v33  ;;  %v2505_v18 = vunpack.i.l.bf16 %v2504_v33  ;;  %v3620_v60 = vunpack.i.h.bf16 %v2499_v23  ;;  %v2500_v57 = vunpack.i.l.bf16 %v2499_v23 }
  0xea   : >> { %971 = vmatpush1.bf16.msra.mxu0 %v781_v21  ;;  %1409 = vmatpush1.bf16.msra.mxu1 %v1338_v2  ;;  %v1342_v2 = vpack.c.bf16 %v3594_v29, %v3598_v14  ;;  %v785_v21 = vpack.c.bf16 %v3426_v62, %v3412_v54  ;;  %v1344_v40 = vpack.c.bf16 %v3612_v39, %v3616_v42 }
  0xeb   : >> { %1011 = vmatprep.subr.bf16.mxu0 %v784_v41  ;;  %1449 = vmatprep.subr.bf16.mxu1 %v1341_v20  ;;  %v1345_v20 = vpack.c.bf16 %v3586_v3, %v3588_v25  ;;  %v3634_v33 = vsel %vm505_vm1, %v2505_v18, %v3618_v37  ;;  %v3638_v54 = vsel %vm505_vm1, %v2500_v57, %v3620_v60 }
  0xec   : >> { %v2514_v41 = vpop.permute.xlu1 %2513  ;;  %v1347_v62 = vpack.c.bf16 %v3618_v37, %v3620_v60  ;;  %v1346_v57 = vpack.c.bf16 %v3634_v33, %v3638_v54 }
  0xed   : >> { %973 = vmatmul.mubr.bf16.vlgmr.msra.gmra.mrb[0].mxu0 %v2008_v36  ;;  %1411 = vmatmul.mubr.bf16.vlgmr.msra.gmra.mrb[0].mxu1 %v2008_v36  ;;  %v2509_v36 = vpop.permute.xlu0 %2508  ;;  %v3642_v23 = vunpack.i.h.bf16 %v2514_v41  ;;  %v2515_v8 = vunpack.i.l.bf16 %v2514_v41 }
  0xee   : >> { %1012 = vmatpush1.bf16.msra.mxu0 %v783_v5  ;;  %1450 = vmatpush1.bf16.msra.mxu1 %v1340_v6  ;;  %v2012_v6 = vcombine.low %v2912_v11, %v2924_v13  ;;  %v3644_v19 = vunpack.i.h.bf16 %v2509_v36  ;;  %v787_v5 = vpack.c.bf16 %v3444_v26, %v3430_v61 }
  0xef   : >> { %1013 = vmatprep.subr.bf16.mxu0 %v786_v59  ;;  %1451 = vmatprep.subr.bf16.mxu1 %v1343_v38  ;;  %v2510_v38 = vunpack.i.l.bf16 %v2509_v36  ;;  %v3660_v61 = vsel %vm505_vm1, %v2515_v8, %v3642_v23  ;;  %v2002_v8 = vcombine.low %v3222_v30, %v3217_v24 }
  0xf0   : >> { %982 = vmatprep.mubr.bf16.mxu0 %v2013_v27  ;;  %1420 = vmatprep.mubr.bf16.mxu1 %v2013_v27  ;;  %v2017_v27 = vcombine.high %v2934_v15, %v2944_v17  ;;  %v3654_v18 = vpop.permute.xlu1 %2523 }
  0xf1   : >> { %v3648_v59 = vpop.permute.xlu0 %2518  ;;  %v3664_v26 = vsel %vm505_vm1, %v2510_v38, %v3644_v19 }
  0xf2   : >> { %1014 = vmatpush1.bf16.msra.mxu0 %v785_v21  ;;  %1452 = vmatpush1.bf16.msra.mxu1 %v1342_v2  ;;  %v790_v2 = vpack.c.bf16 %v3459_v32, %v3436_v35  ;;  %v1349_v35 = vpack.c.bf16 %v3642_v23, %v3644_v19  ;;  %v789_v32 = vpack.c.bf16 %v3466_v16, %v3448_v44  ;;  %v4151_v16 = vld [vmem:[#allocation33_spill] sm:$0xff] }
  0xf3   : >> { %1015 = vmatprep.subr.bf16.mxu0 %v788_v22  ;;  %1453 = vmatprep.subr.bf16.mxu1 %v1345_v20  ;;  %v792_v20 = vpack.c.bf16 %v3475_v58, %v3457_v0  ;;  %v2016_v21 = vcombine.low %v2934_v15, %v2944_v17  ;;  %v1348_v41 = vpack.c.bf16 %v3660_v61, %v3664_v26  ;;  %v4153_v58 = vld [vmem:[#allocation15_spill] sm:$0xff] }
  0xf4   : >> { %v2003_v44 = vcombine.high %v3222_v30, %v3217_v24  ;;  %v791_v0 = vpack.c.bf16 %v3488_v63, %v3470_v55  ;;  %v4155_v55 = vld [vmem:[#allocation34_spill] sm:$0xff]  ;;  %v2004_v24 = vcombine.low %v3237_v53, %v3234_v50 }
  0xf5   : >> { %983 = vmatmul.mubr.bf16.gmra.mrb[4].mxu0 %v2012_v6  ;;  %1421 = vmatmul.mubr.bf16.gmra.mrb[4].mxu1 %v2012_v6  ;;  %v3676_v36 = vpop.permute.xlu0 %2528  ;;  %v3682_v6 = vpop.permute.xlu1 %2533 }
  0xf6   : >> { %1016 = vmatpush1.bf16.msra.mxu0 %v787_v5  ;;  %1454 = vmatpush1.bf16.msra.mxu1 %v1344_v40  ;;  %v4152_v40 = vld [vmem:[#allocation32_spill] sm:$0xff]  ;;  %v2005_v5 = vcombine.high %v3237_v53, %v3234_v50  ;;  %v2006_v50 = vcombine.low %v3259_v52, %v3254_v51 }
  0xf7   : >> { %1017 = vmatprep.subr.bf16.mxu0 %v790_v2  ;;  %1455 = vmatprep.subr.bf16.mxu1 %v1347_v62  ;;  %v2050_v22 = vcombine.high %v4152_v40, %v4151_v16  ;;  %v2021_v62 = vcombine.high %v4153_v58, %v4153_v58  ;;  %v2049_v38 = vcombine.low %v4152_v40, %v4151_v16  ;;  %v4158_v40 = vld [vmem:[#allocation10_spill] sm:$0xff] }
  0xf8   : >> { %992 = vmatprep.mubr.bf16.mxu0 %v2017_v27  ;;  %1430 = vmatprep.mubr.bf16.mxu1 %v2017_v27  ;;  %v4154_v27 = vld [vmem:[#allocation35_spill] sm:$0xff] }
  0xf9   : >> { %v2052_v63 = vcombine.high %v4155_v55, %v4154_v27  ;;  %v2539_v2 = vpop.permute.xlu0 %2538  ;;  %v2051_v30 = vcombine.low %v4155_v55, %v4154_v27 }
  0xfa   : >> { %1018 = vmatpush1.bf16.msra.mxu0 %v789_v32  ;;  %1456 = vmatpush1.bf16.msra.mxu1 %v1346_v57  ;;  %v3696_v57 = vpop.permute.xlu1 %2543  ;;  %v2521_v32 = vunpack.i.h.bf16 %v3648_v59 }
  0xfb   : >> { %1019 = vmatprep.subr.bf16.mxu0 %v792_v20  ;;  %1457 = vmatprep.subr.bf16.mxu1 %v1349_v35  ;;  %v2020_v35 = vcombine.low %v4153_v58, %v4153_v58  ;;  %v2520_v20 = vunpack.i.l.bf16 %v3648_v59  ;;  %v2526_v59 = vunpack.i.h.bf16 %v3654_v18 }
  0xfd   : >> { %993 = vmatmul.mubr.bf16.gmra.mrb[8].mxu0 %v2016_v21  ;;  %1431 = vmatmul.mubr.bf16.gmra.mrb[8].mxu1 %v2016_v21  ;;  %v2007_v21 = vcombine.high %v3259_v52, %v3254_v51  ;;  %v4163_v52 = vld [vmem:[#allocation31_spill] sm:$0xff] }
  0xfe   : >> { %1020 = vmatpush1.bf16.msra.mxu0 %v791_v0  ;;  %1458 = vmatpush1.bf16.msra.mxu1 %v1348_v41  ;;  %v4156_v41 = vld [vmem:[#allocation37_spill] sm:$0xff]  ;;  %v2554_v51 = vpop.permute.xlu1 %2553 }
  0xff   : >> { %1021 = vmatprep.subr.bf16.mxu0 %v2003_v44  ;;  %1459 = vmatprep.subr.bf16.mxu1 %v2050_v22  ;;  %v4157_v44 = vld [vmem:[#allocation36_spill] sm:$0xff]  ;;  %v4159_v22 = vld [vmem:[#allocation9_spill] sm:$0xff] }
 0x100   : >> { %1002 = vmatprep.mubr.bf16.mxu0 %v2021_v62  ;;  %1440 = vmatprep.mubr.bf16.mxu1 %v2021_v62  ;;  %v2054_v16 = vcombine.high %v4157_v44, %v4156_v41  ;;  %v4160_v0 = vmov %v4159_v22  ;;  %v2011_v62 = vcombine.high %v4159_v22, %v4158_v40  ;;  %v2053_v53 = vcombine.low %v4157_v44, %v4156_v41 }
 0x101   : >> { %v2541_v22 = vunpack.i.h.bf16 %v2539_v2 }
 0x102   : >> { %1022 = vmatpush1.bf16.msra.mxu0 %v2002_v8  ;;  %1460 = vmatpush1.bf16.msra.mxu1 %v2049_v38  ;;  %v2525_v8 = vunpack.i.l.bf16 %v3654_v18  ;;  %v2549_v38 = vpop.permute.xlu0 %2548 }
 0x103   : >> { %1023 = vmatprep.subr.bf16.mxu0 %v2005_v5  ;;  %1461 = vmatprep.subr.bf16.mxu1 %v2052_v63  ;;  %v4161_v5 = vld [vmem:[#allocation38_spill] sm:$0xff]  ;;  %v1238_v63 = vsel %vm455_vm0, %v2520_v20, %v2521_v32  ;;  %v2536_v20 = vunpack.i.h.bf16 %v3682_v6 }
 0x104   : >> { %v4162_v27 = vunpack.c.h.bf16 %v4161_v5  ;;  %v4165_v41 = vunpack.c.l.bf16 %v4161_v5 }
 0x105   : >> { %1003 = vmatmul.mubr.bf16.gmra.mrb[12].mxu0 %v2020_v35  ;;  %1441 = vmatmul.mubr.bf16.gmra.mrb[12].mxu1 %v2020_v35  ;;  %v2531_v35 = vunpack.i.h.bf16 %v3676_v36 }
 0x106   : >> { %1024 = vmatpush1.bf16.msra.mxu0 %v2004_v24  ;;  %1462 = vmatpush1.bf16.msra.mxu1 %v2051_v30  ;;  %v1357_v55 = vpack.c.bf16 %v2521_v32, %v4162_v27  ;;  %v2530_v24 = vunpack.i.l.bf16 %v3676_v36  ;;  %v4164_v30 = vunpack.c.h.bf16 %v4163_v52  ;;  %v1356_v44 = vpack.c.bf16 %v1238_v63, %v4165_v41  ;;  %v2559_v27 = vpop.permute.xlu0 %2558 }
 0x107   : >> { %1025 = vmatprep.subr.bf16.mxu0 %v2007_v21  ;;  %1463 = vmatprep.subr.bf16.mxu1 %v2054_v16  ;;  %v1239_v32 = vsel %vm455_vm0, %v2525_v8, %v2526_v59  ;;  %v2535_v36 = vunpack.i.l.bf16 %v3682_v6  ;;  %v1359_v21 = vpack.c.bf16 %v2531_v35, %v2526_v59  ;;  %v2546_v59 = vunpack.i.h.bf16 %v3696_v57 }
 0x108   : >> { %2025 = vmatprep.mubr.msk.bf16.mxu0 %vm920_vm2, %v2011_v62  ;;  %2056 = vmatprep.mubr.msk.bf16.mxu1 %vm920_vm2, %v2011_v62  ;;  %v800_v18 = vpack.c.bf16 %v3505_v31, %v4164_v30  ;;  %v1240_v16 = vsel %vm455_vm0, %v2530_v24, %v2531_v35  ;;  %v2540_v62 = vunpack.i.l.bf16 %v2539_v2  ;;  %v4166_v31 = vunpack.c.l.bf16 %v4163_v52 }
 0x109   : >> { %v1358_v8 = vpack.c.bf16 %v1240_v16, %v1239_v32  ;;  %v1241_v6 = vsel %vm455_vm0, %v2535_v36, %v2536_v20  ;;  %v1361_v2 = vpack.c.bf16 %v2541_v22, %v2536_v20  ;;  %v2550_v35 = vunpack.i.l.bf16 %v2549_v38 }
 0x10a   : >> { %1026 = vmatpush1.bf16.msra.mxu0 %v2006_v50  ;;  %1464 = vmatpush1.bf16.msra.mxu1 %v2053_v53  ;;  %v799_v5 = vpack.c.bf16 %v3521_v43, %v4166_v31  ;;  %v802_v50 = vpack.c.bf16 %v3532_v47, %v3503_v10  ;;  %v2564_v53 = vpop.permute.xlu1 %2563  ;;  %v1242_v63 = vsel %vm455_vm0, %v2540_v62, %v2541_v22  ;;  %v2551_v43 = vunpack.i.h.bf16 %v2549_v38 }
 0x10b   : >> { %1027 = vmatprep.subr.bf16.mxu0 %v800_v18  ;;  %1465 = vmatprep.subr.bf16.mxu1 %v1357_v55  ;;  %v2545_v55 = vunpack.i.l.bf16 %v3696_v57  ;;  %v801_v10 = vpack.c.bf16 %v3550_v12, %v3525_v48  ;;  %v804_v47 = vpack.c.bf16 %v3558_v28, %v3530_v45  ;;  %v1360_v24 = vpack.c.bf16 %v1242_v63, %v1241_v6  ;;  %v2569_v18 = vpop.permute.xlu0 %2568 }
 0x10c   : >> { %v2556_v30 = vunpack.i.h.bf16 %v2554_v51  ;;  %v2555_v57 = vunpack.i.l.bf16 %v2554_v51  ;;  %v1363_v41 = vpack.c.bf16 %v2551_v43, %v2546_v59  ;;  %v2561_v38 = vunpack.i.h.bf16 %v2559_v27 }
 0x10d   : >> { %v1243_v52 = vsel %vm455_vm0, %v2545_v55, %v2546_v59  ;;  %v2560_v32 = vunpack.i.l.bf16 %v2559_v27  ;;  %v803_v48 = vpack.c.bf16 %v3576_v46, %v3554_v34  ;;  %v806_v45 = vpack.c.bf16 %v3568_v4, %v3556_v49 }
 0x10e   : >> { %1028 = vmatpush1.bf16.msra.mxu0 %v799_v5  ;;  %1466 = vmatpush1.bf16.msra.mxu1 %v1356_v44  ;;  %v1244_v44 = vsel %vm455_vm0, %v2550_v35, %v2551_v43  ;;  %v2574_v20 = vpop.permute.xlu1 %2573  ;;  %v1287_v28 = vsel %vm505_vm1, %v2555_v57, %v2556_v30  ;;  %v2566_v51 = vunpack.i.h.bf16 %v2564_v53  ;;  %v2565_v36 = vunpack.i.l.bf16 %v2564_v53  ;;  %v4171_v57 = vld [vmem:[#allocation14_spill] sm:$0xff] }
 0x10f   : >> { %1029 = vmatprep.subr.bf16.mxu0 %v802_v50  ;;  %1467 = vmatprep.subr.bf16.mxu1 %v1359_v21  ;;  %v1362_v12 = vpack.c.bf16 %v1244_v44, %v1243_v52  ;;  %v1365_v21 = vpack.c.bf16 %v2561_v38, %v2556_v30  ;;  %v1288_v16 = vsel %vm505_vm1, %v2560_v32, %v2561_v38  ;;  %v2571_v22 = vunpack.i.h.bf16 %v2569_v18  ;;  %v2579_v46 = vpop.permute.xlu0 %2578  ;;  %v4173_v38 = vld [vmem:[#allocation16_spill] sm:$0xff] }
 0x110   : >> { %v2570_v62 = vunpack.i.l.bf16 %v2569_v18  ;;  %v805_v34 = vpack.c.bf16 %v3598_v14, %v3572_v56  ;;  %v808_v49 = vpack.c.bf16 %v3588_v25, %v3566_v1  ;;  %v1364_v31 = vpack.c.bf16 %v1288_v16, %v1287_v28  ;;  %v4172_v18 = vld [vmem:[#allocation13_spill] sm:$0xff] }
 0x111   : >> { %v1289_v5 = vsel %vm505_vm1, %v2565_v36, %v2566_v51  ;;  %v2576_v27 = vunpack.i.h.bf16 %v2574_v20  ;;  %v2575_v50 = vunpack.i.l.bf16 %v2574_v20  ;;  %v1367_v53 = vpack.c.bf16 %v2571_v22, %v2566_v51 }
 0x112   : >> { %1030 = vmatpush1.bf16.msra.mxu0 %v801_v10  ;;  %1468 = vmatpush1.bf16.msra.mxu1 %v1358_v8  ;;  %v2584_v4 = vpop.permute.xlu1 %2583  ;;  %v1290_v8 = vsel %vm505_vm1, %v2570_v62, %v2571_v22  ;;  %v2581_v6 = vunpack.i.h.bf16 %v2579_v46  ;;  %v2580_v59 = vunpack.i.l.bf16 %v2579_v46  ;;  %v807_v56 = vpack.c.bf16 %v3616_v42, %v3594_v29 }
 0x113   : >> { %1031 = vmatprep.subr.bf16.mxu0 %v804_v47  ;;  %1469 = vmatprep.subr.bf16.mxu1 %v1361_v2  ;;  %v2586_v14 = vunpack.i.h.bf16 %v2584_v4  ;;  %v2585_v1 = vunpack.i.l.bf16 %v2584_v4  ;;  %v810_v25 = vpack.c.bf16 %v3620_v60, %v3586_v3  ;;  %v1366_v55 = vpack.c.bf16 %v1290_v8, %v1289_v5 }
 0x114   : >> { %v1291_v2 = vsel %vm505_vm1, %v2575_v50, %v2576_v27  ;;  %v1369_v63 = vpack.c.bf16 %v2581_v6, %v2576_v27  ;;  %v1292_v43 = vsel %vm505_vm1, %v2580_v59, %v2581_v6  ;;  %v809_v35 = vpack.c.bf16 %v3638_v54, %v3612_v39 }
 0x115   : >> { %v1293_v29 = vsel %vm505_vm1, %v2585_v1, %v2586_v14  ;;  %v812_v42 = vpack.c.bf16 %v3644_v19, %v3618_v37  ;;  %v1368_v10 = vpack.c.bf16 %v1292_v43, %v1291_v2  ;;  %v1371_v3 = vpack.c.bf16 %v2586_v14, %v2586_v14 }
 0x116   : >> { %1032 = vmatpush1.bf16.msra.mxu0 %v803_v48  ;;  %1470 = vmatpush1.bf16.msra.mxu1 %v1360_v24  ;;  %v1370_v60 = vpack.c.bf16 %v1293_v29, %v1293_v29  ;;  %v811_v47 = vpack.c.bf16 %v3664_v26, %v3634_v33  ;;  %v814_v24 = vpack.c.bf16 %v3642_v23, %v3642_v23  ;;  %v4167_v23 = vld [vmem:[#allocation12_spill] sm:$0xff]  ;;  %v4169_v26 = vld [vmem:[#allocation11_spill] sm:$0xff] }
 0x117   : >> { %1033 = vmatprep.subr.bf16.mxu0 %v806_v45  ;;  %1471 = vmatprep.subr.bf16.mxu1 %v1363_v41  ;;  %v813_v39 = vpack.c.bf16 %v3660_v61, %v3660_v61  ;;  %v2010_v33 = vcombine.low %v4160_v0, %v4158_v40  ;;  %v4168_v19 = vmov %v4167_v23  ;;  %v4170_v52 = vmov %v4169_v26 }
 0x118   : >> { %v1373_v37 = vsel %vm933_vm3, %v1370_v60, 0  ;;  %v2015_v30 = vcombine.high %v4169_v26, %v4167_v23  ;;  %v2014_v61 = vcombine.low %v4170_v52, %v4168_v19  ;;  %v2019_v41 = vcombine.high %v4172_v18, %v4171_v57 }
 0x119   : >> { %v935_v54 = vsel %vm933_vm3, %v813_v39, 0  ;;  %v2018_v44 = vcombine.low %v4172_v18, %v4171_v57  ;;  %v2023_v32 = vcombine.high %v4173_v38, %v4173_v38  ;;  %v2022_v20 = vcombine.low %v4173_v38, %v4173_v38 }
 0x11a   : >> { %1034 = vmatpush1.bf16.msra.mxu0 %v805_v34  ;;  %1472 = vmatpush1.bf16.msra.mxu1 %v1362_v12 }
 0x11b   : >> { %1035 = vmatprep.subr.bf16.mxu0 %v808_v49  ;;  %1473 = vmatprep.subr.bf16.mxu1 %v1365_v21 }
 0x11e   : >> { %1036 = vmatpush1.bf16.msra.mxu0 %v807_v56  ;;  %1474 = vmatpush1.bf16.msra.mxu1 %v1364_v31 }
 0x11f   : >> { %1037 = vmatprep.subr.bf16.mxu0 %v810_v25  ;;  %1475 = vmatprep.subr.bf16.mxu1 %v1367_v53 }
 0x122   : >> { %1038 = vmatpush1.bf16.msra.mxu0 %v809_v35  ;;  %1476 = vmatpush1.bf16.msra.mxu1 %v1366_v55 }
 0x123   : >> { %1039 = vmatprep.subr.bf16.mxu0 %v812_v42  ;;  %1477 = vmatprep.subr.bf16.mxu1 %v1369_v63 }
 0x126   : >> { %1040 = vmatpush1.bf16.msra.mxu0 %v811_v47  ;;  %1478 = vmatpush1.bf16.msra.mxu1 %v1368_v10 }
 0x127   : >> { %2024 = vmatprep.subr.msk.bf16.mxu0 %vm933_vm3, %v814_v24  ;;  %2055 = vmatprep.subr.msk.bf16.mxu1 %vm933_vm3, %v1371_v3 }
 0x12a   : >> { %1042 = vmatpush1.bf16.msra.mxu0 %v935_v54  ;;  %1480 = vmatpush1.bf16.msra.mxu1 %v1373_v37 }
 0x12d   : >> { %1044 = vmatmul.mubr.bf16.vlgmr.msra.gmra.mrb[0].mxu0 %v2010_v33  ;;  %1482 = vmatmul.mubr.bf16.vlgmr.msra.gmra.mrb[0].mxu1 %v2010_v33 }
 0x12e   : >> { %2026 = vmatprep.mubr.msk.bf16.mxu0 %vm920_vm2, %v2015_v30  ;;  %2057 = vmatprep.mubr.msk.bf16.mxu1 %vm920_vm2, %v2015_v30 }
 0x135   : >> { %1054 = vmatmul.mubr.bf16.gmra.mrb[4].mxu0 %v2014_v61  ;;  %1492 = vmatmul.mubr.bf16.gmra.mrb[4].mxu1 %v2014_v61 }
 0x136   : >> { %2027 = vmatprep.mubr.msk.bf16.mxu0 %vm920_vm2, %v2019_v41  ;;  %2058 = vmatprep.mubr.msk.bf16.mxu1 %vm920_vm2, %v2019_v41 }
 0x13d   : >> { %1064 = vmatmul.mubr.bf16.gmra.mrb[8].mxu0 %v2018_v44  ;;  %1502 = vmatmul.mubr.bf16.gmra.mrb[8].mxu1 %v2018_v44 }
 0x13e   : >> { %2028 = vmatprep.mubr.msk.bf16.mxu0 %vm920_vm2, %v2023_v32  ;;  %2059 = vmatprep.mubr.msk.bf16.mxu1 %vm920_vm2, %v2023_v32 }
 0x143   : >> { %v818_v48 = vpop.permute.xlu0 %817  ;;  %v823_v45 = vpop.permute.xlu1 %822 }
 0x145   : >> { %1074 = vmatmul.mubr.bf16.gmra.mrb[12].mxu0 %v2022_v20  ;;  %1512 = vmatmul.mubr.bf16.gmra.mrb[12].mxu1 %v2022_v20 }
 0x147   : >> { %v833_v29 = vpop.permute.xlu0 %832  ;;  %v828_v42 = vpop.permute.xlu1 %827 }
 0x200   : >> { %v1045_v12 = vpop.f32.mrb[0].mxu0  ;;  %v1483_v28 = vpop.f32.mrb[0].mxu1 }
 0x201   : >> { %v2079_v51 = vadd.f32 %v1045_v12, %v818_v48  ;;  %v3802_v36 = vadd.f32 %v1483_v28, %v818_v48  ;;  %v1047_v21 = vpop.f32.mrb[1].mxu0  ;;  %v1485_v16 = vpop.f32.mrb[1].mxu1 }
 0x202   : >> { %v2080_v22 = vadd.f32 %v1047_v21, %v818_v48  ;;  %v3805_v62 = vadd.f32 %v1485_v16, %v818_v48  ;;  %v1049_v34 = vpop.f32.mrb[2].mxu0  ;;  %v1487_v46 = vpop.f32.mrb[2].mxu1 }
 0x203   : >> { %v1606_v49 = vmax.f32 %v2079_v51, %v3802_v36  ;;  %v2081_v4 = vadd.f32 %v1049_v34, %v823_v45  ;;  %v2095_v31 = vadd.f32 %v1487_v46, %v823_v45  ;;  %v1051_v5 = vpop.f32.mrb[3].mxu0  ;;  %v1489_v27 = vpop.f32.mrb[3].mxu1  ;;  %v1121_v50 = vmul.f32 %v2079_v51, %v2079_v51 }
 0x204   : >> { %v1607_v53 = vmax.f32 %v2080_v22, %v3805_v62  ;;  %v2082_v8 = vadd.f32 %v1051_v5, %v823_v45  ;;  %v2096_v6 = vadd.f32 %v1489_v27, %v823_v45  ;;  %v1520_v59 = vsel %vm1082_vm4, %v3805_v62, 0.0 }
 0x205   : >> { %v1608_v14 = vmax.f32 %v2081_v4, %v2095_v31  ;;  %v1521_v1 = vadd.f32 %v3802_v36, %v1520_v59  ;;  %v1083_v25 = vsel %vm1082_vm4, %v2080_v22, 0.0  ;;  %v1122_v55 = vmul.f32 %v2080_v22, %v2080_v22 }
 0x206   : >> { %v2071_v2 = vpack.c.bf16 %v1607_v53, %v1606_v49  ;;  %v1609_v63 = vmax.f32 %v2082_v8, %v2096_v6  ;;  %v1084_v43 = vadd.f32 %v2079_v51, %v1083_v25  ;;  %v1087_v35 = vsel %vm1082_vm4, %v2082_v8, 0.0  ;;  %v843_v25 = vpop.permute.xlu0 %842 }
 0x207   : >> { %1522 = vadd.xlane.f32.xlu1 %v1521_v1  ;;  %v1088_v10 = vadd.f32 %v2081_v4, %v1087_v35  ;;  %v1135_v3 = vsel %vm1082_vm4, %v1122_v55, 0.0  ;;  %v1123_v60 = vmul.f32 %v2081_v4, %v2081_v4  ;;  %v1124_v47 = vmul.f32 %v2082_v8, %v2082_v8  ;;  %v838_v55 = vpop.permute.xlu1 %837 }
 0x208   : >> { %1669 = vst.msk [vmem:[%s3818_s6] sm:$0xff] %vm3813_vm6, %v2071_v2  ;;  %v2072_v24 = vpack.c.bf16 %v1609_v63, %v1608_v14  ;;  %1085 = vadd.xlane.f32.xlu0 %v1084_v43  ;;  %v1055_v39 = vpop.f32.mrb[4].mxu0  ;;  %v1493_v37 = vpop.f32.mrb[4].mxu1  ;;  %v1136_v54 = vadd.f32 %v1135_v3, %v1121_v50  ;;  %v1524_v33 = vsel %vm1082_vm4, %v2096_v6, 0.0  ;;  %v1558_v23 = vmul.f32 %v2095_v31, %v2095_v31 }
 0x209   : >> { %v3828_v26 = vadd.f32 %v1055_v39, %v828_v42  ;;  %v3830_v30 = vadd.f32 %v1493_v37, %v828_v42  ;;  %v1057_v61 = vpop.f32.mrb[5].mxu0  ;;  %v1495_v41 = vpop.f32.mrb[5].mxu1  ;;  %v1139_v44 = vsel %vm1082_vm4, %v1124_v47, 0.0  ;;  %v1525_v32 = vadd.f32 %v2095_v31, %v1524_v33 }
 0x20a   : >> { %1670 = vst.msk [vmem:[%s3818_s6 + $0x8] sm:$0xff] %vm3813_vm6, %v2072_v24  ;;  %v3836_v20 = vadd.f32 %v1057_v61, %v828_v42  ;;  %v3838_v48 = vadd.f32 %v1495_v41, %v828_v42  ;;  %v1059_v45 = vpop.f32.mrb[6].mxu0  ;;  %v1497_v12 = vpop.f32.mrb[6].mxu1  ;;  %v1140_v28 = vadd.f32 %v1139_v44, %v1123_v60  ;;  %v1559_v51 = vmul.f32 %v2096_v6, %v2096_v6 }
 0x20b   : >> { %v1610_v21 = vmax.f32 %v3828_v26, %v3830_v30  ;;  %v2085_v16 = vadd.f32 %v1059_v45, %v833_v29  ;;  %v3842_v22 = vadd.f32 %v1497_v12, %v833_v29  ;;  %v1061_v34 = vpop.f32.mrb[7].mxu0  ;;  %v1499_v46 = vpop.f32.mrb[7].mxu1  ;;  %1089 = vadd.xlane.f32.xlu1 %v1088_v10  ;;  %v1556_v49 = vmul.f32 %v3802_v36, %v3802_v36 }
 0x20c   : >> { %v1611_v4 = vmax.f32 %v3836_v20, %v3838_v48  ;;  %v2086_v31 = vadd.f32 %v1061_v34, %v833_v29  ;;  %v2100_v5 = vadd.f32 %v1499_v46, %v833_v29  ;;  %1137 = vadd.xlane.f32.xlu0 %v1136_v54  ;;  %v1574_v27 = vsel %vm1082_vm4, %v1559_v51, 0.0 }
 0x20d   : >> { %v1612_v50 = vmax.f32 %v2085_v16, %v3842_v22  ;;  %v1575_v53 = vadd.f32 %v1574_v27, %v1558_v23  ;;  %v1557_v8 = vmul.f32 %v3805_v62, %v3805_v62  ;;  %v1528_v6 = vsel %vm1082_vm4, %v3838_v48, 0.0 }
 0x20e   : >> { %v2073_v59 = vpack.c.bf16 %v1611_v4, %v1610_v21  ;;  %v1613_v36 = vmax.f32 %v2086_v31, %v2100_v5  ;;  %v1529_v14 = vadd.f32 %v3830_v30, %v1528_v6  ;;  %v1091_v1 = vsel %vm1082_vm4, %v3836_v20, 0.0 }
 0x20f   : >> { %1141 = vadd.xlane.f32.xlu1 %v1140_v28  ;;  %v1570_v2 = vsel %vm1082_vm4, %v1557_v8, 0.0  ;;  %v1092_v63 = vadd.f32 %v3828_v26, %v1091_v1  ;;  %v1127_v43 = vmul.f32 %v2085_v16, %v2085_v16  ;;  %v1128_v35 = vmul.f32 %v2086_v31, %v2086_v31  ;;  %v848_v1 = vpop.permute.xlu1 %847 }
 0x210   : >> { %1671 = vst.msk [vmem:[%s3818_s6 + $0x10] sm:$0xff] %vm3813_vm6, %v2073_v59  ;;  %v2074_v62 = vpack.c.bf16 %v1613_v36, %v1612_v50  ;;  %1526 = vadd.xlane.f32.xlu0 %v1525_v32  ;;  %v1065_v29 = vpop.f32.mrb[8].mxu0  ;;  %v1503_v42 = vpop.f32.mrb[8].mxu1  ;;  %v1571_v10 = vadd.f32 %v1570_v2, %v1556_v49  ;;  %v1095_v3 = vsel %vm1082_vm4, %v2086_v31, 0.0  ;;  %v1562_v60 = vmul.f32 %v3842_v22, %v3842_v22 }
 0x211   : >> { %v3865_v47 = vadd.f32 %v1065_v29, %v838_v55  ;;  %v3867_v24 = vadd.f32 %v1503_v42, %v838_v55  ;;  %v1067_v39 = vpop.f32.mrb[9].mxu0  ;;  %v1505_v37 = vpop.f32.mrb[9].mxu1  ;;  %v1147_v54 = vsel %vm1082_vm4, %v1128_v35, 0.0  ;;  %v3870_v33 = vadd.f32 %v2085_v16, %v1095_v3 }
 0x212   : >> { %1672 = vst.msk [vmem:[%s3818_s6 + $0x18] sm:$0xff] %vm3813_vm6, %v2074_v62  ;;  %v3875_v23 = vadd.f32 %v1067_v39, %v838_v55  ;;  %v3877_v61 = vadd.f32 %v1505_v37, %v838_v55  ;;  %v1069_v41 = vpop.f32.mrb[10].mxu0  ;;  %v1507_v44 = vpop.f32.mrb[10].mxu1  ;;  %v1148_v32 = vadd.f32 %v1147_v54, %v1127_v43  ;;  %v1563_v45 = vmul.f32 %v2100_v5, %v2100_v5 }
 0x213   : >> { %v1614_v12 = vmax.f32 %v3865_v47, %v3867_v24  ;;  %v2089_v28 = vadd.f32 %v1069_v41, %v843_v25  ;;  %v3881_v51 = vadd.f32 %v1507_v44, %v843_v25  ;;  %v1071_v21 = vpop.f32.mrb[11].mxu0  ;;  %v1509_v16 = vpop.f32.mrb[11].mxu1  ;;  %1576 = vadd.xlane.f32.xlu1 %v1575_v53  ;;  %v1125_v34 = vmul.f32 %v3828_v26, %v3828_v26 }
 0x214   : >> { %v1615_v46 = vmax.f32 %v3875_v23, %v3877_v61  ;;  %v2090_v49 = vadd.f32 %v1071_v21, %v843_v25  ;;  %v3887_v4 = vadd.f32 %v1509_v16, %v843_v25  ;;  %1572 = vadd.xlane.f32.xlu0 %v1571_v10  ;;  %v1582_v31 = vsel %vm1082_vm4, %v1563_v45, 0.0 }
 0x215   : >> { %v1616_v27 = vmax.f32 %v2089_v28, %v3881_v51  ;;  %v1583_v50 = vadd.f32 %v1582_v31, %v1562_v60  ;;  %v1126_v8 = vmul.f32 %v3836_v20, %v3836_v20  ;;  %v1099_v53 = vsel %vm1082_vm4, %v3875_v23, 0.0 }
 0x216   : >> { %v2075_v26 = vpack.c.bf16 %v1615_v46, %v1614_v12  ;;  %v1617_v6 = vmax.f32 %v2090_v49, %v3887_v4  ;;  %v3897_v59 = vadd.f32 %v3865_v47, %v1099_v53  ;;  %v1532_v36 = vsel %vm1082_vm4, %v2100_v5, 0.0 }
 0x217   : >> { %1530 = vadd.xlane.f32.xlu1 %v1529_v14  ;;  %v1143_v25 = vsel %vm1082_vm4, %v1126_v8, 0.0  ;;  %v3902_v55 = vadd.f32 %v3842_v22, %v1532_v36  ;;  %v1536_v20 = vsel %vm1082_vm4, %v3877_v61, 0.0  ;;  %v1560_v2 = vmul.f32 %v3830_v30, %v3830_v30 }
 0x218   : >> { %1673 = vst.msk [vmem:[%s3818_s6 + $0x20] sm:$0xff] %vm3813_vm6, %v2075_v26  ;;  %v2076_v43 = vpack.c.bf16 %v1617_v6, %v1616_v27  ;;  %1093 = vadd.xlane.f32.xlu0 %v1092_v63  ;;  %v1075_v5 = vpop.f32.mrb[12].mxu0  ;;  %v1513_v35 = vpop.f32.mrb[12].mxu1  ;;  %v1144_v14 = vadd.f32 %v1143_v25, %v1125_v34  ;;  %v1537_v62 = vadd.f32 %v3867_v24, %v1536_v20  ;;  %v1103_v44 = vsel %vm1082_vm4, %v2090_v49, 0.0 }
 0x219   : >> { %v1561_v22 = vmul.f32 %v3838_v48, %v3838_v48  ;;  %v2091_v29 = vadd.f32 %v1075_v5, %v848_v1  ;;  %v2105_v42 = vadd.f32 %v1513_v35, %v848_v1  ;;  %v1077_v10 = vpop.f32.mrb[13].mxu0  ;;  %v1515_v3 = vpop.f32.mrb[13].mxu1  ;;  %v1131_v60 = vmul.f32 %v2089_v28, %v2089_v28 }
 0x21a   : >> { %v1132_v39 = vmul.f32 %v2090_v49, %v2090_v49  ;;  %1674 = vst.msk [vmem:[%s3818_s6 + $0x28] sm:$0xff] %vm3813_vm6, %v2076_v43  ;;  %v2092_v30 = vadd.f32 %v1077_v10, %v848_v1  ;;  %v2106_v37 = vadd.f32 %v1515_v3, %v848_v1  ;;  %v1079_v63 = vpop.f32.mrb[14].mxu0  ;;  %v1517_v54 = vpop.f32.mrb[14].mxu1  ;;  %v1104_v34 = vadd.f32 %v2089_v28, %v1103_v44 }
 0x21b   : >> { %v1578_v41 = vsel %vm1082_vm4, %v1561_v22, 0.0  ;;  %v1618_v45 = vmax.f32 %v2091_v29, %v2105_v42  ;;  %v1080_v12 = vpop.f32.mrb[15].mxu0  ;;  %v1518_v48 = vpop.f32.mrb[15].mxu1  ;;  %1149 = vadd.xlane.f32.xlu1 %v1148_v32  ;;  %v1108_v31 = vsel %vm1107_vm7, %v2091_v29, 0.0  ;;  %v1129_v32 = vmul.f32 %v3865_v47, %v3865_v47 }
 0x21c   : >> { %v1579_v21 = vadd.f32 %v1578_v41, %v1560_v2  ;;  %v1155_v16 = vsel %vm1082_vm4, %v1132_v39, 0.0  ;;  %v1619_v46 = vmax.f32 %v2092_v30, %v2106_v37  ;;  %1097 = vadd.xlane.f32.xlu0 %v3870_v33  ;;  %v1110_v27 = vsel %vm1109_vm8, %v2092_v30, 0.0  ;;  %v4176_v39 = vld [vmem:[#allocation30_spill] sm:$0xff] }
 0x21d   : >> { %v1156_v56 = vadd.f32 %v1155_v16, %v1131_v60  ;;  %v1111_v49 = vadd.f32 %v1110_v27, %v1108_v31  ;;  %v1130_v8 = vmul.f32 %v3875_v23, %v3875_v23  ;;  %v1544_v28 = vsel %vm1107_vm7, %v2105_v42, 0.0  ;;  %v4180_v12 = vld [vmem:[#allocation22_spill] sm:$0xff] }
 0x21e   : >> { %v2077_v53 = vpack.c.bf16 %v1619_v46, %v1618_v45  ;;  %v1545_v33 = vsel %vm1109_vm8, %v2106_v37, 0.0  ;;  %v1540_v26 = vsel %vm1082_vm4, %v3887_v4, 0.0  ;;  %v1566_v6 = vmul.f32 %v3881_v51, %v3881_v51 }
 0x21f   : >> { %1584 = vadd.xlane.f32.xlu1 %v1583_v50  ;;  %v1151_v36 = vsel %vm1082_vm4, %v1130_v8, 0.0  ;;  %v1546_v1 = vadd.f32 %v1545_v33, %v1544_v28  ;;  %v1541_v47 = vadd.f32 %v3881_v51, %v1540_v26  ;;  %v1567_v23 = vmul.f32 %v3887_v4, %v3887_v4  ;;  %v4184_v8 = vld [vmem:[#allocation28_spill] sm:$0xff] }
 0x220   : >> { %1678 = vst.msk [vmem:[%s3818_s6 + $0x30] sm:$0x11] %vm1677_vm11, %v2077_v53  ;;  %1145 = vadd.xlane.f32.xlu0 %v1144_v14  ;;  %v1152_v25 = vadd.f32 %v1151_v36, %v1129_v32  ;;  %v1564_v20 = vmul.f32 %v3867_v24, %v3867_v24  ;;  %v1565_v2 = vmul.f32 %v3877_v61, %v3877_v61 }
 0x221   : >> { %v1133_v43 = vmul.f32 %v2091_v29, %v2091_v29  ;;  %v1590_v50 = vsel %vm1082_vm4, %v1567_v23, 0.0  ;;  %v1134_v5 = vmul.f32 %v2092_v30, %v2092_v30  ;;  %v1568_v35 = vmul.f32 %v2105_v42, %v2105_v42 }
 0x222   : >> { %v1569_v22 = vmul.f32 %v2106_v37, %v2106_v37  ;;  %v1591_v10 = vadd.f32 %v1590_v50, %v1566_v6  ;;  %v1586_v51 = vsel %vm1082_vm4, %v1565_v2, 0.0 }
 0x223   : >> { %v1159_v4 = vsel %vm1107_vm7, %v1133_v43, 0.0  ;;  %1101 = vadd.xlane.f32.xlu1 %v3897_v59  ;;  %v1587_v14 = vadd.f32 %v1586_v51, %v1564_v20  ;;  %v1160_v3 = vsel %vm1109_vm8, %v1134_v5, 0.0  ;;  %v1594_v24 = vsel %vm1107_vm7, %v1568_v35, 0.0 }
 0x224   : >> { %v1595_v61 = vsel %vm1109_vm8, %v1569_v22, 0.0  ;;  %1534 = vadd.xlane.f32.xlu0 %v3902_v55  ;;  %v1161_v29 = vadd.f32 %v1160_v3, %v1159_v4 }
 0x225   : >> { %v1596_v60 = vadd.f32 %v1595_v61, %v1594_v24 }
 0x227   : >> { %1538 = vadd.xlane.f32.xlu1 %v1537_v62  ;;  %v4178_v62 = vld [vmem:[#allocation29_spill] sm:$0xff] }
 0x228   : >> { %1580 = vadd.xlane.f32.xlu0 %v1579_v21  ;;  %v4181_v21 = vld [vmem:[#allocation23_spill] sm:$0xff] }
 0x22b   : >> { %1157 = vadd.xlane.f32.xlu1 %v1156_v56 }
 0x22c   : >> { %1105 = vadd.xlane.f32.xlu0 %v1104_v34 }
 0x22f   : >> { %1112 = vadd.xlane.f32.xlu1 %v1111_v49 }
 0x230   : >> { %1153 = vadd.xlane.f32.xlu0 %v1152_v25  ;;  %v4186_v25 = vld [vmem:[#allocation27_spill] sm:$0xff] }
 0x233   : >> { %1547 = vadd.xlane.f32.xlu1 %v1546_v1  ;;  %v4185_v1 = vld [vmem:[#allocation20_spill] sm:$0xff] }
 0x234   : >> { %1542 = vadd.xlane.f32.xlu0 %v1541_v47 }
 0x237   : >> { %1592 = vadd.xlane.f32.xlu1 %v1591_v10 }
 0x238   : >> { %1588 = vadd.xlane.f32.xlu0 %v1587_v14 }
 0x23c   : >> { %1162 = vadd.xlane.f32.xlu0 %v1161_v29 }
 0x240   : >> { %1597 = vadd.xlane.f32.xlu0 %v1596_v60  ;;  %v4189_v60 = vld [vmem:[#allocation24_spill] sm:$0xff] }
 0x294   : >> { %v1523_v59 = vpop.xlane.xlu1 %1522 }
 0x295   : >> { %v1086_v42 = vpop.xlane.xlu0 %1085 }
 0x296   : >> { %v1114_v30 = vadd.f32 %v4176_v39, %v1086_v42  ;;  %v4190_v42 = vld [vmem:[#allocation25_spill] sm:$0xff] }
 0x298   : >> { %v3953_v34 = vadd.f32 %v1523_v59, %v1114_v30   ;;  %v1090_v37 = vpop.xlane.xlu1 %1089 }
 0x299   : >> { %v1138_v63 = vpop.xlane.xlu0 %1137  ;;  %v1115_v54 = vadd.f32 %v4178_v62, %v1090_v37 }
 0x29a   : >> { %v4177_v55 = vmov %v3953_v34  ;;  %v1164_v16 = vadd.f32 %v4181_v21, %v1138_v63 }
 0x29b   : > { %1680 = vst.msk [vmem:[%s2979_s16] sm:$0xff] (%p3975_p8), %vm1679_vm12, %v4177_v55 }
 0x29c   : >> { %v1142_v41 = vpop.xlane.xlu1 %1141 }
 0x29d   : >> { %v1527_v44 = vpop.xlane.xlu0 %1526  ;;  %v1165_v48 = vadd.f32 %v4180_v12, %v1142_v41 }
 0x29e   : >> { %v3956_v33 = vadd.f32 %v1527_v44, %v1115_v54   ;;  %v4191_v54 = vld [vmem:[#allocation18_spill] sm:$0xff]  ;;  %v4192_v44 = vld [vmem:[#allocation19_spill] sm:$0xff] }
 0x2a0   : >> { %v4179_v45 = vmov %v3956_v33  ;;  %v1577_v46 = vpop.xlane.xlu1 %1576 }
 0x2a1   : >> { %v3960_v26 = vadd.f32 %v1577_v46, %v1165_v48   ;;  %v1573_v31 = vpop.xlane.xlu0 %1572  ;;  %1681 = vst.msk [vmem:[%s2979_s16 + $0x8] sm:$0xff] (%p3975_p8), %vm1679_vm12, %v4179_v45 }
 0x2a2   : >> { %v3962_v27 = vadd.f32 %v1573_v31, %v1164_v16  }
 0x2a3   : >> { %v4182_v56 = vmov %v3960_v26  ;;  %v4187_v26 = vld [vmem:[#allocation26_spill] sm:$0xff] }
 0x2a4   : >> { %v4183_v49 = vmov %v3962_v27  ;;  %v1531_v32 = vpop.xlane.xlu1 %1530  ;;  %v4188_v27 = vld [vmem:[#allocation21_spill] sm:$0xff]  ;;  %1689 = vst.msk [vmem:[%s2984_s0 + $0x8] sm:$0xff] (%p3975_p8), %vm1679_vm12, %v4182_v56 }
 0x2a5   : >> { %v1094_v34 = vpop.xlane.xlu0 %1093  ;;  %1688 = vst.msk [vmem:[%s2984_s0] sm:$0xff] (%p3975_p8), %vm1679_vm12, %v4183_v49 }
 0x2a6   : >> { %v1116_v28 = vadd.f32 %v4184_v8, %v1094_v34 }
 0x2a8   : >> { %v1551_v53 = vadd.f32 %v1531_v32, %v1116_v28   ;;  %v1150_v6 = vpop.xlane.xlu1 %1149  ;;  %v4193_v32 = vld [vmem:[#allocation17_spill] sm:$0xff] }
 0x2a9   : >> { %v1098_v36 = vpop.xlane.xlu0 %1097  ;;  %v1167_v47 = vadd.f32 %v4185_v1, %v1150_v6 }
 0x2aa   : >> { %v1117_v2 = vadd.f32 %v4186_v25, %v1098_v36  ;;  %1682 = vst.msk [vmem:[%s2979_s16 + $0x10] sm:$0xff] (%p3975_p8), %vm1679_vm12, %v1551_v53 }
 0x2ac   : >> { %v1585_v33 = vpop.xlane.xlu1 %1584 }
 0x2ad   : >> { %v1602_v20 = vadd.f32 %v1585_v33, %v1167_v47   ;;  %v1146_v23 = vpop.xlane.xlu0 %1145  ;;  %v4207_v33 = vmov %v4179_v45 }
 0x2ae   : >> { %v1166_v22 = vadd.f32 %v4188_v27, %v1146_v23  ;;  %v4201_v27 = vmov %v4183_v49 }
 0x2af   : > { %1691 = vst.msk [vmem:[%s2984_s0 + $0x18] sm:$0xff] (%p3975_p8), %vm1679_vm12, %v1602_v20 }
 0x2b0   : >> { %v1102_v43 = vpop.xlane.xlu1 %1101 }
 0x2b1   : >> { %v1535_v50 = vpop.xlane.xlu0 %1534  ;;  %v1118_v35 = vadd.f32 %v4187_v26, %v1102_v43  ;;  %v4200_v26 = vmov %v4182_v56 }
 0x2b2   : >> { %v1552_v5 = vadd.f32 %v1535_v50, %v1117_v2  }
 0x2b4   : >> { %v1539_v10 = vpop.xlane.xlu1 %1538  ;;  %1683 = vst.msk [vmem:[%s2979_s16 + $0x18] sm:$0xff] (%p3975_p8), %vm1679_vm12, %v1552_v5 }
 0x2b5   : >> { %v1553_v51 = vadd.f32 %v1539_v10, %v1118_v35   ;;  %v1581_v4 = vpop.xlane.xlu0 %1580 }
 0x2b6   : >> { %v1601_v14 = vadd.f32 %v1581_v4, %v1166_v22  }
 0x2b7   : > { %1684 = vst.msk [vmem:[%s2979_s16 + $0x20] sm:$0xff] (%p3975_p8), %vm1679_vm12, %v1553_v51 }
 0x2b8   : >> { %v1158_v3 = vpop.xlane.xlu1 %1157  ;;  %v4199_v25 = vmov %v1601_v14  ;;  %1690 = vst.msk [vmem:[%s2984_s0 + $0x10] sm:$0xff] (%p3975_p8), %vm1679_vm12, %v1601_v14 }
 0x2b9   : >> { %v1106_v24 = vpop.xlane.xlu0 %1105  ;;  %v1169_v41 = vadd.f32 %v4191_v54, %v1158_v3 }
 0x2ba   : >> { %v1119_v39 = vadd.f32 %v4190_v42, %v1106_v24  ;;  %v4198_v24 = vmov %v1602_v20 }
 0x2bc   : >> { %v1113_v61 = vpop.xlane.xlu1 %1112 }
 0x2bd   : >> { %v1154_v29 = vpop.xlane.xlu0 %1153  ;;  %v1120_v59 = vadd.f32 %v4189_v60, %v1113_v61 }
 0x2be   : >> { %v1168_v12 = vadd.f32 %v4192_v44, %v1154_v29 }
 0x2c0   : >> { %v1548_v30 = vpop.xlane.xlu1 %1547 }
 0x2c1   : >> { %v1555_v37 = vadd.f32 %v1548_v30, %v1120_v59   ;;  %v1543_v63 = vpop.xlane.xlu0 %1542  ;;  %v4204_v30 = vmov %v1553_v51 }
 0x2c2   : >> { %v1554_v62 = vadd.f32 %v1543_v63, %v1119_v39  }
 0x2c3   : >> { %v4202_v28 = vmov %v1555_v37  ;;  %1687 = vst.msk [vmem:[%s2979_s16 + $0x30] sm:$0x3] (%p3975_p8), %vm1686_vm13, %v1555_v37 }
 0x2c4   : >> { %v1593_v48 = vpop.xlane.xlu1 %1592  ;;  %v4203_v29 = vmov %v1554_v62  ;;  %1685 = vst.msk [vmem:[%s2979_s16 + $0x28] sm:$0xff] (%p3975_p8), %vm1679_vm12, %v1554_v62 }
 0x2c5   : >> { %v1604_v16 = vadd.f32 %v1593_v48, %v1169_v41   ;;  %v1589_v21 = vpop.xlane.xlu0 %1588 }
 0x2c6   : >> { %v1603_v46 = vadd.f32 %v1589_v21, %v1168_v12  }
 0x2c7   : >> { %v4196_v22 = vmov %v1604_v16  ;;  %1693 = vst.msk [vmem:[%s2984_s0 + $0x28] sm:$0xff] (%p3975_p8), %vm1679_vm12, %v1604_v16 }
 0x2c8   : >> { %v4197_v23 = vmov %v1603_v46  ;;  %1692 = vst.msk [vmem:[%s2984_s0 + $0x20] sm:$0xff] (%p3975_p8), %vm1679_vm12, %v1603_v46 }
 0x2c9   : >> { %v1163_v31 = vpop.xlane.xlu0 %1162 }
 0x2ca   : >> { %v1170_v34 = vadd.f32 %v4193_v32, %v1163_v31  ;;  %v4205_v31 = vmov %v1552_v5  ;;  %v4206_v32 = vmov %v1551_v53  ;;  %321 = sbr.rel (!%p3975_p8) target bundleno = 31 (0x1f), region = 98 }
 0x2cd   : >> { %v1598_v8 = vpop.xlane.xlu0 %1597 }
 0x2ce   : >> { %v1605_v6 = vadd.f32 %v1598_v8, %v1170_v34   ;;  %v4208_v34 = vmov %v4177_v55 }
 0x2d0   : >> { %v4195_v21 = vmov %v1605_v6  ;;  %1694 = vst.msk [vmem:[%s2984_s0 + $0x30] sm:$0x3] (%p3975_p8), %vm1686_vm13, %v1605_v6 }
 0x2d1 PF: > { %s16_s22 = sadd.s32 1, %s2723_s22   ;;  %s4209_s18 = smov %s2715_s20 }
 0x2d2   : > { %p13_p9 = scmp.ge.s32.totalorder %s16_s22, 6   ;;  %s4210_s19 = smov %s2719_s21 }
 0x2d3   : > { %s4211_s20 = smov %s4214_s23  ;;  %s4212_s21 = smov %s4218_s24 }
 0x2d4   :  { %15 = sbr.rel (!%p13_p9) target bundleno = 3 (0x3), region = 109 }

// kernel: forward.9
= control target key start
LH: loop header
LB: loop body
LE: loop exit
PB: predicated region body
PF: predicated region fallthrough
CT: control target
= control target key end

     0   :  { %8 = vsyncpa [#allocation3], 0  ;;  %s5510_s12 = smov 0   ;;  %s5776_s0 = inlined_call_operand.vmem [shape: bf16[2,197120], index: 0, kind: input, shape index: {}]   ;;  %s5777_s1 = inlined_call_operand.vmem [shape: bf16[7,197120], index: 1, kind: input, shape index: {}]   ;;  %s5778_s2 = inlined_call_operand.vmem [shape: f32[1,7], index: 2, kind: input, shape index: {}]   ;;  %s5779_s3 = inlined_call_operand.hbm [shape: f32[2,7], index: 3, kind: output, shape index: {}]  }
   0x1 LB: > { %s5516_s13 = sadd.s32 4294967295, %s5486_s12   ;;  %p5098_p0 = scmp.ge.s32.totalorder %s5486_s12, 1  ;;  %s5486_s12 = sphi %s5510_s12, %s14_s12  }
   0x2   : > { %p144_p1 = scmp.lt.s32.totalorder %s5486_s12, 11 }
   0x4   : > { %p145_p2 = pnand %p5098_p0, %p144_p1 }
   0x5   : > { %s167_s14 = smul.u32 (!%p145_p2), 154, %s5516_s13  ;;  %p5100_p4 = scmp.ne.s32.totalorder (!%p145_p2), %s5516_s13, 0 }
   0x6   : > { %148 = sbr.rel (%p145_p2) target bundleno = 570 (0x23a), region = 32 }
   0x7   : > { %p168_p3 = scmp.lt.s32.totalorder (!%p145_p2), %s167_s14, 1539 }
   0xd   : > { %s5781_s14 = smov (!%p168_p3, %s167_s14), 1539  ;;  %182 = sbr.rel (%p5100_p4) target bundleno = 20 (0x14), region = 36 }
   0xe   : > { %s5524_s17 = scalar_lea.vmem %s5776_s0, %s5781_s14  ;;  %s5099_s18 = sshll.u32 %s5781_s14, 2  ;;  %v5101_v0 = vld [vmem:[%s5778_s2] ss:$0 sm:$0xff] (!%p5100_p4)  ;;  %vm191_vm0 = vcmask (!%p5100_p4), 50176  }
   0xf   : > { %s5529_s21 = scalar_lea.vmem %s5777_s1, %s5099_s18  ;;  %192 = vst.msk [vmem:[#allocation2] sm:$0x3] (!%p5100_p4), %vm191_vm0, %v5101_v0 }
  0x14 PF: > { %v214_v1 = vld [vmem:[%s5529_s21] sm:$0xff]  ;;  %v215_v2 = vld [vmem:[%s5529_s21 + $0x8] sm:$0xff]  ;;  %v315_v3 = vlaneseq  ;;  %v216_v8 = vld [vmem:[%s5529_s21 + $0x10] sm:$0xff]  ;;  %v5488_v10 = vmov 1966171168   ;;  %s5489_s24 = smov [#allocation2]  }
  0x15   : > { %v5104_v4 = vcombine.high %v214_v1, %v214_v1  ;;  %v5103_v5 = vcombine.low %v214_v1, %v214_v1  ;;  %v5106_v6 = vcombine.high %v215_v2, %v215_v2  ;;  %v5105_v7 = vcombine.low %v215_v2, %v215_v2  ;;  %v217_v9 = vld [vmem:[%s5529_s21 + $0x18] sm:$0xff]  ;;  %v194_v13 = vld [vmem:[%s5524_s17] sm:$0xff]  ;;  %v195_v19 = vld [vmem:[%s5524_s17 + $0x8] sm:$0xff]  ;;  %s5047_s25 = sshll.u32 %s5489_s24, 4  ;;  %p5265_p5 = scmp.eq.s32.totalorder %s5516_s13, 9  ;;  %s5048_s25 = int_to_ptr.vmem [resolvable:$true] %s5047_s25 }
  0x16   : > { %v313_v11 = vunpack.c.l.s4 %v5488_v10  ;;  %v316_v12 = vshrl.u32 %v315_v3, 7  ;;  %v5108_v14 = vcombine.high %v216_v8, %v216_v8  ;;  %v5110_v15 = vcombine.high %v217_v9, %v217_v9  ;;  %v218_v26 = vld [vmem:[%s5529_s21 + $0x20] sm:$0xff]  ;;  %v219_v30 = vld [vmem:[%s5529_s21 + $0x28] sm:$0xff]  ;;  %v220_v41 = vld [vmem:[%s5529_s21 + $0x30] sm:$0xff]  ;;  %s5450_s26 = scalar_lea.vmem %s5048_s25, 32  ;;  %p5457_p9 = scmp.lt.s32.totalorder %s5048_s25, %s5048_s25 }
  0x17   : > { %1957 = vmatprep.subr.bf16.mxu0 %v5104_v4  ;;  %1997 = vmatprep.subr.bf16.mxu1 %v5106_v6  ;;  %v311_v16 = vcombine.high %v194_v13, %v194_v13  ;;  %v5107_v28 = vcombine.low %v216_v8, %v216_v8  ;;  %v5109_v32 = vcombine.low %v217_v9, %v217_v9  ;;  %v221_v44 = vld [vmem:[%s5529_s21 + $0x38] sm:$0xff]  ;;  %v196_v51 = vld [vmem:[%s5524_s17 + $0x10] sm:$0xff]  ;;  %v222_v54 = vld [vmem:[%s5529_s21 + $0x40] sm:$0xff]  ;;  %vm5038_vm1 = vcmask 50176   ;;  %p5451_p6 = scmp.ne.s32.totalorder %s5048_s25, %s5450_s26  ;;  %p5458_p10 = scmp.lt.s32.totalorder %s5450_s26, %s5450_s26 }
  0x18   : > { %1958 = vmatpush1.bf16.xpose.msra.mxu0 %v5103_v5  ;;  %1998 = vmatpush1.bf16.xpose.msra.mxu1 %v5105_v7  ;;  %v314_v17 = vunpack.c.0.s8 %v313_v11  ;;  %v5112_v34 = vcombine.high %v218_v26, %v218_v26  ;;  %v360_v36 = vcombine.high %v195_v19, %v195_v19  ;;  %v5114_v38 = vcombine.high %v219_v30, %v219_v30  ;;  %v223_v57 = vld [vmem:[%s5529_s21 + $0x48] sm:$0xff]  ;;  %v224_v3 = vld [vmem:[%s5529_s21 + $0x50] sm:$0xff]  ;;  %v225_v6 = vld [vmem:[%s5529_s21 + $0x58] sm:$0xff] }
  0x19   : > { %2037 = vmatprep.subr.bf16.mxu0 %v5108_v14  ;;  %2077 = vmatprep.subr.bf16.mxu1 %v5110_v15  ;;  %v5111_v43 = vcombine.low %v218_v26, %v218_v26  ;;  %v5116_v46 = vcombine.high %v220_v41, %v220_v41  ;;  %v5113_v47 = vcombine.low %v219_v30, %v219_v30  ;;  %v228_v30 = vld [vmem:[%s5529_s21 + $0x70] sm:$0xff]  ;;  %p5452_p7 = pnand %p5451_p6, %p5265_p5  ;;  %p5459_p11 = por %p5458_p10, %p5457_p9 }
  0x1a   : > { %v5540_v18 = vsub.s32 %v314_v17, %v316_v12  ;;  %v5118_v50 = vcombine.high %v221_v44, %v221_v44  ;;  %v5115_v56 = vcombine.low %v220_v41, %v220_v41  ;;  %v5120_v59 = vcombine.high %v222_v54, %v222_v54 }
  0x1b   : > { %v5117_v60 = vcombine.low %v221_v44, %v221_v44  ;;  %v409_v63 = vcombine.high %v196_v51, %v196_v51  ;;  %v5122_v0 = vcombine.high %v223_v57, %v223_v57  ;;  %v5119_v5 = vcombine.low %v222_v54, %v222_v54  ;;  %p5453_p8 = pneg %p5452_p7 }
  0x1c   : > { %v318_v20 = vrot.slane %v194_v13, %v5540_v18  ;;  %v325_v21 = vrot.slane %v311_v16, %v5540_v18  ;;  %v367_v25 = vrot.slane %v195_v19, %v5540_v18  ;;  %v374_v42 = vrot.slane %v360_v36, %v5540_v18  ;;  %v197_v13 = vld [vmem:[%s5524_s17 + $0x18] sm:$0xff]  ;;  %v226_v16 = vld [vmem:[%s5529_s21 + $0x60] sm:$0xff] }
  0x1d   : > { %v416_v55 = vrot.slane %v196_v51, %v5540_v18  ;;  %v423_v4 = vrot.slane %v409_v63, %v5540_v18  ;;  %v5124_v8 = vcombine.high %v224_v3, %v224_v3  ;;  %v5121_v9 = vcombine.low %v223_v57, %v223_v57  ;;  %p5460_p12 = pnand %p5459_p11, %p5453_p8 }
  0x1e   : > { %v326_v22 = vcombine.high %v318_v20, %v318_v20  ;;  %v334_v23 = vrot.slane %v318_v20, %v5540_v18  ;;  %v327_v24 = vcombine.high %v325_v21, %v325_v21  ;;  %v375_v35 = vcombine.high %v367_v25, %v367_v25  ;;  %v227_v20 = vld [vmem:[%s5529_s21 + $0x68] sm:$0xff] }
  0x1f   : > { %v341_v39 = vrot.slane %v325_v21, %v5540_v18  ;;  %v376_v49 = vcombine.high %v374_v42, %v374_v42  ;;  %v383_v52 = vrot.slane %v367_v25, %v5540_v18  ;;  %v424_v62 = vcombine.high %v416_v55, %v416_v55 }
  0x20   : > { %v348_v27 = vrot.slane %v326_v22, %v5540_v18  ;;  %v355_v29 = vrot.slane %v327_v24, %v5540_v18  ;;  %v356_v31 = vcombine.high %v334_v23, %v334_v23  ;;  %v397_v40 = vrot.slane %v375_v35, %v5540_v18 }
  0x21   : > { %v357_v45 = vcombine.high %v341_v39, %v341_v39  ;;  %v404_v53 = vrot.slane %v376_v49, %v5540_v18  ;;  %v405_v58 = vcombine.high %v383_v52, %v383_v52  ;;  %v390_v1 = vrot.slane %v374_v42, %v5540_v18 }
  0x22   : > { %1989 = vmatprep.mubr.bf16.mxu0 %v348_v27  ;;  %v358_v33 = vcombine.high %v348_v27, %v348_v27  ;;  %v359_v37 = vcombine.high %v355_v29, %v355_v29  ;;  %v407_v48 = vcombine.high %v397_v40, %v397_v40  ;;  %v446_v2 = vrot.slane %v424_v62, %v5540_v18 }
  0x23   : > { %1990 = vmatmul.mubr.bf16.vlgmr.msra.gmra.mrb[0].mxu0 %v334_v23  ;;  %v408_v61 = vcombine.high %v404_v53, %v404_v53  ;;  %v406_v7 = vcombine.high %v390_v1, %v390_v1  ;;  %v425_v11 = vcombine.high %v423_v4, %v423_v4  ;;  %v5126_v12 = vcombine.high %v225_v6, %v225_v6 }
  0x24   : > { %2038 = vmatpush1.bf16.xpose.msra.mxu0 %v5107_v28  ;;  %2029 = vmatprep.mubr.bf16.mxu1 %v358_v33  ;;  %v456_v10 = vcombine.high %v446_v2, %v446_v2  ;;  %v432_v14 = vrot.slane %v416_v55, %v5540_v18  ;;  %v465_v17 = vrot.slane %v197_v13, %v5540_v18  ;;  %v229_v33 = vld [vmem:[%s5529_s21 + $0x78] sm:$0xff] }
  0x25   : > { %2030 = vmatmul.mubr.bf16.vlgmr.msra.gmra.mrb[0].mxu1 %v356_v31  ;;  %2069 = vmatprep.mubr.bf16.mxu0 %v355_v29  ;;  %v453_v15 = vrot.slane %v425_v11, %v5540_v18  ;;  %v5123_v19 = vcombine.low %v224_v3, %v224_v3  ;;  %v5128_v22 = vcombine.high %v226_v16, %v226_v16 }
  0x26   : > { %2078 = vmatpush1.bf16.xpose.msra.mxu1 %v5109_v32  ;;  %2117 = vmatprep.subr.bf16.mxu0 %v5112_v34  ;;  %v454_v21 = vcombine.high %v432_v14, %v432_v14  ;;  %v5125_v23 = vcombine.low %v225_v6, %v225_v6  ;;  %v473_v25 = vcombine.high %v465_v17, %v465_v17 }
  0x27   : > { %2109 = vmatprep.mubr.bf16.mxu1 %v359_v37  ;;  %2157 = vmatprep.subr.bf16.mxu1 %v5114_v38  ;;  %v457_v24 = vcombine.high %v453_v15, %v453_v15  ;;  %v458_v26 = vcombine.high %v197_v13, %v197_v13  ;;  %v5130_v27 = vcombine.high %v227_v20, %v227_v20 }
  0x28   : > { %v439_v28 = vrot.slane %v423_v4, %v5540_v18  ;;  %v495_v29 = vrot.slane %v473_v25, %v5540_v18  ;;  %v5127_v32 = vcombine.low %v226_v16, %v226_v16  ;;  %v5132_v35 = vcombine.high %v228_v30, %v228_v30 }
  0x29   : > { %v472_v31 = vrot.slane %v458_v26, %v5540_v18  ;;  %v5129_v36 = vcombine.low %v227_v20, %v227_v20  ;;  %v481_v41 = vrot.slane %v465_v17, %v5540_v18  ;;  %v5133_v49 = vcombine.low %v229_v33, %v229_v33 }
  0x2a   : > { %v455_v34 = vcombine.high %v439_v28, %v439_v28  ;;  %v505_v37 = vcombine.high %v495_v29, %v495_v29 }
  0x2b   : > { %2070 = vmatmul.mubr.bf16.vlgmr.msra.gmra.mrb[4].mxu0 %v341_v39  ;;  %v474_v38 = vcombine.high %v472_v31, %v472_v31  ;;  %v5134_v39 = vcombine.high %v229_v33, %v229_v33  ;;  %v488_v54 = vrot.slane %v472_v31, %v5540_v18 }
  0x2c   : > { %2118 = vmatpush1.bf16.xpose.msra.mxu0 %v5111_v43  ;;  %2149 = vmatprep.mubr.bf16.mxu0 %v397_v40  ;;  %v198_v40 = vld [vmem:[%s5524_s17 + $0x20] sm:$0xff] }
  0x2d   : > { %2110 = vmatmul.mubr.bf16.vlgmr.msra.gmra.mrb[4].mxu1 %v357_v45  ;;  %2197 = vmatprep.subr.bf16.mxu0 %v5116_v46  ;;  %v502_v42 = vrot.slane %v474_v38, %v5540_v18  ;;  %v230_v43 = vld [vmem:[%s5529_s21 + $0x80] sm:$0xff]  ;;  %v514_v44 = vrot.slane %v198_v40, %v5540_v18  ;;  %v5131_v45 = vcombine.low %v228_v30, %v228_v30  ;;  %v231_v46 = vld [vmem:[%s5529_s21 + $0x88] sm:$0xff] }
  0x2e   : > { %2158 = vmatpush1.bf16.xpose.msra.mxu1 %v5113_v47  ;;  %2189 = vmatprep.mubr.bf16.mxu1 %v407_v48  ;;  %v503_v47 = vcombine.high %v481_v41, %v481_v41  ;;  %v5136_v48 = vcombine.high %v230_v43, %v230_v43  ;;  %v5137_v62 = vcombine.low %v231_v46, %v231_v46 }
  0x2f   : > { %2237 = vmatprep.subr.bf16.mxu1 %v5118_v50  ;;  %v506_v50 = vcombine.high %v502_v42, %v502_v42  ;;  %v522_v51 = vcombine.high %v514_v44, %v514_v44  ;;  %v530_v3 = vrot.slane %v514_v44, %v5540_v18 }
  0x31   : > { %v544_v55 = vrot.slane %v522_v51, %v5540_v18 }
  0x33   : > { %2150 = vmatmul.mubr.bf16.vlgmr.msra.gmra.mrb[8].mxu0 %v383_v52  ;;  %v507_v52 = vcombine.high %v198_v40, %v198_v40  ;;  %v554_v63 = vcombine.high %v544_v55, %v544_v55 }
  0x34   : > { %2198 = vmatpush1.bf16.xpose.msra.mxu0 %v5115_v56  ;;  %2229 = vmatprep.mubr.bf16.mxu0 %v404_v53  ;;  %v5138_v53 = vcombine.high %v231_v46, %v231_v46  ;;  %v232_v56 = vld [vmem:[%s5529_s21 + $0x90] sm:$0xff] }
  0x35   : > { %2190 = vmatmul.mubr.bf16.vlgmr.msra.gmra.mrb[8].mxu1 %v405_v58  ;;  %2277 = vmatprep.subr.bf16.mxu0 %v5120_v59  ;;  %v521_v57 = vrot.slane %v507_v52, %v5540_v18  ;;  %v5135_v58 = vcombine.low %v230_v43, %v230_v43  ;;  %v233_v59 = vld [vmem:[%s5529_s21 + $0x98] sm:$0xff] }
  0x36   : > { %2238 = vmatpush1.bf16.xpose.msra.mxu1 %v5117_v60  ;;  %2269 = vmatprep.mubr.bf16.mxu1 %v408_v61  ;;  %v504_v60 = vcombine.high %v488_v54, %v488_v54  ;;  %v5140_v61 = vcombine.high %v232_v56, %v232_v56  ;;  %v5141_v11 = vcombine.low %v233_v59, %v233_v59 }
  0x37   : > { %2317 = vmatprep.subr.bf16.mxu1 %v5122_v0  ;;  %v523_v0 = vcombine.high %v521_v57, %v521_v57  ;;  %v537_v16 = vrot.slane %v521_v57, %v5540_v18 }
  0x39   : > { %v551_v4 = vrot.slane %v523_v0, %v5540_v18 }
  0x3b   : > { %2230 = vmatmul.mubr.bf16.vlgmr.msra.gmra.mrb[12].mxu0 %v390_v1  ;;  %v5142_v1 = vcombine.high %v233_v59, %v233_v59 }
  0x3c   : > { %2278 = vmatpush1.bf16.xpose.msra.mxu0 %v5119_v5  ;;  %2309 = vmatprep.mubr.bf16.mxu0 %v446_v2  ;;  %v199_v2 = vld [vmem:[%s5524_s17 + $0x28] sm:$0xff]  ;;  %v234_v5 = vld [vmem:[%s5529_s21 + $0xa0] sm:$0xff] }
  0x3d   : > { %2270 = vmatmul.mubr.bf16.vlgmr.msra.gmra.mrb[12].mxu1 %v406_v7  ;;  %2357 = vmatprep.subr.bf16.mxu0 %v5124_v8  ;;  %v563_v6 = vrot.slane %v199_v2, %v5540_v18  ;;  %v5139_v7 = vcombine.low %v232_v56, %v232_v56  ;;  %v235_v8 = vld [vmem:[%s5529_s21 + $0xa8] sm:$0xff] }
  0x3e   : > { %2318 = vmatpush1.bf16.xpose.msra.mxu1 %v5121_v9  ;;  %2349 = vmatprep.mubr.bf16.mxu1 %v456_v10  ;;  %v552_v9 = vcombine.high %v530_v3, %v530_v3  ;;  %v5144_v10 = vcombine.high %v234_v5, %v234_v5  ;;  %v5145_v25 = vcombine.low %v235_v8, %v235_v8 }
  0x3f   : > { %2397 = vmatprep.subr.bf16.mxu1 %v5126_v12  ;;  %v555_v12 = vcombine.high %v551_v4, %v551_v4  ;;  %v571_v13 = vcombine.high %v563_v6, %v563_v6  ;;  %v579_v30 = vrot.slane %v563_v6, %v5540_v18 }
  0x41   : > { %v593_v17 = vrot.slane %v571_v13, %v5540_v18 }
  0x43   : > { %2310 = vmatmul.mubr.bf16.vlgmr.msra.gmra.mrb[16].mxu0 %v432_v14  ;;  %v556_v14 = vcombine.high %v199_v2, %v199_v2  ;;  %v603_v26 = vcombine.high %v593_v17, %v593_v17 }
  0x44   : > { %2358 = vmatpush1.bf16.xpose.msra.mxu0 %v5123_v19  ;;  %2389 = vmatprep.mubr.bf16.mxu0 %v453_v15  ;;  %v5146_v15 = vcombine.high %v235_v8, %v235_v8  ;;  %v236_v19 = vld [vmem:[%s5529_s21 + $0xb0] sm:$0xff] }
  0x45   : > { %2350 = vmatmul.mubr.bf16.vlgmr.msra.gmra.mrb[16].mxu1 %v454_v21  ;;  %2437 = vmatprep.subr.bf16.mxu0 %v5128_v22  ;;  %v570_v20 = vrot.slane %v556_v14, %v5540_v18  ;;  %v5143_v21 = vcombine.low %v234_v5, %v234_v5  ;;  %v237_v22 = vld [vmem:[%s5529_s21 + $0xb8] sm:$0xff] }
  0x46   : > { %2398 = vmatpush1.bf16.xpose.msra.mxu1 %v5125_v23  ;;  %2429 = vmatprep.mubr.bf16.mxu1 %v457_v24  ;;  %v553_v23 = vcombine.high %v537_v16, %v537_v16  ;;  %v5148_v24 = vcombine.high %v236_v19, %v236_v19  ;;  %v5149_v38 = vcombine.low %v237_v22, %v237_v22 }
  0x47   : > { %2477 = vmatprep.subr.bf16.mxu1 %v5130_v27  ;;  %v572_v27 = vcombine.high %v570_v20, %v570_v20  ;;  %v586_v43 = vrot.slane %v570_v20, %v5540_v18 }
  0x49   : > { %v600_v31 = vrot.slane %v572_v27, %v5540_v18 }
  0x4b   : > { %2390 = vmatmul.mubr.bf16.vlgmr.msra.gmra.mrb[20].mxu0 %v439_v28  ;;  %v5150_v28 = vcombine.high %v237_v22, %v237_v22 }
  0x4c   : > { %2438 = vmatpush1.bf16.xpose.msra.mxu0 %v5127_v32  ;;  %2469 = vmatprep.mubr.bf16.mxu0 %v495_v29  ;;  %v200_v29 = vld [vmem:[%s5524_s17 + $0x30] sm:$0xff]  ;;  %v238_v32 = vld [vmem:[%s5529_s21 + $0xc0] sm:$0xff] }
  0x4d   : > { %2430 = vmatmul.mubr.bf16.vlgmr.msra.gmra.mrb[20].mxu1 %v455_v34  ;;  %2517 = vmatprep.subr.bf16.mxu0 %v5132_v35  ;;  %v612_v33 = vrot.slane %v200_v29, %v5540_v18  ;;  %v5147_v34 = vcombine.low %v236_v19, %v236_v19  ;;  %v239_v35 = vld [vmem:[%s5529_s21 + $0xc8] sm:$0xff] }
  0x4e   : > { %2478 = vmatpush1.bf16.xpose.msra.mxu1 %v5129_v36  ;;  %2509 = vmatprep.mubr.bf16.mxu1 %v505_v37  ;;  %v601_v36 = vcombine.high %v579_v30, %v579_v30  ;;  %v5152_v37 = vcombine.high %v238_v32, %v238_v32  ;;  %v5153_v51 = vcombine.low %v239_v35, %v239_v35 }
  0x4f   : > { %2557 = vmatprep.subr.bf16.mxu1 %v5134_v39  ;;  %v604_v39 = vcombine.high %v600_v31, %v600_v31  ;;  %v620_v40 = vcombine.high %v612_v33, %v612_v33  ;;  %v628_v56 = vrot.slane %v612_v33, %v5540_v18 }
  0x51   : > { %v642_v44 = vrot.slane %v620_v40, %v5540_v18 }
  0x53   : > { %2470 = vmatmul.mubr.bf16.vlgmr.msra.gmra.mrb[24].mxu0 %v481_v41  ;;  %v605_v41 = vcombine.high %v200_v29, %v200_v29  ;;  %v652_v52 = vcombine.high %v642_v44, %v642_v44 }
  0x54   : > { %2518 = vmatpush1.bf16.xpose.msra.mxu0 %v5131_v45  ;;  %2549 = vmatprep.mubr.bf16.mxu0 %v502_v42  ;;  %v5154_v42 = vcombine.high %v239_v35, %v239_v35  ;;  %v240_v45 = vld [vmem:[%s5529_s21 + $0xd0] sm:$0xff] }
  0x55   : > { %2510 = vmatmul.mubr.bf16.vlgmr.msra.gmra.mrb[24].mxu1 %v503_v47  ;;  %2597 = vmatprep.subr.bf16.mxu0 %v5136_v48  ;;  %v619_v46 = vrot.slane %v605_v41, %v5540_v18  ;;  %v5151_v47 = vcombine.low %v238_v32, %v238_v32  ;;  %v241_v48 = vld [vmem:[%s5529_s21 + $0xd8] sm:$0xff] }
  0x56   : > { %2558 = vmatpush1.bf16.xpose.msra.mxu1 %v5133_v49  ;;  %2589 = vmatprep.mubr.bf16.mxu1 %v506_v50  ;;  %v602_v49 = vcombine.high %v586_v43, %v586_v43  ;;  %v5156_v50 = vcombine.high %v240_v45, %v240_v45  ;;  %v5157_v0 = vcombine.low %v241_v48, %v241_v48 }
  0x57   : > { %2637 = vmatprep.subr.bf16.mxu1 %v5138_v53  ;;  %v621_v53 = vcombine.high %v619_v46, %v619_v46  ;;  %v635_v5 = vrot.slane %v619_v46, %v5540_v18 }
  0x59   : > { %v649_v57 = vrot.slane %v621_v53, %v5540_v18 }
  0x5b   : > { %2550 = vmatmul.mubr.bf16.vlgmr.msra.gmra.mrb[28].mxu0 %v488_v54  ;;  %v5158_v54 = vcombine.high %v241_v48, %v241_v48 }
  0x5c   : > { %2598 = vmatpush1.bf16.xpose.msra.mxu0 %v5135_v58  ;;  %2629 = vmatprep.mubr.bf16.mxu0 %v544_v55  ;;  %v201_v55 = vld [vmem:[%s5524_s17 + $0x38] sm:$0xff]  ;;  %v242_v58 = vld [vmem:[%s5529_s21 + $0xe0] sm:$0xff] }
  0x5d   : > { %2590 = vmatmul.mubr.bf16.vlgmr.msra.gmra.mrb[28].mxu1 %v504_v60  ;;  %2677 = vmatprep.subr.bf16.mxu0 %v5140_v61  ;;  %v661_v59 = vrot.slane %v201_v55, %v5540_v18  ;;  %v5155_v60 = vcombine.low %v240_v45, %v240_v45  ;;  %v243_v61 = vld [vmem:[%s5529_s21 + $0xe8] sm:$0xff] }
  0x5e   : > { %2638 = vmatpush1.bf16.xpose.msra.mxu1 %v5137_v62  ;;  %2669 = vmatprep.mubr.bf16.mxu1 %v554_v63  ;;  %v650_v62 = vcombine.high %v628_v56, %v628_v56  ;;  %v5160_v63 = vcombine.high %v242_v58, %v242_v58  ;;  %v5161_v13 = vcombine.low %v243_v61, %v243_v61 }
  0x5f   : > { %2717 = vmatprep.subr.bf16.mxu1 %v5142_v1  ;;  %v653_v1 = vcombine.high %v649_v57, %v649_v57  ;;  %v669_v2 = vcombine.high %v661_v59, %v661_v59  ;;  %v677_v19 = vrot.slane %v661_v59, %v5540_v18 }
  0x61   : > { %v691_v6 = vrot.slane %v669_v2, %v5540_v18 }
  0x63   : > { %2630 = vmatmul.mubr.bf16.vlgmr.msra.gmra.mrb[32].mxu0 %v530_v3  ;;  %v654_v3 = vcombine.high %v201_v55, %v201_v55  ;;  %v701_v14 = vcombine.high %v691_v6, %v691_v6 }
  0x64   : > { %2678 = vmatpush1.bf16.xpose.msra.mxu0 %v5139_v7  ;;  %2709 = vmatprep.mubr.bf16.mxu0 %v551_v4  ;;  %v5162_v4 = vcombine.high %v243_v61, %v243_v61  ;;  %v244_v7 = vld [vmem:[%s5529_s21 + $0xf0] sm:$0xff] }
  0x65   : > { %2670 = vmatmul.mubr.bf16.vlgmr.msra.gmra.mrb[32].mxu1 %v552_v9  ;;  %2757 = vmatprep.subr.bf16.mxu0 %v5144_v10  ;;  %v668_v8 = vrot.slane %v654_v3, %v5540_v18  ;;  %v5159_v9 = vcombine.low %v242_v58, %v242_v58  ;;  %v245_v10 = vld [vmem:[%s5529_s21 + $0xf8] sm:$0xff] }
  0x66   : > { %2718 = vmatpush1.bf16.xpose.msra.mxu1 %v5141_v11  ;;  %2749 = vmatprep.mubr.bf16.mxu1 %v555_v12  ;;  %v651_v11 = vcombine.high %v635_v5, %v635_v5  ;;  %v5164_v12 = vcombine.high %v244_v7, %v244_v7  ;;  %v5165_v27 = vcombine.low %v245_v10, %v245_v10 }
  0x67   : > { %2797 = vmatprep.subr.bf16.mxu1 %v5146_v15  ;;  %v670_v15 = vcombine.high %v668_v8, %v668_v8  ;;  %v684_v32 = vrot.slane %v668_v8, %v5540_v18 }
  0x69   : > { %v698_v20 = vrot.slane %v670_v15, %v5540_v18 }
  0x6b   : > { %2710 = vmatmul.mubr.bf16.vlgmr.msra.gmra.mrb[36].mxu0 %v537_v16  ;;  %v5166_v16 = vcombine.high %v245_v10, %v245_v10 }
  0x6c   : > { %2758 = vmatpush1.bf16.xpose.msra.mxu0 %v5143_v21  ;;  %2789 = vmatprep.mubr.bf16.mxu0 %v593_v17  ;;  %v202_v17 = vld [vmem:[%s5524_s17 + $0x40] sm:$0xff] }
  0x6d   : > { %2750 = vmatmul.mubr.bf16.vlgmr.msra.gmra.mrb[36].mxu1 %v553_v23  ;;  %2837 = vmatprep.subr.bf16.mxu0 %v5148_v24  ;;  %v246_v21 = vld [vmem:[%s5529_s21 + $0x100] sm:$0xff]  ;;  %v710_v22 = vrot.slane %v202_v17, %v5540_v18  ;;  %v5163_v23 = vcombine.low %v244_v7, %v244_v7  ;;  %v247_v24 = vld [vmem:[%s5529_s21 + $0x108] sm:$0xff] }
  0x6e   : > { %2798 = vmatpush1.bf16.xpose.msra.mxu1 %v5145_v25  ;;  %2829 = vmatprep.mubr.bf16.mxu1 %v603_v26  ;;  %v699_v25 = vcombine.high %v677_v19, %v677_v19  ;;  %v5168_v26 = vcombine.high %v246_v21, %v246_v21  ;;  %v5169_v40 = vcombine.low %v247_v24, %v247_v24 }
  0x6f   : > { %2877 = vmatprep.subr.bf16.mxu1 %v5150_v28  ;;  %v702_v28 = vcombine.high %v698_v20, %v698_v20  ;;  %v718_v29 = vcombine.high %v710_v22, %v710_v22  ;;  %v726_v45 = vrot.slane %v710_v22, %v5540_v18 }
  0x71   : > { %v740_v33 = vrot.slane %v718_v29, %v5540_v18 }
  0x73   : > { %2790 = vmatmul.mubr.bf16.vlgmr.msra.gmra.mrb[40].mxu0 %v579_v30  ;;  %v703_v30 = vcombine.high %v202_v17, %v202_v17  ;;  %v750_v41 = vcombine.high %v740_v33, %v740_v33 }
  0x74   : > { %2838 = vmatpush1.bf16.xpose.msra.mxu0 %v5147_v34  ;;  %2869 = vmatprep.mubr.bf16.mxu0 %v600_v31  ;;  %v5170_v31 = vcombine.high %v247_v24, %v247_v24  ;;  %v248_v34 = vld [vmem:[%s5529_s21 + $0x110] sm:$0xff] }
  0x75   : > { %2830 = vmatmul.mubr.bf16.vlgmr.msra.gmra.mrb[40].mxu1 %v601_v36  ;;  %2917 = vmatprep.subr.bf16.mxu0 %v5152_v37  ;;  %v717_v35 = vrot.slane %v703_v30, %v5540_v18  ;;  %v5167_v36 = vcombine.low %v246_v21, %v246_v21  ;;  %v249_v37 = vld [vmem:[%s5529_s21 + $0x118] sm:$0xff] }
  0x76   : > { %2878 = vmatpush1.bf16.xpose.msra.mxu1 %v5149_v38  ;;  %2909 = vmatprep.mubr.bf16.mxu1 %v604_v39  ;;  %v700_v38 = vcombine.high %v684_v32, %v684_v32  ;;  %v5172_v39 = vcombine.high %v248_v34, %v248_v34  ;;  %v5173_v53 = vcombine.low %v249_v37, %v249_v37 }
  0x77   : > { %2957 = vmatprep.subr.bf16.mxu1 %v5154_v42  ;;  %v719_v42 = vcombine.high %v717_v35, %v717_v35  ;;  %v733_v58 = vrot.slane %v717_v35, %v5540_v18 }
  0x79   : > { %v747_v46 = vrot.slane %v719_v42, %v5540_v18 }
  0x7b   : > { %2870 = vmatmul.mubr.bf16.vlgmr.msra.gmra.mrb[44].mxu0 %v586_v43  ;;  %v5174_v43 = vcombine.high %v249_v37, %v249_v37 }
  0x7c   : > { %2918 = vmatpush1.bf16.xpose.msra.mxu0 %v5151_v47  ;;  %2949 = vmatprep.mubr.bf16.mxu0 %v642_v44  ;;  %v203_v44 = vld [vmem:[%s5524_s17 + $0x48] sm:$0xff]  ;;  %v250_v47 = vld [vmem:[%s5529_s21 + $0x120] sm:$0xff] }
  0x7d   : > { %2910 = vmatmul.mubr.bf16.vlgmr.msra.gmra.mrb[44].mxu1 %v602_v49  ;;  %2997 = vmatprep.subr.bf16.mxu0 %v5156_v50  ;;  %v759_v48 = vrot.slane %v203_v44, %v5540_v18  ;;  %v5171_v49 = vcombine.low %v248_v34, %v248_v34  ;;  %v251_v50 = vld [vmem:[%s5529_s21 + $0x128] sm:$0xff] }
  0x7e   : > { %2958 = vmatpush1.bf16.xpose.msra.mxu1 %v5153_v51  ;;  %2989 = vmatprep.mubr.bf16.mxu1 %v652_v52  ;;  %v748_v51 = vcombine.high %v726_v45, %v726_v45  ;;  %v5176_v52 = vcombine.high %v250_v47, %v250_v47  ;;  %v5177_v2 = vcombine.low %v251_v50, %v251_v50 }
  0x7f   : > { %3037 = vmatprep.subr.bf16.mxu1 %v5158_v54  ;;  %v751_v54 = vcombine.high %v747_v46, %v747_v46  ;;  %v767_v55 = vcombine.high %v759_v48, %v759_v48  ;;  %v775_v7 = vrot.slane %v759_v48, %v5540_v18 }
  0x81   : > { %v789_v59 = vrot.slane %v767_v55, %v5540_v18 }
  0x83   : > { %2950 = vmatmul.mubr.bf16.vlgmr.msra.gmra.mrb[48].mxu0 %v628_v56  ;;  %v752_v56 = vcombine.high %v203_v44, %v203_v44  ;;  %v799_v3 = vcombine.high %v789_v59, %v789_v59 }
  0x84   : > { %2998 = vmatpush1.bf16.xpose.msra.mxu0 %v5155_v60  ;;  %3029 = vmatprep.mubr.bf16.mxu0 %v649_v57  ;;  %v5178_v57 = vcombine.high %v251_v50, %v251_v50  ;;  %v252_v60 = vld [vmem:[%s5529_s21 + $0x130] sm:$0xff] }
  0x85   : > { %2990 = vmatmul.mubr.bf16.vlgmr.msra.gmra.mrb[48].mxu1 %v650_v62  ;;  %3077 = vmatprep.subr.bf16.mxu0 %v5160_v63  ;;  %v766_v61 = vrot.slane %v752_v56, %v5540_v18  ;;  %v5175_v62 = vcombine.low %v250_v47, %v250_v47  ;;  %v253_v63 = vld [vmem:[%s5529_s21 + $0x138] sm:$0xff] }
  0x86   : > { %3038 = vmatpush1.bf16.xpose.msra.mxu1 %v5157_v0  ;;  %3069 = vmatprep.mubr.bf16.mxu1 %v653_v1  ;;  %v749_v0 = vcombine.high %v733_v58, %v733_v58  ;;  %v5180_v1 = vcombine.high %v252_v60, %v252_v60  ;;  %v5181_v15 = vcombine.low %v253_v63, %v253_v63 }
  0x87   : > { %3117 = vmatprep.subr.bf16.mxu1 %v5162_v4  ;;  %v768_v4 = vcombine.high %v766_v61, %v766_v61  ;;  %v782_v21 = vrot.slane %v766_v61, %v5540_v18 }
  0x89   : > { %v796_v8 = vrot.slane %v768_v4, %v5540_v18 }
  0x8b   : > { %3030 = vmatmul.mubr.bf16.vlgmr.msra.gmra.mrb[52].mxu0 %v635_v5  ;;  %v5182_v5 = vcombine.high %v253_v63, %v253_v63 }
  0x8c   : > { %3078 = vmatpush1.bf16.xpose.msra.mxu0 %v5159_v9  ;;  %3109 = vmatprep.mubr.bf16.mxu0 %v691_v6  ;;  %v204_v6 = vld [vmem:[%s5524_s17 + $0x50] sm:$0xff]  ;;  %v254_v9 = vld [vmem:[%s5529_s21 + $0x140] sm:$0xff] }
  0x8d   : > { %3070 = vmatmul.mubr.bf16.vlgmr.msra.gmra.mrb[52].mxu1 %v651_v11  ;;  %3157 = vmatprep.subr.bf16.mxu0 %v5164_v12  ;;  %v808_v10 = vrot.slane %v204_v6, %v5540_v18  ;;  %v5179_v11 = vcombine.low %v252_v60, %v252_v60  ;;  %v255_v12 = vld [vmem:[%s5529_s21 + $0x148] sm:$0xff] }
  0x8e   : > { %3118 = vmatpush1.bf16.xpose.msra.mxu1 %v5161_v13  ;;  %3149 = vmatprep.mubr.bf16.mxu1 %v701_v14  ;;  %v797_v13 = vcombine.high %v775_v7, %v775_v7  ;;  %v5184_v14 = vcombine.high %v254_v9, %v254_v9  ;;  %v5185_v29 = vcombine.low %v255_v12, %v255_v12 }
  0x8f   : > { %3197 = vmatprep.subr.bf16.mxu1 %v5166_v16  ;;  %v800_v16 = vcombine.high %v796_v8, %v796_v8  ;;  %v816_v17 = vcombine.high %v808_v10, %v808_v10  ;;  %v824_v34 = vrot.slane %v808_v10, %v5540_v18 }
  0x91   : > { %v838_v22 = vrot.slane %v816_v17, %v5540_v18 }
  0x93   : > { %3110 = vmatmul.mubr.bf16.vlgmr.msra.gmra.mrb[56].mxu0 %v677_v19  ;;  %v801_v19 = vcombine.high %v204_v6, %v204_v6  ;;  %v848_v30 = vcombine.high %v838_v22, %v838_v22 }
  0x94   : > { %3158 = vmatpush1.bf16.xpose.msra.mxu0 %v5163_v23  ;;  %3189 = vmatprep.mubr.bf16.mxu0 %v698_v20  ;;  %v5186_v20 = vcombine.high %v255_v12, %v255_v12  ;;  %v256_v23 = vld [vmem:[%s5529_s21 + $0x150] sm:$0xff] }
  0x95   : > { %3150 = vmatmul.mubr.bf16.vlgmr.msra.gmra.mrb[56].mxu1 %v699_v25  ;;  %3237 = vmatprep.subr.bf16.mxu0 %v5168_v26  ;;  %v815_v24 = vrot.slane %v801_v19, %v5540_v18  ;;  %v5183_v25 = vcombine.low %v254_v9, %v254_v9  ;;  %v257_v26 = vld [vmem:[%s5529_s21 + $0x158] sm:$0xff] }
  0x96   : > { %3198 = vmatpush1.bf16.xpose.msra.mxu1 %v5165_v27  ;;  %3229 = vmatprep.mubr.bf16.mxu1 %v702_v28  ;;  %v798_v27 = vcombine.high %v782_v21, %v782_v21  ;;  %v5188_v28 = vcombine.high %v256_v23, %v256_v23  ;;  %v5189_v42 = vcombine.low %v257_v26, %v257_v26 }
  0x97   : > { %3277 = vmatprep.subr.bf16.mxu1 %v5170_v31  ;;  %v817_v31 = vcombine.high %v815_v24, %v815_v24  ;;  %v831_v47 = vrot.slane %v815_v24, %v5540_v18 }
  0x99   : > { %v845_v35 = vrot.slane %v817_v31, %v5540_v18 }
  0x9b   : > { %3190 = vmatmul.mubr.bf16.vlgmr.msra.gmra.mrb[60].mxu0 %v684_v32  ;;  %v5190_v32 = vcombine.high %v257_v26, %v257_v26 }
  0x9c   : > { %3238 = vmatpush1.bf16.xpose.msra.mxu0 %v5167_v36  ;;  %3269 = vmatprep.mubr.bf16.mxu0 %v740_v33  ;;  %v205_v33 = vld [vmem:[%s5524_s17 + $0x58] sm:$0xff]  ;;  %v258_v36 = vld [vmem:[%s5529_s21 + $0x160] sm:$0xff] }
  0x9d   : > { %3230 = vmatmul.mubr.bf16.vlgmr.msra.gmra.mrb[60].mxu1 %v700_v38  ;;  %3317 = vmatprep.subr.bf16.mxu0 %v5172_v39  ;;  %v857_v37 = vrot.slane %v205_v33, %v5540_v18  ;;  %v5187_v38 = vcombine.low %v256_v23, %v256_v23  ;;  %v259_v39 = vld [vmem:[%s5529_s21 + $0x168] sm:$0xff] }
  0x9e   : > { %3278 = vmatpush1.bf16.xpose.msra.mxu1 %v5169_v40  ;;  %3309 = vmatprep.mubr.bf16.mxu1 %v750_v41  ;;  %v846_v40 = vcombine.high %v824_v34, %v824_v34  ;;  %v5192_v41 = vcombine.high %v258_v36, %v258_v36  ;;  %v5193_v55 = vcombine.low %v259_v39, %v259_v39 }
  0x9f   : > { %3357 = vmatprep.subr.bf16.mxu1 %v5174_v43  ;;  %v849_v43 = vcombine.high %v845_v35, %v845_v35  ;;  %v865_v44 = vcombine.high %v857_v37, %v857_v37  ;;  %v873_v60 = vrot.slane %v857_v37, %v5540_v18 }
  0xa1   : > { %v887_v48 = vrot.slane %v865_v44, %v5540_v18 }
  0xa3   : > { %3270 = vmatmul.mubr.bf16.vlgmr.msra.gmra.mrb[64].mxu0 %v726_v45  ;;  %v850_v45 = vcombine.high %v205_v33, %v205_v33  ;;  %v897_v56 = vcombine.high %v887_v48, %v887_v48 }
  0xa4   : > { %3318 = vmatpush1.bf16.xpose.msra.mxu0 %v5171_v49  ;;  %3349 = vmatprep.mubr.bf16.mxu0 %v747_v46  ;;  %v5194_v46 = vcombine.high %v259_v39, %v259_v39  ;;  %v260_v49 = vld [vmem:[%s5529_s21 + $0x170] sm:$0xff] }
  0xa5   : > { %3310 = vmatmul.mubr.bf16.vlgmr.msra.gmra.mrb[64].mxu1 %v748_v51  ;;  %3397 = vmatprep.subr.bf16.mxu0 %v5176_v52  ;;  %v864_v50 = vrot.slane %v850_v45, %v5540_v18  ;;  %v5191_v51 = vcombine.low %v258_v36, %v258_v36  ;;  %v261_v52 = vld [vmem:[%s5529_s21 + $0x178] sm:$0xff] }
  0xa6   : > { %3358 = vmatpush1.bf16.xpose.msra.mxu1 %v5173_v53  ;;  %3389 = vmatprep.mubr.bf16.mxu1 %v751_v54  ;;  %v847_v53 = vcombine.high %v831_v47, %v831_v47  ;;  %v5196_v54 = vcombine.high %v260_v49, %v260_v49  ;;  %v5197_v4 = vcombine.low %v261_v52, %v261_v52 }
  0xa7   : > { %3437 = vmatprep.subr.bf16.mxu1 %v5178_v57  ;;  %v866_v57 = vcombine.high %v864_v50, %v864_v50  ;;  %v880_v9 = vrot.slane %v864_v50, %v5540_v18 }
  0xa9   : > { %v894_v61 = vrot.slane %v866_v57, %v5540_v18 }
  0xab   : > { %3350 = vmatmul.mubr.bf16.vlgmr.msra.gmra.mrb[68].mxu0 %v733_v58  ;;  %v5198_v58 = vcombine.high %v261_v52, %v261_v52 }
  0xac   : > { %3398 = vmatpush1.bf16.xpose.msra.mxu0 %v5175_v62  ;;  %3429 = vmatprep.mubr.bf16.mxu0 %v789_v59  ;;  %v206_v59 = vld [vmem:[%s5524_s17 + $0x60] sm:$0xff] }
  0xad   : > { %3390 = vmatmul.mubr.bf16.vlgmr.msra.gmra.mrb[68].mxu1 %v749_v0  ;;  %3477 = vmatprep.subr.bf16.mxu0 %v5180_v1  ;;  %v262_v62 = vld [vmem:[%s5529_s21 + $0x180] sm:$0xff]  ;;  %v906_v63 = vrot.slane %v206_v59, %v5540_v18  ;;  %v5195_v0 = vcombine.low %v260_v49, %v260_v49  ;;  %v263_v1 = vld [vmem:[%s5529_s21 + $0x188] sm:$0xff] }
  0xae   : > { %3438 = vmatpush1.bf16.xpose.msra.mxu1 %v5177_v2  ;;  %3469 = vmatprep.mubr.bf16.mxu1 %v799_v3  ;;  %v895_v2 = vcombine.high %v873_v60, %v873_v60  ;;  %v5200_v3 = vcombine.high %v262_v62, %v262_v62  ;;  %v5201_v17 = vcombine.low %v263_v1, %v263_v1 }
  0xaf   : > { %3517 = vmatprep.subr.bf16.mxu1 %v5182_v5  ;;  %v898_v5 = vcombine.high %v894_v61, %v894_v61  ;;  %v914_v6 = vcombine.high %v906_v63, %v906_v63  ;;  %v922_v23 = vrot.slane %v906_v63, %v5540_v18 }
  0xb1   : > { %v936_v10 = vrot.slane %v914_v6, %v5540_v18 }
  0xb3   : > { %3430 = vmatmul.mubr.bf16.vlgmr.msra.gmra.mrb[72].mxu0 %v775_v7  ;;  %v899_v7 = vcombine.high %v206_v59, %v206_v59  ;;  %v946_v19 = vcombine.high %v936_v10, %v936_v10 }
  0xb4   : > { %3478 = vmatpush1.bf16.xpose.msra.mxu0 %v5179_v11  ;;  %3509 = vmatprep.mubr.bf16.mxu0 %v796_v8  ;;  %v5202_v8 = vcombine.high %v263_v1, %v263_v1  ;;  %v264_v11 = vld [vmem:[%s5529_s21 + $0x190] sm:$0xff] }
  0xb5   : > { %3470 = vmatmul.mubr.bf16.vlgmr.msra.gmra.mrb[72].mxu1 %v797_v13  ;;  %3557 = vmatprep.subr.bf16.mxu0 %v5184_v14  ;;  %v913_v12 = vrot.slane %v899_v7, %v5540_v18  ;;  %v5199_v13 = vcombine.low %v262_v62, %v262_v62  ;;  %v265_v14 = vld [vmem:[%s5529_s21 + $0x198] sm:$0xff]  ;;  %v272_v1 = vld [vmem:[%s5529_s21 + $0x1d0] sm:$0xff] }
  0xb6   : > { %3518 = vmatpush1.bf16.xpose.msra.mxu1 %v5181_v15  ;;  %3549 = vmatprep.mubr.bf16.mxu1 %v800_v16  ;;  %v896_v15 = vcombine.high %v880_v9, %v880_v9  ;;  %v5204_v16 = vcombine.high %v264_v11, %v264_v11  ;;  %v5205_v31 = vcombine.low %v265_v14, %v265_v14  ;;  %v273_v7 = vld [vmem:[%s5529_s21 + $0x1d8] sm:$0xff] }
  0xb7   : > { %3597 = vmatprep.subr.bf16.mxu1 %v5186_v20  ;;  %v915_v20 = vcombine.high %v913_v12, %v913_v12  ;;  %v929_v36 = vrot.slane %v913_v12, %v5540_v18  ;;  %v5220_v12 = vcombine.high %v272_v1, %v272_v1 }
  0xb9   : > { %v943_v24 = vrot.slane %v915_v20, %v5540_v18  ;;  %v209_v20 = vld [vmem:[%s5524_s17 + $0x78] sm:$0xff] }
  0xbb   : > { %3510 = vmatmul.mubr.bf16.vlgmr.msra.gmra.mrb[76].mxu0 %v782_v21  ;;  %v5206_v21 = vcombine.high %v265_v14, %v265_v14 }
  0xbc   : > { %3558 = vmatpush1.bf16.xpose.msra.mxu0 %v5183_v25  ;;  %3589 = vmatprep.mubr.bf16.mxu0 %v838_v22  ;;  %v207_v22 = vld [vmem:[%s5524_s17 + $0x68] sm:$0xff]  ;;  %v266_v25 = vld [vmem:[%s5529_s21 + $0x1a0] sm:$0xff] }
  0xbd   : > { %3550 = vmatmul.mubr.bf16.vlgmr.msra.gmra.mrb[76].mxu1 %v798_v27  ;;  %3637 = vmatprep.subr.bf16.mxu0 %v5188_v28  ;;  %v955_v26 = vrot.slane %v207_v22, %v5540_v18  ;;  %v5203_v27 = vcombine.low %v264_v11, %v264_v11  ;;  %v267_v28 = vld [vmem:[%s5529_s21 + $0x1a8] sm:$0xff] }
  0xbe   : > { %3598 = vmatpush1.bf16.xpose.msra.mxu1 %v5185_v29  ;;  %3629 = vmatprep.mubr.bf16.mxu1 %v848_v30  ;;  %v944_v29 = vcombine.high %v922_v23, %v922_v23  ;;  %v5208_v30 = vcombine.high %v266_v25, %v266_v25  ;;  %v5209_v44 = vcombine.low %v267_v28, %v267_v28 }
  0xbf   : > { %3677 = vmatprep.subr.bf16.mxu1 %v5190_v32  ;;  %v947_v32 = vcombine.high %v943_v24, %v943_v24  ;;  %v963_v33 = vcombine.high %v955_v26, %v955_v26  ;;  %v971_v49 = vrot.slane %v955_v26, %v5540_v18 }
  0xc1   : > { %v985_v37 = vrot.slane %v963_v33, %v5540_v18 }
  0xc3   : > { %3590 = vmatmul.mubr.bf16.vlgmr.msra.gmra.mrb[80].mxu0 %v824_v34  ;;  %v948_v34 = vcombine.high %v207_v22, %v207_v22  ;;  %v995_v45 = vcombine.high %v985_v37, %v985_v37 }
  0xc4   : > { %3638 = vmatpush1.bf16.xpose.msra.mxu0 %v5187_v38  ;;  %3669 = vmatprep.mubr.bf16.mxu0 %v845_v35  ;;  %v5210_v35 = vcombine.high %v267_v28, %v267_v28  ;;  %v268_v38 = vld [vmem:[%s5529_s21 + $0x1b0] sm:$0xff] }
  0xc5   : > { %3630 = vmatmul.mubr.bf16.vlgmr.msra.gmra.mrb[80].mxu1 %v846_v40  ;;  %3717 = vmatprep.subr.bf16.mxu0 %v5192_v41  ;;  %v962_v39 = vrot.slane %v948_v34, %v5540_v18  ;;  %v5207_v40 = vcombine.low %v266_v25, %v266_v25  ;;  %v269_v41 = vld [vmem:[%s5529_s21 + $0x1b8] sm:$0xff]  ;;  %v1053_v25 = vrot.slane %v209_v20, %v5540_v18 }
  0xc6   : > { %3678 = vmatpush1.bf16.xpose.msra.mxu1 %v5189_v42  ;;  %3709 = vmatprep.mubr.bf16.mxu1 %v849_v43  ;;  %v945_v42 = vcombine.high %v929_v36, %v929_v36  ;;  %v5212_v43 = vcombine.high %v268_v38, %v268_v38  ;;  %v5213_v57 = vcombine.low %v269_v41, %v269_v41 }
  0xc7   : > { %3757 = vmatprep.subr.bf16.mxu1 %v5194_v46  ;;  %v964_v46 = vcombine.high %v962_v39, %v962_v39  ;;  %v978_v62 = vrot.slane %v962_v39, %v5540_v18 }
  0xc9   : > { %v992_v50 = vrot.slane %v964_v46, %v5540_v18  ;;  %v994_v11 = vcombine.high %v978_v62, %v978_v62 }
  0xcb   : > { %3670 = vmatmul.mubr.bf16.vlgmr.msra.gmra.mrb[84].mxu0 %v831_v47  ;;  %v5214_v47 = vcombine.high %v269_v41, %v269_v41  ;;  %v1046_v41 = vcombine.high %v209_v20, %v209_v20 }
  0xcc   : > { %3718 = vmatpush1.bf16.xpose.msra.mxu0 %v5191_v51  ;;  %3749 = vmatprep.mubr.bf16.mxu0 %v887_v48  ;;  %v208_v48 = vld [vmem:[%s5524_s17 + $0x70] sm:$0xff]  ;;  %v270_v51 = vld [vmem:[%s5529_s21 + $0x1c0] sm:$0xff] }
  0xcd   : > { %3710 = vmatmul.mubr.bf16.vlgmr.msra.gmra.mrb[84].mxu1 %v847_v53  ;;  %3797 = vmatprep.subr.bf16.mxu0 %v5196_v54  ;;  %v1004_v52 = vrot.slane %v208_v48, %v5540_v18  ;;  %v5211_v53 = vcombine.low %v268_v38, %v268_v38  ;;  %v271_v54 = vld [vmem:[%s5529_s21 + $0x1c8] sm:$0xff]  ;;  %v5215_v6 = vcombine.low %v270_v51, %v270_v51 }
  0xce   : > { %3758 = vmatpush1.bf16.xpose.msra.mxu1 %v5193_v55  ;;  %3789 = vmatprep.mubr.bf16.mxu1 %v897_v56  ;;  %v993_v55 = vcombine.high %v971_v49, %v971_v49  ;;  %v5216_v56 = vcombine.high %v270_v51, %v270_v51  ;;  %v5217_v14 = vcombine.low %v271_v54, %v271_v54 }
  0xcf   : > { %3837 = vmatprep.subr.bf16.mxu1 %v5198_v58  ;;  %v996_v58 = vcombine.high %v992_v50, %v992_v50  ;;  %v1012_v59 = vcombine.high %v1004_v52, %v1004_v52  ;;  %v5221_v38 = vcombine.low %v273_v7, %v273_v7 }
  0xd3   : > { %3750 = vmatmul.mubr.bf16.vlgmr.msra.gmra.mrb[88].mxu0 %v873_v60  ;;  %v997_v60 = vcombine.high %v208_v48, %v208_v48  ;;  %v1060_v48 = vrot.slane %v1046_v41, %v5540_v18 }
  0xd4   : > { %3798 = vmatpush1.bf16.xpose.msra.mxu0 %v5195_v0  ;;  %3829 = vmatprep.mubr.bf16.mxu0 %v894_v61  ;;  %v5218_v61 = vcombine.high %v271_v54, %v271_v54  ;;  %v1034_v0 = vrot.slane %v1012_v59, %v5540_v18  ;;  %v277_v54 = vld [vmem:[%s5529_s21 + $0x1f8] sm:$0xff] }
  0xd5   : > { %3790 = vmatmul.mubr.bf16.vlgmr.msra.gmra.mrb[88].mxu1 %v895_v2  ;;  %3877 = vmatprep.subr.bf16.mxu0 %v5200_v3  ;;  %v1011_v2 = vrot.slane %v997_v60, %v5540_v18 }
  0xd6   : > { %3838 = vmatpush1.bf16.xpose.msra.mxu1 %v5197_v4  ;;  %3869 = vmatprep.mubr.bf16.mxu1 %v898_v5 }
  0xd7   : > { %3917 = vmatprep.subr.bf16.mxu1 %v5202_v8 }
  0xdb   : > { %3830 = vmatmul.mubr.bf16.vlgmr.msra.gmra.mrb[92].mxu0 %v880_v9 }
  0xdc   : > { %3878 = vmatpush1.bf16.xpose.msra.mxu0 %v5199_v13  ;;  %3909 = vmatprep.mubr.bf16.mxu0 %v936_v10 }
  0xdd   : > { %3870 = vmatmul.mubr.bf16.vlgmr.msra.gmra.mrb[92].mxu1 %v896_v15  ;;  %3957 = vmatprep.subr.bf16.mxu0 %v5204_v16  ;;  %v1044_v15 = vcombine.high %v1034_v0, %v1034_v0  ;;  %v1013_v16 = vcombine.high %v1011_v2, %v1011_v2 }
  0xde   : > { %3918 = vmatpush1.bf16.xpose.msra.mxu1 %v5201_v17  ;;  %3949 = vmatprep.mubr.bf16.mxu1 %v946_v19  ;;  %v5222_v19 = vcombine.high %v273_v7, %v273_v7 }
  0xdf   : > { %3997 = vmatprep.subr.bf16.mxu1 %v5206_v21  ;;  %v1020_v21 = vrot.slane %v1004_v52, %v5540_v18 }
  0xe3   : > { %3910 = vmatmul.mubr.bf16.vlgmr.msra.gmra.mrb[96].mxu0 %v922_v23  ;;  %v1041_v23 = vrot.slane %v1013_v16, %v5540_v18 }
  0xe4   : > { %3958 = vmatpush1.bf16.xpose.msra.mxu0 %v5203_v27  ;;  %3989 = vmatprep.mubr.bf16.mxu0 %v943_v24  ;;  %v274_v24 = vld [vmem:[%s5529_s21 + $0x1e0] sm:$0xff] }
  0xe5   : > { %3950 = vmatmul.mubr.bf16.vlgmr.msra.gmra.mrb[96].mxu1 %v944_v29  ;;  %4037 = vmatprep.subr.bf16.mxu0 %v5208_v30  ;;  %v5219_v30 = vcombine.low %v272_v1, %v272_v1  ;;  %v1045_v39 = vcombine.high %v1041_v23, %v1041_v23  ;;  %v5230_v1 = vcombine.high %v277_v54, %v277_v54 }
  0xe6   : > { %3998 = vmatpush1.bf16.xpose.msra.mxu1 %v5205_v31  ;;  %4029 = vmatprep.mubr.bf16.mxu1 %v947_v32  ;;  %v275_v31 = vld [vmem:[%s5529_s21 + $0x1e8] sm:$0xff] }
  0xe7   : > { %4077 = vmatprep.subr.bf16.mxu1 %v5210_v35  ;;  %v1042_v35 = vcombine.high %v1020_v21, %v1020_v21 }
  0xeb   : > { %3990 = vmatmul.mubr.bf16.vlgmr.msra.gmra.mrb[100].mxu0 %v929_v36  ;;  %v5224_v36 = vcombine.high %v274_v24, %v274_v24 }
  0xec   : > { %4038 = vmatpush1.bf16.xpose.msra.mxu0 %v5207_v40  ;;  %4069 = vmatprep.mubr.bf16.mxu0 %v985_v37  ;;  %v1061_v40 = vcombine.high %v1053_v25, %v1053_v25 }
  0xed   : > { %4030 = vmatmul.mubr.bf16.vlgmr.msra.gmra.mrb[100].mxu1 %v945_v42  ;;  %4117 = vmatprep.subr.bf16.mxu0 %v5212_v43  ;;  %v5226_v43 = vcombine.high %v275_v31, %v275_v31 }
  0xee   : > { %4078 = vmatpush1.bf16.xpose.msra.mxu1 %v5209_v44  ;;  %4109 = vmatprep.mubr.bf16.mxu1 %v995_v45  ;;  %v1027_v44 = vrot.slane %v1011_v2, %v5540_v18  ;;  %v1083_v46 = vrot.slane %v1061_v40, %v5540_v18  ;;  %v210_v2 = vld [vmem:[%s5524_s17 + $0x80] sm:$0xff] }
  0xef   : > { %4157 = vmatprep.subr.bf16.mxu1 %v5214_v47  ;;  %v276_v47 = vld [vmem:[%s5529_s21 + $0x1f0] sm:$0xff]  ;;  %v1102_v7 = vrot.slane %v210_v2, %v5540_v18 }
  0xf0   : > { %v5228_v59 = vcombine.high %v276_v47, %v276_v47 }
  0xf3   : > { %4070 = vmatmul.mubr.bf16.vlgmr.msra.gmra.mrb[104].mxu0 %v971_v49 }
  0xf4   : > { %4118 = vmatpush1.bf16.xpose.msra.mxu0 %v5211_v53  ;;  %4149 = vmatprep.mubr.bf16.mxu0 %v992_v50  ;;  %v5223_v53 = vcombine.low %v274_v24, %v274_v24  ;;  %v1095_v24 = vcombine.high %v210_v2, %v210_v2 }
  0xf5   : > { %4110 = vmatmul.mubr.bf16.vlgmr.msra.gmra.mrb[104].mxu1 %v993_v55  ;;  %4197 = vmatprep.subr.bf16.mxu0 %v5216_v56 }
  0xf6   : > { %v1991_v63 = vpop.f32.mrb[0].mxu0  ;;  %4158 = vmatpush1.bf16.xpose.msra.mxu1 %v5213_v57  ;;  %4189 = vmatprep.mubr.bf16.mxu1 %v996_v58  ;;  %v1043_v58 = vcombine.high %v1027_v44, %v1027_v44 }
  0xf7   : > { %v1993_v3 = vpop.f32.mrb[1].mxu0  ;;  %4237 = vmatprep.subr.bf16.mxu1 %v5218_v61  ;;  %v5225_v61 = vcombine.low %v275_v31, %v275_v31  ;;  %v1109_v31 = vrot.slane %v1095_v24, %v5540_v18 }
  0xf8   : > { %v1994_v4 = vpop.f32.mrb[2].mxu0  ;;  %v2031_v5 = vpop.f32.mrb[0].mxu1  ;;  %v1069_v3 = vrot.slane %v1053_v25, %v5540_v18 }
  0xf9   : > { %v2032_v8 = vadd.f32 %v2031_v5, %v1991_v63  ;;  %v1995_v9 = vpop.f32.mrb[3].mxu0  ;;  %v2033_v10 = vpop.f32.mrb[1].mxu1  ;;  %v1062_v63 = vcombine.high %v1060_v48, %v1060_v48 }
  0xfa   : > { %v2034_v13 = vpop.f32.mrb[2].mxu1 }
  0xfb   : > { %4150 = vmatmul.mubr.bf16.vlgmr.msra.gmra.mrb[108].mxu0 %v978_v62  ;;  %v2035_v17 = vpop.f32.mrb[3].mxu1  ;;  %v1093_v62 = vcombine.high %v1083_v46, %v1083_v46  ;;  %v1090_v5 = vrot.slane %v1062_v63, %v5540_v18  ;;  %v279_v13 = vld [vmem:[%s5529_s21 + $0x208] sm:$0xff] }
  0xfc   : > { %4198 = vmatpush1.bf16.xpose.msra.mxu0 %v5215_v6  ;;  %4229 = vmatprep.mubr.bf16.mxu0 %v1034_v0  ;;  %v278_v6 = vld [vmem:[%s5529_s21 + $0x200] sm:$0xff]  ;;  %v1091_v17 = vcombine.high %v1069_v3, %v1069_v3 }
  0xfd   : > { %4190 = vmatmul.mubr.bf16.vlgmr.msra.gmra.mrb[108].mxu1 %v994_v11  ;;  %4277 = vmatprep.subr.bf16.mxu0 %v5220_v12  ;;  %v5227_v12 = vcombine.low %v276_v47, %v276_v47 }
  0xfe   : > { %v2071_v22 = vpop.f32.mrb[4].mxu0  ;;  %4238 = vmatpush1.bf16.xpose.msra.mxu1 %v5217_v14  ;;  %4269 = vmatprep.mubr.bf16.mxu1 %v1044_v15 }
  0xff   : > { %v2072_v26 = vadd.f32 %v2071_v22, %v2032_v8  ;;  %v2073_v27 = vpop.f32.mrb[5].mxu0  ;;  %4317 = vmatprep.subr.bf16.mxu1 %v5222_v19  ;;  %v5232_v19 = vcombine.high %v278_v6, %v278_v6  ;;  %v1094_v22 = vcombine.high %v1090_v5, %v1090_v5 }
 0x100   : > { %v2074_v28 = vpop.f32.mrb[6].mxu0  ;;  %v2111_v29 = vpop.f32.mrb[4].mxu1  ;;  %v1076_v27 = vrot.slane %v1060_v48, %v5540_v18 }
 0x101   : > { %v2112_v32 = vadd.f32 %v2111_v29, %v2072_v26  ;;  %v2075_v33 = vpop.f32.mrb[7].mxu0  ;;  %v2113_v34 = vpop.f32.mrb[5].mxu1  ;;  %v5234_v26 = vcombine.high %v279_v13, %v279_v13 }
 0x102   : > { %v2114_v37 = vpop.f32.mrb[6].mxu1  ;;  %v1092_v41 = vcombine.high %v1076_v27, %v1076_v27 }
 0x103   : > { %4230 = vmatmul.mubr.bf16.vlgmr.msra.gmra.mrb[112].mxu0 %v1020_v21  ;;  %v2115_v42 = vpop.f32.mrb[7].mxu1  ;;  %v5229_v21 = vcombine.low %v277_v54, %v277_v54  ;;  %v281_v37 = vld [vmem:[%s5529_s21 + $0x218] sm:$0xff] }
 0x104   : > { %4278 = vmatpush1.bf16.xpose.msra.mxu0 %v5219_v30  ;;  %4309 = vmatprep.mubr.bf16.mxu0 %v1041_v23  ;;  %v1110_v23 = vcombine.high %v1102_v7, %v1102_v7  ;;  %v280_v30 = vld [vmem:[%s5529_s21 + $0x210] sm:$0xff]  ;;  %v5238_v48 = vcombine.high %v281_v37, %v281_v37 }
 0x105   : > { %4270 = vmatmul.mubr.bf16.vlgmr.msra.gmra.mrb[112].mxu1 %v1042_v35  ;;  %4357 = vmatprep.subr.bf16.mxu0 %v5224_v36  ;;  %v5231_v36 = vcombine.low %v278_v6, %v278_v6  ;;  %v5236_v42 = vcombine.high %v280_v30, %v280_v30 }
 0x106   : > { %v2151_v45 = vpop.f32.mrb[8].mxu0  ;;  %4318 = vmatpush1.bf16.xpose.msra.mxu1 %v5221_v38  ;;  %4349 = vmatprep.mubr.bf16.mxu1 %v1045_v39  ;;  %v1132_v29 = vrot.slane %v1110_v23, %v5540_v18 }
 0x107   : > { %v2152_v49 = vadd.f32 %v2151_v45, %v2112_v32  ;;  %v2153_v50 = vpop.f32.mrb[9].mxu0  ;;  %4397 = vmatprep.subr.bf16.mxu1 %v5226_v43 }
 0x108   : > { %v2154_v51 = vpop.f32.mrb[10].mxu0  ;;  %v2191_v52 = vpop.f32.mrb[8].mxu1  ;;  %v1142_v45 = vcombine.high %v1132_v29, %v1132_v29  ;;  %v1118_v50 = vrot.slane %v1102_v7, %v5540_v18 }
 0x109   : > { %v2192_v55 = vadd.f32 %v2191_v52, %v2152_v49  ;;  %v2155_v56 = vpop.f32.mrb[11].mxu0  ;;  %v2193_v57 = vpop.f32.mrb[9].mxu1  ;;  %v211_v49 = vld [vmem:[%s5524_s17 + $0x88] sm:$0xff] }
 0x10a   : > { %v2194_v60 = vpop.f32.mrb[10].mxu1  ;;  %v1151_v54 = vrot.slane %v211_v49, %v5540_v18  ;;  %v1144_v6 = vcombine.high %v211_v49, %v211_v49 }
 0x10b   : > { %4310 = vmatmul.mubr.bf16.vlgmr.msra.gmra.mrb[116].mxu0 %v1027_v44  ;;  %v2195_v0 = vpop.f32.mrb[11].mxu1  ;;  %v5233_v44 = vcombine.low %v279_v13, %v279_v13  ;;  %v283_v60 = vld [vmem:[%s5529_s21 + $0x228] sm:$0xff] }
 0x10c   : > { %4358 = vmatpush1.bf16.xpose.msra.mxu0 %v5223_v53  ;;  %4389 = vmatprep.mubr.bf16.mxu0 %v1083_v46  ;;  %v1111_v46 = vcombine.high %v1109_v31, %v1109_v31  ;;  %v282_v53 = vld [vmem:[%s5529_s21 + $0x220] sm:$0xff]  ;;  %v1140_v0 = vcombine.high %v1118_v50, %v1118_v50  ;;  %v1158_v13 = vrot.slane %v1144_v6, %v5540_v18 }
 0x10d   : > { %4350 = vmatmul.mubr.bf16.vlgmr.msra.gmra.mrb[116].mxu1 %v1043_v58  ;;  %4437 = vmatprep.subr.bf16.mxu0 %v5228_v59  ;;  %v5235_v59 = vcombine.low %v280_v30, %v280_v30 }
 0x10e   : > { %v2231_v4 = vpop.f32.mrb[12].mxu0  ;;  %4398 = vmatpush1.bf16.xpose.msra.mxu1 %v5225_v61  ;;  %4429 = vmatprep.mubr.bf16.mxu1 %v1093_v62  ;;  %v1139_v52 = vrot.slane %v1111_v46, %v5540_v18 }
 0x10f   : > { %v2232_v8 = vadd.f32 %v2231_v4, %v2192_v55  ;;  %v2233_v9 = vpop.f32.mrb[13].mxu0  ;;  %4477 = vmatprep.subr.bf16.mxu1 %v5230_v1  ;;  %v5240_v1 = vcombine.high %v282_v53, %v282_v53 }
 0x110   : > { %v2234_v10 = vpop.f32.mrb[14].mxu0  ;;  %v2271_v11 = vpop.f32.mrb[12].mxu1  ;;  %v1143_v4 = vcombine.high %v1139_v52, %v1139_v52  ;;  %v1125_v9 = vrot.slane %v1109_v31, %v5540_v18 }
 0x111   : > { %v2272_v14 = vadd.f32 %v2271_v11, %v2232_v8  ;;  %v2235_v15 = vpop.f32.mrb[15].mxu0  ;;  %v2273_v16 = vpop.f32.mrb[13].mxu1  ;;  %v5242_v8 = vcombine.high %v283_v60, %v283_v60 }
 0x112   : > { %v2274_v20 = vpop.f32.mrb[14].mxu1  ;;  %v1141_v24 = vcombine.high %v1125_v9, %v1125_v9 }
 0x113   : > { %4390 = vmatmul.mubr.bf16.vlgmr.msra.gmra.mrb[120].mxu0 %v1069_v3  ;;  %v2275_v25 = vpop.f32.mrb[15].mxu1  ;;  %v5237_v3 = vcombine.low %v281_v37, %v281_v37  ;;  %v285_v20 = vld [vmem:[%s5529_s21 + $0x238] sm:$0xff] }
 0x114   : > { %4438 = vmatpush1.bf16.xpose.msra.mxu0 %v5227_v12  ;;  %4469 = vmatprep.mubr.bf16.mxu0 %v1090_v5  ;;  %v1159_v5 = vcombine.high %v1151_v54, %v1151_v54  ;;  %v284_v12 = vld [vmem:[%s5529_s21 + $0x230] sm:$0xff]  ;;  %v5246_v31 = vcombine.high %v285_v20, %v285_v20 }
 0x115   : > { %4430 = vmatmul.mubr.bf16.vlgmr.msra.gmra.mrb[120].mxu1 %v1091_v17  ;;  %4517 = vmatprep.subr.bf16.mxu0 %v5232_v19  ;;  %v5239_v19 = vcombine.low %v282_v53, %v282_v53  ;;  %v5244_v25 = vcombine.high %v284_v12, %v284_v12 }
 0x116   : > { %v2311_v28 = vpop.f32.mrb[16].mxu0  ;;  %4478 = vmatpush1.bf16.xpose.msra.mxu1 %v5229_v21  ;;  %4509 = vmatprep.mubr.bf16.mxu1 %v1094_v22  ;;  %v1181_v11 = vrot.slane %v1159_v5, %v5540_v18 }
 0x117   : > { %v2312_v32 = vadd.f32 %v2311_v28, %v2272_v14  ;;  %v2313_v33 = vpop.f32.mrb[17].mxu0  ;;  %4557 = vmatprep.subr.bf16.mxu1 %v5234_v26 }
 0x118   : > { %v2314_v34 = vpop.f32.mrb[18].mxu0  ;;  %v2351_v35 = vpop.f32.mrb[16].mxu1  ;;  %v1191_v28 = vcombine.high %v1181_v11, %v1181_v11  ;;  %v1167_v33 = vrot.slane %v1151_v54, %v5540_v18 }
 0x119   : > { %v2352_v38 = vadd.f32 %v2351_v35, %v2312_v32  ;;  %v2315_v39 = vpop.f32.mrb[19].mxu0  ;;  %v2353_v40 = vpop.f32.mrb[17].mxu1  ;;  %v212_v32 = vld [vmem:[%s5524_s17 + $0x90] sm:$0xff] }
 0x11a   : > { %v2354_v43 = vpop.f32.mrb[18].mxu1  ;;  %v1200_v37 = vrot.slane %v212_v32, %v5540_v18  ;;  %v1193_v53 = vcombine.high %v212_v32, %v212_v32 }
 0x11b   : > { %4470 = vmatmul.mubr.bf16.vlgmr.msra.gmra.mrb[124].mxu0 %v1076_v27  ;;  %v2355_v47 = vpop.f32.mrb[19].mxu1  ;;  %v5241_v27 = vcombine.low %v283_v60, %v283_v60  ;;  %v287_v43 = vld [vmem:[%s5529_s21 + $0x248] sm:$0xff] }
 0x11c   : > { %4518 = vmatpush1.bf16.xpose.msra.mxu0 %v5231_v36  ;;  %4549 = vmatprep.mubr.bf16.mxu0 %v1132_v29  ;;  %v1160_v29 = vcombine.high %v1158_v13, %v1158_v13  ;;  %v286_v36 = vld [vmem:[%s5529_s21 + $0x240] sm:$0xff]  ;;  %v1189_v47 = vcombine.high %v1167_v33, %v1167_v33  ;;  %v1207_v60 = vrot.slane %v1193_v53, %v5540_v18 }
 0x11d   : > { %4510 = vmatmul.mubr.bf16.vlgmr.msra.gmra.mrb[124].mxu1 %v1092_v41  ;;  %4597 = vmatprep.subr.bf16.mxu0 %v5236_v42  ;;  %v5243_v42 = vcombine.low %v284_v12, %v284_v12 }
 0x11e   : > { %v2391_v51 = vpop.f32.mrb[20].mxu0  ;;  %4558 = vmatpush1.bf16.xpose.msra.mxu1 %v5233_v44  ;;  %4589 = vmatprep.mubr.bf16.mxu1 %v1142_v45  ;;  %v1188_v35 = vrot.slane %v1160_v29, %v5540_v18  ;;  %v5102_v29 = vld.sshfl [vmem:[%s5524_s17 + $0x98] sm:$0x11 pattern:$0x75316420] }
 0x11f   : > { %v2392_v55 = vadd.f32 %v2391_v51, %v2352_v38  ;;  %v2393_v56 = vpop.f32.mrb[21].mxu0  ;;  %4637 = vmatprep.subr.bf16.mxu1 %v5238_v48  ;;  %v5248_v48 = vcombine.high %v286_v36, %v286_v36 }
 0x120   : > { %v2394_v57 = vpop.f32.mrb[22].mxu0  ;;  %v2431_v58 = vpop.f32.mrb[20].mxu1  ;;  %v1192_v51 = vcombine.high %v1188_v35, %v1188_v35  ;;  %v1174_v56 = vrot.slane %v1158_v13, %v5540_v18 }
 0x121   : > { %v2432_v61 = vadd.f32 %v2431_v58, %v2392_v55  ;;  %v2395_v62 = vpop.f32.mrb[23].mxu0  ;;  %v2433_v63 = vpop.f32.mrb[21].mxu1  ;;  %v5250_v55 = vcombine.high %v287_v43, %v287_v43 }
 0x122   : > { %v2434_v2 = vpop.f32.mrb[22].mxu1  ;;  %v1190_v6 = vcombine.high %v1174_v56, %v1174_v56 }
 0x123   : > { %4550 = vmatmul.mubr.bf16.vlgmr.msra.gmra.mrb[128].mxu0 %v1118_v50  ;;  %v2435_v7 = vpop.f32.mrb[23].mxu1  ;;  %v5245_v50 = vcombine.low %v285_v20, %v285_v20  ;;  %v289_v2 = vld [vmem:[%s5529_s21 + $0x258] sm:$0xff] }
 0x124   : > { %4598 = vmatpush1.bf16.xpose.msra.mxu0 %v5235_v59  ;;  %4629 = vmatprep.mubr.bf16.mxu0 %v1139_v52  ;;  %v1208_v52 = vcombine.high %v1200_v37, %v1200_v37  ;;  %v288_v59 = vld [vmem:[%s5529_s21 + $0x250] sm:$0xff]  ;;  %v5254_v13 = vcombine.high %v289_v2, %v289_v2 }
 0x125   : > { %4590 = vmatmul.mubr.bf16.vlgmr.msra.gmra.mrb[128].mxu1 %v1140_v0  ;;  %4677 = vmatprep.subr.bf16.mxu0 %v5240_v1  ;;  %v5247_v1 = vcombine.low %v286_v36, %v286_v36  ;;  %v5252_v7 = vcombine.high %v288_v59, %v288_v59 }
 0x126   : > { %v2471_v10 = vpop.f32.mrb[24].mxu0  ;;  %4638 = vmatpush1.bf16.xpose.msra.mxu1 %v5237_v3  ;;  %4669 = vmatprep.mubr.bf16.mxu1 %v1143_v4  ;;  %v1230_v58 = vrot.slane %v1208_v52, %v5540_v18  ;;  %v1256_v52 = vrot.slane %v5102_v29, %v5540_v18 }
 0x127   : > { %v2472_v14 = vadd.f32 %v2471_v10, %v2432_v61  ;;  %v2473_v15 = vpop.f32.mrb[25].mxu0  ;;  %4717 = vmatprep.subr.bf16.mxu1 %v5242_v8 }
 0x128   : > { %v2474_v16 = vpop.f32.mrb[26].mxu0  ;;  %v2511_v17 = vpop.f32.mrb[24].mxu1  ;;  %v1240_v10 = vcombine.high %v1230_v58, %v1230_v58 }
 0x129   : > { %v2512_v21 = vadd.f32 %v2511_v17, %v2472_v14  ;;  %v2475_v22 = vpop.f32.mrb[27].mxu0  ;;  %v2513_v23 = vpop.f32.mrb[25].mxu1  ;;  %v1216_v14 = vrot.slane %v1200_v37, %v5540_v18  ;;  %v290_v17 = vld [vmem:[%s5529_s21 + $0x260] sm:$0xff] }
 0x12a   : > { %v2514_v26 = vpop.f32.mrb[26].mxu1  ;;  %v5251_v23 = vcombine.low %v288_v59, %v288_v59 }
 0x12b   : > { %4630 = vmatmul.mubr.bf16.vlgmr.msra.gmra.mrb[132].mxu0 %v1125_v9  ;;  %v2515_v30 = vpop.f32.mrb[27].mxu1  ;;  %v5249_v9 = vcombine.low %v287_v43, %v287_v43 }
 0x12c   : > { %4678 = vmatpush1.bf16.xpose.msra.mxu0 %v5239_v19  ;;  %4709 = vmatprep.mubr.bf16.mxu0 %v1181_v11  ;;  %v1209_v11 = vcombine.high %v1207_v60, %v1207_v60 }
 0x12d   : > { %4670 = vmatmul.mubr.bf16.vlgmr.msra.gmra.mrb[132].mxu1 %v1141_v24  ;;  %4757 = vmatprep.subr.bf16.mxu0 %v5244_v25 }
 0x12e   : > { %v2551_v34 = vpop.f32.mrb[28].mxu0  ;;  %4718 = vmatpush1.bf16.xpose.msra.mxu1 %v5241_v27  ;;  %4749 = vmatprep.mubr.bf16.mxu1 %v1191_v28  ;;  %v1237_v16 = vrot.slane %v1209_v11, %v5540_v18  ;;  %v1238_v27 = vcombine.high %v1216_v14, %v1216_v14  ;;  %v5256_v28 = vcombine.high %v290_v17, %v290_v17 }
 0x12f   : > { %v2552_v38 = vadd.f32 %v2551_v34, %v2512_v21  ;;  %v2553_v39 = vpop.f32.mrb[29].mxu0  ;;  %4797 = vmatprep.subr.bf16.mxu1 %v5246_v31  ;;  %v5253_v31 = vcombine.low %v289_v2, %v289_v2  ;;  %v1249_v34 = vcombine.high %v5102_v29, %v5102_v29 }
 0x130   : > { %v2554_v40 = vpop.f32.mrb[30].mxu0  ;;  %v2591_v41 = vpop.f32.mrb[28].mxu1  ;;  %v1241_v32 = vcombine.high %v1237_v16, %v1237_v16 }
 0x131   : > { %v2592_v44 = vadd.f32 %v2591_v41, %v2552_v38  ;;  %v2555_v45 = vpop.f32.mrb[31].mxu0  ;;  %v2593_v46 = vpop.f32.mrb[29].mxu1  ;;  %v5255_v41 = vcombine.low %v290_v17, %v290_v17 }
 0x132   : > { %v2594_v49 = vpop.f32.mrb[30].mxu1 }
 0x133   : > { %4710 = vmatmul.mubr.bf16.vlgmr.msra.gmra.mrb[136].mxu0 %v1167_v33  ;;  %v2595_v54 = vpop.f32.mrb[31].mxu1 }
 0x134   : > { %4758 = vmatpush1.bf16.xpose.msra.mxu0 %v5243_v42  ;;  %4789 = vmatprep.mubr.bf16.mxu0 %v1188_v35  ;;  %v1223_v35 = vrot.slane %v1207_v60, %v5540_v18  ;;  %v1263_v42 = vrot.slane %v1249_v34, %v5540_v18 }
 0x135   : > { %4750 = vmatmul.mubr.bf16.vlgmr.msra.gmra.mrb[136].mxu1 %v1189_v47  ;;  %4837 = vmatprep.subr.bf16.mxu0 %v5248_v48 }
 0x136   : > { %v2631_v57 = vpop.f32.mrb[32].mxu0  ;;  %4798 = vmatpush1.bf16.xpose.msra.mxu1 %v5245_v50  ;;  %4829 = vmatprep.mubr.bf16.mxu1 %v1192_v51  ;;  %v1239_v46 = vcombine.high %v1223_v35, %v1223_v35 }
 0x137   : > { %v2632_v61 = vadd.f32 %v2631_v57, %v2592_v44  ;;  %v2633_v62 = vpop.f32.mrb[33].mxu0  ;;  %4877 = vmatprep.subr.bf16.mxu1 %v5250_v55 }
 0x138   : > { %v2634_v63 = vpop.f32.mrb[34].mxu0  ;;  %v2671_v0 = vpop.f32.mrb[32].mxu1 }
 0x139   : > { %v2672_v3 = vadd.f32 %v2671_v0, %v2632_v61  ;;  %v2635_v4 = vpop.f32.mrb[35].mxu0  ;;  %v2673_v5 = vpop.f32.mrb[33].mxu1 }
 0x13a   : > { %v2674_v8 = vpop.f32.mrb[34].mxu1 }
 0x13b   : > { %4790 = vmatmul.mubr.bf16.vlgmr.msra.gmra.mrb[140].mxu0 %v1174_v56  ;;  %v2675_v12 = vpop.f32.mrb[35].mxu1 }
 0x13c   : > { %4838 = vmatpush1.bf16.xpose.msra.mxu0 %v5247_v1  ;;  %4869 = vmatprep.mubr.bf16.mxu0 %v1230_v58 }
 0x13d   : > { %4830 = vmatmul.mubr.bf16.vlgmr.msra.gmra.mrb[140].mxu1 %v1190_v6  ;;  %4917 = vmatprep.subr.bf16.mxu0 %v5252_v7 }
 0x13e   : > { %v2711_v15 = vpop.f32.mrb[36].mxu0  ;;  %4878 = vmatpush1.bf16.xpose.msra.mxu1 %v5249_v9  ;;  %4909 = vmatprep.mubr.bf16.mxu1 %v1240_v10 }
 0x13f   : > { %v2712_v19 = vadd.f32 %v2711_v15, %v2672_v3  ;;  %v2713_v20 = vpop.f32.mrb[37].mxu0  ;;  %4957 = vmatprep.subr.bf16.mxu1 %v5254_v13 }
 0x140   : > { %v2714_v21 = vpop.f32.mrb[38].mxu0  ;;  %v2751_v22 = vpop.f32.mrb[36].mxu1 }
 0x141   : > { %v2752_v24 = vadd.f32 %v2751_v22, %v2712_v19  ;;  %v2715_v25 = vpop.f32.mrb[39].mxu0  ;;  %v2753_v26 = vpop.f32.mrb[37].mxu1 }
 0x142   : > { %v2754_v30 = vpop.f32.mrb[38].mxu1 }
 0x143   : > { %4870 = vmatmul.mubr.bf16.vlgmr.msra.gmra.mrb[144].mxu0 %v1216_v14  ;;  %v2755_v33 = vpop.f32.mrb[39].mxu1 }
 0x144   : > { %4918 = vmatpush1.bf16.xpose.msra.mxu0 %v5251_v23  ;;  %4949 = vmatprep.mubr.bf16.mxu0 %v1237_v16 }
 0x145   : > { %4910 = vmatmul.mubr.bf16.vlgmr.msra.gmra.mrb[144].mxu1 %v1238_v27  ;;  %4997 = vmatprep.subr.bf16.mxu0 %v5256_v28 }
 0x146   : > { %v2791_v36 = vpop.f32.mrb[40].mxu0  ;;  %4958 = vmatpush1.bf16.xpose.msra.mxu1 %v5253_v31  ;;  %4989 = vmatprep.mubr.bf16.mxu1 %v1241_v32 }
 0x147   : > { %v2792_v37 = vadd.f32 %v2791_v36, %v2752_v24  ;;  %v2793_v38 = vpop.f32.mrb[41].mxu0 }
 0x148   : > { %v2794_v39 = vpop.f32.mrb[42].mxu0  ;;  %v2831_v40 = vpop.f32.mrb[40].mxu1 }
 0x149   : > { %v2832_v43 = vadd.f32 %v2831_v40, %v2792_v37  ;;  %v2795_v44 = vpop.f32.mrb[43].mxu0  ;;  %v2833_v45 = vpop.f32.mrb[41].mxu1 }
 0x14a   : > { %v2834_v47 = vpop.f32.mrb[42].mxu1 }
 0x14b   : > { %4950 = vmatmul.mubr.bf16.vlgmr.msra.gmra.mrb[148].mxu0 %v1223_v35  ;;  %v2835_v48 = vpop.f32.mrb[43].mxu1 }
 0x14c   : > { %4998 = vmatpush1.bf16.xpose.msra.mxu0 %v5255_v41  ;;  %5029 = vmatprep.mubr.bf16.mxu0 %v1263_v42 }
 0x14d   : > { %4990 = vmatmul.mubr.bf16.vlgmr.msra.gmra.mrb[148].mxu1 %v1239_v46 }
 0x14e   : > { %v2871_v49 = vpop.f32.mrb[44].mxu0 }
 0x14f   : > { %v2872_v50 = vadd.f32 %v2871_v49, %v2832_v43  ;;  %v2873_v51 = vpop.f32.mrb[45].mxu0 }
 0x150   : > { %v2874_v53 = vpop.f32.mrb[46].mxu0  ;;  %v2911_v54 = vpop.f32.mrb[44].mxu1 }
 0x151   : > { %v2912_v55 = vadd.f32 %v2911_v54, %v2872_v50  ;;  %v2875_v56 = vpop.f32.mrb[47].mxu0  ;;  %v2913_v57 = vpop.f32.mrb[45].mxu1 }
 0x152   : > { %v2914_v58 = vpop.f32.mrb[46].mxu1 }
 0x153   : > { %5030 = vmatmul.mubr.bf16.vlgmr.msra.gmra.mrb[152].mxu0 %v1256_v52  ;;  %v2915_v59 = vpop.f32.mrb[47].mxu1 }
 0x156   : > { %v2951_v60 = vpop.f32.mrb[48].mxu0 }
 0x157   : > { %v2952_v61 = vadd.f32 %v2951_v60, %v2912_v55  ;;  %v2953_v62 = vpop.f32.mrb[49].mxu0 }
 0x158   : > { %v2954_v63 = vpop.f32.mrb[50].mxu0  ;;  %v2991_v0 = vpop.f32.mrb[48].mxu1 }
 0x159   : > { %v2992_v1 = vadd.f32 %v2991_v0, %v2952_v61  ;;  %v2955_v2 = vpop.f32.mrb[51].mxu0  ;;  %v2993_v3 = vpop.f32.mrb[49].mxu1 }
 0x15a   : > { %v2994_v4 = vpop.f32.mrb[50].mxu1 }
 0x15b   : > { %v2995_v5 = vpop.f32.mrb[51].mxu1 }
 0x15e   : > { %v3031_v6 = vpop.f32.mrb[52].mxu0 }
 0x15f   : > { %v3032_v18 = vadd.f32 %v3031_v6, %v2992_v1  ;;  %v3033_v7 = vpop.f32.mrb[53].mxu0 }
 0x160   : > { %v3034_v8 = vpop.f32.mrb[54].mxu0  ;;  %v3071_v9 = vpop.f32.mrb[52].mxu1 }
 0x161   : > { %v3072_v10 = vadd.f32 %v3071_v9, %v3032_v18  ;;  %v3035_v11 = vpop.f32.mrb[55].mxu0  ;;  %v3073_v12 = vpop.f32.mrb[53].mxu1 }
 0x162   : > { %v3074_v13 = vpop.f32.mrb[54].mxu1 }
 0x163   : > { %v3075_v14 = vpop.f32.mrb[55].mxu1 }
 0x166   : > { %v3111_v15 = vpop.f32.mrb[56].mxu0 }
 0x167   : > { %v3112_v16 = vadd.f32 %v3111_v15, %v3072_v10  ;;  %v3113_v17 = vpop.f32.mrb[57].mxu0 }
 0x168   : > { %v3114_v19 = vpop.f32.mrb[58].mxu0  ;;  %v3151_v20 = vpop.f32.mrb[56].mxu1 }
 0x169   : > { %v3152_v21 = vadd.f32 %v3151_v20, %v3112_v16  ;;  %v3115_v22 = vpop.f32.mrb[59].mxu0  ;;  %v3153_v23 = vpop.f32.mrb[57].mxu1 }
 0x16a   : > { %v3154_v24 = vpop.f32.mrb[58].mxu1 }
 0x16b   : > { %v3155_v25 = vpop.f32.mrb[59].mxu1 }
 0x16e   : > { %v3191_v26 = vpop.f32.mrb[60].mxu0 }
 0x16f   : > { %v3192_v27 = vadd.f32 %v3191_v26, %v3152_v21  ;;  %v3193_v28 = vpop.f32.mrb[61].mxu0 }
 0x170   : > { %v3194_v29 = vpop.f32.mrb[62].mxu0  ;;  %v3231_v30 = vpop.f32.mrb[60].mxu1 }
 0x171   : > { %v3232_v31 = vadd.f32 %v3231_v30, %v3192_v27  ;;  %v3195_v32 = vpop.f32.mrb[63].mxu0  ;;  %v3233_v33 = vpop.f32.mrb[61].mxu1 }
 0x172   : > { %v3234_v34 = vpop.f32.mrb[62].mxu1 }
 0x173   : > { %v3235_v35 = vpop.f32.mrb[63].mxu1 }
 0x176   : > { %v3271_v36 = vpop.f32.mrb[64].mxu0 }
 0x177   : > { %v3272_v37 = vadd.f32 %v3271_v36, %v3232_v31  ;;  %v3273_v38 = vpop.f32.mrb[65].mxu0 }
 0x178   : > { %v3274_v39 = vpop.f32.mrb[66].mxu0  ;;  %v3311_v40 = vpop.f32.mrb[64].mxu1 }
 0x179   : > { %v3312_v41 = vadd.f32 %v3311_v40, %v3272_v37  ;;  %v3275_v42 = vpop.f32.mrb[67].mxu0  ;;  %v3313_v43 = vpop.f32.mrb[65].mxu1 }
 0x17a   : > { %v3314_v44 = vpop.f32.mrb[66].mxu1 }
 0x17b   : > { %v3315_v45 = vpop.f32.mrb[67].mxu1 }
 0x17e   : > { %v3351_v46 = vpop.f32.mrb[68].mxu0 }
 0x17f   : > { %v3352_v47 = vadd.f32 %v3351_v46, %v3312_v41  ;;  %v3353_v48 = vpop.f32.mrb[69].mxu0 }
 0x180   : > { %v3354_v49 = vpop.f32.mrb[70].mxu0  ;;  %v3391_v50 = vpop.f32.mrb[68].mxu1 }
 0x181   : > { %v3392_v51 = vadd.f32 %v3391_v50, %v3352_v47  ;;  %v3355_v52 = vpop.f32.mrb[71].mxu0  ;;  %v3393_v53 = vpop.f32.mrb[69].mxu1 }
 0x182   : > { %v3394_v54 = vpop.f32.mrb[70].mxu1 }
 0x183   : > { %v3395_v55 = vpop.f32.mrb[71].mxu1 }
 0x186   : > { %v3431_v56 = vpop.f32.mrb[72].mxu0 }
 0x187   : > { %v3432_v57 = vadd.f32 %v3431_v56, %v3392_v51  ;;  %v3433_v58 = vpop.f32.mrb[73].mxu0 }
 0x188   : > { %v3434_v59 = vpop.f32.mrb[74].mxu0  ;;  %v3471_v60 = vpop.f32.mrb[72].mxu1 }
 0x189   : > { %v3472_v61 = vadd.f32 %v3471_v60, %v3432_v57  ;;  %v3435_v62 = vpop.f32.mrb[75].mxu0  ;;  %v3473_v63 = vpop.f32.mrb[73].mxu1 }
 0x18a   : > { %v3474_v0 = vpop.f32.mrb[74].mxu1 }
 0x18b   : > { %v3475_v1 = vpop.f32.mrb[75].mxu1 }
 0x18e   : > { %v3511_v2 = vpop.f32.mrb[76].mxu0 }
 0x18f   : > { %v3512_v3 = vadd.f32 %v3511_v2, %v3472_v61  ;;  %v3513_v4 = vpop.f32.mrb[77].mxu0 }
 0x190   : > { %v3514_v5 = vpop.f32.mrb[78].mxu0  ;;  %v3551_v6 = vpop.f32.mrb[76].mxu1 }
 0x191   : > { %v3552_v18 = vadd.f32 %v3551_v6, %v3512_v3  ;;  %v3515_v7 = vpop.f32.mrb[79].mxu0  ;;  %v3553_v8 = vpop.f32.mrb[77].mxu1 }
 0x192   : > { %v3554_v9 = vpop.f32.mrb[78].mxu1 }
 0x193   : > { %v3555_v10 = vpop.f32.mrb[79].mxu1 }
 0x196   : > { %v3591_v11 = vpop.f32.mrb[80].mxu0 }
 0x197   : > { %v3592_v12 = vadd.f32 %v3591_v11, %v3552_v18  ;;  %v3593_v13 = vpop.f32.mrb[81].mxu0 }
 0x198   : > { %v3594_v14 = vpop.f32.mrb[82].mxu0  ;;  %v3631_v15 = vpop.f32.mrb[80].mxu1 }
 0x199   : > { %v3632_v16 = vadd.f32 %v3631_v15, %v3592_v12  ;;  %v3595_v17 = vpop.f32.mrb[83].mxu0  ;;  %v3633_v19 = vpop.f32.mrb[81].mxu1 }
 0x19a   : > { %v3634_v20 = vpop.f32.mrb[82].mxu1 }
 0x19b   : > { %v3635_v21 = vpop.f32.mrb[83].mxu1 }
 0x19e   : > { %v3671_v22 = vpop.f32.mrb[84].mxu0 }
 0x19f   : > { %v3672_v23 = vadd.f32 %v3671_v22, %v3632_v16  ;;  %v3673_v24 = vpop.f32.mrb[85].mxu0 }
 0x1a0   : > { %v3674_v25 = vpop.f32.mrb[86].mxu0  ;;  %v3711_v26 = vpop.f32.mrb[84].mxu1 }
 0x1a1   : > { %v3712_v27 = vadd.f32 %v3711_v26, %v3672_v23  ;;  %v3675_v28 = vpop.f32.mrb[87].mxu0  ;;  %v3713_v29 = vpop.f32.mrb[85].mxu1 }
 0x1a2   : > { %v3714_v30 = vpop.f32.mrb[86].mxu1 }
 0x1a3   : > { %v3715_v31 = vpop.f32.mrb[87].mxu1 }
 0x1a6   : > { %v3751_v32 = vpop.f32.mrb[88].mxu0 }
 0x1a7   : > { %v3752_v33 = vadd.f32 %v3751_v32, %v3712_v27  ;;  %v3753_v34 = vpop.f32.mrb[89].mxu0 }
 0x1a8   : > { %v3754_v35 = vpop.f32.mrb[90].mxu0  ;;  %v3791_v36 = vpop.f32.mrb[88].mxu1 }
 0x1a9   : > { %v3792_v37 = vadd.f32 %v3791_v36, %v3752_v33  ;;  %v3755_v38 = vpop.f32.mrb[91].mxu0  ;;  %v3793_v39 = vpop.f32.mrb[89].mxu1 }
 0x1aa   : > { %v3794_v40 = vpop.f32.mrb[90].mxu1 }
 0x1ab   : > { %v3795_v41 = vpop.f32.mrb[91].mxu1 }
 0x1ae   : > { %v3831_v42 = vpop.f32.mrb[92].mxu0 }
 0x1af   : > { %v3832_v43 = vadd.f32 %v3831_v42, %v3792_v37  ;;  %v3833_v44 = vpop.f32.mrb[93].mxu0 }
 0x1b0   : > { %v3834_v45 = vpop.f32.mrb[94].mxu0  ;;  %v3871_v46 = vpop.f32.mrb[92].mxu1 }
 0x1b1   : > { %v3872_v47 = vadd.f32 %v3871_v46, %v3832_v43  ;;  %v3835_v48 = vpop.f32.mrb[95].mxu0  ;;  %v3873_v49 = vpop.f32.mrb[93].mxu1 }
 0x1b2   : > { %v3874_v50 = vpop.f32.mrb[94].mxu1 }
 0x1b3   : > { %v3875_v51 = vpop.f32.mrb[95].mxu1 }
 0x1b6   : > { %v3911_v52 = vpop.f32.mrb[96].mxu0 }
 0x1b7   : > { %v3912_v53 = vadd.f32 %v3911_v52, %v3872_v47  ;;  %v3913_v54 = vpop.f32.mrb[97].mxu0 }
 0x1b8   : > { %v3914_v55 = vpop.f32.mrb[98].mxu0  ;;  %v3951_v56 = vpop.f32.mrb[96].mxu1 }
 0x1b9   : > { %v3952_v57 = vadd.f32 %v3951_v56, %v3912_v53  ;;  %v3915_v58 = vpop.f32.mrb[99].mxu0  ;;  %v3953_v59 = vpop.f32.mrb[97].mxu1 }
 0x1ba   : > { %v3954_v60 = vpop.f32.mrb[98].mxu1 }
 0x1bb   : > { %v3955_v61 = vpop.f32.mrb[99].mxu1 }
 0x1be   : > { %v3991_v62 = vpop.f32.mrb[100].mxu0 }
 0x1bf   : > { %v3992_v63 = vadd.f32 %v3991_v62, %v3952_v57  ;;  %v3993_v0 = vpop.f32.mrb[101].mxu0 }
 0x1c0   : > { %v3994_v1 = vpop.f32.mrb[102].mxu0  ;;  %v4031_v2 = vpop.f32.mrb[100].mxu1 }
 0x1c1   : > { %v4032_v3 = vadd.f32 %v4031_v2, %v3992_v63  ;;  %v3995_v4 = vpop.f32.mrb[103].mxu0  ;;  %v4033_v5 = vpop.f32.mrb[101].mxu1 }
 0x1c2   : > { %v4034_v6 = vpop.f32.mrb[102].mxu1 }
 0x1c3   : > { %v4035_v18 = vpop.f32.mrb[103].mxu1 }
 0x1c6   : > { %v4071_v7 = vpop.f32.mrb[104].mxu0 }
 0x1c7   : > { %v4072_v8 = vadd.f32 %v4071_v7, %v4032_v3  ;;  %v4073_v9 = vpop.f32.mrb[105].mxu0 }
 0x1c8   : > { %v4074_v10 = vpop.f32.mrb[106].mxu0  ;;  %v4111_v11 = vpop.f32.mrb[104].mxu1 }
 0x1c9   : > { %v4112_v12 = vadd.f32 %v4111_v11, %v4072_v8  ;;  %v4075_v13 = vpop.f32.mrb[107].mxu0  ;;  %v4113_v14 = vpop.f32.mrb[105].mxu1 }
 0x1ca   : > { %v4114_v15 = vpop.f32.mrb[106].mxu1 }
 0x1cb   : > { %v4115_v16 = vpop.f32.mrb[107].mxu1 }
 0x1ce   : > { %v4151_v17 = vpop.f32.mrb[108].mxu0 }
 0x1cf   : > { %v4152_v19 = vadd.f32 %v4151_v17, %v4112_v12  ;;  %v4153_v20 = vpop.f32.mrb[109].mxu0 }
 0x1d0   : > { %v4154_v21 = vpop.f32.mrb[110].mxu0  ;;  %v4191_v22 = vpop.f32.mrb[108].mxu1 }
 0x1d1   : > { %v4192_v23 = vadd.f32 %v4191_v22, %v4152_v19  ;;  %v4155_v24 = vpop.f32.mrb[111].mxu0  ;;  %v4193_v25 = vpop.f32.mrb[109].mxu1 }
 0x1d2   : > { %v4194_v26 = vpop.f32.mrb[110].mxu1 }
 0x1d3   : > { %v4195_v27 = vpop.f32.mrb[111].mxu1 }
 0x1d6   : > { %v4231_v28 = vpop.f32.mrb[112].mxu0 }
 0x1d7   : > { %v4232_v29 = vadd.f32 %v4231_v28, %v4192_v23  ;;  %v4233_v30 = vpop.f32.mrb[113].mxu0 }
 0x1d8   : > { %v4234_v31 = vpop.f32.mrb[114].mxu0  ;;  %v4271_v32 = vpop.f32.mrb[112].mxu1 }
 0x1d9   : > { %v4272_v33 = vadd.f32 %v4271_v32, %v4232_v29  ;;  %v4235_v34 = vpop.f32.mrb[115].mxu0  ;;  %v4273_v35 = vpop.f32.mrb[113].mxu1 }
 0x1da   : > { %v4274_v36 = vpop.f32.mrb[114].mxu1 }
 0x1db   : > { %v4275_v37 = vpop.f32.mrb[115].mxu1 }
 0x1de   : > { %v4311_v38 = vpop.f32.mrb[116].mxu0 }
 0x1df   : > { %v4312_v39 = vadd.f32 %v4311_v38, %v4272_v33  ;;  %v4313_v40 = vpop.f32.mrb[117].mxu0 }
 0x1e0   : > { %v4314_v41 = vpop.f32.mrb[118].mxu0  ;;  %v4351_v42 = vpop.f32.mrb[116].mxu1 }
 0x1e1   : > { %v4352_v43 = vadd.f32 %v4351_v42, %v4312_v39  ;;  %v4315_v44 = vpop.f32.mrb[119].mxu0  ;;  %v4353_v45 = vpop.f32.mrb[117].mxu1 }
 0x1e2   : > { %v4354_v46 = vpop.f32.mrb[118].mxu1 }
 0x1e3   : > { %v4355_v47 = vpop.f32.mrb[119].mxu1 }
 0x1e6   : > { %v4391_v48 = vpop.f32.mrb[120].mxu0 }
 0x1e7   : > { %v4392_v49 = vadd.f32 %v4391_v48, %v4352_v43  ;;  %v4393_v50 = vpop.f32.mrb[121].mxu0 }
 0x1e8   : > { %v4394_v51 = vpop.f32.mrb[122].mxu0  ;;  %v4431_v52 = vpop.f32.mrb[120].mxu1 }
 0x1e9   : > { %v4432_v53 = vadd.f32 %v4431_v52, %v4392_v49  ;;  %v4395_v54 = vpop.f32.mrb[123].mxu0  ;;  %v4433_v55 = vpop.f32.mrb[121].mxu1 }
 0x1ea   : > { %v4434_v56 = vpop.f32.mrb[122].mxu1 }
 0x1eb   : > { %v4435_v57 = vpop.f32.mrb[123].mxu1 }
 0x1ee   : > { %v4471_v58 = vpop.f32.mrb[124].mxu0 }
 0x1ef   : > { %v4472_v59 = vadd.f32 %v4471_v58, %v4432_v53  ;;  %v4473_v60 = vpop.f32.mrb[125].mxu0 }
 0x1f0   : > { %v4474_v61 = vpop.f32.mrb[126].mxu0  ;;  %v4511_v62 = vpop.f32.mrb[124].mxu1 }
 0x1f1   : > { %v4512_v63 = vadd.f32 %v4511_v62, %v4472_v59  ;;  %v4475_v0 = vpop.f32.mrb[127].mxu0  ;;  %v4513_v1 = vpop.f32.mrb[125].mxu1 }
 0x1f2   : > { %v4514_v2 = vpop.f32.mrb[126].mxu1  ;;  %v193_v0 = vld [vmem:[#allocation2] sm:$0x3] }
 0x1f3   : > { %v4515_v3 = vpop.f32.mrb[127].mxu1 }
 0x1f6   : > { %v4551_v4 = vpop.f32.mrb[128].mxu0 }
 0x1f7   : > { %v4552_v5 = vadd.f32 %v4551_v4, %v4512_v63  ;;  %v4553_v6 = vpop.f32.mrb[129].mxu0 }
 0x1f8   : > { %v4554_v18 = vpop.f32.mrb[130].mxu0  ;;  %v4591_v7 = vpop.f32.mrb[128].mxu1 }
 0x1f9   : > { %v4592_v8 = vadd.f32 %v4591_v7, %v4552_v5  ;;  %v4555_v9 = vpop.f32.mrb[131].mxu0  ;;  %v4593_v10 = vpop.f32.mrb[129].mxu1 }
 0x1fa   : > { %v4594_v11 = vpop.f32.mrb[130].mxu1 }
 0x1fb   : > { %v4595_v12 = vpop.f32.mrb[131].mxu1 }
 0x1fe   : > { %v4631_v13 = vpop.f32.mrb[132].mxu0 }
 0x1ff   : > { %v4632_v14 = vadd.f32 %v4631_v13, %v4592_v8  ;;  %v4633_v15 = vpop.f32.mrb[133].mxu0 }
 0x200   : > { %v4634_v16 = vpop.f32.mrb[134].mxu0  ;;  %v4671_v17 = vpop.f32.mrb[132].mxu1 }
 0x201   : > { %v4672_v19 = vadd.f32 %v4671_v17, %v4632_v14  ;;  %v4635_v20 = vpop.f32.mrb[135].mxu0  ;;  %v4673_v21 = vpop.f32.mrb[133].mxu1 }
 0x202   : > { %v4674_v22 = vpop.f32.mrb[134].mxu1 }
 0x203   : > { %v4675_v23 = vpop.f32.mrb[135].mxu1 }
 0x206   : > { %v4711_v24 = vpop.f32.mrb[136].mxu0 }
 0x207   : > { %v4712_v25 = vadd.f32 %v4711_v24, %v4672_v19  ;;  %v4713_v26 = vpop.f32.mrb[137].mxu0 }
 0x208   : > { %v4714_v27 = vpop.f32.mrb[138].mxu0  ;;  %v4751_v28 = vpop.f32.mrb[136].mxu1 }
 0x209   : > { %v4752_v29 = vadd.f32 %v4751_v28, %v4712_v25  ;;  %v4715_v30 = vpop.f32.mrb[139].mxu0  ;;  %v4753_v31 = vpop.f32.mrb[137].mxu1 }
 0x20a   : > { %v4754_v32 = vpop.f32.mrb[138].mxu1 }
 0x20b   : > { %v4755_v33 = vpop.f32.mrb[139].mxu1 }
 0x20e   : > { %v4791_v34 = vpop.f32.mrb[140].mxu0 }
 0x20f   : > { %v4792_v35 = vadd.f32 %v4791_v34, %v4752_v29  ;;  %v4793_v36 = vpop.f32.mrb[141].mxu0 }
 0x210   : > { %v4794_v37 = vpop.f32.mrb[142].mxu0  ;;  %v4831_v38 = vpop.f32.mrb[140].mxu1 }
 0x211   : > { %v4832_v39 = vadd.f32 %v4831_v38, %v4792_v35  ;;  %v4795_v40 = vpop.f32.mrb[143].mxu0  ;;  %v4833_v41 = vpop.f32.mrb[141].mxu1 }
 0x212   : > { %v4834_v42 = vpop.f32.mrb[142].mxu1 }
 0x213   : > { %v4835_v43 = vpop.f32.mrb[143].mxu1 }
 0x216   : > { %v4871_v44 = vpop.f32.mrb[144].mxu0 }
 0x217   : > { %v4872_v45 = vadd.f32 %v4871_v44, %v4832_v39  ;;  %v4873_v46 = vpop.f32.mrb[145].mxu0 }
 0x218   : > { %v4874_v47 = vpop.f32.mrb[146].mxu0  ;;  %v4911_v48 = vpop.f32.mrb[144].mxu1 }
 0x219   : > { %v4912_v49 = vadd.f32 %v4911_v48, %v4872_v45  ;;  %v4875_v50 = vpop.f32.mrb[147].mxu0  ;;  %v4913_v51 = vpop.f32.mrb[145].mxu1 }
 0x21a   : > { %v4914_v52 = vpop.f32.mrb[146].mxu1 }
 0x21b   : > { %v4915_v53 = vpop.f32.mrb[147].mxu1 }
 0x21e   : > { %v4951_v54 = vpop.f32.mrb[148].mxu0 }
 0x21f   : > { %v4952_v55 = vadd.f32 %v4951_v54, %v4912_v49  ;;  %v4953_v56 = vpop.f32.mrb[149].mxu0 }
 0x220   : > { %v4954_v57 = vpop.f32.mrb[150].mxu0  ;;  %v4991_v58 = vpop.f32.mrb[148].mxu1 }
 0x221   : > { %v4992_v59 = vadd.f32 %v4991_v58, %v4952_v55  ;;  %v4955_v60 = vpop.f32.mrb[151].mxu0  ;;  %v4993_v61 = vpop.f32.mrb[149].mxu1 }
 0x222   : > { %v4994_v62 = vpop.f32.mrb[150].mxu1 }
 0x223   : > { %v4995_v63 = vpop.f32.mrb[151].mxu1 }
 0x226   : > { %v5031_v1 = vpop.f32.mrb[152].mxu0 }
 0x227   : > { %v5032_v2 = vadd.f32 %v5031_v1, %v4992_v59  ;;  %v5033_v3 = vpop.f32.mrb[153].mxu0 }
 0x228   : > { %v5034_v4 = vpop.f32.mrb[154].mxu0 }
 0x229   : > { %v5037_v5 = vadd.f32 %v5032_v2, %v193_v0  ;;  %v5035_v6 = vpop.f32.mrb[155].mxu0 }
 0x22b   : > { %5039 = vst.msk [vmem:[#allocation2] sm:$0x3] %vm5038_vm1, %v5037_v5 }
 0x22c   : > { %5463 = shalt.err (!%p5460_p12)
}
 0x22d   : > { %s5464_s29 = scalar_lea.hbm %s5779_s3, 32 }
 0x22e   : > { %p5465_p13 = scmp.ne.s32.totalorder %s5779_s3, %s5464_s29  ;;  %p5470_p2 = scmp.lt.u32.totalorder %s5464_s29, %s5779_s3 }
 0x230   : > { %p5466_p0 = pnand %p5465_p13, %p5265_p5 }
 0x232   : > { %p5467_p1 = pneg %p5466_p0 }
 0x234   : > { %p5472_p3 = pnand %p5470_p2, %p5467_p1 }
 0x236   : > { %5475 = shalt.err (!%p5472_p3)
}
 0x237   : > { %5262 = dma.vmem_to_hbm [thread:$0]  (%p5265_p5), %s5048_s25, 32, %s5779_s3, [#allocation3]  }
 0x238   : > { %5481 = dma.done.wait (%p5265_p5), [#allocation3], 32  }
 0x239   : > { %5483 = vsyncadd (%p5265_p5), [#allocation3], 4294967264 }
 0x23a PF: > { %s14_s12 = sadd.s32 1, %s5486_s12  }
 0x23b   : > { %p11_p4 = scmp.ge.s32.totalorder %s14_s12, 12  }
 0x23d   :  { %13 = sbr.rel (!%p11_p4) target bundleno = 1 (0x1), region = 66 }
 0x244   :  { %5060 = vsyncpa [#allocation3], 1 }
 0x245   :  { %5062 = vsyncpa [#allocation3 + $0x1], 1 }

</bundles_post_ra>
